<compile_context>
chip_gen: v7x
topology: tpu7x:2x2x1
jax: 0.10.0
libtpu: 0.0.40
codegen_flags: <defaults>
</compile_context>

<pallas_src>
import jax
import jax.numpy as jnp
from jax.experimental import pallas as pl
from jax.experimental.pallas import tpu as pltpu


def _round_up(x, m):
    return (x + m - 1) // m * m


# ----------------------------- fused forward kernel ---------------------------------------

def _mnist_fused_kernel(x_ref, w1_ref, b1_ref, w2_ref, b2_ref,
                        w3_ref, b3_ref, w4_ref, b4_ref, o_ref):
    f32 = jnp.float32
    bf16 = jnp.bfloat16
    TB = x_ref.shape[2]                       # images handled by this grid step

    # ---- conv1 (1->20, 5x5): ONE MXU matmul on wrapper-built im2col patches.
    #      x_ref: [24, 24, TB, 25] bf16, rows ordered (h, w, b), taps k = i*5 + j.
    lhs1 = x_ref[...].reshape(24 * 24 * TB, 25)
    acc1 = jnp.dot(lhs1, w1_ref[...], preferred_element_type=f32)    # [24*24*TB, 20]

    # ---- maxpool 2x2 entirely on leading dims (pure VPU max, no shuffles).
    #      conv1 bias + ReLU applied after the pool (both commute with max -> identical
    #      to the reference order conv -> ReLU -> pool).
    t1 = acc1.reshape(12, 2, 24, TB, 20)
    hmax1 = jnp.maximum(t1[:, 0], t1[:, 1])                          # [12, 24, TB, 20]
    t2 = hmax1.reshape(12, 12, 2, TB, 20)
    p1 = jnp.maximum(t2[:, :, 0], t2[:, :, 1])                       # [12, 12, TB, 20]
    p1 = jnp.maximum(p1 + b1_ref[...], 0.0).astype(bf16)

    # ---- conv2 (20->50, 5x5): im2col along W once (K = 5 taps * 20 ch = 100), then
    #      5 grouped MXU matmuls (one per kh tap) instead of 25 tiny K=20 ones.
    #      p1w[h, w, b, j*20+c] = p1[h, w+j, b, c]
    p1w = jnp.concatenate([p1[:, j:j + 8] for j in range(5)], axis=-1)   # [12, 8, TB, 100]
    acc2 = jnp.zeros((8 * 8 * TB, 50), f32)
    for i in range(5):
        lhs2 = p1w[i:i + 8].reshape(8 * 8 * TB, 100)                 # leading-dim slice
        acc2 = acc2 + jnp.dot(lhs2, w2_ref[i], preferred_element_type=f32)

    # ---- maxpool 2x2 (+ conv2 bias + ReLU after the pool), leading dims only.
    t3 = acc2.reshape(4, 2, 8, TB, 50)
    hmax2 = jnp.maximum(t3[:, 0], t3[:, 1])                          # [4, 8, TB, 50]
    t4 = hmax2.reshape(4, 4, 2, TB, 50)
    p2 = jnp.maximum(t4[:, :, 0], t4[:, :, 1])                       # [4, 4, TB, 50]
    p2 = jnp.maximum(p2 + b2_ref[...], 0.0).astype(bf16)

    # ---- fc1 (800 -> 500): flatten in (h, w, c) order; the fc1 weight rows were
    #      pre-permuted to match, so this is a single [TB,800]x[800,500] matmul.
    #      NOTE: no ReLU between the two Linear layers (matches the reference).
    x_fc = jnp.concatenate([p2[h, w] for h in range(4) for w in range(4)],
                           axis=-1)                                  # [TB, 800] bf16
    h1 = jnp.dot(x_fc, w3_ref[...], preferred_element_type=f32) + b3_ref[...]

    # ---- fc2 (500 -> 10), weights/bias zero-padded to 128 lanes -> lane-dense store.
    out = jnp.dot(h1.astype(bf16), w4_ref[...],
                  preferred_element_type=f32) + b4_ref[...]          # [TB, 128]
    o_ref[...] = out.astype(o_ref.dtype)


# ----------------------------- wrapper / param prep ---------------------------------------

def prepare_params(p):
    """One-time repacking of PyTorch-layout params into kernel-friendly layouts."""
    f32, bf16 = jnp.float32, jnp.bfloat16
    w4p = jnp.zeros((500, 128), f32).at[:, :10].set(jnp.transpose(p['fc2_w'], (1, 0)))
    b4p = jnp.zeros((1, 128), f32).at[0, :10].set(p['fc2_b'])
    return {
        # conv1 weight as [25, 20], rows ordered k = i*5 + j (matches patch tap order).
        'w1': jnp.transpose(p['conv1_w'], (2, 3, 1, 0)).reshape(25, 20).astype(bf16),
        'b1': p['conv1_b'].reshape(1, 20).astype(f32),
        # conv2 weight grouped per kh tap: [5, 100, 50], group rows ordered (kw, cin).
        'w2': jnp.transpose(p['conv2_w'], (2, 3, 1, 0)).reshape(5, 100, 50).astype(bf16),
        'b2': p['conv2_b'].reshape(1, 50).astype(f32),
        # fc1 weight [500, 800] -> [800, 500] with rows permuted to (h, w, c) flatten
        # order, so the kernel never transposes activations or weights.
        'w3': jnp.transpose(p['fc1_w'].reshape(500, 50, 4, 4), (2, 3, 1, 0))
                 .reshape(800, 500).astype(bf16),
        'b3': p['fc1_b'].reshape(1, 500).astype(f32),
        # fc2 weight [10, 500] -> [500, 128] (zero-padded output lanes), bias [1, 128].
        'w4': w4p.astype(bf16),
        'b4': b4p,
    }


def mnist_net_forward(x_nchw, pp):
    B = x_nchw.shape[0]
    assert x_nchw.shape[1:] == (1, 28, 28)
    f32 = jnp.float32

    # Batch tile per grid step: >=8 keeps all in-kernel sublane merges aligned; 16
    # amortizes per-step overhead and keeps peak VMEM (~15 MiB incl. double-buffered
    # patches) inside the default scoped limit on every generation (incl. v7x, 64 MiB).
    TB = min(16, _round_up(B, 8))
    Bp = _round_up(B, TB)

    x = x_nchw.reshape(B, 28, 28).astype(f32)       # C == 1: NCHW -> HW is a pure reshape
    if Bp != B:
        x = jnp.concatenate([x, jnp.zeros((Bp - B, 28, 28), f32)], axis=0)

    # conv1 im2col in the wrapper (pure data movement), laid out (h, w, b, tap) so that
    # in-kernel pooling and conv2 tap slicing only ever touch leading dims.
    cols = [x[:, i:i + 24, j:j + 24] for i in range(5) for j in range(5)]
    patches = jnp.stack(cols, axis=-1)                               # [Bp, 24, 24, 25]
    patches = jnp.transpose(patches, (1, 2, 0, 3)).astype(jnp.bfloat16)  # [24,24,Bp,25]

    out = pl.pallas_call(
        _mnist_fused_kernel,
        out_shape=jax.ShapeDtypeStruct((Bp, 128), f32),
        grid=(Bp // TB,),
        in_specs=[
            pl.BlockSpec((24, 24, TB, 25), lambda g: (0, 0, g, 0)),  # per-tile patches
            pl.BlockSpec((25, 20), lambda g: (0, 0)),                # weights: constant
            pl.BlockSpec((1, 20), lambda g: (0, 0)),                 #  index_map -> stay
            pl.BlockSpec((5, 100, 50), lambda g: (0, 0, 0)),         #  VMEM-resident
            pl.BlockSpec((1, 50), lambda g: (0, 0)),
            pl.BlockSpec((800, 500), lambda g: (0, 0)),
            pl.BlockSpec((1, 500), lambda g: (0, 0)),
            pl.BlockSpec((500, 128), lambda g: (0, 0)),
            pl.BlockSpec((1, 128), lambda g: (0, 0)),
        ],
        out_specs=pl.BlockSpec((TB, 128), lambda g: (g, 0)),
        compiler_params=pltpu.CompilerParams(
            dimension_semantics=("parallel",)),      # batch tiles split across TCs (v7x)
    )(patches, pp['w1'], pp['b1'], pp['w2'], pp['b2'],
      pp['w3'], pp['b3'], pp['w4'], pp['b4'])
    return out[:B, :10]


def init_params(key):
    ks = jax.random.split(key, 8)

    def u(k, shape, fan_in):  # PyTorch-style uniform(-1/sqrt(fan_in), 1/sqrt(fan_in))
        bound = 1.0 / jnp.sqrt(jnp.float32(fan_in))
        return jax.random.uniform(k, shape, jnp.float32, -bound, bound)

    return {
        'conv1_w': u(ks[0], (20, 1, 5, 5), 1 * 5 * 5),
        'conv1_b': u(ks[1], (20,), 1 * 5 * 5),
        'conv2_w': u(ks[2], (50, 20, 5, 5), 20 * 5 * 5),
        'conv2_b': u(ks[3], (50,), 20 * 5 * 5),
        'fc1_w':   u(ks[4], (500, 800), 800),
        'fc1_b':   u(ks[5], (500,), 800),
        'fc2_w':   u(ks[6], (10, 500), 500),
        'fc2_b':   u(ks[7], (10,), 500),
    }


if __name__ == "__main__":
    key = jax.random.PRNGKey(0)
    pkey, xkey = jax.random.split(key)
    params = prepare_params(init_params(pkey))       # one-time weight repacking
    # 28x28 input is required by the architecture (flatten must produce 4*4*50 = 800).
    x = jax.random.normal(xkey, (2, 1, 28, 28), dtype=jnp.float32)
    out = jax.jit(mnist_net_forward)(x, params)
    out = jax.block_until_ready(out)
    assert out.shape == (2, 10) and out.dtype == jnp.float32
    print("KERNEL_OK")
</pallas_src>

<mosaic_0001>
module attributes {stable_mosaic.version = 11 : i64} {
  func.func @_mnist_fused_kernel(%arg0: i32, %arg1: memref<24x24x8x25xbf16, #tpu.memory_space<vmem>>, %arg2: memref<25x20xbf16, #tpu.memory_space<vmem>>, %arg3: memref<1x20xf32, #tpu.memory_space<vmem>>, %arg4: memref<5x100x50xbf16, #tpu.memory_space<vmem>>, %arg5: memref<1x50xf32, #tpu.memory_space<vmem>>, %arg6: memref<800x500xbf16, #tpu.memory_space<vmem>>, %arg7: memref<1x500xf32, #tpu.memory_space<vmem>>, %arg8: memref<500x128xbf16, #tpu.memory_space<vmem>>, %arg9: memref<1x128xf32, #tpu.memory_space<vmem>>, %arg10: memref<8x128xf32, #tpu.memory_space<vmem>>) attributes {dimension_semantics = [#tpu.dimension_semantics<parallel>], iteration_bounds = array<i64: 1>, scalar_prefetch = 0 : i64, scratch_operands = 0 : i64, tpu.core_type = #tpu.core_type<tc>, window_params = [{transform_indices = @transform_0, window_bounds = array<i64: 24, 24, 8, 25>}, {pipeline_mode = #tpu.pipeline_mode<synchronous>, transform_indices = @transform_1, window_bounds = array<i64: 25, 20>}, {pipeline_mode = #tpu.pipeline_mode<synchronous>, transform_indices = @transform_2, window_bounds = array<i64: 1, 20>}, {pipeline_mode = #tpu.pipeline_mode<synchronous>, transform_indices = @transform_3, window_bounds = array<i64: 5, 100, 50>}, {pipeline_mode = #tpu.pipeline_mode<synchronous>, transform_indices = @transform_4, window_bounds = array<i64: 1, 50>}, {pipeline_mode = #tpu.pipeline_mode<synchronous>, transform_indices = @transform_5, window_bounds = array<i64: 800, 500>}, {pipeline_mode = #tpu.pipeline_mode<synchronous>, transform_indices = @transform_6, window_bounds = array<i64: 1, 500>}, {pipeline_mode = #tpu.pipeline_mode<synchronous>, transform_indices = @transform_7, window_bounds = array<i64: 500, 128>}, {pipeline_mode = #tpu.pipeline_mode<synchronous>, transform_indices = @transform_8, window_bounds = array<i64: 1, 128>}, {transform_indices = @transform_9, window_bounds = array<i64: 8, 128>}]} {
    %c0 = arith.constant 0 : index
    %c0_0 = arith.constant 0 : index
    %c0_1 = arith.constant 0 : index
    %c0_2 = arith.constant 0 : index
    %0 = vector.load %arg1[%c0, %c0_0, %c0_1, %c0_2] : memref<24x24x8x25xbf16, #tpu.memory_space<vmem>>, vector<24x24x8x25xbf16>
    %1 = vector.shape_cast %0 : vector<24x24x8x25xbf16> to vector<4608x25xbf16>
    %c0_3 = arith.constant 0 : index
    %c0_4 = arith.constant 0 : index
    %2 = vector.load %arg2[%c0_3, %c0_4] : memref<25x20xbf16, #tpu.memory_space<vmem>>, vector<25x20xbf16>
    %cst = arith.constant dense<0.000000e+00> : vector<4608x20xf32>
    %3 = tpu.matmul %1, %2, %cst {dimension_numbers = #tpu.dot_dimension_numbers<[1], [0], [0], [1], [0, 0, 1, 1], [], []>} : vector<4608x25xbf16>, vector<25x20xbf16>, vector<4608x20xf32> -> vector<4608x20xf32>
    %4 = vector.shape_cast %3 : vector<4608x20xf32> to vector<12x2x24x8x20xf32>
    %5 = vector.extract_strided_slice %4 {offsets = [0, 0, 0, 0, 0], sizes = [12, 1, 24, 8, 20], strides = [1, 1, 1, 1, 1]} : vector<12x2x24x8x20xf32> to vector<12x1x24x8x20xf32>
    %6 = vector.shape_cast %5 : vector<12x1x24x8x20xf32> to vector<12x24x8x20xf32>
    %7 = vector.extract_strided_slice %4 {offsets = [0, 1, 0, 0, 0], sizes = [12, 1, 24, 8, 20], strides = [1, 1, 1, 1, 1]} : vector<12x2x24x8x20xf32> to vector<12x1x24x8x20xf32>
    %8 = vector.shape_cast %7 : vector<12x1x24x8x20xf32> to vector<12x24x8x20xf32>
    %9 = arith.maximumf %6, %8 : vector<12x24x8x20xf32>
    %10 = vector.shape_cast %9 : vector<12x24x8x20xf32> to vector<12x12x2x8x20xf32>
    %11 = vector.extract_strided_slice %10 {offsets = [0, 0, 0, 0, 0], sizes = [12, 12, 1, 8, 20], strides = [1, 1, 1, 1, 1]} : vector<12x12x2x8x20xf32> to vector<12x12x1x8x20xf32>
    %12 = vector.shape_cast %11 : vector<12x12x1x8x20xf32> to vector<12x12x8x20xf32>
    %13 = vector.extract_strided_slice %10 {offsets = [0, 0, 1, 0, 0], sizes = [12, 12, 1, 8, 20], strides = [1, 1, 1, 1, 1]} : vector<12x12x2x8x20xf32> to vector<12x12x1x8x20xf32>
    %14 = vector.shape_cast %13 : vector<12x12x1x8x20xf32> to vector<12x12x8x20xf32>
    %15 = arith.maximumf %12, %14 : vector<12x12x8x20xf32>
    %c0_5 = arith.constant 0 : index
    %c0_6 = arith.constant 0 : index
    %16 = vector.load %arg3[%c0_5, %c0_6] : memref<1x20xf32, #tpu.memory_space<vmem>>, vector<1x20xf32>
    %17 = vector.shape_cast %16 : vector<1x20xf32> to vector<1x1x1x20xf32>
    %18 = vector.broadcast %17 : vector<1x1x1x20xf32> to vector<12x12x8x20xf32>
    %19 = arith.addf %15, %18 : vector<12x12x8x20xf32>
    %cst_7 = arith.constant 0.000000e+00 : f32
    %20 = vector.broadcast %cst_7 : f32 to vector<12x12x8x20xf32>
    %21 = arith.maximumf %19, %20 : vector<12x12x8x20xf32>
    %22 = arith.truncf %21 : vector<12x12x8x20xf32> to vector<12x12x8x20xbf16>
    %23 = vector.extract_strided_slice %22 {offsets = [0, 0, 0, 0], sizes = [12, 8, 8, 20], strides = [1, 1, 1, 1]} : vector<12x12x8x20xbf16> to vector<12x8x8x20xbf16>
    %24 = vector.extract_strided_slice %22 {offsets = [0, 1, 0, 0], sizes = [12, 8, 8, 20], strides = [1, 1, 1, 1]} : vector<12x12x8x20xbf16> to vector<12x8x8x20xbf16>
    %25 = vector.extract_strided_slice %22 {offsets = [0, 2, 0, 0], sizes = [12, 8, 8, 20], strides = [1, 1, 1, 1]} : vector<12x12x8x20xbf16> to vector<12x8x8x20xbf16>
    %26 = vector.extract_strided_slice %22 {offsets = [0, 3, 0, 0], sizes = [12, 8, 8, 20], strides = [1, 1, 1, 1]} : vector<12x12x8x20xbf16> to vector<12x8x8x20xbf16>
    %27 = vector.extract_strided_slice %22 {offsets = [0, 4, 0, 0], sizes = [12, 8, 8, 20], strides = [1, 1, 1, 1]} : vector<12x12x8x20xbf16> to vector<12x8x8x20xbf16>
    %28 = tpu.concatenate %23, %24, %25, %26, %27 in 3 : vector<12x8x8x20xbf16>, vector<12x8x8x20xbf16>, vector<12x8x8x20xbf16>, vector<12x8x8x20xbf16>, vector<12x8x8x20xbf16> -> vector<12x8x8x100xbf16>
    %cst_8 = arith.constant 0.000000e+00 : f32
    %29 = vector.broadcast %cst_8 : f32 to vector<512x50xf32>
    %30 = vector.extract_strided_slice %28 {offsets = [0, 0, 0, 0], sizes = [8, 8, 8, 100], strides = [1, 1, 1, 1]} : vector<12x8x8x100xbf16> to vector<8x8x8x100xbf16>
    %31 = vector.shape_cast %30 : vector<8x8x8x100xbf16> to vector<512x100xbf16>
    %c0_9 = arith.constant 0 : index
    %c0_10 = arith.constant 0 : index
    %c0_11 = arith.constant 0 : index
    %32 = vector.load %arg4[%c0_9, %c0_10, %c0_11] : memref<5x100x50xbf16, #tpu.memory_space<vmem>>, vector<1x100x50xbf16>
    %33 = vector.shape_cast %32 : vector<1x100x50xbf16> to vector<100x50xbf16>
    %cst_12 = arith.constant dense<0.000000e+00> : vector<512x50xf32>
    %34 = tpu.matmul %31, %33, %cst_12 {dimension_numbers = #tpu.dot_dimension_numbers<[1], [0], [0], [1], [0, 0, 1, 1], [], []>} : vector<512x100xbf16>, vector<100x50xbf16>, vector<512x50xf32> -> vector<512x50xf32>
    %35 = arith.addf %29, %34 : vector<512x50xf32>
    %36 = vector.extract_strided_slice %28 {offsets = [1, 0, 0, 0], sizes = [8, 8, 8, 100], strides = [1, 1, 1, 1]} : vector<12x8x8x100xbf16> to vector<8x8x8x100xbf16>
    %37 = vector.shape_cast %36 : vector<8x8x8x100xbf16> to vector<512x100xbf16>
    %c1 = arith.constant 1 : index
    %c0_13 = arith.constant 0 : index
    %c0_14 = arith.constant 0 : index
    %38 = vector.load %arg4[%c1, %c0_13, %c0_14] : memref<5x100x50xbf16, #tpu.memory_space<vmem>>, vector<1x100x50xbf16>
    %39 = vector.shape_cast %38 : vector<1x100x50xbf16> to vector<100x50xbf16>
    %cst_15 = arith.constant dense<0.000000e+00> : vector<512x50xf32>
    %40 = tpu.matmul %37, %39, %cst_15 {dimension_numbers = #tpu.dot_dimension_numbers<[1], [0], [0], [1], [0, 0, 1, 1], [], []>} : vector<512x100xbf16>, vector<100x50xbf16>, vector<512x50xf32> -> vector<512x50xf32>
    %41 = arith.addf %35, %40 : vector<512x50xf32>
    %42 = vector.extract_strided_slice %28 {offsets = [2, 0, 0, 0], sizes = [8, 8, 8, 100], strides = [1, 1, 1, 1]} : vector<12x8x8x100xbf16> to vector<8x8x8x100xbf16>
    %43 = vector.shape_cast %42 : vector<8x8x8x100xbf16> to vector<512x100xbf16>
    %c2 = arith.constant 2 : index
    %c0_16 = arith.constant 0 : index
    %c0_17 = arith.constant 0 : index
    %44 = vector.load %arg4[%c2, %c0_16, %c0_17] : memref<5x100x50xbf16, #tpu.memory_space<vmem>>, vector<1x100x50xbf16>
    %45 = vector.shape_cast %44 : vector<1x100x50xbf16> to vector<100x50xbf16>
    %cst_18 = arith.constant dense<0.000000e+00> : vector<512x50xf32>
    %46 = tpu.matmul %43, %45, %cst_18 {dimension_numbers = #tpu.dot_dimension_numbers<[1], [0], [0], [1], [0, 0, 1, 1], [], []>} : vector<512x100xbf16>, vector<100x50xbf16>, vector<512x50xf32> -> vector<512x50xf32>
    %47 = arith.addf %41, %46 : vector<512x50xf32>
    %48 = vector.extract_strided_slice %28 {offsets = [3, 0, 0, 0], sizes = [8, 8, 8, 100], strides = [1, 1, 1, 1]} : vector<12x8x8x100xbf16> to vector<8x8x8x100xbf16>
    %49 = vector.shape_cast %48 : vector<8x8x8x100xbf16> to vector<512x100xbf16>
    %c3 = arith.constant 3 : index
    %c0_19 = arith.constant 0 : index
    %c0_20 = arith.constant 0 : index
    %50 = vector.load %arg4[%c3, %c0_19, %c0_20] : memref<5x100x50xbf16, #tpu.memory_space<vmem>>, vector<1x100x50xbf16>
    %51 = vector.shape_cast %50 : vector<1x100x50xbf16> to vector<100x50xbf16>
    %cst_21 = arith.constant dense<0.000000e+00> : vector<512x50xf32>
    %52 = tpu.matmul %49, %51, %cst_21 {dimension_numbers = #tpu.dot_dimension_numbers<[1], [0], [0], [1], [0, 0, 1, 1], [], []>} : vector<512x100xbf16>, vector<100x50xbf16>, vector<512x50xf32> -> vector<512x50xf32>
    %53 = arith.addf %47, %52 : vector<512x50xf32>
    %54 = vector.extract_strided_slice %28 {offsets = [4, 0, 0, 0], sizes = [8, 8, 8, 100], strides = [1, 1, 1, 1]} : vector<12x8x8x100xbf16> to vector<8x8x8x100xbf16>
    %55 = vector.shape_cast %54 : vector<8x8x8x100xbf16> to vector<512x100xbf16>
    %c4 = arith.constant 4 : index
    %c0_22 = arith.constant 0 : index
    %c0_23 = arith.constant 0 : index
    %56 = vector.load %arg4[%c4, %c0_22, %c0_23] : memref<5x100x50xbf16, #tpu.memory_space<vmem>>, vector<1x100x50xbf16>
    %57 = vector.shape_cast %56 : vector<1x100x50xbf16> to vector<100x50xbf16>
    %cst_24 = arith.constant dense<0.000000e+00> : vector<512x50xf32>
    %58 = tpu.matmul %55, %57, %cst_24 {dimension_numbers = #tpu.dot_dimension_numbers<[1], [0], [0], [1], [0, 0, 1, 1], [], []>} : vector<512x100xbf16>, vector<100x50xbf16>, vector<512x50xf32> -> vector<512x50xf32>
    %59 = arith.addf %53, %58 : vector<512x50xf32>
    %60 = vector.shape_cast %59 : vector<512x50xf32> to vector<4x2x8x8x50xf32>
    %61 = vector.extract_strided_slice %60 {offsets = [0, 0, 0, 0, 0], sizes = [4, 1, 8, 8, 50], strides = [1, 1, 1, 1, 1]} : vector<4x2x8x8x50xf32> to vector<4x1x8x8x50xf32>
    %62 = vector.shape_cast %61 : vector<4x1x8x8x50xf32> to vector<4x8x8x50xf32>
    %63 = vector.extract_strided_slice %60 {offsets = [0, 1, 0, 0, 0], sizes = [4, 1, 8, 8, 50], strides = [1, 1, 1, 1, 1]} : vector<4x2x8x8x50xf32> to vector<4x1x8x8x50xf32>
    %64 = vector.shape_cast %63 : vector<4x1x8x8x50xf32> to vector<4x8x8x50xf32>
    %65 = arith.maximumf %62, %64 : vector<4x8x8x50xf32>
    %66 = vector.shape_cast %65 : vector<4x8x8x50xf32> to vector<4x4x2x8x50xf32>
    %67 = vector.extract_strided_slice %66 {offsets = [0, 0, 0, 0, 0], sizes = [4, 4, 1, 8, 50], strides = [1, 1, 1, 1, 1]} : vector<4x4x2x8x50xf32> to vector<4x4x1x8x50xf32>
    %68 = vector.shape_cast %67 : vector<4x4x1x8x50xf32> to vector<4x4x8x50xf32>
    %69 = vector.extract_strided_slice %66 {offsets = [0, 0, 1, 0, 0], sizes = [4, 4, 1, 8, 50], strides = [1, 1, 1, 1, 1]} : vector<4x4x2x8x50xf32> to vector<4x4x1x8x50xf32>
    %70 = vector.shape_cast %69 : vector<4x4x1x8x50xf32> to vector<4x4x8x50xf32>
    %71 = arith.maximumf %68, %70 : vector<4x4x8x50xf32>
    %c0_25 = arith.constant 0 : index
    %c0_26 = arith.constant 0 : index
    %72 = vector.load %arg5[%c0_25, %c0_26] : memref<1x50xf32, #tpu.memory_space<vmem>>, vector<1x50xf32>
    %73 = vector.shape_cast %72 : vector<1x50xf32> to vector<1x1x1x50xf32>
    %74 = vector.broadcast %73 : vector<1x1x1x50xf32> to vector<4x4x8x50xf32>
    %75 = arith.addf %71, %74 : vector<4x4x8x50xf32>
    %cst_27 = arith.constant 0.000000e+00 : f32
    %76 = vector.broadcast %cst_27 : f32 to vector<4x4x8x50xf32>
    %77 = arith.maximumf %75, %76 : vector<4x4x8x50xf32>
    %78 = arith.truncf %77 : vector<4x4x8x50xf32> to vector<4x4x8x50xbf16>
    %79 = vector.extract_strided_slice %78 {offsets = [0, 0, 0, 0], sizes = [1, 1, 8, 50], strides = [1, 1, 1, 1]} : vector<4x4x8x50xbf16> to vector<1x1x8x50xbf16>
    %80 = vector.shape_cast %79 : vector<1x1x8x50xbf16> to vector<8x50xbf16>
    %81 = vector.extract_strided_slice %78 {offsets = [0, 1, 0, 0], sizes = [1, 1, 8, 50], strides = [1, 1, 1, 1]} : vector<4x4x8x50xbf16> to vector<1x1x8x50xbf16>
    %82 = vector.shape_cast %81 : vector<1x1x8x50xbf16> to vector<8x50xbf16>
    %83 = vector.extract_strided_slice %78 {offsets = [0, 2, 0, 0], sizes = [1, 1, 8, 50], strides = [1, 1, 1, 1]} : vector<4x4x8x50xbf16> to vector<1x1x8x50xbf16>
    %84 = vector.shape_cast %83 : vector<1x1x8x50xbf16> to vector<8x50xbf16>
    %85 = vector.extract_strided_slice %78 {offsets = [0, 3, 0, 0], sizes = [1, 1, 8, 50], strides = [1, 1, 1, 1]} : vector<4x4x8x50xbf16> to vector<1x1x8x50xbf16>
    %86 = vector.shape_cast %85 : vector<1x1x8x50xbf16> to vector<8x50xbf16>
    %87 = vector.extract_strided_slice %78 {offsets = [1, 0, 0, 0], sizes = [1, 1, 8, 50], strides = [1, 1, 1, 1]} : vector<4x4x8x50xbf16> to vector<1x1x8x50xbf16>
    %88 = vector.shape_cast %87 : vector<1x1x8x50xbf16> to vector<8x50xbf16>
    %89 = vector.extract_strided_slice %78 {offsets = [1, 1, 0, 0], sizes = [1, 1, 8, 50], strides = [1, 1, 1, 1]} : vector<4x4x8x50xbf16> to vector<1x1x8x50xbf16>
    %90 = vector.shape_cast %89 : vector<1x1x8x50xbf16> to vector<8x50xbf16>
    %91 = vector.extract_strided_slice %78 {offsets = [1, 2, 0, 0], sizes = [1, 1, 8, 50], strides = [1, 1, 1, 1]} : vector<4x4x8x50xbf16> to vector<1x1x8x50xbf16>
    %92 = vector.shape_cast %91 : vector<1x1x8x50xbf16> to vector<8x50xbf16>
    %93 = vector.extract_strided_slice %78 {offsets = [1, 3, 0, 0], sizes = [1, 1, 8, 50], strides = [1, 1, 1, 1]} : vector<4x4x8x50xbf16> to vector<1x1x8x50xbf16>
    %94 = vector.shape_cast %93 : vector<1x1x8x50xbf16> to vector<8x50xbf16>
    %95 = vector.extract_strided_slice %78 {offsets = [2, 0, 0, 0], sizes = [1, 1, 8, 50], strides = [1, 1, 1, 1]} : vector<4x4x8x50xbf16> to vector<1x1x8x50xbf16>
    %96 = vector.shape_cast %95 : vector<1x1x8x50xbf16> to vector<8x50xbf16>
    %97 = vector.extract_strided_slice %78 {offsets = [2, 1, 0, 0], sizes = [1, 1, 8, 50], strides = [1, 1, 1, 1]} : vector<4x4x8x50xbf16> to vector<1x1x8x50xbf16>
    %98 = vector.shape_cast %97 : vector<1x1x8x50xbf16> to vector<8x50xbf16>
    %99 = vector.extract_strided_slice %78 {offsets = [2, 2, 0, 0], sizes = [1, 1, 8, 50], strides = [1, 1, 1, 1]} : vector<4x4x8x50xbf16> to vector<1x1x8x50xbf16>
    %100 = vector.shape_cast %99 : vector<1x1x8x50xbf16> to vector<8x50xbf16>
    %101 = vector.extract_strided_slice %78 {offsets = [2, 3, 0, 0], sizes = [1, 1, 8, 50], strides = [1, 1, 1, 1]} : vector<4x4x8x50xbf16> to vector<1x1x8x50xbf16>
    %102 = vector.shape_cast %101 : vector<1x1x8x50xbf16> to vector<8x50xbf16>
    %103 = vector.extract_strided_slice %78 {offsets = [3, 0, 0, 0], sizes = [1, 1, 8, 50], strides = [1, 1, 1, 1]} : vector<4x4x8x50xbf16> to vector<1x1x8x50xbf16>
    %104 = vector.shape_cast %103 : vector<1x1x8x50xbf16> to vector<8x50xbf16>
    %105 = vector.extract_strided_slice %78 {offsets = [3, 1, 0, 0], sizes = [1, 1, 8, 50], strides = [1, 1, 1, 1]} : vector<4x4x8x50xbf16> to vector<1x1x8x50xbf16>
    %106 = vector.shape_cast %105 : vector<1x1x8x50xbf16> to vector<8x50xbf16>
    %107 = vector.extract_strided_slice %78 {offsets = [3, 2, 0, 0], sizes = [1, 1, 8, 50], strides = [1, 1, 1, 1]} : vector<4x4x8x50xbf16> to vector<1x1x8x50xbf16>
    %108 = vector.shape_cast %107 : vector<1x1x8x50xbf16> to vector<8x50xbf16>
    %109 = vector.extract_strided_slice %78 {offsets = [3, 3, 0, 0], sizes = [1, 1, 8, 50], strides = [1, 1, 1, 1]} : vector<4x4x8x50xbf16> to vector<1x1x8x50xbf16>
    %110 = vector.shape_cast %109 : vector<1x1x8x50xbf16> to vector<8x50xbf16>
    %111 = tpu.concatenate %80, %82, %84, %86, %88, %90, %92, %94, %96, %98, %100, %102, %104, %106, %108, %110 in 1 : vector<8x50xbf16>, vector<8x50xbf16>, vector<8x50xbf16>, vector<8x50xbf16>, vector<8x50xbf16>, vector<8x50xbf16>, vector<8x50xbf16>, vector<8x50xbf16>, vector<8x50xbf16>, vector<8x50xbf16>, vector<8x50xbf16>, vector<8x50xbf16>, vector<8x50xbf16>, vector<8x50xbf16>, vector<8x50xbf16>, vector<8x50xbf16> -> vector<8x800xbf16>
    %c0_28 = arith.constant 0 : index
    %c0_29 = arith.constant 0 : index
    %112 = vector.load %arg6[%c0_28, %c0_29] : memref<800x500xbf16, #tpu.memory_space<vmem>>, vector<800x500xbf16>
    %cst_30 = arith.constant dense<0.000000e+00> : vector<8x500xf32>
    %113 = tpu.matmul %111, %112, %cst_30 {dimension_numbers = #tpu.dot_dimension_numbers<[1], [0], [0], [1], [0, 0, 1, 1], [], []>} : vector<8x800xbf16>, vector<800x500xbf16>, vector<8x500xf32> -> vector<8x500xf32>
    %c0_31 = arith.constant 0 : index
    %c0_32 = arith.constant 0 : index
    %114 = vector.load %arg7[%c0_31, %c0_32] : memref<1x500xf32, #tpu.memory_space<vmem>>, vector<1x500xf32>
    %115 = vector.broadcast %114 : vector<1x500xf32> to vector<8x500xf32>
    %116 = arith.addf %113, %115 : vector<8x500xf32>
    %117 = arith.truncf %116 : vector<8x500xf32> to vector<8x500xbf16>
    %c0_33 = arith.constant 0 : index
    %c0_34 = arith.constant 0 : index
    %118 = vector.load %arg8[%c0_33, %c0_34] : memref<500x128xbf16, #tpu.memory_space<vmem>>, vector<500x128xbf16>
    %cst_35 = arith.constant dense<0.000000e+00> : vector<8x128xf32>
    %119 = tpu.matmul %117, %118, %cst_35 {dimension_numbers = #tpu.dot_dimension_numbers<[1], [0], [0], [1], [0, 0, 1, 1], [], []>} : vector<8x500xbf16>, vector<500x128xbf16>, vector<8x128xf32> -> vector<8x128xf32>
    %c0_36 = arith.constant 0 : index
    %c0_37 = arith.constant 0 : index
    %120 = vector.load %arg9[%c0_36, %c0_37] : memref<1x128xf32, #tpu.memory_space<vmem>>, vector<1x128xf32>
    %121 = vector.broadcast %120 : vector<1x128xf32> to vector<8x128xf32>
    %122 = arith.addf %119, %121 : vector<8x128xf32>
    %c0_38 = arith.constant 0 : index
    %c0_39 = arith.constant 0 : index
    %123 = vector.load %arg10[%c0_38, %c0_39] : memref<8x128xf32, #tpu.memory_space<vmem>>, vector<8x128xf32>
    tpu.vector_store %arg10[%c0_38, %c0_39], %122 {strides = array<i32>} : memref<8x128xf32, #tpu.memory_space<vmem>>, vector<8x128xf32>,
    return
  }
  func.func @transform_0(%arg0: i32) -> (i32, i32, i32, i32) {
    %c0_i32 = arith.constant 0 : i32
    %c0_i32_0 = arith.constant 0 : i32
    %c0_i32_1 = arith.constant 0 : i32
    %c0_i32_2 = arith.constant 0 : i32
    return %c0_i32, %c0_i32_0, %arg0, %c0_i32_1 : i32, i32, i32, i32
  }
  func.func @transform_1(%arg0: i32) -> (i32, i32) {
    %c0_i32 = arith.constant 0 : i32
    %c0_i32_0 = arith.constant 0 : i32
    %c0_i32_1 = arith.constant 0 : i32
    return %c0_i32, %c0_i32_0 : i32, i32
  }
  func.func @transform_2(%arg0: i32) -> (i32, i32) {
    %c0_i32 = arith.constant 0 : i32
    %c0_i32_0 = arith.constant 0 : i32
    %c0_i32_1 = arith.constant 0 : i32
    return %c0_i32, %c0_i32_0 : i32, i32
  }
  func.func @transform_3(%arg0: i32) -> (i32, i32, i32) {
    %c0_i32 = arith.constant 0 : i32
    %c0_i32_0 = arith.constant 0 : i32
    %c0_i32_1 = arith.constant 0 : i32
    %c0_i32_2 = arith.constant 0 : i32
    return %c0_i32, %c0_i32_0, %c0_i32_1 : i32, i32, i32
  }
  func.func @transform_4(%arg0: i32) -> (i32, i32) {
    %c0_i32 = arith.constant 0 : i32
    %c0_i32_0 = arith.constant 0 : i32
    %c0_i32_1 = arith.constant 0 : i32
    return %c0_i32, %c0_i32_0 : i32, i32
  }
  func.func @transform_5(%arg0: i32) -> (i32, i32) {
    %c0_i32 = arith.constant 0 : i32
    %c0_i32_0 = arith.constant 0 : i32
    %c0_i32_1 = arith.constant 0 : i32
    return %c0_i32, %c0_i32_0 : i32, i32
  }
  func.func @transform_6(%arg0: i32) -> (i32, i32) {
    %c0_i32 = arith.constant 0 : i32
    %c0_i32_0 = arith.constant 0 : i32
    %c0_i32_1 = arith.constant 0 : i32
    return %c0_i32, %c0_i32_0 : i32, i32
  }
  func.func @transform_7(%arg0: i32) -> (i32, i32) {
    %c0_i32 = arith.constant 0 : i32
    %c0_i32_0 = arith.constant 0 : i32
    %c0_i32_1 = arith.constant 0 : i32
    return %c0_i32, %c0_i32_0 : i32, i32
  }
  func.func @transform_8(%arg0: i32) -> (i32, i32) {
    %c0_i32 = arith.constant 0 : i32
    %c0_i32_0 = arith.constant 0 : i32
    %c0_i32_1 = arith.constant 0 : i32
    return %c0_i32, %c0_i32_0 : i32, i32
  }
  func.func @transform_9(%arg0: i32) -> (i32, i32) {
    %c0_i32 = arith.constant 0 : i32
    %c0_i32_0 = arith.constant 0 : i32
    return %arg0, %c0_i32 : i32, i32
  }
}

</mosaic_0001>

<bundles_post_ra>
// kernel: mnist_net_forward.1
= control target key start
LH: loop header
LB: loop body
LE: loop exit
PB: predicated region body
PF: predicated region fallthrough
CT: control target
= control target key end

     0   :  { %vm2929_vm0 = vcmask 1043456   ;;  %vm2930_vm1 = vcmask 1044480   ;;  %vm2064_vm2 = vcmask 203776   ;;  %v15906_v1 = vmov 65535   ;;  %s15907_s24 = smov 20   ;;  %s15908_s29 = smov 40   ;;  %s21122_s1 = inlined_call_operand.vmem [shape: bf16[25,20], index: 1, kind: input, shape index: {}]   ;;  %s21123_s0 = inlined_call_operand.vmem [shape: bf16[24,24,8,25], index: 0, kind: input, shape index: {}]   ;;  %s21124_s2 = inlined_call_operand.vmem [shape: f32[1,20], index: 2, kind: input, shape index: {}]   ;;  %s21125_s3 = inlined_call_operand.vmem [shape: bf16[5,100,50], index: 3, kind: input, shape index: {}]   ;;  %s21126_s5 = inlined_call_operand.vmem [shape: bf16[800,500], index: 5, kind: input, shape index: {}]   ;;  %s21127_s4 = inlined_call_operand.vmem [shape: f32[1,50], index: 4, kind: input, shape index: {}]   ;;  %s21128_s7 = inlined_call_operand.vmem [shape: bf16[500,128], index: 7, kind: input, shape index: {}]   ;;  %s21129_s6 = inlined_call_operand.vmem [shape: f32[1,500], index: 6, kind: input, shape index: {}]   ;;  %s21130_s8 = inlined_call_operand.vmem [shape: f32[1,128], index: 8, kind: input, shape index: {}]   ;;  %s21131_s9 = inlined_call_operand.vmem [shape: f32[8,128], index: 9, kind: output, shape index: {}]  }
   0x1   :  { %v15243_v0 = vld [vmem:[%s21122_s1] sm:$0xff]   ;;  %v2931_v2 = vsel %vm2929_vm0, 4294967295, %v15906_v1  ;;  %v15244_v3 = vld [vmem:[%s21122_s1 + $0x8] sm:$0x1f]   ;;  %v15247_v8 = vld [vmem:[%s21123_s0 + $0x10] sm:$0xff]   ;;  %s15909_s11 = smov 60  }
   0x2   :  { %13959 = vmatprep.subr.bf16.mxu0 %v15243_v0  ;;  %v2932_v4 = vsel %vm2930_vm1, %v2931_v2, 0  ;;  %v15245_v5 = vld [vmem:[%s21123_s0] sm:$0xff]   ;;  %14929 = vmatprep.subr.bf16.mxu1 %v15243_v0  ;;  %v15246_v7 = vld [vmem:[%s21123_s0 + $0x8] sm:$0xff]   ;;  %v15248_v9 = vld [vmem:[%s21123_s0 + $0x18] sm:$0xff]   ;;  %s15910_s14 = smov 80   ;;  %vm8235_vm3 = vcmask 1041408  }
   0x3   :  { %13960 = vmatpush3.bf16.msra.mxu0 %v15243_v0  ;;  %v2934_v6 = vand.u32 %v15244_v3, %v2932_v4  ;;  %14931 = vmatpush3.bf16.msra.mxu1 %v15243_v0  ;;  %v15249_v10 = vld [vmem:[%s21123_s0 + $0x20] sm:$0xff]   ;;  %v15250_v11 = vld [vmem:[%s21123_s0 + $0x28] sm:$0xff]   ;;  %v15251_v12 = vld [vmem:[%s21123_s0 + $0x30] sm:$0xff]   ;;  %vm7044_vm4 = vcmask 162816   ;;  %vm7333_vm5 = vcmask 326656   ;;  %vm7526_vm6 = vcmask 490496  }
   0x4   :  { %13963 = vmatprep.mubr.msk.bf16.mxu0 %vm2064_vm2, %v15245_v5  ;;  %v15252_v13 = vld [vmem:[%s21123_s0 + $0x38] sm:$0xff]   ;;  %v15253_v14 = vld [vmem:[%s21123_s0 + $0x40] sm:$0xff]   ;;  %v15254_v15 = vld [vmem:[%s21123_s0 + $0x48] sm:$0xff]   ;;  %vm7719_vm7 = vcmask 654336   ;;  %vm8138_vm8 = vcmask 818176   ;;  %s15911_s25 = smov 22  }
   0x5   :  { %13961 = vmatprep.subr.bf16.mxu0 %v2934_v6  ;;  %14930 = vmatprep.subr.bf16.mxu1 %v2934_v6  ;;  %v15255_v16 = vld [vmem:[%s21123_s0 + $0x50] sm:$0xff]   ;;  %v15256_v17 = vld [vmem:[%s21123_s0 + $0x58] sm:$0xff]   ;;  %v15257_v18 = vld [vmem:[%s21123_s0 + $0x60] sm:$0xff]   ;;  %s15917_s27 = smov 66   ;;  %s15918_s28 = smov 16   ;;  %vm10369_vm9 = vcmask 179200  }
   0x6   :  { %v15258_v19 = vld [vmem:[%s21123_s0 + $0x68] sm:$0xff]   ;;  %v15259_v20 = vld [vmem:[%s21123_s0 + $0x70] sm:$0xff]   ;;  %v15260_v21 = vld [vmem:[%s21123_s0 + $0x78] sm:$0xff]   ;;  %s15919_s30 = smov 44   ;;  %s15920_s10 = smov 116   ;;  %vm10362_vm10 = vcmask 408576  }
   0x7   :  { %13962 = vmatpush3.bf16.msra.mxu0 %v2934_v6  ;;  %14932 = vmatpush3.bf16.msra.mxu1 %v2934_v6  ;;  %v15261_v22 = vld [vmem:[%s21123_s0 + $0x80] sm:$0xff]   ;;  %v15262_v23 = vld [vmem:[%s21123_s0 + $0x88] sm:$0xff]   ;;  %v15263_v24 = vld [vmem:[%s21123_s0 + $0x90] sm:$0xff]   ;;  %s15921_s12 = smov 10   ;;  %s15922_s13 = smov 88   ;;  %vm10372_vm11 = vcmask 588800  }
   0x8   :  { %v15264_v25 = vld [vmem:[%s21123_s0 + $0x98] sm:$0xff]   ;;  %v15265_v26 = vld [vmem:[%s21123_s0 + $0xa0] sm:$0xff]   ;;  %v15266_v27 = vld [vmem:[%s21123_s0 + $0xa8] sm:$0xff]   ;;  %s15923_s15 = smov 38   ;;  %s15924_s16 = smov 110   ;;  %vm10375_vm12 = vcmask 998400  }
   0x9   :  { %v15267_v28 = vld [vmem:[%s21123_s0 + $0xb0] sm:$0xff]   ;;  %v15268_v29 = vld [vmem:[%s21123_s0 + $0xb8] sm:$0xff]   ;;  %v15269_v30 = vld [vmem:[%s21123_s0 + $0xc0] sm:$0xff]   ;;  %vm10386_vm13 = vcmask 130048   ;;  %vm10389_vm14 = vcmask 539648   ;;  %vm10392_vm15 = vcmask 949248  }
   0xa   :  { %13964 = vmatmul.mubr.msk.bf16.vlgmr.msra.gmra.mrb[0].mxu0 %vm2064_vm2, %v15246_v7  ;;  %v15270_v31 = vld [vmem:[%s21123_s0 + $0xc8] sm:$0xff]   ;;  %v15271_v32 = vld [vmem:[%s21123_s0 + $0xd0] sm:$0xff]   ;;  %v15272_v33 = vld [vmem:[%s21123_s0 + $0xd8] sm:$0xff]   ;;  %vm10379_vm0 = vcmask 359424   ;;  %vm10396_vm1 = vcmask 310272  }
   0xb   :  { %13967 = vmatprep.mubr.msk.bf16.mxu0 %vm2064_vm2, %v15247_v8  ;;  %v15273_v34 = vld [vmem:[%s21123_s0 + $0xe0] sm:$0xff]   ;;  %v15274_v35 = vld [vmem:[%s21123_s0 + $0xe8] sm:$0xff]   ;;  %v15275_v36 = vld [vmem:[%s21123_s0 + $0xf0] sm:$0xff]  }
   0xc   :  { %v15276_v37 = vld [vmem:[%s21123_s0 + $0xf8] sm:$0xff]   ;;  %v15277_v38 = vld [vmem:[%s21123_s0 + $0x100] sm:$0xff]   ;;  %v15278_v39 = vld [vmem:[%s21123_s0 + $0x108] sm:$0xff]  }
   0xd   :  { %v15279_v40 = vld [vmem:[%s21123_s0 + $0x110] sm:$0xff]   ;;  %v15280_v41 = vld [vmem:[%s21123_s0 + $0x118] sm:$0xff]   ;;  %v15281_v42 = vld [vmem:[%s21123_s0 + $0x120] sm:$0xff]  }
   0xe   :  { %v15282_v43 = vld [vmem:[%s21123_s0 + $0x128] sm:$0xff]   ;;  %v15283_v44 = vld [vmem:[%s21123_s0 + $0x130] sm:$0xff]   ;;  %v15284_v45 = vld [vmem:[%s21123_s0 + $0x138] sm:$0xff]  }
   0xf   :  { %v15285_v46 = vld [vmem:[%s21123_s0 + $0x140] sm:$0xff]   ;;  %v15286_v47 = vld [vmem:[%s21123_s0 + $0x148] sm:$0xff]   ;;  %v15287_v48 = vld [vmem:[%s21123_s0 + $0x150] sm:$0xff]  }
  0x10   :  { %v15288_v49 = vld [vmem:[%s21123_s0 + $0x158] sm:$0xff]   ;;  %v15289_v50 = vld [vmem:[%s21123_s0 + $0x160] sm:$0xff]   ;;  %v15290_v51 = vld [vmem:[%s21123_s0 + $0x168] sm:$0xff]  }
  0x11   :  { %v15291_v52 = vld [vmem:[%s21123_s0 + $0x170] sm:$0xff]   ;;  %v15292_v53 = vld [vmem:[%s21123_s0 + $0x178] sm:$0xff]   ;;  %v15293_v54 = vld [vmem:[%s21123_s0 + $0x180] sm:$0xff]  }
  0x12   :  { %13968 = vmatmul.mubr.msk.bf16.gmra.mrb[4].mxu0 %vm2064_vm2, %v15248_v9  ;;  %v15294_v55 = vld [vmem:[%s21123_s0 + $0x188] sm:$0xff]   ;;  %v15295_v56 = vld [vmem:[%s21123_s0 + $0x190] sm:$0xff]   ;;  %v15296_v57 = vld [vmem:[%s21123_s0 + $0x198] sm:$0xff]  }
  0x13   :  { %13971 = vmatprep.mubr.msk.bf16.mxu0 %vm2064_vm2, %v15249_v10  ;;  %v15297_v58 = vld [vmem:[%s21123_s0 + $0x1a0] sm:$0xff]   ;;  %v15298_v59 = vld [vmem:[%s21123_s0 + $0x1a8] sm:$0xff]   ;;  %v15299_v60 = vld [vmem:[%s21123_s0 + $0x1b0] sm:$0xff]  }
  0x14   :  { %v15300_v63 = vld [vmem:[%s21123_s0 + $0x1b8] sm:$0xff]   ;;  %v15301_v1 = vld [vmem:[%s21123_s0 + $0x1c0] sm:$0xff]   ;;  %v15302_v5 = vld [vmem:[%s21123_s0 + $0x1c8] sm:$0xff]  }
  0x15   :  { %v15303_v7 = vld [vmem:[%s21123_s0 + $0x1d0] sm:$0xff]  }
  0x1a   :  { %13972 = vmatmul.mubr.msk.bf16.gmra.mrb[8].mxu0 %vm2064_vm2, %v15250_v11  ;;  %v15304_v11 = vld [vmem:[%s21123_s0 + $0x1d8] sm:$0xff]  }
  0x1b   :  { %13975 = vmatprep.mubr.msk.bf16.mxu0 %vm2064_vm2, %v15251_v12 }
  0x22   :  { %13976 = vmatmul.mubr.msk.bf16.gmra.mrb[12].mxu0 %vm2064_vm2, %v15252_v13  ;;  %v15305_v13 = vld [vmem:[%s21123_s0 + $0x1e0] sm:$0xff]  }
  0x23   :  { %13979 = vmatprep.mubr.msk.bf16.mxu0 %vm2064_vm2, %v15253_v14 }
  0x2a   :  { %13980 = vmatmul.mubr.msk.bf16.gmra.mrb[16].mxu0 %vm2064_vm2, %v15254_v15 }
  0x2b   :  { %13983 = vmatprep.mubr.msk.bf16.mxu0 %vm2064_vm2, %v15255_v16 }
  0x32   :  { %13984 = vmatmul.mubr.msk.bf16.gmra.mrb[20].mxu0 %vm2064_vm2, %v15256_v17  ;;  %v15306_v17 = vld [vmem:[%s21123_s0 + $0x1e8] sm:$0xff]  }
  0x33   :  { %13987 = vmatprep.mubr.msk.bf16.mxu0 %vm2064_vm2, %v15257_v18 }
  0x3a   :  { %13988 = vmatmul.mubr.msk.bf16.gmra.mrb[24].mxu0 %vm2064_vm2, %v15258_v19  ;;  %v15307_v19 = vld [vmem:[%s21123_s0 + $0x1f0] sm:$0xff]  }
  0x3b   :  { %13991 = vmatprep.mubr.msk.bf16.mxu0 %vm2064_vm2, %v15259_v20 }
  0x42   :  { %13992 = vmatmul.mubr.msk.bf16.gmra.mrb[28].mxu0 %vm2064_vm2, %v15260_v21 }
  0x43   :  { %13995 = vmatprep.mubr.msk.bf16.mxu0 %vm2064_vm2, %v15261_v22 }
  0x4a   :  { %13996 = vmatmul.mubr.msk.bf16.gmra.mrb[32].mxu0 %vm2064_vm2, %v15262_v23  ;;  %v15308_v23 = vld [vmem:[%s21123_s0 + $0x1f8] sm:$0xff]  }
  0x4b   :  { %13999 = vmatprep.mubr.msk.bf16.mxu0 %vm2064_vm2, %v15263_v24 }
  0x52   :  { %14000 = vmatmul.mubr.msk.bf16.gmra.mrb[36].mxu0 %vm2064_vm2, %v15264_v25  ;;  %v15309_v25 = vld [vmem:[%s21123_s0 + $0x200] sm:$0xff]  }
  0x53   :  { %14003 = vmatprep.mubr.msk.bf16.mxu0 %vm2064_vm2, %v15265_v26 }
  0x5a   :  { %14004 = vmatmul.mubr.msk.bf16.gmra.mrb[40].mxu0 %vm2064_vm2, %v15266_v27 }
  0x5b   :  { %14007 = vmatprep.mubr.msk.bf16.mxu0 %vm2064_vm2, %v15267_v28 }
  0x62   :  { %14008 = vmatmul.mubr.msk.bf16.gmra.mrb[44].mxu0 %vm2064_vm2, %v15268_v29  ;;  %v15310_v29 = vld [vmem:[%s21123_s0 + $0x208] sm:$0xff]  }
  0x63   :  { %14011 = vmatprep.mubr.msk.bf16.mxu0 %vm2064_vm2, %v15269_v30 }
  0x6a   :  { %14012 = vmatmul.mubr.msk.bf16.gmra.mrb[48].mxu0 %vm2064_vm2, %v15270_v31  ;;  %v15311_v31 = vld [vmem:[%s21123_s0 + $0x210] sm:$0xff]  }
  0x6b   :  { %14015 = vmatprep.mubr.msk.bf16.mxu0 %vm2064_vm2, %v15271_v32 }
  0x72   :  { %14016 = vmatmul.mubr.msk.bf16.gmra.mrb[52].mxu0 %vm2064_vm2, %v15272_v33 }
  0x73   :  { %14019 = vmatprep.mubr.msk.bf16.mxu0 %vm2064_vm2, %v15273_v34 }
  0x7a   :  { %14020 = vmatmul.mubr.msk.bf16.gmra.mrb[56].mxu0 %vm2064_vm2, %v15274_v35 }
  0x7b   :  { %14023 = vmatprep.mubr.msk.bf16.mxu0 %vm2064_vm2, %v15275_v36  ;;  %v15312_v36 = vld [vmem:[%s21123_s0 + $0x218] sm:$0xff]  }
  0x82   :  { %14024 = vmatmul.mubr.msk.bf16.gmra.mrb[60].mxu0 %vm2064_vm2, %v15276_v37 }
  0x83   :  { %14027 = vmatprep.mubr.msk.bf16.mxu0 %vm2064_vm2, %v15277_v38 }
  0x8a   :  { %14028 = vmatmul.mubr.msk.bf16.gmra.mrb[64].mxu0 %vm2064_vm2, %v15278_v39  ;;  %v15313_v39 = vld [vmem:[%s21123_s0 + $0x220] sm:$0xff]  }
  0x8b   :  { %14031 = vmatprep.mubr.msk.bf16.mxu0 %vm2064_vm2, %v15279_v40 }
  0x92   :  { %14032 = vmatmul.mubr.msk.bf16.gmra.mrb[68].mxu0 %vm2064_vm2, %v15280_v41 }
  0x93   :  { %14035 = vmatprep.mubr.msk.bf16.mxu0 %vm2064_vm2, %v15281_v42 }
  0x9a   :  { %14036 = vmatmul.mubr.msk.bf16.gmra.mrb[72].mxu0 %vm2064_vm2, %v15282_v43  ;;  %v16299_v43 = vld [vmem:[%s21124_s2] ss:$0 sm:$0xff] }
  0x9b   :  { %14039 = vmatprep.mubr.msk.bf16.mxu0 %vm2064_vm2, %v15283_v44 }
  0xa2   :  { %14040 = vmatmul.mubr.msk.bf16.gmra.mrb[76].mxu0 %vm2064_vm2, %v15284_v45 }
  0xa3   :  { %14043 = vmatprep.mubr.msk.bf16.mxu0 %vm2064_vm2, %v15285_v46 }
  0xaa   :  { %14044 = vmatmul.mubr.msk.bf16.gmra.mrb[80].mxu0 %vm2064_vm2, %v15286_v47 }
  0xab   :  { %14047 = vmatprep.mubr.msk.bf16.mxu0 %vm2064_vm2, %v15287_v48 }
  0xb2   :  { %14048 = vmatmul.mubr.msk.bf16.gmra.mrb[84].mxu0 %vm2064_vm2, %v15288_v49 }
  0xb3   :  { %14051 = vmatprep.mubr.msk.bf16.mxu0 %vm2064_vm2, %v15289_v50  ;;  %v15314_v50 = vld [vmem:[%s21123_s0 + $0x228] sm:$0xff]  }
  0xba   :  { %14052 = vmatmul.mubr.msk.bf16.gmra.mrb[88].mxu0 %vm2064_vm2, %v15290_v51 }
  0xbb   :  { %14055 = vmatprep.mubr.msk.bf16.mxu0 %vm2064_vm2, %v15291_v52 }
  0xc2   :  { %14056 = vmatmul.mubr.msk.bf16.gmra.mrb[92].mxu0 %vm2064_vm2, %v15292_v53 }
  0xc3   :  { %14059 = vmatprep.mubr.msk.bf16.mxu0 %vm2064_vm2, %v15293_v54  ;;  %v15315_v54 = vld [vmem:[%s21123_s0 + $0x230] sm:$0xff]  }
  0xca   :  { %14060 = vmatmul.mubr.msk.bf16.gmra.mrb[96].mxu0 %vm2064_vm2, %v15294_v55 }
  0xcb   :  { %14063 = vmatprep.mubr.msk.bf16.mxu0 %vm2064_vm2, %v15295_v56 }
  0xd2   :  { %14064 = vmatmul.mubr.msk.bf16.gmra.mrb[100].mxu0 %vm2064_vm2, %v15296_v57 }
  0xd3   :  { %14067 = vmatprep.mubr.msk.bf16.mxu0 %vm2064_vm2, %v15297_v58 }
  0xda   :  { %14068 = vmatmul.mubr.msk.bf16.gmra.mrb[104].mxu0 %vm2064_vm2, %v15298_v59 }
  0xdb   :  { %14071 = vmatprep.mubr.msk.bf16.mxu0 %vm2064_vm2, %v15299_v60 }
  0xdd   :  { %v13965_v61 = vpop.f32.mrb[0].mxu0 }
  0xde   :  { %v2970_v62 = vpop.f32.mrb[1].mxu0 }
  0xdf   :  { %v13966_v0 = vpop.f32.mrb[2].mxu0 }
  0xe0   :  { %v2973_v2 = vpop.f32.mrb[3].mxu0 }
  0xe2   :  { %14072 = vmatmul.mubr.msk.bf16.gmra.mrb[108].mxu0 %vm2064_vm2, %v15300_v63 }
  0xe3   :  { %14075 = vmatprep.mubr.msk.bf16.mxu0 %vm2064_vm2, %v15301_v1 }
  0xe5   :  { %v16210_v3 = vpop.f32.mrb[4].mxu0 }
  0xe6   :  { %v16212_v4 = vpop.f32.mrb[5].mxu0 }
  0xe7   :  { %v16217_v6 = vpop.f32.mrb[6].mxu0 }
  0xe8   :  { %v16222_v8 = vpop.f32.mrb[7].mxu0 }
  0xea   :  { %14076 = vmatmul.mubr.msk.bf16.gmra.mrb[112].mxu0 %vm2064_vm2, %v15302_v5 }
  0xeb   :  { %14079 = vmatprep.mubr.msk.bf16.mxu0 %vm2064_vm2, %v15303_v7 }
  0xed   :  { %v16226_v9 = vpop.f32.mrb[8].mxu0 }
  0xee   :  { %v16228_v10 = vpop.f32.mrb[9].mxu0 }
  0xef   :  { %v16233_v12 = vpop.f32.mrb[10].mxu0 }
  0xf0   :  { %v16238_v14 = vpop.f32.mrb[11].mxu0 }
  0xf2   :  { %14080 = vmatmul.mubr.msk.bf16.gmra.mrb[116].mxu0 %vm2064_vm2, %v15304_v11 }
  0xf3   :  { %14083 = vmatprep.mubr.msk.bf16.mxu0 %vm2064_vm2, %v15305_v13 }
  0xf5   :  { %v16242_v15 = vpop.f32.mrb[12].mxu0 }
  0xf6   :  { %v16244_v16 = vpop.f32.mrb[13].mxu0 }
  0xf7   :  { %v16249_v18 = vpop.f32.mrb[14].mxu0 }
  0xf8   :  { %v16254_v20 = vpop.f32.mrb[15].mxu0 }
  0xfa   :  { %14084 = vmatmul.mubr.msk.bf16.gmra.mrb[120].mxu0 %vm2064_vm2, %v15306_v17 }
  0xfb   :  { %14087 = vmatprep.mubr.msk.bf16.mxu0 %vm2064_vm2, %v15307_v19 }
  0xfd   :  { %v16258_v21 = vpop.f32.mrb[16].mxu0 }
  0xfe   :  { %v16260_v22 = vpop.f32.mrb[17].mxu0 }
  0xff   :  { %v16265_v24 = vpop.f32.mrb[18].mxu0 }
 0x100   :  { %v16270_v26 = vpop.f32.mrb[19].mxu0 }
 0x102   :  { %14088 = vmatmul.mubr.msk.bf16.gmra.mrb[124].mxu0 %vm2064_vm2, %v15308_v23 }
 0x103   :  { %14091 = vmatprep.mubr.msk.bf16.mxu0 %vm2064_vm2, %v15309_v25 }
 0x105   :  { %v16274_v27 = vpop.f32.mrb[20].mxu0 }
 0x106   :  { %v16276_v28 = vpop.f32.mrb[21].mxu0 }
 0x107   :  { %v16281_v30 = vpop.f32.mrb[22].mxu0 }
 0x108   :  { %v16286_v32 = vpop.f32.mrb[23].mxu0 }
 0x10a   :  { %14092 = vmatmul.mubr.msk.bf16.gmra.mrb[128].mxu0 %vm2064_vm2, %v15310_v29 }
 0x10b   :  { %14095 = vmatprep.mubr.msk.bf16.mxu0 %vm2064_vm2, %v15311_v31  ;;  %v15318_v31 = vld [vmem:[%s21123_s0 + $0x248] sm:$0xff]  }
 0x10d   :  { %v13989_v33 = vpop.f32.mrb[24].mxu0 }
 0x10e   :  { %v5275_v34 = vmax.f32 %v13965_v61, %v13989_v33  ;;  %v3066_v35 = vpop.f32.mrb[25].mxu0 }
 0x10f   :  { %v5273_v37 = vmax.f32 %v2970_v62, %v3066_v35  ;;  %v13990_v38 = vpop.f32.mrb[26].mxu0  ;;  %v15319_v35 = vld [vmem:[%s21123_s0 + $0x250] sm:$0xff]  }
 0x110   :  { %v5276_v40 = vmax.f32 %v13966_v0, %v13990_v38  ;;  %v3069_v41 = vpop.f32.mrb[27].mxu0 }
 0x111   :  { %v5274_v42 = vmax.f32 %v2973_v2, %v3069_v41  ;;  %v15316_v2 = vld [vmem:[%s21123_s0 + $0x238] sm:$0xff]  }
 0x112   :  { %14096 = vmatmul.mubr.msk.bf16.gmra.mrb[132].mxu0 %vm2064_vm2, %v15312_v36  ;;  %v5562_v44 = vmax.f32 %v5275_v34, %v5276_v40 }
 0x113   :  { %v16302_v45 = vmax.f32 %v5273_v37, %v5274_v42  ;;  %14099 = vmatprep.mubr.msk.bf16.mxu0 %vm2064_vm2, %v15313_v39 }
 0x114   :  { %v5713_v46 = vadd.f32 %v16299_v43, %v5562_v44 }
 0x115   :  { %v13993_v47 = vpop.f32.mrb[28].mxu0 }
 0x116   :  { %v5279_v48 = vmax.f32 %v16210_v3, %v13993_v47  ;;  %v3082_v49 = vpop.f32.mrb[29].mxu0  ;;  %v5857_v51 = vmax.f32 %v5713_v46, 0.0 }
 0x117   :  { %v5277_v52 = vmax.f32 %v16212_v4, %v3082_v49  ;;  %v13994_v53 = vpop.f32.mrb[30].mxu0 }
 0x118   :  { %v5280_v55 = vmax.f32 %v16217_v6, %v13994_v53  ;;  %v3085_v56 = vpop.f32.mrb[31].mxu0  ;;  %v16315_v57 = vpack.c.bf16 %v5857_v51, %v5857_v51  ;;  %v15317_v6 = vld [vmem:[%s21123_s0 + $0x240] sm:$0xff]  }
 0x119   :  { %v5278_v58 = vmax.f32 %v16222_v8, %v3085_v56  ;;  %v15322_v56 = vld [vmem:[%s21123_s0 + $0x268] sm:$0xff]  }
 0x11a   :  { %21215 = vst [vmem:[#allocation2_spill] sm:$0xff] %v16315_v57  ;;  %v5564_v59 = vmax.f32 %v5279_v48, %v5280_v55  ;;  %14100 = vmatmul.mubr.msk.bf16.gmra.mrb[136].mxu0 %vm2064_vm2, %v15314_v50  ;;  %6240 = vrot.lane.b32.xlu0 %v16315_v57, %s15907_s24  ;;  %v15321_v48 = vld [vmem:[%s21123_s0 + $0x260] sm:$0xff]  }
 0x11b   :  { %v5563_v60 = vmax.f32 %v5277_v52, %v5278_v58  ;;  %14103 = vmatprep.mubr.msk.bf16.mxu0 %vm2064_vm2, %v15315_v54 }
 0x11c   :  { %v5715_v61 = vadd.f32 %v16299_v43, %v5564_v59 }
 0x11d   :  { %v13997_v62 = vpop.f32.mrb[32].mxu0  ;;  %v5714_v63 = vadd.f32 %v16299_v43, %v5563_v60  ;;  %v15323_v60 = vld [vmem:[%s21123_s0 + $0x270] sm:$0xff]  }
 0x11e   :  { %v5283_v0 = vmax.f32 %v16226_v9, %v13997_v62  ;;  %v3098_v1 = vpop.f32.mrb[33].mxu0  ;;  %v5859_v3 = vmax.f32 %v5715_v61, 0.0 }
 0x11f   :  { %v5281_v4 = vmax.f32 %v16228_v10, %v3098_v1  ;;  %v13998_v5 = vpop.f32.mrb[34].mxu0  ;;  %v5858_v13 = vmax.f32 %v5714_v63, 0.0 }
 0x120   :  { %v5284_v7 = vmax.f32 %v16233_v12, %v13998_v5  ;;  %v3101_v8 = vpop.f32.mrb[35].mxu0  ;;  %v16333_v11 = vpack.c.bf16 %v5859_v3, %v5859_v3  ;;  %v15325_v5 = vld [vmem:[%s21123_s0 + $0x280] sm:$0xff]  }
 0x121   :  { %v5282_v9 = vmax.f32 %v16238_v14, %v3101_v8  ;;  %v16343_v19 = vpack.c.bf16 %v5858_v13, %v5858_v13 }
 0x122   :  { %21216 = vst [vmem:[#allocation3_spill] sm:$0xff] %v16333_v11  ;;  %v5566_v17 = vmax.f32 %v5283_v0, %v5284_v7  ;;  %14104 = vmatmul.mubr.msk.bf16.gmra.mrb[140].mxu0 %vm2064_vm2, %v15316_v2  ;;  %6446 = vrot.lane.b32.xlu1 %v16333_v11, %s15908_s29 }
 0x123   :  { %v5565_v10 = vmax.f32 %v5281_v4, %v5282_v9  ;;  %6244 = vrot.lane.b32.xlu0 %v16333_v11, %s15907_s24  ;;  %14107 = vmatprep.mubr.msk.bf16.mxu0 %vm2064_vm2, %v15317_v6  ;;  %21217 = vst [vmem:[#allocation4_spill] sm:$0xff] %v16343_v19 }
 0x124   :  { %v5717_v12 = vadd.f32 %v16299_v43, %v5566_v17 }
 0x125   :  { %v14001_v23 = vpop.f32.mrb[36].mxu0  ;;  %v5716_v36 = vadd.f32 %v16299_v43, %v5565_v10  ;;  %v15326_v10 = vld [vmem:[%s21123_s0 + $0x288] sm:$0xff]  }
 0x126   :  { %v5861_v25 = vmax.f32 %v5717_v12, 0.0  ;;  %v5287_v14 = vmax.f32 %v16242_v15, %v14001_v23  ;;  %6242 = vrot.lane.b32.xlu1 %v16343_v19, %s15907_s24  ;;  %v3114_v29 = vpop.f32.mrb[37].mxu0  ;;  %v15327_v23 = vld [vmem:[%s21123_s0 + $0x290] sm:$0xff]  }
 0x127   :  { %6648 = vrot.lane.b32.xlu0 %v16333_v11, %s15909_s11  ;;  %v5285_v33 = vmax.f32 %v16244_v16, %v3114_v29  ;;  %v14002_v34 = vpop.f32.mrb[38].mxu0  ;;  %v5860_v41 = vmax.f32 %v5716_v36, 0.0 }
 0x128   :  { %v16357_v15 = vpack.c.bf16 %v5861_v25, %v5861_v25  ;;  %v5288_v37 = vmax.f32 %v16249_v18, %v14002_v34  ;;  %v3117_v38 = vpop.f32.mrb[39].mxu0 }
 0x129   :  { %v5286_v39 = vmax.f32 %v16254_v20, %v3117_v38  ;;  %v15320_v20 = vld [vmem:[%s21123_s0 + $0x258] sm:$0xff]  }
 0x12a   :  { %21218 = vst [vmem:[#allocation5_spill] sm:$0xff] %v16357_v15  ;;  %v5568_v40 = vmax.f32 %v5287_v14, %v5288_v37  ;;  %14108 = vmatmul.mubr.msk.bf16.gmra.mrb[144].mxu0 %vm2064_vm2, %v15318_v31  ;;  %6450 = vrot.lane.b32.xlu1 %v16357_v15, %s15908_s29 }
 0x12b   :  { %v5567_v16 = vmax.f32 %v5285_v33, %v5286_v39  ;;  %6444 = vrot.lane.b32.xlu0 %v16343_v19, %s15908_s29  ;;  %14111 = vmatprep.mubr.msk.bf16.mxu0 %vm2064_vm2, %v15319_v35  ;;  %v15328_v33 = vld [vmem:[%s21123_s0 + $0x298] sm:$0xff]   ;;  %v15329_v35 = vld [vmem:[%s21123_s0 + $0x2a0] sm:$0xff]   ;;  %v15330_v39 = vld [vmem:[%s21123_s0 + $0x2a8] sm:$0xff]  }
 0x12c   :  { %v5719_v49 = vadd.f32 %v16299_v43, %v5568_v40 }
 0x12d   :  { %v14005_v42 = vpop.f32.mrb[40].mxu0 }
 0x12e   :  { %v5291_v44 = vmax.f32 %v16258_v21, %v14005_v42  ;;  %6854 = vrot.lane.b32.xlu1 %v16357_v15, %s15910_s14  ;;  %v3130_v18 = vpop.f32.mrb[41].mxu0  ;;  %v16380_v21 = vpack.c.bf16 %v5860_v41, %v5860_v41  ;;  %v5863_v54 = vmax.f32 %v5719_v49, 0.0  ;;  %v15365_v49 = vld [vmem:[%s21123_s0 + $0x8a0] sm:$0xff]  }
 0x12f   :  { %6652 = vrot.lane.b32.xlu0 %v16357_v15, %s15909_s11  ;;  %v5289_v46 = vmax.f32 %v16260_v22, %v3130_v18  ;;  %v14006_v47 = vpop.f32.mrb[42].mxu0  ;;  %v15332_v18 = vld [vmem:[%s21123_s0 + $0x2b8] sm:$0xff]   ;;  %14515 = vmatprep.mubr.msk.bf16.mxu1 %vm2064_vm2, %v15365_v49 }
 0x130   :  { %21219 = vst [vmem:[#allocation6_spill] sm:$0xff] %v16380_v21  ;;  %v5292_v50 = vmax.f32 %v16265_v24, %v14006_v47  ;;  %v3133_v51 = vpop.f32.mrb[43].mxu0  ;;  %v16405_v61 = vpack.c.bf16 %v5863_v54, %v5863_v54  ;;  %v15335_v54 = vld [vmem:[%s21123_s0 + $0x2d0] sm:$0xff]  }
 0x131   :  { %v5290_v52 = vmax.f32 %v16270_v26, %v3133_v51  ;;  %v15334_v51 = vld [vmem:[%s21123_s0 + $0x2c8] sm:$0xff]  }
 0x132   :  { %v16385_v53 = vmax.f32 %v5291_v44, %v5292_v50  ;;  %14112 = vmatmul.mubr.msk.bf16.gmra.mrb[148].mxu0 %vm2064_vm2, %v15320_v20  ;;  %6246 = vrot.lane.b32.xlu1 %v16380_v21, %s15907_s24 }
 0x133   :  { %v5569_v22 = vmax.f32 %v5289_v46, %v5290_v52  ;;  %6248 = vrot.lane.b32.xlu0 %v16357_v15, %s15907_s24  ;;  %14115 = vmatprep.mubr.msk.bf16.mxu0 %vm2064_vm2, %v15321_v48  ;;  %v15333_v46 = vld [vmem:[%s21123_s0 + $0x2c0] sm:$0xff]   ;;  %v15366_v52 = vld [vmem:[%s21123_s0 + $0x8a8] sm:$0xff]  }
 0x134   :  { %14516 = vmatmul.mubr.msk.bf16.vlgmr.msra.gmra.mrb[0].mxu1 %vm2064_vm2, %v15366_v52 }
 0x135   :  { %v14009_v55 = vpop.f32.mrb[44].mxu0  ;;  %v5720_v7 = vadd.f32 %v16299_v43, %v5569_v22 }
 0x136   :  { %v5295_v24 = vmax.f32 %v16274_v27, %v14009_v55  ;;  %6650 = vrot.lane.b32.xlu1 %v16380_v21, %s15909_s11  ;;  %v3146_v26 = vpop.f32.mrb[45].mxu0  ;;  %v5718_v27 = vadd.f32 %v16299_v43, %v5567_v16  ;;  %v15331_v16 = vld [vmem:[%s21123_s0 + $0x2b0] sm:$0xff]  }
 0x137   :  { %6448 = vrot.lane.b32.xlu0 %v16380_v21, %s15908_s29  ;;  %v5293_v58 = vmax.f32 %v16276_v28, %v3146_v26  ;;  %v14010_v59 = vpop.f32.mrb[46].mxu0  ;;  %v5864_v13 = vmax.f32 %v5720_v7, 0.0  ;;  %v15369_v26 = vld [vmem:[%s21123_s0 + $0x8b0] sm:$0xff]  }
 0x138   :  { %v5296_v62 = vmax.f32 %v16281_v30, %v14010_v59  ;;  %v3149_v63 = vpop.f32.mrb[47].mxu0  ;;  %v5862_v2 = vmax.f32 %v5718_v27, 0.0  ;;  %v15336_v59 = vld [vmem:[%s21123_s0 + $0x2d8] sm:$0xff]   ;;  %14519 = vmatprep.mubr.msk.bf16.mxu1 %vm2064_vm2, %v15369_v26 }
 0x139   :  { %v5294_v0 = vmax.f32 %v16286_v32, %v3149_v63  ;;  %v15324_v32 = vld [vmem:[%s21123_s0 + $0x278] sm:$0xff]   ;;  %v16465_v14 = vpack.c.bf16 %v5864_v13, %v5864_v13  ;;  %v15337_v63 = vld [vmem:[%s21123_s0 + $0x2e0] sm:$0xff]  }
 0x13a   :  { %v16410_v1 = vmax.f32 %v5295_v24, %v5296_v62  ;;  %14116 = vmatmul.mubr.msk.bf16.gmra.mrb[152].mxu0 %vm2064_vm2, %v15322_v56  ;;  %6858 = vrot.lane.b32.xlu1 %v16405_v61, %s15910_s14  ;;  %v16436_v6 = vpack.c.bf16 %v5862_v2, %v5862_v2  ;;  %v15373_v13 = vld [vmem:[%s21123_s0 + $0x8c0] sm:$0xff]  }
 0x13b   :  { %v16415_v28 = vmax.f32 %v5293_v58, %v5294_v0  ;;  %6852 = vrot.lane.b32.xlu0 %v16380_v21, %s15910_s14  ;;  %14119 = vmatprep.mubr.msk.bf16.mxu0 %vm2064_vm2, %v15323_v60  ;;  %v15370_v60 = vld [vmem:[%s21123_s0 + $0x8b8] sm:$0xff]  }
 0x13c   :  { %21220 = vst [vmem:[#allocation7_spill] sm:$0xff] %v16436_v6  ;;  %14520 = vmatmul.mubr.msk.bf16.gmra.mrb[4].mxu1 %vm2064_vm2, %v15370_v60 }
 0x13d   :  { %v16420_v3 = vpop.f32.mrb[48].mxu0  ;;  %14523 = vmatprep.mubr.msk.bf16.mxu1 %vm2064_vm2, %v15373_v13 }
 0x13e   :  { %6454 = vrot.lane.b32.xlu1 %v16405_v61, %s15908_s29  ;;  %v16424_v30 = vpop.f32.mrb[49].mxu0 }
 0x13f   :  { %6252 = vrot.lane.b32.xlu0 %v16405_v61, %s15907_s24  ;;  %v16431_v4 = vpop.f32.mrb[50].mxu0 }
 0x140   :  { %v16439_v8 = vpop.f32.mrb[51].mxu0 }
 0x142   :  { %14120 = vmatmul.mubr.msk.bf16.gmra.mrb[156].mxu0 %vm2064_vm2, %v15324_v32  ;;  %6654 = vrot.lane.b32.xlu1 %v16436_v6, %s15909_s11 }
 0x143   :  { %6856 = vrot.lane.b32.xlu0 %v16436_v6, %s15910_s14  ;;  %14123 = vmatprep.mubr.msk.bf16.mxu0 %vm2064_vm2, %v15325_v5 }
 0x145   :  { %v16447_v9 = vpop.f32.mrb[52].mxu0 }
 0x146   :  { %6250 = vrot.lane.b32.xlu1 %v16436_v6, %s15907_s24  ;;  %v16451_v17 = vpop.f32.mrb[53].mxu0 }
 0x147   :  { %6452 = vrot.lane.b32.xlu0 %v16436_v6, %s15908_s29  ;;  %v16458_v12 = vpop.f32.mrb[54].mxu0 }
 0x148   :  { %v16463_v25 = vpop.f32.mrb[55].mxu0 }
 0x14a   :  { %14124 = vmatmul.mubr.msk.bf16.gmra.mrb[160].mxu0 %vm2064_vm2, %v15326_v10  ;;  %6254 = vrot.lane.b32.xlu1 %v16465_v14, %s15907_s24 }
 0x14b   :  { %6456 = vrot.lane.b32.xlu0 %v16465_v14, %s15908_s29  ;;  %14127 = vmatprep.mubr.msk.bf16.mxu0 %vm2064_vm2, %v15327_v23 }
 0x14d   :  { %v16473_v29 = vpop.f32.mrb[56].mxu0 }
 0x14e   :  { %v16475_v31 = vpop.f32.mrb[57].mxu0 }
 0x14f   :  { %v16480_v34 = vpop.f32.mrb[58].mxu0 }
 0x150   :  { %v16485_v36 = vpop.f32.mrb[59].mxu0 }
 0x152   :  { %14128 = vmatmul.mubr.msk.bf16.gmra.mrb[164].mxu0 %vm2064_vm2, %v15328_v33  ;;  %v15374_v33 = vld [vmem:[%s21123_s0 + $0x8c8] sm:$0xff]  }
 0x153   :  { %14131 = vmatprep.mubr.msk.bf16.mxu0 %vm2064_vm2, %v15329_v35  ;;  %14524 = vmatmul.mubr.msk.bf16.gmra.mrb[8].mxu1 %vm2064_vm2, %v15374_v33  ;;  %v15342_v33 = vld [vmem:[%s21123_s0 + $0x308] sm:$0xff]  }
 0x155   :  { %v16489_v37 = vpop.f32.mrb[60].mxu0 }
 0x156   :  { %v16491_v38 = vpop.f32.mrb[61].mxu0 }
 0x157   :  { %v16496_v40 = vpop.f32.mrb[62].mxu0 }
 0x158   :  { %v16501_v41 = vpop.f32.mrb[63].mxu0 }
 0x15a   :  { %14132 = vmatmul.mubr.msk.bf16.gmra.mrb[168].mxu0 %vm2064_vm2, %v15330_v39 }
 0x15b   :  { %14135 = vmatprep.mubr.msk.bf16.mxu0 %vm2064_vm2, %v15331_v16  ;;  %v15339_v16 = vld [vmem:[%s21123_s0 + $0x2f0] sm:$0xff]  }
 0x15d   :  { %v16505_v42 = vpop.f32.mrb[64].mxu0 }
 0x15e   :  { %v16507_v44 = vpop.f32.mrb[65].mxu0 }
 0x15f   :  { %v16512_v20 = vpop.f32.mrb[66].mxu0 }
 0x160   :  { %v16517_v47 = vpop.f32.mrb[67].mxu0 }
 0x162   :  { %14136 = vmatmul.mubr.msk.bf16.gmra.mrb[172].mxu0 %vm2064_vm2, %v15332_v18 }
 0x163   :  { %14139 = vmatprep.mubr.msk.bf16.mxu0 %vm2064_vm2, %v15333_v46 }
 0x165   :  { %v16521_v48 = vpop.f32.mrb[68].mxu0 }
 0x166   :  { %v16526_v50 = vpop.f32.mrb[69].mxu0 }
 0x167   :  { %v16534_v22 = vpop.f32.mrb[70].mxu0 }
 0x168   :  { %v16540_v55 = vpop.f32.mrb[71].mxu0 }
 0x16a   :  { %14140 = vmatmul.mubr.msk.bf16.gmra.mrb[176].mxu0 %vm2064_vm2, %v15334_v51 }
 0x16b   :  { %14143 = vmatprep.mubr.msk.bf16.mxu0 %vm2064_vm2, %v15335_v54 }
 0x16d   :  { %v14037_v24 = vpop.f32.mrb[72].mxu0 }
 0x16e   :  { %v5299_v56 = vmax.f32 %v16420_v3, %v14037_v24  ;;  %v3258_v58 = vpop.f32.mrb[73].mxu0  ;;  %v15377_v24 = vld [vmem:[%s21123_s0 + $0x8d0] sm:$0xff]  }
 0x16f   :  { %v5297_v27 = vmax.f32 %v16424_v30, %v3258_v58  ;;  %v14038_v62 = vpop.f32.mrb[74].mxu0  ;;  %14527 = vmatprep.mubr.msk.bf16.mxu1 %vm2064_vm2, %v15377_v24  ;;  %v15389_v24 = vld [vmem:[%s21123_s0 + $0x8f0] sm:$0xff]  }
 0x170   :  { %v5300_v0 = vmax.f32 %v16431_v4, %v14038_v62  ;;  %v3261_v2 = vpop.f32.mrb[75].mxu0  ;;  %v15341_v62 = vld [vmem:[%s21123_s0 + $0x300] sm:$0xff]  }
 0x171   :  { %v5298_v3 = vmax.f32 %v16439_v8, %v3261_v2  ;;  %v15338_v8 = vld [vmem:[%s21123_s0 + $0x2e8] sm:$0xff]  }
 0x172   :  { %v5574_v32 = vmax.f32 %v5299_v56, %v5300_v0  ;;  %14144 = vmatmul.mubr.msk.bf16.gmra.mrb[180].mxu0 %vm2064_vm2, %v15336_v59  ;;  %v15340_v56 = vld [vmem:[%s21123_s0 + $0x2f8] sm:$0xff]  }
 0x173   :  { %v16564_v5 = vmax.f32 %v5297_v27, %v5298_v3  ;;  %14147 = vmatprep.mubr.msk.bf16.mxu0 %vm2064_vm2, %v15337_v63  ;;  %v15378_v59 = vld [vmem:[%s21123_s0 + $0x8d8] sm:$0xff]  }
 0x174   :  { %v5725_v30 = vadd.f32 %v16299_v43, %v5574_v32  ;;  %14528 = vmatmul.mubr.msk.bf16.gmra.mrb[12].mxu1 %vm2064_vm2, %v15378_v59  ;;  %v15379_v3 = vld [vmem:[%s21125_s3 + $0x34] sm:$0xff]  }
 0x175   :  { %v14041_v7 = vpop.f32.mrb[76].mxu0  ;;  %14539 = vmatprep.subr.bf16.mxu1 %v15379_v3 }
 0x176   :  { %v5303_v4 = vmax.f32 %v16447_v9, %v14041_v7  ;;  %v3274_v10 = vpop.f32.mrb[77].mxu0  ;;  %v5869_v23 = vmax.f32 %v5725_v30, 0.0  ;;  %14540 = vmatpush3.bf16.msra.mxu1 %v15379_v3 }
 0x177   :  { %v5301_v35 = vmax.f32 %v16451_v17, %v3274_v10  ;;  %v14042_v39 = vpop.f32.mrb[78].mxu0 }
 0x178   :  { %v5304_v9 = vmax.f32 %v16458_v12, %v14042_v39  ;;  %v3277_v18 = vpop.f32.mrb[79].mxu0  ;;  %v16584_v46 = vpack.c.bf16 %v5869_v23, %v5869_v23 }
 0x179   :  { %v5302_v49 = vmax.f32 %v16463_v25, %v3277_v18 }
 0x17a   :  { %v5576_v51 = vmax.f32 %v5303_v4, %v5304_v9  ;;  %14148 = vmatmul.mubr.msk.bf16.gmra.mrb[184].mxu0 %vm2064_vm2, %v15338_v8  ;;  %6256 = vrot.lane.b32.xlu0 %v16584_v46, %s15907_s24  ;;  %v15383_v4 = vld [vmem:[%s21123_s0 + $0x8e0] sm:$0xff]   ;;  %v15343_v9 = vld [vmem:[%s21123_s0 + $0x310] sm:$0xff]  }
 0x17b   :  { %v5575_v17 = vmax.f32 %v5301_v35, %v5302_v49  ;;  %14151 = vmatprep.mubr.msk.bf16.mxu0 %vm2064_vm2, %v15339_v16  ;;  %v15384_v35 = vld [vmem:[%s21123_s0 + $0x8e8] sm:$0xff]   ;;  %14531 = vmatprep.mubr.msk.bf16.mxu1 %vm2064_vm2, %v15383_v4 }
 0x17c   :  { %v5727_v52 = vadd.f32 %v16299_v43, %v5576_v51  ;;  %14532 = vmatmul.mubr.msk.bf16.gmra.mrb[16].mxu1 %vm2064_vm2, %v15384_v35 }
 0x17d   :  { %v14045_v54 = vpop.f32.mrb[80].mxu0  ;;  %v5726_v12 = vadd.f32 %v16299_v43, %v5575_v17  ;;  %v15385_v17 = vld [vmem:[%s21125_s3 + $0x44] sm:$0xff]   ;;  %14535 = vmatprep.mubr.msk.bf16.mxu1 %vm2064_vm2, %v15389_v24 }
 0x17e   :  { %v5307_v25 = vmax.f32 %v16473_v29, %v14045_v54  ;;  %v3290_v26 = vpop.f32.mrb[81].mxu0  ;;  %v5871_v58 = vmax.f32 %v5727_v52, 0.0  ;;  %v15350_v24 = vld [vmem:[%s21123_s0 + $0x348] sm:$0xff]  }
 0x17f   :  { %v5305_v60 = vmax.f32 %v16475_v31, %v3290_v26  ;;  %v14046_v27 = vpop.f32.mrb[82].mxu0  ;;  %v5870_v2 = vmax.f32 %v5726_v12, 0.0 }
 0x180   :  { %v5308_v29 = vmax.f32 %v16480_v34, %v14046_v27  ;;  %v3293_v63 = vpop.f32.mrb[83].mxu0  ;;  %v16610_v0 = vpack.c.bf16 %v5871_v58, %v5871_v58  ;;  %v15382_v34 = vld [vmem:[%s21125_s3 + $0x3c] sm:$0xff]  }
 0x181   :  { %v5306_v31 = vmax.f32 %v16485_v36, %v3293_v63  ;;  %v16627_v13 = vpack.c.bf16 %v5870_v2, %v5870_v2  ;;  %14541 = vmatprep.subr.bf16.mxu1 %v15382_v34  ;;  %v15390_v58 = vld [vmem:[%s21123_s0 + $0x8f8] sm:$0xff]  }
 0x182   :  { %v5578_v32 = vmax.f32 %v5307_v25, %v5308_v29  ;;  %14152 = vmatmul.mubr.msk.bf16.gmra.mrb[188].mxu0 %vm2064_vm2, %v15340_v56  ;;  %6664 = vrot.lane.b32.xlu0 %v16610_v0, %s15909_s11  ;;  %v15344_v56 = vld [vmem:[%s21123_s0 + $0x318] sm:$0xff]  }
 0x183   :  { %v5577_v30 = vmax.f32 %v5305_v60, %v5306_v31  ;;  %6260 = vrot.lane.b32.xlu1 %v16610_v0, %s15907_s24  ;;  %14155 = vmatprep.mubr.msk.bf16.mxu0 %vm2064_vm2, %v15341_v62  ;;  %v15391_v29 = vld [vmem:[%s21125_s3 + $0x54] sm:$0xff]   ;;  %v15394_v31 = vld [vmem:[%s21125_s3 + $0x5c] sm:$0xff]  }
 0x184   :  { %v5729_v7 = vadd.f32 %v16299_v43, %v5578_v32  ;;  %14542 = vmatpush3.bf16.msra.mxu1 %v15382_v34 }
 0x185   :  { %v14049_v36 = vpop.f32.mrb[84].mxu0  ;;  %v5728_v39 = vadd.f32 %v16299_v43, %v5577_v30  ;;  %14543 = vmatprep.subr.bf16.mxu1 %v15385_v17  ;;  %14536 = vmatmul.mubr.msk.bf16.gmra.mrb[20].mxu1 %vm2064_vm2, %v15390_v58 }
 0x186   :  { %v5873_v10 = vmax.f32 %v5729_v7, 0.0  ;;  %v5311_v8 = vmax.f32 %v16489_v37, %v14049_v36  ;;  %6258 = vrot.lane.b32.xlu0 %v16627_v13, %s15907_s24  ;;  %v3306_v23 = vpop.f32.mrb[85].mxu0  ;;  %v15346_v7 = vld [vmem:[%s21123_s0 + $0x328] sm:$0xff]  }
 0x187   :  { %6462 = vrot.lane.b32.xlu1 %v16610_v0, %s15908_s29  ;;  %v5309_v37 = vmax.f32 %v16491_v38, %v3306_v23  ;;  %v14050_v16 = vpop.f32.mrb[86].mxu0  ;;  %v5872_v54 = vmax.f32 %v5728_v39, 0.0 }
 0x188   :  { %v16649_v18 = vpack.c.bf16 %v5873_v10, %v5873_v10  ;;  %v5312_v49 = vmax.f32 %v16496_v40, %v14050_v16  ;;  %v3309_v51 = vpop.f32.mrb[87].mxu0  ;;  %v15388_v40 = vld [vmem:[%s21125_s3 + $0x4c] sm:$0xff]   ;;  %14544 = vmatpush3.bf16.msra.mxu1 %v15385_v17  ;;  %v15349_v17 = vld [vmem:[%s21123_s0 + $0x340] sm:$0xff]  }
 0x189   :  { %v5310_v38 = vmax.f32 %v16501_v41, %v3309_v51  ;;  %14545 = vmatprep.subr.bf16.mxu1 %v15388_v40  ;;  %v16690_v63 = vpack.c.bf16 %v5872_v54, %v5872_v54  ;;  %v15347_v10 = vld [vmem:[%s21123_s0 + $0x330] sm:$0xff]  }
 0x18a   :  { %v5580_v52 = vmax.f32 %v5311_v8, %v5312_v49  ;;  %14156 = vmatmul.mubr.msk.bf16.gmra.mrb[192].mxu0 %vm2064_vm2, %v15342_v33  ;;  %6460 = vrot.lane.b32.xlu0 %v16627_v13, %s15908_s29  ;;  %v15348_v49 = vld [vmem:[%s21123_s0 + $0x338] sm:$0xff]  }
 0x18b   :  { %v5579_v12 = vmax.f32 %v5309_v37, %v5310_v38  ;;  %6466 = vrot.lane.b32.xlu1 %v16649_v18, %s15908_s29  ;;  %14159 = vmatprep.mubr.msk.bf16.mxu0 %vm2064_vm2, %v15343_v9 }
 0x18c   :  { %14546 = vmatpush3.bf16.msra.mxu1 %v15388_v40 }
 0x18d   :  { %v14053_v41 = vpop.f32.mrb[88].mxu0  ;;  %14547 = vmatprep.subr.bf16.mxu1 %v15391_v29  ;;  %v5730_v35 = vadd.f32 %v16299_v43, %v5579_v12 }
 0x18e   :  { %v5315_v25 = vmax.f32 %v16505_v42, %v14053_v41  ;;  %6668 = vrot.lane.b32.xlu0 %v16649_v18, %s15909_s11  ;;  %v3322_v26 = vpop.f32.mrb[89].mxu0  ;;  %v15345_v42 = vld [vmem:[%s21123_s0 + $0x320] sm:$0xff]  }
 0x18f   :  { %6870 = vrot.lane.b32.xlu1 %v16649_v18, %s15910_s14  ;;  %v5313_v59 = vmax.f32 %v16507_v44, %v3322_v26  ;;  %v14054_v60 = vpop.f32.mrb[90].mxu0  ;;  %v5731_v44 = vadd.f32 %v16299_v43, %v5580_v52  ;;  %v15351_v26 = vld [vmem:[%s21123_s0 + $0x350] sm:$0xff]  }
 0x190   :  { %v5316_v27 = vmax.f32 %v16512_v20, %v14054_v60  ;;  %v3325_v62 = vpop.f32.mrb[91].mxu0  ;;  %14548 = vmatpush3.bf16.msra.mxu1 %v15391_v29  ;;  %v16782_v60 = vpop.permute.xlu0 %6240  ;;  %v15352_v29 = vld [vmem:[%s21123_s0 + $0x358] sm:$0xff]  }
 0x191   :  { %v5314_v2 = vmax.f32 %v16517_v47, %v3325_v62  ;;  %v5875_v32 = vmax.f32 %v5731_v44, 0.0  ;;  %14549 = vmatprep.subr.bf16.mxu1 %v15394_v31 }
 0x192   :  { %v5582_v3 = vmax.f32 %v5315_v25, %v5316_v27  ;;  %14160 = vmatmul.mubr.msk.bf16.gmra.mrb[196].mxu0 %vm2064_vm2, %v15344_v56  ;;  %6264 = vrot.lane.b32.xlu0 %v16649_v18, %s15907_s24 }
 0x193   :  { %v5581_v20 = vmax.f32 %v5313_v59, %v5314_v2  ;;  %6262 = vrot.lane.b32.xlu1 %v16690_v63, %s15907_s24  ;;  %14163 = vmatprep.mubr.msk.bf16.mxu0 %vm2064_vm2, %v15345_v42  ;;  %v16719_v33 = vpack.c.bf16 %v5875_v32, %v5875_v32  ;;  %v15353_v2 = vld [vmem:[%s21123_s0 + $0x360] sm:$0xff]  }
 0x194   :  { %14550 = vmatpush3.bf16.msra.mxu1 %v15394_v31  ;;  %v5733_v54 = vadd.f32 %v16299_v43, %v5582_v3 }
 0x195   :  { %v14057_v47 = vpop.f32.mrb[92].mxu0  ;;  %v5732_v56 = vadd.f32 %v16299_v43, %v5581_v20  ;;  %v16798_v3 = vpop.permute.xlu0 %6244 }
 0x196   :  { %v5319_v30 = vmax.f32 %v16521_v48, %v14057_v47  ;;  %6464 = vrot.lane.b32.xlu0 %v16690_v63, %s15908_s29  ;;  %v3338_v34 = vpop.f32.mrb[93].mxu0  ;;  %v15395_v48 = vld [vmem:[%s21125_s3 + $0x64] ss:$0 sps:$4 sm:$0x33]   ;;  %v5877_v40 = vmax.f32 %v5733_v54, 0.0  ;;  %21221 = vst [vmem:[#allocation8_spill] sm:$0xff] %v16798_v3 }
 0x197   :  { %6666 = vrot.lane.b32.xlu1 %v16690_v63, %s15909_s11  ;;  %v5317_v36 = vmax.f32 %v16526_v50, %v3338_v34  ;;  %v14058_v4 = vpop.f32.mrb[94].mxu0  ;;  %v8237_v50 = vsel %vm8235_vm3, %v15395_v48, 0  ;;  %15217 = vmatprep.subr.msk.bf16.mxu1 %vm8235_vm3, %v15395_v48  ;;  %v5876_v42 = vmax.f32 %v5732_v56, 0.0  ;;  %v16808_v34 = vpop.permute.xlu1 %6446  ;;  %v15357_v54 = vld [vmem:[%s21123_s0 + $0x380] sm:$0xff]  }
 0x198   :  { %v5320_v8 = vmax.f32 %v16534_v22, %v14058_v4  ;;  %v3341_v23 = vpop.f32.mrb[95].mxu0  ;;  %v5874_v22 = vmax.f32 %v5730_v35, 0.0  ;;  %14552 = vmatpush3.bf16.msra.mxu1 %v8237_v50  ;;  %v6021_v59 = vpack.c.bf16 %v5877_v40, %v5877_v40  ;;  %21222 = vst [vmem:[#allocation9_spill] sm:$0xff] %v16808_v34 }
 0x199   :  { %v5318_v39 = vmax.f32 %v16540_v55, %v3341_v23  ;;  %v6020_v31 = vpack.c.bf16 %v5876_v42, %v5876_v42  ;;  %v16812_v4 = vpop.permute.xlu0 %6648  ;;  %v15358_v42 = vld [vmem:[%s21123_s0 + $0x388] sm:$0xff]  }
 0x19a   :  { %v5584_v37 = vmax.f32 %v5319_v30, %v5320_v8  ;;  %14164 = vmatmul.mubr.msk.bf16.gmra.mrb[200].mxu0 %vm2064_vm2, %v15346_v7  ;;  %6868 = vrot.lane.b32.xlu0 %v16690_v63, %s15910_s14  ;;  %v16749_v52 = vpack.c.bf16 %v5874_v22, %v5874_v22  ;;  %21223 = vst [vmem:[#allocation10_spill] sm:$0xff] %v16812_v4  ;;  %v15355_v8 = vld [vmem:[%s21123_s0 + $0x370] sm:$0xff]  }
 0x19b   :  { %v5583_v16 = vmax.f32 %v5317_v36, %v5318_v39  ;;  %6874 = vrot.lane.b32.xlu1 %v16719_v33, %s15910_s14  ;;  %14167 = vmatprep.mubr.msk.bf16.mxu0 %vm2064_vm2, %v15347_v10  ;;  %v16830_v50 = vpop.permute.xlu1 %6242 }
 0x19c   :  { %v5735_v47 = vadd.f32 %v16299_v43, %v5584_v37 }
 0x19d   :  { %v16731_v9 = vpop.f32.mrb[96].mxu0  ;;  %v5734_v32 = vadd.f32 %v16299_v43, %v5583_v16  ;;  %v15354_v43 = vld [vmem:[%s21123_s0 + $0x368] sm:$0xff]   ;;  %v16834_v37 = vpop.permute.xlu0 %6444 }
 0x19e   :  { %6268 = vrot.lane.b32.xlu0 %v16719_v33, %s15907_s24  ;;  %v16735_v55 = vpop.f32.mrb[97].mxu0  ;;  %v5879_v36 = vmax.f32 %v5735_v47, 0.0  ;;  %21224 = vst [vmem:[#allocation11_spill] sm:$0xff] %v16834_v37 }
 0x19f   :  { %6470 = vrot.lane.b32.xlu1 %v16719_v33, %s15908_s29  ;;  %v16742_v51 = vpop.f32.mrb[98].mxu0  ;;  %v5878_v30 = vmax.f32 %v5734_v32, 0.0 }
 0x1a0   :  { %v16747_v38 = vpop.f32.mrb[99].mxu0  ;;  %v6023_v39 = vpack.c.bf16 %v5879_v36, %v5879_v36 }
 0x1a1   :  { %v6022_v35 = vpack.c.bf16 %v5878_v30, %v5878_v30 }
 0x1a2   :  { %14168 = vmatmul.mubr.msk.bf16.gmra.mrb[204].mxu0 %vm2064_vm2, %v15348_v49  ;;  %6672 = vrot.lane.b32.xlu0 %v16719_v33, %s15909_s11  ;;  %v15356_v49 = vld [vmem:[%s21123_s0 + $0x378] sm:$0xff]  }
 0x1a3   :  { %6670 = vrot.lane.b32.xlu1 %v16749_v52, %s15909_s11  ;;  %14171 = vmatprep.mubr.msk.bf16.mxu0 %vm2064_vm2, %v15349_v17 }
 0x1a5   :  { %v16758_v12 = vpop.f32.mrb[100].mxu0 }
 0x1a6   :  { %6872 = vrot.lane.b32.xlu0 %v16749_v52, %s15910_s14  ;;  %v16762_v41 = vpop.f32.mrb[101].mxu0 }
 0x1a7   :  { %6266 = vrot.lane.b32.xlu1 %v16749_v52, %s15907_s24  ;;  %v16769_v25 = vpop.f32.mrb[102].mxu0 }
 0x1a8   :  { %v16775_v58 = vpop.f32.mrb[103].mxu0 }
 0x1aa   :  { %14172 = vmatmul.mubr.msk.bf16.gmra.mrb[208].mxu0 %vm2064_vm2, %v15350_v24  ;;  %6468 = vrot.lane.b32.xlu0 %v16749_v52, %s15908_s29  ;;  %v16851_v24 = vpop.permute.xlu1 %6450 }
 0x1ab   :  { %6474 = vrot.lane.b32.xlu1 %v6021_v59, %s15908_s29  ;;  %14175 = vmatprep.mubr.msk.bf16.mxu0 %vm2064_vm2, %v15351_v26  ;;  %21225 = vst [vmem:[#allocation12_spill] sm:$0xff] %v16851_v24  ;;  %v16853_v26 = vpop.permute.xlu0 %6652 }
 0x1ac   :  { %21226 = vst [vmem:[#allocation13_spill] sm:$0xff] %v16853_v26 }
 0x1ad   :  { %v16784_v27 = vpop.f32.mrb[104].mxu0 }
 0x1ae   :  { %6676 = vrot.lane.b32.xlu0 %v6021_v59, %s15909_s11  ;;  %v16787_v62 = vpop.f32.mrb[105].mxu0 }
 0x1af   :  { %6878 = vrot.lane.b32.xlu1 %v6021_v59, %s15910_s14  ;;  %v16793_v44 = vpop.f32.mrb[106].mxu0  ;;  %v16871_v32 = vpop.permute.xlu0 %6248 }
 0x1b0   :  { %v16800_v20 = vpop.f32.mrb[107].mxu0  ;;  %21228 = vst [vmem:[#allocation15_spill] sm:$0xff] %v16871_v32 }
 0x1b2   :  { %14176 = vmatmul.mubr.msk.bf16.gmra.mrb[212].mxu0 %vm2064_vm2, %v15352_v29  ;;  %6472 = vrot.lane.b32.xlu0 %v6020_v31, %s15908_s29  ;;  %v16864_v29 = vpop.permute.xlu1 %6854 }
 0x1b3   :  { %6270 = vrot.lane.b32.xlu1 %v6020_v31, %s15907_s24  ;;  %14179 = vmatprep.mubr.msk.bf16.mxu0 %vm2064_vm2, %v15353_v2  ;;  %21227 = vst [vmem:[#allocation14_spill] sm:$0xff] %v16864_v29 }
 0x1b5   :  { %v16810_v7 = vpop.f32.mrb[108].mxu0 }
 0x1b6   :  { %6876 = vrot.lane.b32.xlu0 %v6020_v31, %s15910_s14  ;;  %v16815_v10 = vpop.f32.mrb[109].mxu0  ;;  %v16877_v30 = vpop.permute.xlu1 %6246 }
 0x1b7   :  { %6674 = vrot.lane.b32.xlu1 %v6020_v31, %s15909_s11  ;;  %v16821_v48 = vpop.f32.mrb[110].mxu0  ;;  %v15359_v31 = vld [vmem:[%s21123_s0 + $0x390] sm:$0xff]   ;;  %21229 = vst [vmem:[#allocation16_spill] sm:$0xff] %v16877_v30 }
 0x1b8   :  { %v16826_v23 = vpop.f32.mrb[111].mxu0 }
 0x1ba   :  { %14180 = vmatmul.mubr.msk.bf16.gmra.mrb[216].mxu0 %vm2064_vm2, %v15354_v43  ;;  %6880 = vrot.lane.b32.xlu0 %v6022_v35, %s15910_s14  ;;  %v16879_v43 = vpop.permute.xlu0 %6448 }
 0x1bb   :  { %6882 = vrot.lane.b32.xlu1 %v6023_v39, %s15910_s14  ;;  %14183 = vmatprep.mubr.msk.bf16.mxu0 %vm2064_vm2, %v15355_v8  ;;  %21230 = vst [vmem:[#allocation17_spill] sm:$0xff] %v16879_v43  ;;  %v15360_v39 = vld [vmem:[%s21123_s0 + $0x398] sm:$0xff]  }
 0x1bd   :  { %v16836_v16 = vpop.f32.mrb[112].mxu0 }
 0x1be   :  { %v16838_v22 = vpop.f32.mrb[113].mxu0 }
 0x1bf   :  { %6678 = vrot.lane.b32.xlu1 %v6022_v35, %s15909_s11  ;;  %v16844_v17 = vpop.f32.mrb[114].mxu0 }
 0x1c0   :  { %v16849_v40 = vpop.f32.mrb[115].mxu0 }
 0x1c2   :  { %14184 = vmatmul.mubr.msk.bf16.gmra.mrb[220].mxu0 %vm2064_vm2, %v15356_v49 }
 0x1c3   :  { %14187 = vmatprep.mubr.msk.bf16.mxu0 %vm2064_vm2, %v15357_v54 }
 0x1c5   :  { %v16857_v56 = vpop.f32.mrb[116].mxu0 }
 0x1c6   :  { %v16859_v59 = vpop.f32.mrb[117].mxu0 }
 0x1c7   :  { %v16866_v2 = vpop.f32.mrb[118].mxu0 }
 0x1c8   :  { %v16873_v47 = vpop.f32.mrb[119].mxu0 }
 0x1ca   :  { %14188 = vmatmul.mubr.msk.bf16.gmra.mrb[224].mxu0 %vm2064_vm2, %v15358_v42  ;;  %v15361_v42 = vld [vmem:[%s21123_s0 + $0x3a0] sm:$0xff]  }
 0x1cb   :  { %14191 = vmatprep.mubr.msk.bf16.mxu0 %vm2064_vm2, %v15359_v31 }
 0x1cd   :  { %v14085_v36 = vpop.f32.mrb[120].mxu0 }
 0x1ce   :  { %v5323_v8 = vmax.f32 %v16731_v9, %v14085_v36  ;;  %v3450_v35 = vpop.f32.mrb[121].mxu0  ;;  %v16892_v9 = vpop.permute.xlu1 %6650 }
 0x1cf   :  { %v5321_v49 = vmax.f32 %v16735_v55, %v3450_v35  ;;  %v14086_v54 = vpop.f32.mrb[122].mxu0  ;;  %21231 = vst [vmem:[#allocation18_spill] sm:$0xff] %v16892_v9  ;;  %v16897_v55 = vpop.permute.xlu0 %6852  ;;  %v16902_v35 = vld [vmem:[%s21124_s2] ss:$0 sm:$0xff] }
 0x1d0   :  { %v5324_v31 = vmax.f32 %v16742_v51, %v14086_v54  ;;  %v3453_v6 = vpop.f32.mrb[123].mxu0  ;;  %21232 = vst [vmem:[#allocation19_spill] sm:$0xff] %v16897_v55 }
 0x1d1   :  { %v5322_v21 = vmax.f32 %v16747_v38, %v3453_v6 }
 0x1d2   :  { %v5586_v32 = vmax.f32 %v5323_v8, %v5324_v31  ;;  %14192 = vmatmul.mubr.msk.bf16.gmra.mrb[228].mxu0 %vm2064_vm2, %v15360_v39  ;;  %v16916_v26 = vpop.permute.xlu1 %6858 }
 0x1d3   :  { %v16894_v36 = vmax.f32 %v5321_v49, %v5322_v21  ;;  %14195 = vmatprep.mubr.msk.bf16.mxu0 %vm2064_vm2, %v15361_v42  ;;  %v15362_v21 = vld [vmem:[%s21123_s0 + $0x3a8] sm:$0xff]   ;;  %v15363_v42 = vld [vmem:[%s21123_s0 + $0x3b0] sm:$0xff]   ;;  %21233 = vst [vmem:[#allocation20_spill] sm:$0xff] %v16916_v26 }
 0x1d4   :  { %v5737_v51 = vadd.f32 %v16902_v35, %v5586_v32 }
 0x1d5   :  { %v14089_v54 = vpop.f32.mrb[124].mxu0 }
 0x1d6   :  { %v5327_v6 = vmax.f32 %v16758_v12, %v14089_v54  ;;  %v3466_v38 = vpop.f32.mrb[125].mxu0  ;;  %v5881_v8 = vmax.f32 %v5737_v51, 0.0  ;;  %v16919_v54 = vpop.permute.xlu0 %6252 }
 0x1d7   :  { %v5325_v39 = vmax.f32 %v16762_v41, %v3466_v38  ;;  %v14090_v49 = vpop.f32.mrb[126].mxu0  ;;  %21234 = vst [vmem:[#allocation21_spill] sm:$0xff] %v16919_v54 }
 0x1d8   :  { %v5328_v31 = vmax.f32 %v16769_v25, %v14090_v49  ;;  %v3469_v15 = vpop.f32.mrb[127].mxu0  ;;  %v16914_v32 = vpack.c.bf16 %v5881_v8, %v5881_v8 }
 0x1d9   :  { %v5326_v12 = vmax.f32 %v16775_v58, %v3469_v15  ;;  %v15364_v15 = vld [vmem:[%s21123_s0 + $0x3b8] sm:$0xff]  }
 0x1da   :  { %v5588_v43 = vmax.f32 %v5327_v6, %v5328_v31  ;;  %14196 = vmatmul.mubr.msk.bf16.gmra.mrb[232].mxu0 %vm2064_vm2, %v15362_v21  ;;  %6272 = vrot.lane.b32.xlu0 %v16914_v32, %s15907_s24  ;;  %v16931_v6 = vpop.permute.xlu1 %6454 }
 0x1db   :  { %v5587_v41 = vmax.f32 %v5325_v39, %v5326_v12  ;;  %14199 = vmatprep.mubr.msk.bf16.mxu0 %vm2064_vm2, %v15363_v42  ;;  %21235 = vst [vmem:[#allocation22_spill] sm:$0xff] %v16931_v6  ;;  %v16937_v42 = vpop.permute.xlu0 %6856 }
 0x1dc   :  { %v5739_v25 = vadd.f32 %v16902_v35, %v5588_v43  ;;  %v15367_v43 = vld [vmem:[%s21123_s0 + $0x3c0] sm:$0xff]   ;;  %21236 = vst [vmem:[#allocation23_spill] sm:$0xff] %v16937_v42 }
 0x1dd   :  { %v14093_v51 = vpop.f32.mrb[128].mxu0  ;;  %v5738_v38 = vadd.f32 %v16902_v35, %v5587_v41 }
 0x1de   :  { %v5331_v8 = vmax.f32 %v16784_v27, %v14093_v51  ;;  %v3482_v49 = vpop.f32.mrb[129].mxu0  ;;  %v5883_v58 = vmax.f32 %v5739_v25, 0.0 }
 0x1df   :  { %v5329_v21 = vmax.f32 %v16787_v62, %v3482_v49  ;;  %v14094_v39 = vpop.f32.mrb[130].mxu0  ;;  %v5882_v41 = vmax.f32 %v5738_v38, 0.0 }
 0x1e0   :  { %v5332_v31 = vmax.f32 %v16793_v44, %v14094_v39  ;;  %v3485_v27 = vpop.f32.mrb[131].mxu0  ;;  %v16940_v12 = vpack.c.bf16 %v5883_v58, %v5883_v58  ;;  %v16952_v58 = vpop.permute.xlu1 %6654  ;;  %v15368_v39 = vld [vmem:[%s21123_s0 + $0x3c8] sm:$0xff]  }
 0x1e1   :  { %v5330_v51 = vmax.f32 %v16800_v20, %v3485_v27  ;;  %v16950_v49 = vpack.c.bf16 %v5882_v41, %v5882_v41  ;;  %21237 = vst [vmem:[#allocation24_spill] sm:$0xff] %v16952_v58  ;;  %v16954_v20 = vpop.permute.xlu0 %6452  ;;  %v15371_v27 = vld [vmem:[%s21123_s0 + $0x3d0] sm:$0xff]  }
 0x1e2   :  { %v5590_v25 = vmax.f32 %v5331_v8, %v5332_v31  ;;  %14200 = vmatmul.mubr.msk.bf16.gmra.mrb[236].mxu0 %vm2064_vm2, %v15364_v15  ;;  %6478 = vrot.lane.b32.xlu1 %v16940_v12, %s15908_s29  ;;  %21238 = vst [vmem:[#allocation25_spill] sm:$0xff] %v16954_v20 }
 0x1e3   :  { %v5589_v62 = vmax.f32 %v5329_v21, %v5330_v51  ;;  %6276 = vrot.lane.b32.xlu0 %v16940_v12, %s15907_s24  ;;  %14203 = vmatprep.mubr.msk.bf16.mxu0 %vm2064_vm2, %v15367_v43 }
 0x1e4   :  { %v5741_v44 = vadd.f32 %v16902_v35, %v5590_v25 }
 0x1e5   :  { %v14097_v38 = vpop.f32.mrb[132].mxu0 }
 0x1e6   :  { %v5885_v8 = vmax.f32 %v5741_v44, 0.0  ;;  %v5335_v15 = vmax.f32 %v16810_v7, %v14097_v38  ;;  %6274 = vrot.lane.b32.xlu1 %v16950_v49, %s15907_s24  ;;  %v3498_v21 = vpop.f32.mrb[133].mxu0  ;;  %v5740_v7 = vadd.f32 %v16902_v35, %v5589_v62  ;;  %v16981_v62 = vpop.permute.xlu0 %6456 }
 0x1e7   :  { %6680 = vrot.lane.b32.xlu0 %v16940_v12, %s15909_s11  ;;  %v5333_v43 = vmax.f32 %v16815_v10, %v3498_v21  ;;  %v14098_v31 = vpop.f32.mrb[134].mxu0  ;;  %v16976_v10 = vpop.permute.xlu1 %6250  ;;  %21240 = vst [vmem:[#allocation27_spill] sm:$0xff] %v16981_v62 }
 0x1e8   :  { %v16968_v41 = vpack.c.bf16 %v5885_v8, %v5885_v8  ;;  %v5336_v51 = vmax.f32 %v16821_v48, %v14098_v31  ;;  %v3501_v25 = vpop.f32.mrb[135].mxu0  ;;  %21239 = vst [vmem:[#allocation26_spill] sm:$0xff] %v16976_v10  ;;  %v5884_v48 = vmax.f32 %v5740_v7, 0.0 }
 0x1e9   :  { %v5334_v44 = vmax.f32 %v16826_v23, %v3501_v25 }
 0x1ea   :  { %v5592_v38 = vmax.f32 %v5335_v15, %v5336_v51  ;;  %14204 = vmatmul.mubr.msk.bf16.gmra.mrb[240].mxu0 %vm2064_vm2, %v15368_v39  ;;  %6482 = vrot.lane.b32.xlu1 %v16968_v41, %s15908_s29  ;;  %v15372_v39 = vld [vmem:[%s21123_s0 + $0x3d8] sm:$0xff]   ;;  %v16995_v7 = vpack.c.bf16 %v5884_v48, %v5884_v48 }
 0x1eb   :  { %v5591_v21 = vmax.f32 %v5333_v43, %v5334_v44  ;;  %6476 = vrot.lane.b32.xlu0 %v16950_v49, %s15908_s29  ;;  %14207 = vmatprep.mubr.msk.bf16.mxu0 %vm2064_vm2, %v15371_v27  ;;  %v15375_v27 = vld [vmem:[%s21123_s0 + $0x3e0] sm:$0xff]  }
 0x1ec   :  { %v16998_v51 = vpop.permute.xlu0 %6256 }
 0x1ed   :  { %v14101_v8 = vpop.f32.mrb[136].mxu0 }
 0x1ee   :  { %v5339_v23 = vmax.f32 %v16836_v16, %v14101_v8  ;;  %6886 = vrot.lane.b32.xlu1 %v16968_v41, %s15910_s14  ;;  %v3514_v15 = vpop.f32.mrb[137].mxu0  ;;  %v5743_v16 = vadd.f32 %v16902_v35, %v5592_v38  ;;  %v17001_v8 = vpop.permute.xlu1 %6254 }
 0x1ef   :  { %6684 = vrot.lane.b32.xlu0 %v16968_v41, %s15909_s11  ;;  %v5337_v43 = vmax.f32 %v16838_v22, %v3514_v15  ;;  %v14102_v31 = vpop.f32.mrb[138].mxu0  ;;  %21241 = vst [vmem:[#allocation28_spill] sm:$0xff] %v17001_v8 }
 0x1f0   :  { %v5340_v25 = vmax.f32 %v16844_v17, %v14102_v31  ;;  %v3517_v44 = vpop.f32.mrb[139].mxu0  ;;  %v5887_v38 = vmax.f32 %v5743_v16, 0.0  ;;  %v15380_v31 = vld [vmem:[%s21123_s0 + $0x3f0] sm:$0xff]  }
 0x1f1   :  { %v5338_v62 = vmax.f32 %v16849_v40, %v3517_v44 }
 0x1f2   :  { %v5594_v6 = vmax.f32 %v5339_v23, %v5340_v25  ;;  %14208 = vmatmul.mubr.msk.bf16.gmra.mrb[244].mxu0 %vm2064_vm2, %v15372_v39  ;;  %6278 = vrot.lane.b32.xlu1 %v16995_v7, %s15907_s24 }
 0x1f3   :  { %v17007_v22 = vmax.f32 %v5337_v43, %v5338_v62  ;;  %6280 = vrot.lane.b32.xlu0 %v16968_v41, %s15907_s24  ;;  %14211 = vmatprep.mubr.msk.bf16.mxu0 %vm2064_vm2, %v15375_v27  ;;  %v15376_v62 = vld [vmem:[%s21123_s0 + $0x3e8] sm:$0xff]   ;;  %v17028_v27 = vpack.c.bf16 %v5887_v38, %v5887_v38 }
 0x1f4   :  { %v17012_v17 = vpop.permute.xlu0 %6664 }
 0x1f5   :  { %v17014_v48 = vpop.permute.xlu1 %6260  ;;  %v14105_v15 = vpop.f32.mrb[140].mxu0 }
 0x1f6   :  { %v5343_v40 = vmax.f32 %v16857_v56, %v14105_v15  ;;  %6682 = vrot.lane.b32.xlu1 %v16995_v7, %s15909_s11  ;;  %v3530_v23 = vpop.f32.mrb[141].mxu0  ;;  %v5742_v56 = vadd.f32 %v16902_v35, %v5591_v21 }
 0x1f7   :  { %6480 = vrot.lane.b32.xlu0 %v16995_v7, %s15908_s29  ;;  %v5341_v39 = vmax.f32 %v16859_v59, %v3530_v23  ;;  %v14106_v43 = vpop.f32.mrb[142].mxu0 }
 0x1f8   :  { %v5344_v16 = vmax.f32 %v16866_v2, %v14106_v43  ;;  %v6259_v25 = vpop.permute.xlu0 %6258  ;;  %v3533_v44 = vpop.f32.mrb[143].mxu0  ;;  %v5886_v2 = vmax.f32 %v5742_v56, 0.0  ;;  %v5745_v56 = vadd.f32 %v16902_v35, %v5594_v6 }
 0x1f9   :  { %v6463_v15 = vpop.permute.xlu1 %6462  ;;  %v5342_v8 = vmax.f32 %v16873_v47, %v3533_v44  ;;  %v5724_v47 = vadd.f32 %v16902_v35, %v16564_v5 }
 0x1fa   :  { %v17033_v54 = vmax.f32 %v5343_v40, %v5344_v16  ;;  %14212 = vmatmul.mubr.msk.bf16.gmra.mrb[248].mxu0 %vm2064_vm2, %v15376_v62  ;;  %6890 = vrot.lane.b32.xlu1 %v17028_v27, %s15910_s14  ;;  %v17063_v43 = vpack.c.bf16 %v5886_v2, %v5886_v2  ;;  %v5889_v20 = vmax.f32 %v5745_v56, 0.0 }
 0x1fb   :  { %v17038_v59 = vmax.f32 %v5341_v39, %v5342_v8  ;;  %6884 = vrot.lane.b32.xlu0 %v16995_v7, %s15910_s14  ;;  %14215 = vmatprep.mubr.msk.bf16.mxu0 %vm2064_vm2, %v15380_v31  ;;  %v15381_v8 = vld [vmem:[%s21123_s0 + $0x3f8] sm:$0xff]   ;;  %v15386_v39 = vld [vmem:[%s21123_s0 + $0x400] sm:$0xff]   ;;  %v5868_v44 = vmax.f32 %v5724_v47, 0.0  ;;  %v7074_v47 = vsel %vm7044_vm4, %v16584_v46, %v6259_v25  ;;  %v5744_v25 = vadd.f32 %v16902_v35, %v17007_v22 }
 0x1fc   :  { %v6461_v21 = vpop.permute.xlu0 %6460  ;;  %v6033_v24 = vpack.c.bf16 %v5889_v20, %v5889_v20  ;;  %v7353_v19 = vsel %vm7333_vm5, %v7074_v47, %v6463_v15 }
 0x1fd   :  { %v17043_v38 = vpop.permute.xlu1 %6466  ;;  %v17045_v23 = vpop.f32.mrb[144].mxu0  ;;  %v6012_v6 = vpack.c.bf16 %v5868_v44, %v5868_v44  ;;  %v15392_v44 = vld [vmem:[%s21123_s0 + $0x410] sm:$0xff]   ;;  %v5888_v22 = vmax.f32 %v5744_v25, 0.0 }
 0x1fe   :  { %6486 = vrot.lane.b32.xlu1 %v17028_v27, %s15908_s29  ;;  %v17051_v40 = vpop.f32.mrb[145].mxu0 }
 0x1ff   :  { %6284 = vrot.lane.b32.xlu0 %v17028_v27, %s15907_s24  ;;  %v17058_v62 = vpop.f32.mrb[146].mxu0  ;;  %v7071_v46 = vsel %vm7044_vm4, %v6012_v6, %v16998_v51 }
 0x200   :  { %v17065_v5 = vpop.permute.xlu0 %6668  ;;  %v17067_v31 = vpop.f32.mrb[147].mxu0  ;;  %v7351_v29 = vsel %vm7333_vm5, %v7071_v46, %v6461_v21  ;;  %v5747_v46 = vadd.f32 %v16902_v35, %v17033_v54  ;;  %v7077_v54 = vsel %vm7044_vm4, %v16627_v13, %v17014_v48  ;;  %v15397_v13 = vld [vmem:[%s21123_s0 + $0x428] sm:$0xff]   ;;  %v15398_v48 = vld [vmem:[%s21123_s0 + $0x430] sm:$0xff]  }
 0x201   :  { %v6871_v16 = vpop.permute.xlu1 %6870  ;;  %v7544_v20 = vsel %vm7526_vm6, %v7351_v29, %v17012_v17  ;;  %v15393_v29 = vld [vmem:[%s21123_s0 + $0x418] sm:$0xff]  }
 0x202   :  { %14216 = vmatmul.mubr.msk.bf16.gmra.mrb[252].mxu0 %vm2064_vm2, %v15381_v8  ;;  %6686 = vrot.lane.b32.xlu1 %v17063_v43, %s15909_s11 }
 0x203   :  { %6688 = vrot.lane.b32.xlu0 %v17028_v27, %s15909_s11  ;;  %14219 = vmatprep.mubr.msk.bf16.mxu0 %vm2064_vm2, %v15386_v39  ;;  %v15387_v39 = vld [vmem:[%s21123_s0 + $0x408] sm:$0xff]  }
 0x204   :  { %v17076_v2 = vpop.permute.xlu0 %6264 }
 0x205   :  { %v6263_v10 = vpop.permute.xlu1 %6262  ;;  %v17078_v26 = vpop.f32.mrb[148].mxu0 }
 0x206   :  { %6282 = vrot.lane.b32.xlu1 %v17063_v43, %s15907_s24  ;;  %v17084_v8 = vpop.f32.mrb[149].mxu0 }
 0x207   :  { %6888 = vrot.lane.b32.xlu0 %v17063_v43, %s15910_s14  ;;  %v17091_v56 = vpop.f32.mrb[150].mxu0 }
 0x208   :  { %v6465_v42 = vpop.permute.xlu0 %6464  ;;  %v17100_v58 = vpop.f32.mrb[151].mxu0 }
 0x209   :  { %v6667_v3 = vpop.permute.xlu1 %6666 }
 0x20a   :  { %v7546_v55 = vsel %vm7526_vm6, %v7353_v19, %v6667_v3  ;;  %14220 = vmatmul.mubr.msk.bf16.gmra.mrb[0].mxu0 %vm2064_vm2, %v15387_v39  ;;  %6490 = vrot.lane.b32.xlu1 %v6033_v24, %s15908_s29 }
 0x20b   :  { %6484 = vrot.lane.b32.xlu0 %v17063_v43, %s15908_s29  ;;  %14223 = vmatprep.mubr.msk.bf16.mxu0 %vm2064_vm2, %v15392_v44  ;;  %v7739_v21 = vsel %vm7719_vm7, %v7546_v55, %v6871_v16  ;;  %v15396_v55 = vld [vmem:[%s21123_s0 + $0x420] sm:$0xff]   ;;  %v6032_v44 = vpack.c.bf16 %v5888_v22, %v5888_v22  ;;  %v5891_v22 = vmax.f32 %v5747_v46, 0.0 }
 0x20c   :  { %v6869_v51 = vpop.permute.xlu0 %6868 }
 0x20d   :  { %v7737_v15 = vsel %vm7719_vm7, %v7544_v20, %v6869_v51  ;;  %v6875_v19 = vpop.permute.xlu1 %6874  ;;  %v17114_v3 = vpop.f32.mrb[152].mxu0  ;;  %v7080_v20 = vsel %vm7044_vm4, %v16610_v0, %v6263_v10 }
 0x20e   :  { %v17116_v6 = vcombine.low %v7737_v15, %v7739_v21  ;;  %6894 = vrot.lane.b32.xlu1 %v6033_v24, %s15910_s14  ;;  %v17119_v47 = vpop.f32.mrb[153].mxu0  ;;  %v7355_v15 = vsel %vm7333_vm5, %v7077_v54, %v6465_v42 }
 0x20f   :  { %6692 = vrot.lane.b32.xlu0 %v6033_v24, %s15909_s11  ;;  %v17125_v17 = vpop.f32.mrb[154].mxu0  ;;  %v5746_v24 = vadd.f32 %v16902_v35, %v17038_v59  ;;  %v7357_v59 = vsel %vm7333_vm5, %v7080_v20, %v17043_v38  ;;  %v7548_v38 = vsel %vm7526_vm6, %v7355_v15, %v17065_v5  ;;  %v6035_v20 = vpack.c.bf16 %v5891_v22, %v5891_v22 }
 0x210   :  { %21242 = vst [vmem:[#allocation29_spill] sm:$0xff] %v17116_v6  ;;  %14553 = vmatprep.mubr.msk.bf16.mxu1 %vm8138_vm8, %v17116_v6  ;;  %v17132_v16 = vpop.permute.xlu0 %6268  ;;  %v17134_v39 = vpop.f32.mrb[155].mxu0 }
 0x211   :  { %v17138_v25 = vpop.permute.xlu1 %6470  ;;  %v5890_v21 = vmax.f32 %v5746_v24, 0.0 }
 0x212   :  { %14224 = vmatmul.mubr.msk.bf16.gmra.mrb[4].mxu0 %vm2064_vm2, %v15393_v29  ;;  %6286 = vrot.lane.b32.xlu1 %v6032_v44, %s15907_s24 }
 0x213   :  { %6488 = vrot.lane.b32.xlu0 %v6032_v44, %s15908_s29  ;;  %14227 = vmatprep.mubr.msk.bf16.mxu0 %vm2064_vm2, %v15396_v55  ;;  %v6034_v6 = vpack.c.bf16 %v5890_v21, %v5890_v21  ;;  %v15399_v21 = vld [vmem:[%s21123_s0 + $0x438] sm:$0xff]  }
 0x214   :  { %v6673_v51 = vpop.permute.xlu0 %6672 }
 0x215   :  { %v6671_v0 = vpop.permute.xlu1 %6670  ;;  %v17154_v10 = vpop.f32.mrb[156].mxu0 }
 0x216   :  { %v7550_v29 = vsel %vm7526_vm6, %v7357_v59, %v6671_v0  ;;  %6690 = vrot.lane.b32.xlu1 %v6032_v44, %s15909_s11  ;;  %v17158_v55 = vpop.f32.mrb[157].mxu0 }
 0x217   :  { %6892 = vrot.lane.b32.xlu0 %v6032_v44, %s15910_s14  ;;  %v17164_v42 = vpop.f32.mrb[158].mxu0  ;;  %v7743_v59 = vsel %vm7719_vm7, %v7550_v29, %v6875_v19 }
 0x218   :  { %v6873_v46 = vpop.permute.xlu0 %6872  ;;  %v17171_v24 = vpop.f32.mrb[159].mxu0 }
 0x219   :  { %v7741_v54 = vsel %vm7719_vm7, %v7548_v38, %v6873_v46  ;;  %v6267_v0 = vpop.permute.xlu1 %6266 }
 0x21a   :  { %v17175_v44 = vcombine.low %v7741_v54, %v7743_v59  ;;  %14228 = vmatmul.mubr.msk.bf16.gmra.mrb[8].mxu0 %vm2064_vm2, %v15397_v13  ;;  %6898 = vrot.lane.b32.xlu1 %v6035_v20, %s15910_s14  ;;  %v15400_v13 = vld [vmem:[%s21123_s0 + $0x440] sm:$0xff]   ;;  %v7086_v9 = vsel %vm7044_vm4, %v16649_v18, %v6267_v0 }
 0x21b   :  { %6896 = vrot.lane.b32.xlu0 %v6034_v6, %s15910_s14  ;;  %14231 = vmatprep.mubr.msk.bf16.mxu0 %vm2064_vm2, %v15398_v48  ;;  %v7361_v18 = vsel %vm7333_vm5, %v7086_v9, %v17138_v25 }
 0x21c   :  { %21243 = vst [vmem:[#allocation30_spill] sm:$0xff] %v17175_v44  ;;  %v6469_v5 = vpop.permute.xlu0 %6468  ;;  %14554 = vmatmul.mubr.msk.bf16.vlgmr.msra.gmra.mrb[24].mxu1 %vm8138_vm8, %v17175_v44 }
 0x21d   :  { %v6475_v22 = vpop.permute.xlu1 %6474  ;;  %v17183_v15 = vpop.f32.mrb[160].mxu0 }
 0x21e   :  { %6694 = vrot.lane.b32.xlu1 %v6034_v6, %s15909_s11  ;;  %v17186_v19 = vpop.f32.mrb[161].mxu0  ;;  %v7083_v6 = vsel %vm7044_vm4, %v16690_v63, %v17076_v2  ;;  %v15402_v63 = vld [vmem:[%s21123_s0 + $0x450] sm:$0xff]  }
 0x21f   :  { %v17191_v29 = vpop.f32.mrb[162].mxu0  ;;  %v7359_v54 = vsel %vm7333_vm5, %v7083_v6, %v6469_v5 }
 0x220   :  { %v6677_v48 = vpop.permute.xlu0 %6676  ;;  %v17196_v38 = vpop.f32.mrb[163].mxu0  ;;  %v7552_v2 = vsel %vm7526_vm6, %v7359_v54, %v6673_v51 }
 0x221   :  { %v6879_v46 = vpop.permute.xlu1 %6878 }
 0x222   :  { %14232 = vmatmul.mubr.msk.bf16.gmra.mrb[12].mxu0 %vm2064_vm2, %v15399_v21  ;;  %v15401_v21 = vld [vmem:[%s21123_s0 + $0x448] sm:$0xff]  }
 0x223   :  { %14235 = vmatprep.mubr.msk.bf16.mxu0 %vm2064_vm2, %v15400_v13 }
 0x224   :  { %v6473_v20 = vpop.permute.xlu0 %6472 }
 0x225   :  { %v6271_v59 = vpop.permute.xlu1 %6270  ;;  %v17204_v44 = vpop.f32.mrb[164].mxu0 }
 0x226   :  { %v17208_v11 = vpop.f32.mrb[165].mxu0  ;;  %v7092_v9 = vsel %vm7044_vm4, %v16719_v33, %v6271_v59 }
 0x227   :  { %v17213_v13 = vpop.f32.mrb[166].mxu0  ;;  %v7365_v59 = vsel %vm7333_vm5, %v7092_v9, %v6475_v22 }
 0x228   :  { %v6877_v5 = vpop.permute.xlu0 %6876  ;;  %v17219_v6 = vpop.f32.mrb[167].mxu0 }
 0x229   :  { %v7745_v30 = vsel %vm7719_vm7, %v7552_v2, %v6877_v5  ;;  %v6675_v0 = vpop.permute.xlu1 %6674  ;;  %v7089_v2 = vsel %vm7044_vm4, %v16749_v52, %v17132_v16  ;;  %v15404_v52 = vld [vmem:[%s21123_s0 + $0x460] sm:$0xff]  }
 0x22a   :  { %v7554_v4 = vsel %vm7526_vm6, %v7361_v18, %v6675_v0  ;;  %14236 = vmatmul.mubr.msk.bf16.gmra.mrb[16].mxu0 %vm2064_vm2, %v15401_v21 }
 0x22b   :  { %v7747_v34 = vsel %vm7719_vm7, %v7554_v4, %v6879_v46  ;;  %14239 = vmatprep.mubr.msk.bf16.mxu0 %vm2064_vm2, %v15402_v63  ;;  %v7363_v4 = vsel %vm7333_vm5, %v7089_v2, %v6473_v20 }
 0x22c   :  { %v17228_v37 = vcombine.low %v7745_v30, %v7747_v34  ;;  %v15403_v34 = vld [vmem:[%s21123_s0 + $0x458] sm:$0xff]   ;;  %v6881_v33 = vpop.permute.xlu0 %6880  ;;  %v7556_v18 = vsel %vm7526_vm6, %v7363_v4, %v6677_v48  ;;  %v15406_v4 = vld [vmem:[%s21123_s0 + $0x470] sm:$0xff]  }
 0x22d   :  { %v6883_v51 = vpop.permute.xlu1 %6882  ;;  %v14133_v54 = vpop.f32.mrb[168].mxu0 }
 0x22e   :  { %21244 = vst [vmem:[#allocation31_spill] sm:$0xff] %v17228_v37  ;;  %v5347_v25 = vmax.f32 %v17045_v23, %v14133_v54  ;;  %14557 = vmatprep.mubr.msk.bf16.mxu1 %vm8138_vm8, %v17228_v37  ;;  %v3642_v21 = vpop.f32.mrb[169].mxu0 }
 0x22f   :  { %v5345_v30 = vmax.f32 %v17051_v40, %v3642_v21  ;;  %v14134_v46 = vpop.f32.mrb[170].mxu0  ;;  %v7749_v40 = vsel %vm7719_vm7, %v7556_v18, %v6881_v33 }
 0x230   :  { %v5348_v23 = vmax.f32 %v17058_v62, %v14134_v46  ;;  %v3645_v16 = vpop.f32.mrb[171].mxu0 }
 0x231   :  { %v6679_v63 = vpop.permute.xlu1 %6678  ;;  %v5346_v5 = vmax.f32 %v17067_v31, %v3645_v16 }
 0x232   :  { %v5598_v0 = vmax.f32 %v5347_v25, %v5348_v23  ;;  %v7558_v20 = vsel %vm7526_vm6, %v7365_v59, %v6679_v63  ;;  %14240 = vmatmul.mubr.msk.bf16.gmra.mrb[20].mxu0 %vm2064_vm2, %v15403_v34  ;;  %v15405_v25 = vld [vmem:[%s21123_s0 + $0x468] sm:$0xff]  }
 0x233   :  { %v7751_v54 = vsel %vm7719_vm7, %v7558_v20, %v6883_v51  ;;  %v17254_v2 = vmax.f32 %v5345_v30, %v5346_v5  ;;  %14243 = vmatprep.mubr.msk.bf16.mxu0 %vm2064_vm2, %v15404_v52  ;;  %v15408_v20 = vld [vmem:[%s21123_s0 + $0x480] sm:$0xff]  }
 0x234   :  { %v17257_v62 = vcombine.low %v7749_v40, %v7751_v54  ;;  %v5749_v22 = vadd.f32 %v16902_v35, %v5598_v0 }
 0x235   :  { %v14137_v31 = vpop.f32.mrb[172].mxu0 }
 0x236   :  { %21245 = vst [vmem:[#allocation32_spill] sm:$0xff] %v17257_v62  ;;  %v5351_v48 = vmax.f32 %v17078_v26, %v14137_v31  ;;  %14558 = vmatmul.mubr.msk.bf16.gmra.mrb[28].mxu1 %vm8138_vm8, %v17257_v62  ;;  %v3658_v9 = vpop.f32.mrb[173].mxu0  ;;  %v5893_v51 = vmax.f32 %v5749_v22, 0.0 }
 0x237   :  { %v5349_v21 = vmax.f32 %v17084_v8, %v3658_v9  ;;  %v14138_v34 = vpop.f32.mrb[174].mxu0 }
 0x238   :  { %v5352_v30 = vmax.f32 %v17091_v56, %v14138_v34  ;;  %v3661_v46 = vpop.f32.mrb[175].mxu0  ;;  %v17271_v26 = vpack.c.bf16 %v5893_v51, %v5893_v51  ;;  %v15409_v34 = vld [vmem:[%s21123_s0 + $0x488] sm:$0xff]  }
 0x239   :  { %v5350_v52 = vmax.f32 %v17100_v58, %v3661_v46  ;;  %v15407_v58 = vld [vmem:[%s21123_s0 + $0x478] sm:$0xff]   ;;  %v15410_v46 = vld [vmem:[%s21123_s0 + $0x490] sm:$0xff]  }
 0x23a   :  { %v5600_v33 = vmax.f32 %v5351_v48, %v5352_v30  ;;  %14244 = vmatmul.mubr.msk.bf16.gmra.mrb[24].mxu0 %vm2064_vm2, %v15405_v25  ;;  %6288 = vrot.lane.b32.xlu0 %v17271_v26, %s15907_s24 }
 0x23b   :  { %v5599_v23 = vmax.f32 %v5349_v21, %v5350_v52  ;;  %14247 = vmatprep.mubr.msk.bf16.mxu0 %vm2064_vm2, %v15406_v4 }
 0x23c   :  { %v5751_v8 = vadd.f32 %v16902_v35, %v5600_v33 }
 0x23d   :  { %v14141_v16 = vpop.f32.mrb[176].mxu0  ;;  %v5750_v59 = vadd.f32 %v16902_v35, %v5599_v23 }
 0x23e   :  { %v5355_v56 = vmax.f32 %v17114_v3, %v14141_v16  ;;  %v3674_v63 = vpop.f32.mrb[177].mxu0  ;;  %v5895_v5 = vmax.f32 %v5751_v8, 0.0 }
 0x23f   :  { %v5353_v18 = vmax.f32 %v17119_v47, %v3674_v63  ;;  %v14142_v0 = vpop.f32.mrb[178].mxu0  ;;  %v5894_v31 = vmax.f32 %v5750_v59, 0.0 }
 0x240   :  { %v5356_v40 = vmax.f32 %v17125_v17, %v14142_v0  ;;  %v3677_v54 = vpop.f32.mrb[179].mxu0  ;;  %v17289_v22 = vpack.c.bf16 %v5895_v5, %v5895_v5 }
 0x241   :  { %v5354_v3 = vmax.f32 %v17134_v39, %v3677_v54  ;;  %v17299_v9 = vpack.c.bf16 %v5894_v31, %v5894_v31 }
 0x242   :  { %v5602_v48 = vmax.f32 %v5355_v56, %v5356_v40  ;;  %14248 = vmatmul.mubr.msk.bf16.gmra.mrb[28].mxu0 %vm2064_vm2, %v15407_v58  ;;  %6494 = vrot.lane.b32.xlu1 %v17289_v22, %s15908_s29 }
 0x243   :  { %v5601_v47 = vmax.f32 %v5353_v18, %v5354_v3  ;;  %6292 = vrot.lane.b32.xlu0 %v17289_v22, %s15907_s24  ;;  %14251 = vmatprep.mubr.msk.bf16.mxu0 %vm2064_vm2, %v15408_v20  ;;  %v15412_v18 = vld [vmem:[%s21123_s0 + $0x4a0] sm:$0xff]  }
 0x244   :  { %v5753_v17 = vadd.f32 %v16902_v35, %v5602_v48 }
 0x245   :  { %v14145_v25 = vpop.f32.mrb[180].mxu0 }
 0x246   :  { %v5897_v51 = vmax.f32 %v5753_v17, 0.0  ;;  %v5359_v39 = vmax.f32 %v17154_v10, %v14145_v25  ;;  %6290 = vrot.lane.b32.xlu1 %v17299_v9, %s15907_s24  ;;  %v3690_v21 = vpop.f32.mrb[181].mxu0  ;;  %v5752_v10 = vadd.f32 %v16902_v35, %v5601_v47 }
 0x247   :  { %6696 = vrot.lane.b32.xlu0 %v17289_v22, %s15909_s11  ;;  %v5357_v4 = vmax.f32 %v17158_v55, %v3690_v21  ;;  %v14146_v30 = vpop.f32.mrb[182].mxu0 }
 0x248   :  { %v17313_v52 = vpack.c.bf16 %v5897_v51, %v5897_v51  ;;  %v5360_v33 = vmax.f32 %v17164_v42, %v14146_v30  ;;  %v3693_v23 = vpop.f32.mrb[183].mxu0  ;;  %v5896_v59 = vmax.f32 %v5752_v10, 0.0  ;;  %v15413_v51 = vld [vmem:[%s21123_s0 + $0x4a8] sm:$0xff]  }
 0x249   :  { %v5358_v8 = vmax.f32 %v17171_v24, %v3693_v23  ;;  %v15411_v24 = vld [vmem:[%s21123_s0 + $0x498] sm:$0xff]  }
 0x24a   :  { %v5604_v16 = vmax.f32 %v5359_v39, %v5360_v33  ;;  %14252 = vmatmul.mubr.msk.bf16.gmra.mrb[32].mxu0 %vm2064_vm2, %v15409_v34  ;;  %6498 = vrot.lane.b32.xlu1 %v17313_v52, %s15908_s29  ;;  %v17336_v0 = vpack.c.bf16 %v5896_v59, %v5896_v59  ;;  %v15414_v34 = vld [vmem:[%s21123_s0 + $0x4b0] sm:$0xff]  }
 0x24b   :  { %v5603_v55 = vmax.f32 %v5357_v4, %v5358_v8  ;;  %6492 = vrot.lane.b32.xlu0 %v17299_v9, %s15908_s29  ;;  %14255 = vmatprep.mubr.msk.bf16.mxu0 %vm2064_vm2, %v15410_v46 }
 0x24c   :  { %v17340_v54 = vpop.permute.xlu0 %6272 }
 0x24d   :  { %v14149_v56 = vpop.f32.mrb[184].mxu0 }
 0x24e   :  { %v5363_v63 = vmax.f32 %v17183_v15, %v14149_v56  ;;  %6902 = vrot.lane.b32.xlu1 %v17313_v52, %s15910_s14  ;;  %v3706_v42 = vpop.f32.mrb[185].mxu0  ;;  %v5755_v15 = vadd.f32 %v16902_v35, %v5604_v16  ;;  %v15415_v56 = vld [vmem:[%s21123_s0 + $0x4b8] sm:$0xff]  }
 0x24f   :  { %6700 = vrot.lane.b32.xlu0 %v17313_v52, %s15909_s11  ;;  %v5361_v58 = vmax.f32 %v17186_v19, %v3706_v42  ;;  %v14150_v5 = vpop.f32.mrb[186].mxu0 }
 0x250   :  { %v5364_v20 = vmax.f32 %v17191_v29, %v14150_v5  ;;  %v3709_v40 = vpop.f32.mrb[187].mxu0  ;;  %v5899_v48 = vmax.f32 %v5755_v15, 0.0 }
 0x251   :  { %v5362_v31 = vmax.f32 %v17196_v38, %v3709_v40 }
 0x252   :  { %v5606_v3 = vmax.f32 %v5363_v63, %v5364_v20  ;;  %14256 = vmatmul.mubr.msk.bf16.gmra.mrb[36].mxu0 %vm2064_vm2, %v15411_v24  ;;  %6294 = vrot.lane.b32.xlu1 %v17336_v0, %s15907_s24  ;;  %v17365_v4 = vpack.c.bf16 %v5899_v48, %v5899_v48  ;;  %v5736_v63 = vadd.f32 %v16902_v35, %v16894_v36  ;;  %v15416_v24 = vld [vmem:[%s21123_s0 + $0x4c0] sm:$0xff]  }
 0x253   :  { %v5605_v19 = vmax.f32 %v5361_v58, %v5362_v31  ;;  %6296 = vrot.lane.b32.xlu0 %v17313_v52, %s15907_s24  ;;  %14259 = vmatprep.mubr.msk.bf16.mxu0 %vm2064_vm2, %v15412_v18 }
 0x254   :  { %v17349_v47 = vpop.permute.xlu1 %6478  ;;  %v5757_v5 = vadd.f32 %v16902_v35, %v5606_v3  ;;  %v5880_v36 = vmax.f32 %v5736_v63, 0.0 }
 0x255   :  { %v17351_v29 = vpop.permute.xlu0 %6276  ;;  %v14153_v17 = vpop.f32.mrb[188].mxu0 }
 0x256   :  { %v5367_v38 = vmax.f32 %v17204_v44, %v14153_v17  ;;  %6698 = vrot.lane.b32.xlu1 %v17336_v0, %s15909_s11  ;;  %v3722_v25 = vpop.f32.mrb[189].mxu0  ;;  %v5754_v44 = vadd.f32 %v16902_v35, %v5603_v55  ;;  %v5901_v31 = vmax.f32 %v5757_v5, 0.0 }
 0x257   :  { %6496 = vrot.lane.b32.xlu0 %v17336_v0, %s15908_s29  ;;  %v5365_v39 = vmax.f32 %v17208_v11, %v3722_v25  ;;  %v14154_v21 = vpop.f32.mrb[190].mxu0  ;;  %v6024_v25 = vpack.c.bf16 %v5880_v36, %v5880_v36 }
 0x258   :  { %v5368_v30 = vmax.f32 %v17213_v13, %v14154_v21  ;;  %v6275_v46 = vpop.permute.xlu1 %6274  ;;  %v3725_v10 = vpop.f32.mrb[191].mxu0  ;;  %v5898_v13 = vmax.f32 %v5754_v44, 0.0  ;;  %v15418_v21 = vld [vmem:[%s21123_s0 + $0x4d0] sm:$0xff]  }
 0x259   :  { %v6681_v33 = vpop.permute.xlu0 %6680  ;;  %v5366_v23 = vmax.f32 %v17219_v6, %v3725_v10  ;;  %v6045_v10 = vpack.c.bf16 %v5901_v31, %v5901_v31  ;;  %v15419_v31 = vld [vmem:[%s21123_s0 + $0x4d8] sm:$0xff]  }
 0x25a   :  { %v17370_v8 = vmax.f32 %v5367_v38, %v5368_v30  ;;  %14260 = vmatmul.mubr.msk.bf16.gmra.mrb[40].mxu0 %vm2064_vm2, %v15413_v51  ;;  %6906 = vrot.lane.b32.xlu1 %v17365_v4, %s15910_s14  ;;  %v17400_v58 = vpack.c.bf16 %v5898_v13, %v5898_v13  ;;  %v15417_v38 = vld [vmem:[%s21123_s0 + $0x4c8] sm:$0xff]   ;;  %v7098_v51 = vsel %vm7044_vm4, %v16914_v32, %v6275_v46 }
 0x25b   :  { %v17375_v11 = vmax.f32 %v5365_v39, %v5366_v23  ;;  %6900 = vrot.lane.b32.xlu0 %v17336_v0, %s15910_s14  ;;  %14263 = vmatprep.mubr.msk.bf16.mxu0 %vm2064_vm2, %v15414_v34  ;;  %v5756_v34 = vadd.f32 %v16902_v35, %v5605_v19  ;;  %v7095_v23 = vsel %vm7044_vm4, %v6024_v25, %v17340_v54  ;;  %v15420_v25 = vld [vmem:[%s21123_s0 + $0x4e0] sm:$0xff]  }
 0x25c   :  { %v17380_v16 = vpop.permute.xlu1 %6482  ;;  %v7369_v46 = vsel %vm7333_vm5, %v7098_v51, %v17349_v47 }
 0x25d   :  { %v6477_v55 = vpop.permute.xlu0 %6476  ;;  %v17382_v59 = vpop.f32.mrb[192].mxu0  ;;  %v5900_v63 = vmax.f32 %v5756_v34, 0.0 }
 0x25e   :  { %6502 = vrot.lane.b32.xlu1 %v17365_v4, %s15908_s29  ;;  %v17386_v6 = vpop.f32.mrb[193].mxu0  ;;  %v7367_v32 = vsel %vm7333_vm5, %v7095_v23, %v6477_v55 }
 0x25f   :  { %6300 = vrot.lane.b32.xlu0 %v17365_v4, %s15907_s24  ;;  %v17395_v42 = vpop.f32.mrb[194].mxu0  ;;  %v7560_v54 = vsel %vm7526_vm6, %v7367_v32, %v6681_v33  ;;  %v6044_v34 = vpack.c.bf16 %v5900_v63, %v5900_v63 }
 0x260   :  { %v6887_v18 = vpop.permute.xlu1 %6886  ;;  %v17403_v15 = vpop.f32.mrb[195].mxu0 }
 0x261   :  { %v17405_v20 = vpop.permute.xlu0 %6684 }
 0x262   :  { %14264 = vmatmul.mubr.msk.bf16.gmra.mrb[44].mxu0 %vm2064_vm2, %v15415_v56  ;;  %6702 = vrot.lane.b32.xlu1 %v17400_v58, %s15909_s11 }
 0x263   :  { %6704 = vrot.lane.b32.xlu0 %v17365_v4, %s15909_s11  ;;  %14267 = vmatprep.mubr.msk.bf16.mxu0 %vm2064_vm2, %v15416_v24 }
 0x264   :  { %v6279_v40 = vpop.permute.xlu1 %6278 }
 0x265   :  { %v17413_v48 = vpop.permute.xlu0 %6280  ;;  %v17415_v3 = vpop.f32.mrb[196].mxu0 }
 0x266   :  { %6298 = vrot.lane.b32.xlu1 %v17400_v58, %s15907_s24  ;;  %v17419_v17 = vpop.f32.mrb[197].mxu0 }
 0x267   :  { %6904 = vrot.lane.b32.xlu0 %v17400_v58, %s15910_s14  ;;  %v17428_v39 = vpop.f32.mrb[198].mxu0 }
 0x268   :  { %v6683_v44 = vpop.permute.xlu1 %6682  ;;  %v17434_v30 = vpop.f32.mrb[199].mxu0 }
 0x269   :  { %v6481_v13 = vpop.permute.xlu0 %6480  ;;  %v7562_v56 = vsel %vm7526_vm6, %v7369_v46, %v6683_v44  ;;  %v5758_v44 = vadd.f32 %v16902_v35, %v17375_v11 }
 0x26a   :  { %14268 = vmatmul.mubr.msk.bf16.gmra.mrb[48].mxu0 %vm2064_vm2, %v15417_v38  ;;  %6506 = vrot.lane.b32.xlu1 %v6045_v10, %s15908_s29  ;;  %v7755_v5 = vsel %vm7719_vm7, %v7562_v56, %v6887_v18  ;;  %v5759_v18 = vadd.f32 %v16902_v35, %v17370_v8  ;;  %v7104_v8 = vsel %vm7044_vm4, %v16940_v12, %v6279_v40  ;;  %v15421_v40 = vld [vmem:[%s21123_s0 + $0x4e8] sm:$0xff]  }
 0x26b   :  { %6500 = vrot.lane.b32.xlu0 %v17400_v58, %s15908_s29  ;;  %14271 = vmatprep.mubr.msk.bf16.mxu0 %vm2064_vm2, %v15418_v21  ;;  %v7101_v35 = vsel %vm7044_vm4, %v16950_v49, %v17351_v29  ;;  %v5902_v56 = vmax.f32 %v5758_v44, 0.0  ;;  %v15422_v29 = vld [vmem:[%s21123_s0 + $0x4f0] sm:$0xff]  }
 0x26c   :  { %v6891_v19 = vpop.permute.xlu1 %6890  ;;  %v5903_v32 = vmax.f32 %v5759_v18, 0.0  ;;  %v7371_v63 = vsel %vm7333_vm5, %v7101_v35, %v6481_v13 }
 0x26d   :  { %v6885_v24 = vpop.permute.xlu0 %6884  ;;  %v17448_v55 = vpop.f32.mrb[200].mxu0 }
 0x26e   :  { %v7753_v47 = vsel %vm7719_vm7, %v7560_v54, %v6885_v24  ;;  %6910 = vrot.lane.b32.xlu1 %v6045_v10, %s15910_s14  ;;  %v17453_v36 = vpop.f32.mrb[201].mxu0  ;;  %v7373_v54 = vsel %vm7333_vm5, %v7104_v8, %v17380_v16 }
 0x26f   :  { %v17458_v38 = vcombine.low %v7753_v47, %v7755_v5  ;;  %6708 = vrot.lane.b32.xlu0 %v6045_v10, %s15909_s11  ;;  %v17461_v33 = vpop.f32.mrb[202].mxu0  ;;  %v6047_v47 = vpack.c.bf16 %v5903_v32, %v5903_v32  ;;  %v7564_v5 = vsel %vm7526_vm6, %v7371_v63, %v17405_v20  ;;  %v15423_v32 = vld [vmem:[%s21123_s0 + $0x4f8] sm:$0xff]  }
 0x270   :  { %v17468_v51 = vpop.permute.xlu1 %6486  ;;  %v17470_v21 = vpop.f32.mrb[203].mxu0 }
 0x271   :  { %21246 = vst [vmem:[#allocation33_spill] sm:$0xff] %v17458_v38  ;;  %14561 = vmatprep.mubr.msk.bf16.mxu1 %vm8138_vm8, %v17458_v38  ;;  %v17476_v10 = vpop.permute.xlu0 %6284 }
 0x272   :  { %14272 = vmatmul.mubr.msk.bf16.gmra.mrb[52].mxu0 %vm2064_vm2, %v15419_v31  ;;  %6302 = vrot.lane.b32.xlu1 %v6044_v34, %s15907_s24 }
 0x273   :  { %6504 = vrot.lane.b32.xlu0 %v6044_v34, %s15908_s29  ;;  %14275 = vmatprep.mubr.msk.bf16.mxu0 %vm2064_vm2, %v15420_v25  ;;  %v6046_v25 = vpack.c.bf16 %v5902_v56, %v5902_v56  ;;  %v15424_v56 = vld [vmem:[%s21123_s0 + $0x500] sm:$0xff]  }
 0x274   :  { %v6687_v23 = vpop.permute.xlu1 %6686 }
 0x275   :  { %v6689_v11 = vpop.permute.xlu0 %6688  ;;  %v17487_v46 = vpop.f32.mrb[204].mxu0  ;;  %v7566_v24 = vsel %vm7526_vm6, %v7373_v54, %v6687_v23 }
 0x276   :  { %6706 = vrot.lane.b32.xlu1 %v6044_v34, %s15909_s11  ;;  %v17493_v12 = vpop.f32.mrb[205].mxu0  ;;  %v7759_v44 = vsel %vm7719_vm7, %v7566_v24, %v6891_v19 }
 0x277   :  { %6908 = vrot.lane.b32.xlu0 %v6044_v34, %s15910_s14  ;;  %v17500_v49 = vpop.f32.mrb[206].mxu0 }
 0x278   :  { %v6283_v13 = vpop.permute.xlu1 %6282  ;;  %v17505_v16 = vpop.f32.mrb[207].mxu0 }
 0x279   :  { %v6889_v31 = vpop.permute.xlu0 %6888 }
 0x27a   :  { %v7757_v18 = vsel %vm7719_vm7, %v7564_v5, %v6889_v31  ;;  %14276 = vmatmul.mubr.msk.bf16.gmra.mrb[56].mxu0 %vm2064_vm2, %v15421_v40  ;;  %6914 = vrot.lane.b32.xlu1 %v6047_v47, %s15910_s14  ;;  %v7110_v47 = vsel %vm7044_vm4, %v16968_v41, %v6283_v13 }
 0x27b   :  { %v17513_v34 = vcombine.low %v7757_v18, %v7759_v44  ;;  %6912 = vrot.lane.b32.xlu0 %v6046_v25, %s15910_s14  ;;  %14279 = vmatprep.mubr.msk.bf16.mxu0 %vm2064_vm2, %v15422_v29  ;;  %v7107_v29 = vsel %vm7044_vm4, %v16995_v7, %v17413_v48  ;;  %v15425_v44 = vld [vmem:[%s21123_s0 + $0x508] sm:$0xff]   ;;  %v15426_v7 = vld [vmem:[%s21123_s0 + $0x510] sm:$0xff]   ;;  %v7377_v41 = vsel %vm7333_vm5, %v7110_v47, %v17468_v51 }
 0x27c   :  { %v6491_v8 = vpop.permute.xlu1 %6490  ;;  %v7113_v51 = vsel %vm7044_vm4, %v17063_v43, %v17476_v10 }
 0x27d   :  { %21247 = vst [vmem:[#allocation34_spill] sm:$0xff] %v17513_v34  ;;  %v6485_v23 = vpop.permute.xlu0 %6484  ;;  %14562 = vmatmul.mubr.msk.bf16.gmra.mrb[32].mxu1 %vm8138_vm8, %v17513_v34  ;;  %v17519_v20 = vpop.f32.mrb[208].mxu0 }
 0x27e   :  { %6710 = vrot.lane.b32.xlu1 %v6046_v25, %s15909_s11  ;;  %v17522_v19 = vpop.f32.mrb[209].mxu0  ;;  %v7375_v25 = vsel %vm7333_vm5, %v7107_v29, %v6485_v23 }
 0x27f   :  { %v17527_v35 = vpop.f32.mrb[210].mxu0  ;;  %v7568_v23 = vsel %vm7526_vm6, %v7375_v25, %v6689_v11 }
 0x280   :  { %v6895_v63 = vpop.permute.xlu1 %6894  ;;  %v17532_v54 = vpop.f32.mrb[211].mxu0 }
 0x281   :  { %v6693_v40 = vpop.permute.xlu0 %6692 }
 0x282   :  { %14280 = vmatmul.mubr.msk.bf16.gmra.mrb[60].mxu0 %vm2064_vm2, %v15423_v32 }
 0x283   :  { %14283 = vmatprep.mubr.msk.bf16.mxu0 %vm2064_vm2, %v15424_v56 }
 0x284   :  { %v6287_v24 = vpop.permute.xlu1 %6286 }
 0x285   :  { %v6489_v5 = vpop.permute.xlu0 %6488  ;;  %v17541_v31 = vpop.f32.mrb[212].mxu0  ;;  %v7116_v11 = vsel %vm7044_vm4, %v17028_v27, %v6287_v24  ;;  %v15428_v27 = vld [vmem:[%s21123_s0 + $0x520] sm:$0xff]  }
 0x286   :  { %v17544_v18 = vpop.f32.mrb[213].mxu0  ;;  %v7381_v24 = vsel %vm7333_vm5, %v7116_v11, %v6491_v8  ;;  %v17598_v8 = vld [vmem:[%s21124_s2] ss:$0 sm:$0xff] }
 0x287   :  { %v17549_v32 = vpop.f32.mrb[214].mxu0 }
 0x288   :  { %v6691_v48 = vpop.permute.xlu1 %6690  ;;  %v17556_v13 = vpop.f32.mrb[215].mxu0 }
 0x289   :  { %v6893_v56 = vpop.permute.xlu0 %6892  ;;  %v7570_v29 = vsel %vm7526_vm6, %v7377_v41, %v6691_v48 }
 0x28a   :  { %v7761_v34 = vsel %vm7719_vm7, %v7568_v23, %v6893_v56  ;;  %v7763_v38 = vsel %vm7719_vm7, %v7570_v29, %v6895_v63  ;;  %14284 = vmatmul.mubr.msk.bf16.gmra.mrb[64].mxu0 %vm2064_vm2, %v15425_v44  ;;  %v7379_v63 = vsel %vm7333_vm5, %v7113_v51, %v6489_v5 }
 0x28b   :  { %v17563_v62 = vcombine.low %v7761_v34, %v7763_v38  ;;  %14287 = vmatprep.mubr.msk.bf16.mxu0 %vm2064_vm2, %v15426_v7  ;;  %v15427_v34 = vld [vmem:[%s21123_s0 + $0x518] sm:$0xff]  }
 0x28c   :  { %v6899_v37 = vpop.permute.xlu1 %6898 }
 0x28d   :  { %21248 = vst [vmem:[#allocation35_spill] sm:$0xff] %v17563_v62  ;;  %v14181_v47 = vpop.f32.mrb[216].mxu0  ;;  %14565 = vmatprep.mubr.msk.bf16.mxu1 %vm8138_vm8, %v17563_v62  ;;  %v6897_v44 = vpop.permute.xlu0 %6896 }
 0x28e   :  { %v5371_v25 = vmax.f32 %v17382_v59, %v14181_v47  ;;  %v3834_v38 = vpop.f32.mrb[217].mxu0  ;;  %v7572_v59 = vsel %vm7526_vm6, %v7379_v63, %v6693_v40  ;;  %v15429_v47 = vld [vmem:[%s21123_s0 + $0x528] sm:$0xff]  }
 0x28f   :  { %v5369_v7 = vmax.f32 %v17386_v6, %v3834_v38  ;;  %v14182_v43 = vpop.f32.mrb[218].mxu0  ;;  %v7765_v56 = vsel %vm7719_vm7, %v7572_v59, %v6897_v44 }
 0x290   :  { %v5372_v10 = vmax.f32 %v17395_v42, %v14182_v43  ;;  %v6695_v5 = vpop.permute.xlu1 %6694  ;;  %v3837_v41 = vpop.f32.mrb[219].mxu0 }
 0x291   :  { %v7574_v48 = vsel %vm7526_vm6, %v7381_v24, %v6695_v5  ;;  %v5370_v23 = vmax.f32 %v17403_v15, %v3837_v41 }
 0x292   :  { %v5610_v6 = vmax.f32 %v5371_v25, %v5372_v10  ;;  %v7767_v29 = vsel %vm7719_vm7, %v7574_v48, %v6899_v37  ;;  %14288 = vmatmul.mubr.msk.bf16.gmra.mrb[68].mxu0 %vm2064_vm2, %v15427_v34  ;;  %v15430_v34 = vld [vmem:[%s21123_s0 + $0x530] sm:$0xff]  }
 0x293   :  { %v17590_v51 = vcombine.low %v7765_v56, %v7767_v29  ;;  %v17592_v42 = vmax.f32 %v5369_v7, %v5370_v23  ;;  %14291 = vmatprep.mubr.msk.bf16.mxu0 %vm2064_vm2, %v15428_v27  ;;  %v15432_v56 = vld [vmem:[%s21123_s0 + $0x540] sm:$0xff]  }
 0x294   :  { %v5761_v15 = vadd.f32 %v17598_v8, %v5610_v6 }
 0x295   :  { %21249 = vst [vmem:[#allocation36_spill] sm:$0xff] %v17590_v51  ;;  %v14185_v40 = vpop.f32.mrb[220].mxu0  ;;  %14566 = vmatmul.mubr.msk.bf16.gmra.mrb[36].mxu1 %vm8138_vm8, %v17590_v51 }
 0x296   :  { %v5375_v37 = vmax.f32 %v17415_v3, %v14185_v40  ;;  %v3850_v11 = vpop.f32.mrb[221].mxu0  ;;  %v5905_v63 = vmax.f32 %v5761_v15, 0.0 }
 0x297   :  { %v5373_v25 = vmax.f32 %v17419_v17, %v3850_v11  ;;  %v14186_v38 = vpop.f32.mrb[222].mxu0 }
 0x298   :  { %v5376_v44 = vmax.f32 %v17428_v39, %v14186_v38  ;;  %v3853_v7 = vpop.f32.mrb[223].mxu0  ;;  %v17612_v43 = vpack.c.bf16 %v5905_v63, %v5905_v63  ;;  %v15433_v38 = vld [vmem:[%s21123_s0 + $0x548] sm:$0xff]  }
 0x299   :  { %v5374_v3 = vmax.f32 %v17434_v30, %v3853_v7  ;;  %v15431_v30 = vld [vmem:[%s21123_s0 + $0x538] sm:$0xff]   ;;  %v15434_v7 = vld [vmem:[%s21123_s0 + $0x550] sm:$0xff]  }
 0x29a   :  { %v5612_v27 = vmax.f32 %v5375_v37, %v5376_v44  ;;  %14292 = vmatmul.mubr.msk.bf16.gmra.mrb[72].mxu0 %vm2064_vm2, %v15429_v47  ;;  %6304 = vrot.lane.b32.xlu0 %v17612_v43, %s15907_s24 }
 0x29b   :  { %v5611_v10 = vmax.f32 %v5373_v25, %v5374_v3  ;;  %14295 = vmatprep.mubr.msk.bf16.mxu0 %vm2064_vm2, %v15430_v34 }
 0x29c   :  { %v5763_v17 = vadd.f32 %v17598_v8, %v5612_v27 }
 0x29d   :  { %v5762_v24 = vadd.f32 %v17598_v8, %v5611_v10  ;;  %v14189_v5 = vpop.f32.mrb[224].mxu0 }
 0x29e   :  { %v5379_v39 = vmax.f32 %v17448_v55, %v14189_v5  ;;  %v3866_v41 = vpop.f32.mrb[225].mxu0  ;;  %v5907_v59 = vmax.f32 %v5763_v17, 0.0 }
 0x29f   :  { %v5377_v48 = vmax.f32 %v17453_v36, %v3866_v41  ;;  %v14190_v23 = vpop.f32.mrb[226].mxu0  ;;  %v5906_v40 = vmax.f32 %v5762_v24, 0.0 }
 0x2a0   :  { %v5380_v6 = vmax.f32 %v17461_v33, %v14190_v23  ;;  %v3869_v29 = vpop.f32.mrb[227].mxu0  ;;  %v17630_v15 = vpack.c.bf16 %v5907_v59, %v5907_v59 }
 0x2a1   :  { %v5378_v55 = vmax.f32 %v17470_v21, %v3869_v29  ;;  %v17640_v11 = vpack.c.bf16 %v5906_v40, %v5906_v40 }
 0x2a2   :  { %v5614_v37 = vmax.f32 %v5379_v39, %v5380_v6  ;;  %14296 = vmatmul.mubr.msk.bf16.gmra.mrb[76].mxu0 %vm2064_vm2, %v15431_v30  ;;  %6510 = vrot.lane.b32.xlu1 %v17630_v15, %s15908_s29 }
 0x2a3   :  { %v5613_v36 = vmax.f32 %v5377_v48, %v5378_v55  ;;  %6308 = vrot.lane.b32.xlu0 %v17630_v15, %s15907_s24  ;;  %14299 = vmatprep.mubr.msk.bf16.mxu0 %vm2064_vm2, %v15432_v56  ;;  %v15436_v48 = vld [vmem:[%s21123_s0 + $0x560] sm:$0xff]  }
 0x2a4   :  { %v5765_v33 = vadd.f32 %v17598_v8, %v5614_v37 }
 0x2a5   :  { %v14193_v47 = vpop.f32.mrb[228].mxu0 }
 0x2a6   :  { %v5909_v63 = vmax.f32 %v5765_v33, 0.0  ;;  %v5383_v21 = vmax.f32 %v17487_v46, %v14193_v47  ;;  %6306 = vrot.lane.b32.xlu1 %v17640_v11, %s15907_s24  ;;  %v3882_v25 = vpop.f32.mrb[229].mxu0  ;;  %v5764_v46 = vadd.f32 %v17598_v8, %v5613_v36 }
 0x2a7   :  { %6712 = vrot.lane.b32.xlu0 %v17630_v15, %s15909_s11  ;;  %v5381_v34 = vmax.f32 %v17493_v12, %v3882_v25  ;;  %v14194_v44 = vpop.f32.mrb[230].mxu0 }
 0x2a8   :  { %v17654_v3 = vpack.c.bf16 %v5909_v63, %v5909_v63  ;;  %v5384_v27 = vmax.f32 %v17500_v49, %v14194_v44  ;;  %v3885_v10 = vpop.f32.mrb[231].mxu0  ;;  %v5908_v5 = vmax.f32 %v5764_v46, 0.0  ;;  %v15437_v63 = vld [vmem:[%s21123_s0 + $0x568] sm:$0xff]  }
 0x2a9   :  { %v5382_v17 = vmax.f32 %v17505_v16, %v3885_v10  ;;  %v15435_v16 = vld [vmem:[%s21123_s0 + $0x558] sm:$0xff]  }
 0x2aa   :  { %v5616_v24 = vmax.f32 %v5383_v21, %v5384_v27  ;;  %14300 = vmatmul.mubr.msk.bf16.gmra.mrb[80].mxu0 %vm2064_vm2, %v15433_v38  ;;  %6514 = vrot.lane.b32.xlu1 %v17654_v3, %s15908_s29  ;;  %v17677_v23 = vpack.c.bf16 %v5908_v5, %v5908_v5  ;;  %v15438_v38 = vld [vmem:[%s21123_s0 + $0x570] sm:$0xff]  }
 0x2ab   :  { %v5615_v12 = vmax.f32 %v5381_v34, %v5382_v17  ;;  %6508 = vrot.lane.b32.xlu0 %v17640_v11, %s15908_s29  ;;  %14303 = vmatprep.mubr.msk.bf16.mxu0 %vm2064_vm2, %v15434_v7 }
 0x2ac   :  { %v17681_v29 = vpop.permute.xlu0 %6288 }
 0x2ad   :  { %v14197_v39 = vpop.f32.mrb[232].mxu0 }
 0x2ae   :  { %v5387_v41 = vmax.f32 %v17519_v20, %v14197_v39  ;;  %6918 = vrot.lane.b32.xlu1 %v17654_v3, %s15910_s14  ;;  %v3898_v49 = vpop.f32.mrb[233].mxu0  ;;  %v5767_v20 = vadd.f32 %v17598_v8, %v5616_v24  ;;  %v15439_v39 = vld [vmem:[%s21123_s0 + $0x578] sm:$0xff]  }
 0x2af   :  { %6716 = vrot.lane.b32.xlu0 %v17654_v3, %s15909_s11  ;;  %v5385_v30 = vmax.f32 %v17522_v19, %v3898_v49  ;;  %v14198_v59 = vpop.f32.mrb[234].mxu0 }
 0x2b0   :  { %v5388_v56 = vmax.f32 %v17527_v35, %v14198_v59  ;;  %v3901_v6 = vpop.f32.mrb[235].mxu0  ;;  %v5911_v37 = vmax.f32 %v5767_v20, 0.0 }
 0x2b1   :  { %v5386_v40 = vmax.f32 %v17532_v54, %v3901_v6 }
 0x2b2   :  { %v5618_v55 = vmax.f32 %v5387_v41, %v5388_v56  ;;  %14304 = vmatmul.mubr.msk.bf16.gmra.mrb[84].mxu0 %vm2064_vm2, %v15435_v16  ;;  %6310 = vrot.lane.b32.xlu1 %v17677_v23, %s15907_s24  ;;  %v17706_v34 = vpack.c.bf16 %v5911_v37, %v5911_v37  ;;  %v5748_v41 = vadd.f32 %v17598_v8, %v17254_v2  ;;  %v15440_v16 = vld [vmem:[%s21123_s0 + $0x580] sm:$0xff]  }
 0x2b3   :  { %v5617_v19 = vmax.f32 %v5385_v30, %v5386_v40  ;;  %6312 = vrot.lane.b32.xlu0 %v17654_v3, %s15907_s24  ;;  %14307 = vmatprep.mubr.msk.bf16.mxu0 %vm2064_vm2, %v15436_v48 }
 0x2b4   :  { %v17690_v36 = vpop.permute.xlu1 %6494  ;;  %v5769_v59 = vadd.f32 %v17598_v8, %v5618_v55  ;;  %v5892_v2 = vmax.f32 %v5748_v41, 0.0 }
 0x2b5   :  { %v17692_v35 = vpop.permute.xlu0 %6292  ;;  %v14201_v33 = vpop.f32.mrb[236].mxu0 }
 0x2b6   :  { %v5391_v54 = vmax.f32 %v17541_v31, %v14201_v33  ;;  %6714 = vrot.lane.b32.xlu1 %v17677_v23, %s15909_s11  ;;  %v3914_v47 = vpop.f32.mrb[237].mxu0  ;;  %v5766_v31 = vadd.f32 %v17598_v8, %v5615_v12  ;;  %v5913_v40 = vmax.f32 %v5769_v59, 0.0 }
 0x2b7   :  { %6512 = vrot.lane.b32.xlu0 %v17677_v23, %s15908_s29  ;;  %v5389_v21 = vmax.f32 %v17544_v18, %v3914_v47  ;;  %v14202_v25 = vpop.f32.mrb[238].mxu0  ;;  %v6036_v47 = vpack.c.bf16 %v5892_v2, %v5892_v2 }
 0x2b8   :  { %v5392_v44 = vmax.f32 %v17549_v32, %v14202_v25  ;;  %v6291_v7 = vpop.permute.xlu1 %6290  ;;  %v3917_v46 = vpop.f32.mrb[239].mxu0  ;;  %v5910_v32 = vmax.f32 %v5766_v31, 0.0  ;;  %v15442_v25 = vld [vmem:[%s21123_s0 + $0x590] sm:$0xff]  }
 0x2b9   :  { %v6697_v27 = vpop.permute.xlu0 %6696  ;;  %v5390_v10 = vmax.f32 %v17556_v13, %v3917_v46  ;;  %v6057_v46 = vpack.c.bf16 %v5913_v40, %v5913_v40  ;;  %v15443_v40 = vld [vmem:[%s21123_s0 + $0x598] sm:$0xff]  }
 0x2ba   :  { %v17711_v17 = vmax.f32 %v5391_v54, %v5392_v44  ;;  %14308 = vmatmul.mubr.msk.bf16.gmra.mrb[88].mxu0 %vm2064_vm2, %v15437_v63  ;;  %6922 = vrot.lane.b32.xlu1 %v17706_v34, %s15910_s14  ;;  %v17741_v30 = vpack.c.bf16 %v5910_v32, %v5910_v32  ;;  %v15441_v54 = vld [vmem:[%s21123_s0 + $0x588] sm:$0xff]   ;;  %v7122_v63 = vsel %vm7044_vm4, %v17271_v26, %v6291_v7 }
 0x2bb   :  { %v17716_v18 = vmax.f32 %v5389_v21, %v5390_v10  ;;  %6916 = vrot.lane.b32.xlu0 %v17677_v23, %s15910_s14  ;;  %14311 = vmatprep.mubr.msk.bf16.mxu0 %vm2064_vm2, %v15438_v38  ;;  %v5768_v38 = vadd.f32 %v17598_v8, %v5617_v19  ;;  %v7119_v10 = vsel %vm7044_vm4, %v6036_v47, %v17681_v29  ;;  %v15444_v47 = vld [vmem:[%s21123_s0 + $0x5a0] sm:$0xff]  }
 0x2bc   :  { %v17721_v24 = vpop.permute.xlu1 %6498  ;;  %v7385_v7 = vsel %vm7333_vm5, %v7122_v63, %v17690_v36 }
 0x2bd   :  { %v6493_v12 = vpop.permute.xlu0 %6492  ;;  %v17723_v5 = vpop.f32.mrb[240].mxu0  ;;  %v5912_v41 = vmax.f32 %v5768_v38, 0.0 }
 0x2be   :  { %6518 = vrot.lane.b32.xlu1 %v17706_v34, %s15908_s29  ;;  %v17727_v13 = vpop.f32.mrb[241].mxu0  ;;  %v7383_v26 = vsel %vm7333_vm5, %v7119_v10, %v6493_v12 }
 0x2bf   :  { %6316 = vrot.lane.b32.xlu0 %v17706_v34, %s15907_s24  ;;  %v17736_v49 = vpop.f32.mrb[242].mxu0  ;;  %v7576_v29 = vsel %vm7526_vm6, %v7383_v26, %v6697_v27  ;;  %v6056_v38 = vpack.c.bf16 %v5912_v41, %v5912_v41 }
 0x2c0   :  { %v6903_v48 = vpop.permute.xlu1 %6902  ;;  %v17744_v20 = vpop.f32.mrb[243].mxu0 }
 0x2c1   :  { %v17746_v56 = vpop.permute.xlu0 %6700 }
 0x2c2   :  { %14312 = vmatmul.mubr.msk.bf16.gmra.mrb[92].mxu0 %vm2064_vm2, %v15439_v39  ;;  %6718 = vrot.lane.b32.xlu1 %v17741_v30, %s15909_s11 }
 0x2c3   :  { %6720 = vrot.lane.b32.xlu0 %v17706_v34, %s15909_s11  ;;  %14315 = vmatprep.mubr.msk.bf16.mxu0 %vm2064_vm2, %v15440_v16 }
 0x2c4   :  { %v6295_v6 = vpop.permute.xlu1 %6294 }
 0x2c5   :  { %v17754_v37 = vpop.permute.xlu0 %6296  ;;  %v17756_v55 = vpop.f32.mrb[244].mxu0 }
 0x2c6   :  { %6314 = vrot.lane.b32.xlu1 %v17741_v30, %s15907_s24  ;;  %v17760_v33 = vpop.f32.mrb[245].mxu0 }
 0x2c7   :  { %6920 = vrot.lane.b32.xlu0 %v17741_v30, %s15910_s14  ;;  %v17769_v21 = vpop.f32.mrb[246].mxu0 }
 0x2c8   :  { %v6699_v31 = vpop.permute.xlu1 %6698  ;;  %v17775_v44 = vpop.f32.mrb[247].mxu0 }
 0x2c9   :  { %v6497_v32 = vpop.permute.xlu0 %6496  ;;  %v7578_v39 = vsel %vm7526_vm6, %v7385_v7, %v6699_v31  ;;  %v5770_v31 = vadd.f32 %v17598_v8, %v17716_v18  ;;  %v7125_v18 = vsel %vm7044_vm4, %v17299_v9, %v17692_v35  ;;  %v15446_v35 = vld [vmem:[%s21123_s0 + $0x5b0] sm:$0xff]  }
 0x2ca   :  { %14316 = vmatmul.mubr.msk.bf16.gmra.mrb[96].mxu0 %vm2064_vm2, %v15441_v54  ;;  %6522 = vrot.lane.b32.xlu1 %v6057_v46, %s15908_s29  ;;  %v7771_v59 = vsel %vm7719_vm7, %v7578_v39, %v6903_v48  ;;  %v5771_v48 = vadd.f32 %v17598_v8, %v17711_v17  ;;  %v7128_v17 = vsel %vm7044_vm4, %v17289_v22, %v6295_v6  ;;  %v15445_v6 = vld [vmem:[%s21123_s0 + $0x5a8] sm:$0xff]  }
 0x2cb   :  { %6516 = vrot.lane.b32.xlu0 %v17741_v30, %s15908_s29  ;;  %14319 = vmatprep.mubr.msk.bf16.mxu0 %vm2064_vm2, %v15442_v25  ;;  %v5914_v41 = vmax.f32 %v5770_v31, 0.0 }
 0x2cc   :  { %v6907_v19 = vpop.permute.xlu1 %6906  ;;  %v5915_v26 = vmax.f32 %v5771_v48, 0.0 }
 0x2cd   :  { %v6901_v16 = vpop.permute.xlu0 %6900  ;;  %v17789_v12 = vpop.f32.mrb[248].mxu0  ;;  %v6058_v48 = vpack.c.bf16 %v5914_v41, %v5914_v41 }
 0x2ce   :  { %v7769_v36 = vsel %vm7719_vm7, %v7576_v29, %v6901_v16  ;;  %6926 = vrot.lane.b32.xlu1 %v6057_v46, %s15910_s14  ;;  %v17794_v2 = vpop.f32.mrb[249].mxu0  ;;  %v7387_v29 = vsel %vm7333_vm5, %v7125_v18, %v6497_v32  ;;  %v7389_v16 = vsel %vm7333_vm5, %v7128_v17, %v17721_v24  ;;  %v15447_v18 = vld [vmem:[%s21123_s0 + $0x5b8] sm:$0xff]  }
 0x2cf   :  { %v17799_v54 = vcombine.low %v7769_v36, %v7771_v59  ;;  %6724 = vrot.lane.b32.xlu0 %v6057_v46, %s15909_s11  ;;  %v17802_v27 = vpop.f32.mrb[250].mxu0  ;;  %v6059_v59 = vpack.c.bf16 %v5915_v26, %v5915_v26 }
 0x2d0   :  { %v17809_v63 = vpop.permute.xlu1 %6502  ;;  %v17811_v25 = vpop.f32.mrb[251].mxu0 }
 0x2d1   :  { %21250 = vst [vmem:[#allocation37_spill] sm:$0xff] %v17799_v54  ;;  %14569 = vmatprep.mubr.msk.bf16.mxu1 %vm8138_vm8, %v17799_v54  ;;  %v17817_v46 = vpop.permute.xlu0 %6300 }
 0x2d2   :  { %14320 = vmatmul.mubr.msk.bf16.gmra.mrb[100].mxu0 %vm2064_vm2, %v15443_v40  ;;  %6318 = vrot.lane.b32.xlu1 %v6056_v38, %s15907_s24  ;;  %v7580_v40 = vsel %vm7526_vm6, %v7387_v29, %v17746_v56  ;;  %v15448_v29 = vld [vmem:[%s21123_s0 + $0x5c0] sm:$0xff]  }
 0x2d3   :  { %6520 = vrot.lane.b32.xlu0 %v6056_v38, %s15908_s29  ;;  %14323 = vmatprep.mubr.msk.bf16.mxu0 %vm2064_vm2, %v15444_v47 }
 0x2d4   :  { %v6703_v10 = vpop.permute.xlu1 %6702 }
 0x2d5   :  { %v6705_v7 = vpop.permute.xlu0 %6704  ;;  %v17828_v39 = vpop.f32.mrb[252].mxu0  ;;  %v7582_v36 = vsel %vm7526_vm6, %v7389_v16, %v6703_v10 }
 0x2d6   :  { %6722 = vrot.lane.b32.xlu1 %v6056_v38, %s15909_s11  ;;  %v17834_v22 = vpop.f32.mrb[253].mxu0  ;;  %v7775_v17 = vsel %vm7719_vm7, %v7582_v36, %v6907_v19 }
 0x2d7   :  { %6924 = vrot.lane.b32.xlu0 %v6056_v38, %s15910_s14  ;;  %v17841_v9 = vpop.f32.mrb[254].mxu0 }
 0x2d8   :  { %v6299_v32 = vpop.permute.xlu1 %6298  ;;  %v17846_v24 = vpop.f32.mrb[255].mxu0 }
 0x2d9   :  { %v6905_v47 = vpop.permute.xlu0 %6904 }
 0x2da   :  { %v7773_v31 = vsel %vm7719_vm7, %v7580_v40, %v6905_v47  ;;  %14324 = vmatmul.mubr.msk.bf16.gmra.mrb[104].mxu0 %vm2064_vm2, %v15445_v6  ;;  %6930 = vrot.lane.b32.xlu1 %v6059_v59, %s15910_s14  ;;  %v7131_v59 = vsel %vm7044_vm4, %v17336_v0, %v17754_v37  ;;  %v7134_v40 = vsel %vm7044_vm4, %v17313_v52, %v6299_v32  ;;  %v15450_v0 = vld [vmem:[%s21123_s0 + $0x5d0] sm:$0xff]  }
 0x2db   :  { %v17854_v38 = vcombine.low %v7773_v31, %v7775_v17  ;;  %6928 = vrot.lane.b32.xlu0 %v6058_v48, %s15910_s14  ;;  %14327 = vmatprep.mubr.msk.bf16.mxu0 %vm2064_vm2, %v15446_v35  ;;  %v7393_v52 = vsel %vm7333_vm5, %v7134_v40, %v17809_v63  ;;  %v7137_v63 = vsel %vm7044_vm4, %v17400_v58, %v17817_v46 }
 0x2dc   :  { %v6507_v10 = vpop.permute.xlu1 %6506 }
 0x2dd   :  { %21251 = vst [vmem:[#allocation38_spill] sm:$0xff] %v17854_v38  ;;  %v6501_v26 = vpop.permute.xlu0 %6500  ;;  %14570 = vmatmul.mubr.msk.bf16.gmra.mrb[40].mxu1 %vm8138_vm8, %v17854_v38  ;;  %v17860_v56 = vpop.f32.mrb[0].mxu0 }
 0x2de   :  { %6726 = vrot.lane.b32.xlu1 %v6058_v48, %s15909_s11  ;;  %v17863_v19 = vpop.f32.mrb[1].mxu0  ;;  %v7391_v31 = vsel %vm7333_vm5, %v7131_v59, %v6501_v26 }
 0x2df   :  { %v17868_v41 = vpop.f32.mrb[2].mxu0  ;;  %v7584_v26 = vsel %vm7526_vm6, %v7391_v31, %v6705_v7 }
 0x2e0   :  { %v6911_v16 = vpop.permute.xlu1 %6910  ;;  %v17873_v6 = vpop.f32.mrb[3].mxu0 }
 0x2e1   :  { %v6709_v36 = vpop.permute.xlu0 %6708 }
 0x2e2   :  { %14328 = vmatmul.mubr.msk.bf16.gmra.mrb[108].mxu0 %vm2064_vm2, %v15447_v18  ;;  %v15449_v18 = vld [vmem:[%s21123_s0 + $0x5c8] sm:$0xff]  }
 0x2e3   :  { %14331 = vmatprep.mubr.msk.bf16.mxu0 %vm2064_vm2, %v15448_v29 }
 0x2e4   :  { %v6303_v35 = vpop.permute.xlu1 %6302 }
 0x2e5   :  { %v6505_v47 = vpop.permute.xlu0 %6504  ;;  %v17882_v48 = vpop.f32.mrb[4].mxu0  ;;  %v7140_v7 = vsel %vm7044_vm4, %v17365_v4, %v6303_v35  ;;  %v15452_v4 = vld [vmem:[%s21123_s0 + $0x5e0] sm:$0xff]  }
 0x2e6   :  { %v17885_v17 = vpop.f32.mrb[5].mxu0  ;;  %v7397_v35 = vsel %vm7333_vm5, %v7140_v7, %v6507_v10 }
 0x2e7   :  { %v17890_v29 = vpop.f32.mrb[6].mxu0 }
 0x2e8   :  { %v6707_v37 = vpop.permute.xlu1 %6706  ;;  %v17897_v32 = vpop.f32.mrb[7].mxu0 }
 0x2e9   :  { %v6909_v59 = vpop.permute.xlu0 %6908  ;;  %v7586_v38 = vsel %vm7526_vm6, %v7393_v52, %v6707_v37 }
 0x2ea   :  { %v7777_v54 = vsel %vm7719_vm7, %v7584_v26, %v6909_v59  ;;  %v7779_v51 = vsel %vm7719_vm7, %v7586_v38, %v6911_v16  ;;  %14332 = vmatmul.mubr.msk.bf16.gmra.mrb[112].mxu0 %vm2064_vm2, %v15449_v18  ;;  %v7395_v38 = vsel %vm7333_vm5, %v7137_v63, %v6505_v47 }
 0x2eb   :  { %v17904_v62 = vcombine.low %v7777_v54, %v7779_v51  ;;  %14335 = vmatprep.mubr.msk.bf16.mxu0 %vm2064_vm2, %v15450_v0  ;;  %v15451_v54 = vld [vmem:[%s21123_s0 + $0x5d8] sm:$0xff]  }
 0x2ec   :  { %v6915_v57 = vpop.permute.xlu1 %6914 }
 0x2ed   :  { %21252 = vst [vmem:[#allocation39_spill] sm:$0xff] %v17904_v62  ;;  %v14229_v40 = vpop.f32.mrb[8].mxu0  ;;  %14573 = vmatprep.mubr.msk.bf16.mxu1 %vm8138_vm8, %v17904_v62  ;;  %v6913_v31 = vpop.permute.xlu0 %6912 }
 0x2ee   :  { %v5395_v16 = vmax.f32 %v17723_v5, %v14229_v40  ;;  %v4026_v51 = vpop.f32.mrb[9].mxu0  ;;  %v7588_v5 = vsel %vm7526_vm6, %v7395_v38, %v6709_v36 }
 0x2ef   :  { %v5393_v18 = vmax.f32 %v17727_v13, %v4026_v51  ;;  %v14230_v58 = vpop.f32.mrb[10].mxu0  ;;  %v7781_v26 = vsel %vm7719_vm7, %v7588_v5, %v6913_v31  ;;  %v15454_v51 = vld [vmem:[%s21123_s0 + $0x5f0] sm:$0xff]  }
 0x2f0   :  { %v5396_v46 = vmax.f32 %v17736_v49, %v14230_v58  ;;  %v6711_v47 = vpop.permute.xlu1 %6710  ;;  %v4029_v0 = vpop.f32.mrb[11].mxu0 }
 0x2f1   :  { %v7590_v52 = vsel %vm7526_vm6, %v7397_v35, %v6711_v47  ;;  %v5394_v37 = vmax.f32 %v17744_v20, %v4029_v0 }
 0x2f2   :  { %v5622_v13 = vmax.f32 %v5395_v16, %v5396_v46  ;;  %v7783_v59 = vsel %vm7719_vm7, %v7590_v52, %v6915_v57  ;;  %14336 = vmatmul.mubr.msk.bf16.gmra.mrb[116].mxu0 %vm2064_vm2, %v15451_v54  ;;  %v15453_v57 = vld [vmem:[%s21123_s0 + $0x5e8] sm:$0xff]  }
 0x2f3   :  { %v17931_v63 = vcombine.low %v7781_v26, %v7783_v59  ;;  %v17933_v49 = vmax.f32 %v5393_v18, %v5394_v37  ;;  %14339 = vmatprep.mubr.msk.bf16.mxu0 %vm2064_vm2, %v15452_v4  ;;  %v15456_v37 = vld [vmem:[%s21123_s0 + $0x600] sm:$0xff]  }
 0x2f4   :  { %v5773_v10 = vadd.f32 %v17598_v8, %v5622_v13 }
 0x2f5   :  { %21253 = vst [vmem:[#allocation40_spill] sm:$0xff] %v17931_v63  ;;  %v14233_v36 = vpop.f32.mrb[12].mxu0  ;;  %14574 = vmatmul.mubr.msk.bf16.gmra.mrb[44].mxu1 %vm8138_vm8, %v17931_v63 }
 0x2f6   :  { %v5399_v20 = vmax.f32 %v17756_v55, %v14233_v36  ;;  %v4042_v7 = vpop.f32.mrb[13].mxu0  ;;  %v5917_v40 = vmax.f32 %v5773_v10, 0.0 }
 0x2f7   :  { %v5397_v38 = vmax.f32 %v17760_v33, %v4042_v7  ;;  %v14234_v16 = vpop.f32.mrb[14].mxu0 }
 0x2f8   :  { %v5400_v54 = vmax.f32 %v17769_v21, %v14234_v16  ;;  %v4045_v31 = vpop.f32.mrb[15].mxu0  ;;  %v17948_v18 = vpack.c.bf16 %v5917_v40, %v5917_v40 }
 0x2f9   :  { %v5398_v55 = vmax.f32 %v17775_v44, %v4045_v31  ;;  %v15455_v44 = vld [vmem:[%s21123_s0 + $0x5f8] sm:$0xff]  }
 0x2fa   :  { %v5624_v58 = vmax.f32 %v5399_v20, %v5400_v54  ;;  %14340 = vmatmul.mubr.msk.bf16.gmra.mrb[120].mxu0 %vm2064_vm2, %v15453_v57  ;;  %6320 = vrot.lane.b32.xlu0 %v17948_v18, %s15907_s24  ;;  %v15458_v54 = vld [vmem:[%s21123_s0 + $0x610] sm:$0xff]  }
 0x2fb   :  { %v5623_v4 = vmax.f32 %v5397_v38, %v5398_v55  ;;  %14343 = vmatprep.mubr.msk.bf16.mxu0 %vm2064_vm2, %v15454_v51  ;;  %v15457_v38 = vld [vmem:[%s21123_s0 + $0x608] sm:$0xff]  }
 0x2fc   :  { %v5775_v33 = vadd.f32 %v17598_v8, %v5624_v58 }
 0x2fd   :  { %v5774_v46 = vadd.f32 %v17598_v8, %v5623_v4  ;;  %v14237_v35 = vpop.f32.mrb[16].mxu0 }
 0x2fe   :  { %v5403_v21 = vmax.f32 %v17789_v12, %v14237_v35  ;;  %v4058_v47 = vpop.f32.mrb[17].mxu0  ;;  %v5919_v0 = vmax.f32 %v5775_v33, 0.0 }
 0x2ff   :  { %v5401_v5 = vmax.f32 %v17794_v2, %v4058_v47  ;;  %v14238_v52 = vpop.f32.mrb[18].mxu0  ;;  %v5918_v10 = vmax.f32 %v5774_v46, 0.0 }
 0x300   :  { %v5404_v26 = vmax.f32 %v17802_v27, %v14238_v52  ;;  %v4061_v13 = vpop.f32.mrb[19].mxu0  ;;  %v17966_v59 = vpack.c.bf16 %v5919_v0, %v5919_v0  ;;  %v15460_v0 = vld [vmem:[%s21123_s0 + $0x620] sm:$0xff]  }
 0x301   :  { %v5402_v12 = vmax.f32 %v17811_v25, %v4061_v13  ;;  %v17976_v20 = vpack.c.bf16 %v5918_v10, %v5918_v10 }
 0x302   :  { %v5626_v36 = vmax.f32 %v5403_v21, %v5404_v26  ;;  %14344 = vmatmul.mubr.msk.bf16.gmra.mrb[124].mxu0 %vm2064_vm2, %v15455_v44  ;;  %6526 = vrot.lane.b32.xlu1 %v17966_v59, %s15908_s29 }
 0x303   :  { %v5625_v2 = vmax.f32 %v5401_v5, %v5402_v12  ;;  %6324 = vrot.lane.b32.xlu0 %v17966_v59, %s15907_s24  ;;  %14347 = vmatprep.mubr.msk.bf16.mxu0 %vm2064_vm2, %v15456_v37 }
 0x304   :  { %v5777_v27 = vadd.f32 %v17598_v8, %v5626_v36 }
 0x305   :  { %v14241_v7 = vpop.f32.mrb[20].mxu0 }
 0x306   :  { %v5921_v57 = vmax.f32 %v5777_v27, 0.0  ;;  %v5407_v25 = vmax.f32 %v17828_v39, %v14241_v7  ;;  %6322 = vrot.lane.b32.xlu1 %v17976_v20, %s15907_s24  ;;  %v4074_v40 = vpop.f32.mrb[21].mxu0  ;;  %v5776_v39 = vadd.f32 %v17598_v8, %v5625_v2  ;;  %v15461_v7 = vld [vmem:[%s21123_s0 + $0x628] sm:$0xff]  }
 0x307   :  { %6728 = vrot.lane.b32.xlu0 %v17966_v59, %s15909_s11  ;;  %v5405_v16 = vmax.f32 %v17834_v22, %v4074_v40  ;;  %v14242_v51 = vpop.f32.mrb[22].mxu0  ;;  %v15462_v40 = vld [vmem:[%s21123_s0 + $0x630] sm:$0xff]  }
 0x308   :  { %v17990_v31 = vpack.c.bf16 %v5921_v57, %v5921_v57  ;;  %v5408_v55 = vmax.f32 %v17841_v9, %v14242_v51  ;;  %v4077_v58 = vpop.f32.mrb[23].mxu0  ;;  %v5920_v46 = vmax.f32 %v5776_v39, 0.0 }
 0x309   :  { %v5406_v4 = vmax.f32 %v17846_v24, %v4077_v58  ;;  %v15459_v24 = vld [vmem:[%s21123_s0 + $0x618] sm:$0xff]  }
 0x30a   :  { %v5628_v33 = vmax.f32 %v5407_v25, %v5408_v55  ;;  %14348 = vmatmul.mubr.msk.bf16.gmra.mrb[128].mxu0 %vm2064_vm2, %v15457_v38  ;;  %6530 = vrot.lane.b32.xlu1 %v17990_v31, %s15908_s29  ;;  %v18013_v5 = vpack.c.bf16 %v5920_v46, %v5920_v46  ;;  %v15463_v46 = vld [vmem:[%s21123_s0 + $0x638] sm:$0xff]  }
 0x30b   :  { %v5627_v22 = vmax.f32 %v5405_v16, %v5406_v4  ;;  %6524 = vrot.lane.b32.xlu0 %v17976_v20, %s15908_s29  ;;  %14351 = vmatprep.mubr.msk.bf16.mxu0 %vm2064_vm2, %v15458_v54 }
 0x30c   :  { %v18017_v26 = vpop.permute.xlu0 %6304 }
 0x30d   :  { %v14245_v35 = vpop.f32.mrb[24].mxu0 }
 0x30e   :  { %v5411_v21 = vmax.f32 %v17860_v56, %v14245_v35  ;;  %6934 = vrot.lane.b32.xlu1 %v17990_v31, %s15910_s14  ;;  %v4090_v9 = vpop.f32.mrb[25].mxu0  ;;  %v5779_v56 = vadd.f32 %v17598_v8, %v5628_v33  ;;  %v5760_v35 = vadd.f32 %v17598_v8, %v17592_v42 }
 0x30f   :  { %6732 = vrot.lane.b32.xlu0 %v17990_v31, %s15909_s11  ;;  %v5409_v47 = vmax.f32 %v17863_v19, %v4090_v9  ;;  %v14246_v44 = vpop.f32.mrb[26].mxu0  ;;  %v15464_v9 = vld [vmem:[%s21123_s0 + $0x640] sm:$0xff]  }
 0x310   :  { %v5412_v52 = vmax.f32 %v17868_v41, %v14246_v44  ;;  %v4093_v37 = vpop.f32.mrb[27].mxu0  ;;  %v5923_v12 = vmax.f32 %v5779_v56, 0.0  ;;  %v5904_v42 = vmax.f32 %v5760_v35, 0.0 }
 0x311   :  { %v5410_v13 = vmax.f32 %v17873_v6, %v4093_v37 }
 0x312   :  { %v5630_v10 = vmax.f32 %v5411_v21, %v5412_v52  ;;  %14352 = vmatmul.mubr.msk.bf16.gmra.mrb[132].mxu0 %vm2064_vm2, %v15459_v24  ;;  %6326 = vrot.lane.b32.xlu1 %v18013_v5, %s15907_s24  ;;  %v18042_v38 = vpack.c.bf16 %v5923_v12, %v5923_v12 }
 0x313   :  { %v5629_v19 = vmax.f32 %v5409_v47, %v5410_v13  ;;  %6328 = vrot.lane.b32.xlu0 %v17990_v31, %s15907_s24  ;;  %14355 = vmatprep.mubr.msk.bf16.mxu0 %vm2064_vm2, %v15460_v0 }
 0x314   :  { %v18026_v36 = vpop.permute.xlu1 %6510  ;;  %v5781_v47 = vadd.f32 %v17598_v8, %v5630_v10 }
 0x315   :  { %v18028_v41 = vpop.permute.xlu0 %6308  ;;  %v14249_v2 = vpop.f32.mrb[28].mxu0 }
 0x316   :  { %v5415_v6 = vmax.f32 %v17882_v48, %v14249_v2  ;;  %6730 = vrot.lane.b32.xlu1 %v18013_v5, %s15909_s11  ;;  %v4106_v27 = vpop.f32.mrb[29].mxu0  ;;  %v5778_v48 = vadd.f32 %v17598_v8, %v5627_v22  ;;  %v5925_v37 = vmax.f32 %v5781_v47, 0.0  ;;  %v15465_v2 = vld [vmem:[%s21123_s0 + $0x648] sm:$0xff]  }
 0x317   :  { %6528 = vrot.lane.b32.xlu0 %v18013_v5, %s15908_s29  ;;  %v5413_v57 = vmax.f32 %v17885_v17, %v4106_v27  ;;  %v14250_v25 = vpop.f32.mrb[30].mxu0 }
 0x318   :  { %v5416_v16 = vmax.f32 %v17890_v29, %v14250_v25  ;;  %v6307_v51 = vpop.permute.xlu1 %6306  ;;  %v4109_v54 = vpop.f32.mrb[31].mxu0  ;;  %v5922_v29 = vmax.f32 %v5778_v48, 0.0  ;;  %v5780_v25 = vadd.f32 %v17598_v8, %v5629_v19 }
 0x319   :  { %v6713_v39 = vpop.permute.xlu0 %6712  ;;  %v5414_v55 = vmax.f32 %v17897_v32, %v4109_v54  ;;  %v7146_v27 = vsel %vm7044_vm4, %v17612_v43, %v6307_v51 }
 0x31a   :  { %v18047_v58 = vmax.f32 %v5415_v6, %v5416_v16  ;;  %14356 = vmatmul.mubr.msk.bf16.gmra.mrb[136].mxu0 %vm2064_vm2, %v15461_v7  ;;  %6938 = vrot.lane.b32.xlu1 %v18042_v38, %s15910_s14  ;;  %v18077_v24 = vpack.c.bf16 %v5922_v29, %v5922_v29  ;;  %v6048_v6 = vpack.c.bf16 %v5904_v42, %v5904_v42  ;;  %v15467_v42 = vld [vmem:[%s21123_s0 + $0x658] sm:$0xff]  }
 0x31b   :  { %v18052_v17 = vmax.f32 %v5413_v57, %v5414_v55  ;;  %6932 = vrot.lane.b32.xlu0 %v18013_v5, %s15910_s14  ;;  %14359 = vmatprep.mubr.msk.bf16.mxu0 %vm2064_vm2, %v15462_v40  ;;  %v15466_v57 = vld [vmem:[%s21123_s0 + $0x650] sm:$0xff]   ;;  %v6069_v16 = vpack.c.bf16 %v5925_v37, %v5925_v37  ;;  %v7401_v51 = vsel %vm7333_vm5, %v7146_v27, %v18026_v36 }
 0x31c   :  { %v18057_v4 = vpop.permute.xlu1 %6514  ;;  %v7143_v54 = vsel %vm7044_vm4, %v6048_v6, %v18017_v26 }
 0x31d   :  { %v6509_v33 = vpop.permute.xlu0 %6508  ;;  %v18059_v22 = vpop.f32.mrb[32].mxu0 }
 0x31e   :  { %6534 = vrot.lane.b32.xlu1 %v18042_v38, %s15908_s29  ;;  %v18063_v32 = vpop.f32.mrb[33].mxu0  ;;  %v7399_v43 = vsel %vm7333_vm5, %v7143_v54, %v6509_v33 }
 0x31f   :  { %6332 = vrot.lane.b32.xlu0 %v18042_v38, %s15907_s24  ;;  %v18072_v21 = vpop.f32.mrb[34].mxu0  ;;  %v7592_v26 = vsel %vm7526_vm6, %v7399_v43, %v6713_v39 }
 0x320   :  { %v6919_v44 = vpop.permute.xlu1 %6918  ;;  %v18080_v0 = vpop.f32.mrb[35].mxu0 }
 0x321   :  { %v18082_v56 = vpop.permute.xlu0 %6716 }
 0x322   :  { %14360 = vmatmul.mubr.msk.bf16.gmra.mrb[140].mxu0 %vm2064_vm2, %v15463_v46  ;;  %6734 = vrot.lane.b32.xlu1 %v18077_v24, %s15909_s11  ;;  %v5924_v46 = vmax.f32 %v5780_v25, 0.0  ;;  %v5782_v25 = vadd.f32 %v17598_v8, %v18052_v17 }
 0x323   :  { %6736 = vrot.lane.b32.xlu0 %v18042_v38, %s15909_s11  ;;  %14363 = vmatprep.mubr.msk.bf16.mxu0 %vm2064_vm2, %v15464_v9 }
 0x324   :  { %v6311_v52 = vpop.permute.xlu1 %6310 }
 0x325   :  { %v18090_v13 = vpop.permute.xlu0 %6312  ;;  %v18092_v10 = vpop.f32.mrb[36].mxu0 }
 0x326   :  { %6330 = vrot.lane.b32.xlu1 %v18077_v24, %s15907_s24  ;;  %v18096_v12 = vpop.f32.mrb[37].mxu0 }
 0x327   :  { %6936 = vrot.lane.b32.xlu0 %v18077_v24, %s15910_s14  ;;  %v18105_v7 = vpop.f32.mrb[38].mxu0 }
 0x328   :  { %v6715_v40 = vpop.permute.xlu1 %6714  ;;  %v18111_v48 = vpop.f32.mrb[39].mxu0 }
 0x329   :  { %v6513_v55 = vpop.permute.xlu0 %6512  ;;  %v7594_v29 = vsel %vm7526_vm6, %v7401_v51, %v6715_v40  ;;  %v5926_v51 = vmax.f32 %v5782_v25, 0.0 }
 0x32a   :  { %14364 = vmatmul.mubr.msk.bf16.gmra.mrb[144].mxu0 %vm2064_vm2, %v15465_v2  ;;  %6538 = vrot.lane.b32.xlu1 %v6069_v16, %s15908_s29  ;;  %v7787_v9 = vsel %vm7719_vm7, %v7594_v29, %v6919_v44  ;;  %v15468_v2 = vld [vmem:[%s21123_s0 + $0x660] sm:$0xff]   ;;  %v5783_v44 = vadd.f32 %v17598_v8, %v18047_v58  ;;  %v7152_v58 = vsel %vm7044_vm4, %v17630_v15, %v6311_v52  ;;  %v15469_v52 = vld [vmem:[%s21123_s0 + $0x668] sm:$0xff]  }
 0x32b   :  { %6532 = vrot.lane.b32.xlu0 %v18077_v24, %s15908_s29  ;;  %14367 = vmatprep.mubr.msk.bf16.mxu0 %vm2064_vm2, %v15466_v57  ;;  %v6068_v57 = vpack.c.bf16 %v5924_v46, %v5924_v46  ;;  %v7149_v8 = vsel %vm7044_vm4, %v17640_v11, %v18028_v41  ;;  %v7405_v46 = vsel %vm7333_vm5, %v7152_v58, %v18057_v4  ;;  %v15470_v41 = vld [vmem:[%s21123_s0 + $0x670] sm:$0xff]  }
 0x32c   :  { %v6923_v19 = vpop.permute.xlu1 %6922  ;;  %v5927_v54 = vmax.f32 %v5783_v44, 0.0  ;;  %v7403_v29 = vsel %vm7333_vm5, %v7149_v8, %v6513_v55  ;;  %v15472_v8 = vld [vmem:[%s21123_s0 + $0x680] sm:$0xff]  }
 0x32d   :  { %v6917_v35 = vpop.permute.xlu0 %6916  ;;  %v18125_v33 = vpop.f32.mrb[40].mxu0 }
 0x32e   :  { %v7785_v36 = vsel %vm7719_vm7, %v7592_v26, %v6917_v35  ;;  %6942 = vrot.lane.b32.xlu1 %v6069_v16, %s15910_s14  ;;  %v18130_v47 = vpop.f32.mrb[41].mxu0  ;;  %v6071_v35 = vpack.c.bf16 %v5927_v54, %v5927_v54 }
 0x32f   :  { %v18135_v37 = vcombine.low %v7785_v36, %v7787_v9  ;;  %6740 = vrot.lane.b32.xlu0 %v6069_v16, %s15909_s11  ;;  %v18138_v39 = vpop.f32.mrb[42].mxu0  ;;  %v7596_v36 = vsel %vm7526_vm6, %v7403_v29, %v18082_v56 }
 0x330   :  { %v18145_v6 = vpop.permute.xlu1 %6518  ;;  %v18147_v27 = vpop.f32.mrb[43].mxu0 }
 0x331   :  { %21254 = vst [vmem:[#allocation41_spill] sm:$0xff] %v18135_v37  ;;  %14577 = vmatprep.mubr.msk.bf16.mxu1 %vm8138_vm8, %v18135_v37  ;;  %v18153_v40 = vpop.permute.xlu0 %6316 }
 0x332   :  { %14368 = vmatmul.mubr.msk.bf16.gmra.mrb[148].mxu0 %vm2064_vm2, %v15467_v42  ;;  %6334 = vrot.lane.b32.xlu1 %v6068_v57, %s15907_s24  ;;  %v6070_v42 = vpack.c.bf16 %v5926_v51, %v5926_v51 }
 0x333   :  { %6536 = vrot.lane.b32.xlu0 %v6068_v57, %s15908_s29  ;;  %14371 = vmatprep.mubr.msk.bf16.mxu0 %vm2064_vm2, %v15468_v2 }
 0x334   :  { %v6719_v16 = vpop.permute.xlu1 %6718 }
 0x335   :  { %v6721_v17 = vpop.permute.xlu0 %6720  ;;  %v18164_v43 = vpop.f32.mrb[44].mxu0  ;;  %v7598_v26 = vsel %vm7526_vm6, %v7405_v46, %v6719_v16  ;;  %v15471_v16 = vld [vmem:[%s21123_s0 + $0x678] sm:$0xff]  }
 0x336   :  { %6738 = vrot.lane.b32.xlu1 %v6068_v57, %s15909_s11  ;;  %v18170_v15 = vpop.f32.mrb[45].mxu0  ;;  %v7791_v44 = vsel %vm7719_vm7, %v7598_v26, %v6923_v19  ;;  %v7155_v26 = vsel %vm7044_vm4, %v17677_v23, %v18090_v13  ;;  %v15474_v23 = vld [vmem:[%s21123_s0 + $0x690] sm:$0xff]  }
 0x337   :  { %6940 = vrot.lane.b32.xlu0 %v6068_v57, %s15910_s14  ;;  %v18177_v11 = vpop.f32.mrb[46].mxu0 }
 0x338   :  { %v6315_v55 = vpop.permute.xlu1 %6314  ;;  %v18182_v4 = vpop.f32.mrb[47].mxu0 }
 0x339   :  { %v6921_v9 = vpop.permute.xlu0 %6920 }
 0x33a   :  { %v7789_v2 = vsel %vm7719_vm7, %v7596_v36, %v6921_v9  ;;  %14372 = vmatmul.mubr.msk.bf16.gmra.mrb[152].mxu0 %vm2064_vm2, %v15469_v52  ;;  %6946 = vrot.lane.b32.xlu1 %v6071_v35, %s15910_s14 }
 0x33b   :  { %v18190_v57 = vcombine.low %v7789_v2, %v7791_v44  ;;  %6944 = vrot.lane.b32.xlu0 %v6070_v42, %s15910_s14  ;;  %14375 = vmatprep.mubr.msk.bf16.mxu0 %vm2064_vm2, %v15470_v41  ;;  %v7158_v41 = vsel %vm7044_vm4, %v17654_v3, %v6315_v55  ;;  %v15473_v2 = vld [vmem:[%s21123_s0 + $0x688] sm:$0xff]  }
 0x33c   :  { %v6523_v25 = vpop.permute.xlu1 %6522  ;;  %v7409_v3 = vsel %vm7333_vm5, %v7158_v41, %v18145_v6  ;;  %v7161_v6 = vsel %vm7044_vm4, %v17741_v30, %v18153_v40 }
 0x33d   :  { %21255 = vst [vmem:[#allocation42_spill] sm:$0xff] %v18190_v57  ;;  %v6517_v58 = vpop.permute.xlu0 %6516  ;;  %14578 = vmatmul.mubr.msk.bf16.gmra.mrb[48].mxu1 %vm8138_vm8, %v18190_v57  ;;  %v18196_v56 = vpop.f32.mrb[48].mxu0 }
 0x33e   :  { %6742 = vrot.lane.b32.xlu1 %v6070_v42, %s15909_s11  ;;  %v18199_v19 = vpop.f32.mrb[49].mxu0  ;;  %v7407_v9 = vsel %vm7333_vm5, %v7155_v26, %v6517_v58 }
 0x33f   :  { %v18204_v54 = vpop.f32.mrb[50].mxu0  ;;  %v7600_v58 = vsel %vm7526_vm6, %v7407_v9, %v6721_v17 }
 0x340   :  { %v6927_v51 = vpop.permute.xlu1 %6926  ;;  %v18209_v29 = vpop.f32.mrb[51].mxu0 }
 0x341   :  { %v6725_v46 = vpop.permute.xlu0 %6724 }
 0x342   :  { %14376 = vmatmul.mubr.msk.bf16.gmra.mrb[156].mxu0 %vm2064_vm2, %v15471_v16 }
 0x343   :  { %14379 = vmatprep.mubr.msk.bf16.mxu0 %vm2064_vm2, %v15472_v8 }
 0x344   :  { %v6319_v52 = vpop.permute.xlu1 %6318 }
 0x345   :  { %v6521_v35 = vpop.permute.xlu0 %6520  ;;  %v18218_v36 = vpop.f32.mrb[52].mxu0  ;;  %v7164_v17 = vsel %vm7044_vm4, %v17706_v34, %v6319_v52  ;;  %v15476_v34 = vld [vmem:[%s21123_s0 + $0x6a0] sm:$0xff]  }
 0x346   :  { %v18221_v42 = vpop.f32.mrb[53].mxu0  ;;  %v7413_v52 = vsel %vm7333_vm5, %v7164_v17, %v6523_v25  ;;  %v18275_v25 = vld [vmem:[%s21124_s2] ss:$0 sm:$0xff] }
 0x347   :  { %v18226_v44 = vpop.f32.mrb[54].mxu0 }
 0x348   :  { %v6723_v13 = vpop.permute.xlu1 %6722  ;;  %v18233_v55 = vpop.f32.mrb[55].mxu0 }
 0x349   :  { %v6925_v16 = vpop.permute.xlu0 %6924  ;;  %v7602_v8 = vsel %vm7526_vm6, %v7409_v3, %v6723_v13 }
 0x34a   :  { %v7793_v26 = vsel %vm7719_vm7, %v7600_v58, %v6925_v16  ;;  %v7795_v57 = vsel %vm7719_vm7, %v7602_v8, %v6927_v51  ;;  %14380 = vmatmul.mubr.msk.bf16.gmra.mrb[160].mxu0 %vm2064_vm2, %v15473_v2  ;;  %v7411_v51 = vsel %vm7333_vm5, %v7161_v6, %v6521_v35  ;;  %v15475_v2 = vld [vmem:[%s21123_s0 + $0x698] sm:$0xff]  }
 0x34b   :  { %v18240_v37 = vcombine.low %v7793_v26, %v7795_v57  ;;  %14383 = vmatprep.mubr.msk.bf16.mxu0 %vm2064_vm2, %v15474_v23 }
 0x34c   :  { %v6931_v63 = vpop.permute.xlu1 %6930 }
 0x34d   :  { %21256 = vst [vmem:[#allocation43_spill] sm:$0xff] %v18240_v37  ;;  %v14277_v41 = vpop.f32.mrb[56].mxu0  ;;  %14581 = vmatprep.mubr.msk.bf16.mxu1 %vm8138_vm8, %v18240_v37  ;;  %v6929_v23 = vpop.permute.xlu0 %6928 }
 0x34e   :  { %v5419_v9 = vmax.f32 %v18059_v22, %v14277_v41  ;;  %v4218_v57 = vpop.f32.mrb[57].mxu0  ;;  %v7604_v22 = vsel %vm7526_vm6, %v7411_v51, %v6725_v46  ;;  %v15477_v51 = vld [vmem:[%s21123_s0 + $0x6a8] sm:$0xff]  }
 0x34f   :  { %v5417_v3 = vmax.f32 %v18063_v32, %v4218_v57  ;;  %v14278_v30 = vpop.f32.mrb[58].mxu0  ;;  %v7797_v8 = vsel %vm7719_vm7, %v7604_v22, %v6929_v23 }
 0x350   :  { %v5420_v40 = vmax.f32 %v18072_v21, %v14278_v30  ;;  %v6727_v35 = vpop.permute.xlu1 %6726  ;;  %v4221_v13 = vpop.f32.mrb[59].mxu0 }
 0x351   :  { %v7606_v58 = vsel %vm7526_vm6, %v7413_v52, %v6727_v35  ;;  %v5418_v16 = vmax.f32 %v18080_v0, %v4221_v13 }
 0x352   :  { %v5634_v32 = vmax.f32 %v5419_v9, %v5420_v40  ;;  %v7799_v26 = vsel %vm7719_vm7, %v7606_v58, %v6931_v63  ;;  %14384 = vmatmul.mubr.msk.bf16.gmra.mrb[164].mxu0 %vm2064_vm2, %v15475_v2  ;;  %v15478_v2 = vld [vmem:[%s21123_s0 + $0x6b0] sm:$0xff]  }
 0x353   :  { %v18267_v6 = vcombine.low %v7797_v8, %v7799_v26  ;;  %v18269_v21 = vmax.f32 %v5417_v3, %v5418_v16  ;;  %14387 = vmatprep.mubr.msk.bf16.mxu0 %vm2064_vm2, %v15476_v34  ;;  %v15480_v8 = vld [vmem:[%s21123_s0 + $0x6c0] sm:$0xff]  }
 0x354   :  { %v5785_v0 = vadd.f32 %v18275_v25, %v5634_v32 }
 0x355   :  { %21257 = vst [vmem:[#allocation44_spill] sm:$0xff] %v18267_v6  ;;  %v14281_v46 = vpop.f32.mrb[60].mxu0  ;;  %14582 = vmatmul.mubr.msk.bf16.gmra.mrb[52].mxu1 %vm8138_vm8, %v18267_v6 }
 0x356   :  { %v5929_v63 = vmax.f32 %v5785_v0, 0.0  ;;  %v5423_v17 = vmax.f32 %v18092_v10, %v14281_v46  ;;  %v4234_v41 = vpop.f32.mrb[61].mxu0 }
 0x357   :  { %v5421_v9 = vmax.f32 %v18096_v12, %v4234_v41  ;;  %v14282_v57 = vpop.f32.mrb[62].mxu0 }
 0x358   :  { %v18288_v23 = vpack.c.bf16 %v5929_v63, %v5929_v63  ;;  %v5424_v3 = vmax.f32 %v18105_v7, %v14282_v57  ;;  %v4237_v30 = vpop.f32.mrb[63].mxu0  ;;  %v15481_v57 = vld [vmem:[%s21123_s0 + $0x6c8] sm:$0xff]  }
 0x359   :  { %v5422_v34 = vmax.f32 %v18111_v48, %v4237_v30  ;;  %v15479_v48 = vld [vmem:[%s21123_s0 + $0x6b8] sm:$0xff]   ;;  %v15482_v30 = vld [vmem:[%s21123_s0 + $0x6d0] sm:$0xff]  }
 0x35a   :  { %v5636_v10 = vmax.f32 %v5423_v17, %v5424_v3  ;;  %14388 = vmatmul.mubr.msk.bf16.gmra.mrb[168].mxu0 %vm2064_vm2, %v15477_v51  ;;  %6336 = vrot.lane.b32.xlu0 %v18288_v23, %s15907_s24 }
 0x35b   :  { %v5635_v40 = vmax.f32 %v5421_v9, %v5422_v34  ;;  %14391 = vmatprep.mubr.msk.bf16.mxu0 %vm2064_vm2, %v15478_v2 }
 0x35c   :  { %v5787_v12 = vadd.f32 %v18275_v25, %v5636_v10 }
 0x35d   :  { %v5786_v52 = vadd.f32 %v18275_v25, %v5635_v40  ;;  %v14285_v35 = vpop.f32.mrb[64].mxu0 }
 0x35e   :  { %v5931_v13 = vmax.f32 %v5787_v12, 0.0  ;;  %v5427_v7 = vmax.f32 %v18125_v33, %v14285_v35  ;;  %v4250_v22 = vpop.f32.mrb[65].mxu0 }
 0x35f   :  { %v5425_v58 = vmax.f32 %v18130_v47, %v4250_v22  ;;  %v14286_v16 = vpop.f32.mrb[66].mxu0  ;;  %v5930_v26 = vmax.f32 %v5786_v52, 0.0 }
 0x360   :  { %v18306_v32 = vpack.c.bf16 %v5931_v13, %v5931_v13  ;;  %v5428_v0 = vmax.f32 %v18138_v39, %v14286_v16  ;;  %v4253_v46 = vpop.f32.mrb[67].mxu0 }
 0x361   :  { %v5426_v33 = vmax.f32 %v18147_v27, %v4253_v46  ;;  %v18316_v17 = vpack.c.bf16 %v5930_v26, %v5930_v26 }
 0x362   :  { %v5638_v63 = vmax.f32 %v5427_v7, %v5428_v0  ;;  %14392 = vmatmul.mubr.msk.bf16.gmra.mrb[172].mxu0 %vm2064_vm2, %v15479_v48  ;;  %6542 = vrot.lane.b32.xlu1 %v18306_v32, %s15908_s29 }
 0x363   :  { %v5637_v47 = vmax.f32 %v5425_v58, %v5426_v33  ;;  %6340 = vrot.lane.b32.xlu0 %v18306_v32, %s15907_s24  ;;  %14395 = vmatprep.mubr.msk.bf16.mxu0 %vm2064_vm2, %v15480_v8  ;;  %v15484_v58 = vld [vmem:[%s21123_s0 + $0x6e0] sm:$0xff]  }
 0x364   :  { %v5789_v41 = vadd.f32 %v18275_v25, %v5638_v63 }
 0x365   :  { %v14289_v39 = vpop.f32.mrb[68].mxu0 }
 0x366   :  { %v5933_v51 = vmax.f32 %v5789_v41, 0.0  ;;  %v5431_v27 = vmax.f32 %v18164_v43, %v14289_v39  ;;  %6338 = vrot.lane.b32.xlu1 %v18316_v17, %s15907_s24  ;;  %v4266_v9 = vpop.f32.mrb[69].mxu0  ;;  %v5788_v43 = vadd.f32 %v18275_v25, %v5637_v47 }
 0x367   :  { %6744 = vrot.lane.b32.xlu0 %v18306_v32, %s15909_s11  ;;  %v5429_v2 = vmax.f32 %v18170_v15, %v4266_v9  ;;  %v14290_v3 = vpop.f32.mrb[70].mxu0 }
 0x368   :  { %v18331_v34 = vpack.c.bf16 %v5933_v51, %v5933_v51  ;;  %v5432_v10 = vmax.f32 %v18177_v11, %v14290_v3  ;;  %v4269_v40 = vpop.f32.mrb[71].mxu0  ;;  %v5932_v35 = vmax.f32 %v5788_v43, 0.0  ;;  %v15485_v51 = vld [vmem:[%s21123_s0 + $0x6e8] sm:$0xff]  }
 0x369   :  { %v5430_v12 = vmax.f32 %v18182_v4, %v4269_v40  ;;  %v15483_v4 = vld [vmem:[%s21123_s0 + $0x6d8] sm:$0xff]  }
 0x36a   :  { %v5640_v52 = vmax.f32 %v5431_v27, %v5432_v10  ;;  %14396 = vmatmul.mubr.msk.bf16.gmra.mrb[176].mxu0 %vm2064_vm2, %v15481_v57  ;;  %6546 = vrot.lane.b32.xlu1 %v18331_v34, %s15908_s29  ;;  %v18354_v16 = vpack.c.bf16 %v5932_v35, %v5932_v35  ;;  %v15486_v57 = vld [vmem:[%s21123_s0 + $0x6f0] sm:$0xff]  }
 0x36b   :  { %v5639_v15 = vmax.f32 %v5429_v2, %v5430_v12  ;;  %6540 = vrot.lane.b32.xlu0 %v18316_v17, %s15908_s29  ;;  %14399 = vmatprep.mubr.msk.bf16.mxu0 %vm2064_vm2, %v15482_v30 }
 0x36c   :  { %v18358_v0 = vpop.permute.xlu0 %6320 }
 0x36d   :  { %v14293_v13 = vpop.f32.mrb[72].mxu0 }
 0x36e   :  { %v5435_v7 = vmax.f32 %v18196_v56, %v14293_v13  ;;  %6950 = vrot.lane.b32.xlu1 %v18331_v34, %s15910_s14  ;;  %v4282_v11 = vpop.f32.mrb[73].mxu0  ;;  %v5791_v56 = vadd.f32 %v18275_v25, %v5640_v52  ;;  %v15487_v13 = vld [vmem:[%s21123_s0 + $0x6f8] sm:$0xff]  }
 0x36f   :  { %6748 = vrot.lane.b32.xlu0 %v18331_v34, %s15909_s11  ;;  %v5433_v22 = vmax.f32 %v18199_v19, %v4282_v11  ;;  %v14294_v48 = vpop.f32.mrb[74].mxu0 }
 0x370   :  { %v5436_v8 = vmax.f32 %v18204_v54, %v14294_v48  ;;  %v4285_v26 = vpop.f32.mrb[75].mxu0  ;;  %v5935_v63 = vmax.f32 %v5791_v56, 0.0 }
 0x371   :  { %v5434_v46 = vmax.f32 %v18209_v29, %v4285_v26 }
 0x372   :  { %v5642_v33 = vmax.f32 %v5435_v7, %v5436_v8  ;;  %14400 = vmatmul.mubr.msk.bf16.gmra.mrb[180].mxu0 %vm2064_vm2, %v15483_v4  ;;  %6342 = vrot.lane.b32.xlu1 %v18354_v16, %s15907_s24  ;;  %v18383_v2 = vpack.c.bf16 %v5935_v63, %v5935_v63  ;;  %v5772_v7 = vadd.f32 %v18275_v25, %v17933_v49  ;;  %v15488_v4 = vld [vmem:[%s21123_s0 + $0x700] sm:$0xff]  }
 0x373   :  { %v5641_v19 = vmax.f32 %v5433_v22, %v5434_v46  ;;  %6344 = vrot.lane.b32.xlu0 %v18331_v34, %s15907_s24  ;;  %14403 = vmatprep.mubr.msk.bf16.mxu0 %vm2064_vm2, %v15484_v58 }
 0x374   :  { %v18367_v47 = vpop.permute.xlu1 %6526  ;;  %v5793_v48 = vadd.f32 %v18275_v25, %v5642_v33  ;;  %v5916_v49 = vmax.f32 %v5772_v7, 0.0 }
 0x375   :  { %v18369_v54 = vpop.permute.xlu0 %6324  ;;  %v14297_v41 = vpop.f32.mrb[76].mxu0 }
 0x376   :  { %v5439_v29 = vmax.f32 %v18218_v36, %v14297_v41  ;;  %6746 = vrot.lane.b32.xlu1 %v18354_v16, %s15909_s11  ;;  %v4298_v39 = vpop.f32.mrb[77].mxu0  ;;  %v5790_v36 = vadd.f32 %v18275_v25, %v5639_v15  ;;  %v5937_v26 = vmax.f32 %v5793_v48, 0.0 }
 0x377   :  { %6544 = vrot.lane.b32.xlu0 %v18354_v16, %s15908_s29  ;;  %v5437_v27 = vmax.f32 %v18221_v42, %v4298_v39  ;;  %v14298_v9 = vpop.f32.mrb[78].mxu0  ;;  %v6060_v39 = vpack.c.bf16 %v5916_v49, %v5916_v49 }
 0x378   :  { %v5440_v3 = vmax.f32 %v18226_v44, %v14298_v9  ;;  %v6323_v30 = vpop.permute.xlu1 %6322  ;;  %v4301_v43 = vpop.f32.mrb[79].mxu0  ;;  %v5934_v44 = vmax.f32 %v5790_v36, 0.0  ;;  %v15490_v9 = vld [vmem:[%s21123_s0 + $0x710] sm:$0xff]   ;;  %v5792_v36 = vadd.f32 %v18275_v25, %v5641_v19 }
 0x379   :  { %v6729_v10 = vpop.permute.xlu0 %6728  ;;  %v5438_v40 = vmax.f32 %v18233_v55, %v4301_v43 }
 0x37a   :  { %v18388_v12 = vmax.f32 %v5439_v29, %v5440_v3  ;;  %14404 = vmatmul.mubr.msk.bf16.gmra.mrb[184].mxu0 %vm2064_vm2, %v15485_v51  ;;  %6954 = vrot.lane.b32.xlu1 %v18383_v2, %s15910_s14  ;;  %v18418_v22 = vpack.c.bf16 %v5934_v44, %v5934_v44  ;;  %v15489_v29 = vld [vmem:[%s21123_s0 + $0x708] sm:$0xff]   ;;  %v7170_v51 = vsel %vm7044_vm4, %v17948_v18, %v6323_v30  ;;  %v5936_v19 = vmax.f32 %v5792_v36, 0.0 }
 0x37b   :  { %v18393_v42 = vmax.f32 %v5437_v27, %v5438_v40  ;;  %6948 = vrot.lane.b32.xlu0 %v18354_v16, %s15910_s14  ;;  %14407 = vmatprep.mubr.msk.bf16.mxu0 %vm2064_vm2, %v15486_v57  ;;  %v6081_v57 = vpack.c.bf16 %v5937_v26, %v5937_v26  ;;  %v7167_v40 = vsel %vm7044_vm4, %v6060_v39, %v18358_v0  ;;  %v15491_v26 = vld [vmem:[%s21123_s0 + $0x718] sm:$0xff]   ;;  %v15492_v39 = vld [vmem:[%s21123_s0 + $0x720] sm:$0xff]  }
 0x37c   :  { %v18398_v52 = vpop.permute.xlu1 %6530  ;;  %v7417_v30 = vsel %vm7333_vm5, %v7170_v51, %v18367_v47  ;;  %v6080_v51 = vpack.c.bf16 %v5936_v19, %v5936_v19 }
 0x37d   :  { %v6525_v15 = vpop.permute.xlu0 %6524  ;;  %v18400_v35 = vpop.f32.mrb[80].mxu0 }
 0x37e   :  { %6550 = vrot.lane.b32.xlu1 %v18383_v2, %s15908_s29  ;;  %v18404_v55 = vpop.f32.mrb[81].mxu0  ;;  %v7415_v18 = vsel %vm7333_vm5, %v7167_v40, %v6525_v15 }
 0x37f   :  { %6348 = vrot.lane.b32.xlu0 %v18383_v2, %s15907_s24  ;;  %v18413_v11 = vpop.f32.mrb[82].mxu0  ;;  %v7608_v0 = vsel %vm7526_vm6, %v7415_v18, %v6729_v10 }
 0x380   :  { %v6935_v58 = vpop.permute.xlu1 %6934  ;;  %v18421_v56 = vpop.f32.mrb[83].mxu0 }
 0x381   :  { %v18423_v8 = vpop.permute.xlu0 %6732 }
 0x382   :  { %14408 = vmatmul.mubr.msk.bf16.gmra.mrb[188].mxu0 %vm2064_vm2, %v15487_v13  ;;  %6750 = vrot.lane.b32.xlu1 %v18418_v22, %s15909_s11 }
 0x383   :  { %6752 = vrot.lane.b32.xlu0 %v18383_v2, %s15909_s11  ;;  %14411 = vmatprep.mubr.msk.bf16.mxu0 %vm2064_vm2, %v15488_v4 }
 0x384   :  { %v6327_v46 = vpop.permute.xlu1 %6326 }
 0x385   :  { %v18431_v63 = vpop.permute.xlu0 %6328  ;;  %v18433_v33 = vpop.f32.mrb[84].mxu0  ;;  %v7176_v40 = vsel %vm7044_vm4, %v17966_v59, %v6327_v46  ;;  %v15493_v46 = vld [vmem:[%s21123_s0 + $0x728] sm:$0xff]  }
 0x386   :  { %6346 = vrot.lane.b32.xlu1 %v18418_v22, %s15907_s24  ;;  %v18437_v41 = vpop.f32.mrb[85].mxu0 }
 0x387   :  { %6952 = vrot.lane.b32.xlu0 %v18418_v22, %s15910_s14  ;;  %v18446_v27 = vpop.f32.mrb[86].mxu0 }
 0x388   :  { %v6731_v3 = vpop.permute.xlu1 %6730  ;;  %v18452_v43 = vpop.f32.mrb[87].mxu0 }
 0x389   :  { %v6529_v44 = vpop.permute.xlu0 %6528  ;;  %v7610_v13 = vsel %vm7526_vm6, %v7417_v30, %v6731_v3  ;;  %v5794_v3 = vadd.f32 %v18275_v25, %v18393_v42  ;;  %v7173_v42 = vsel %vm7044_vm4, %v17976_v20, %v18369_v54  ;;  %v15494_v54 = vld [vmem:[%s21123_s0 + $0x730] sm:$0xff]  }
 0x38a   :  { %14412 = vmatmul.mubr.msk.bf16.gmra.mrb[192].mxu0 %vm2064_vm2, %v15489_v29  ;;  %6554 = vrot.lane.b32.xlu1 %v6081_v57, %s15908_s29  ;;  %v7803_v48 = vsel %vm7719_vm7, %v7610_v13, %v6935_v58  ;;  %v5795_v58 = vadd.f32 %v18275_v25, %v18388_v12 }
 0x38b   :  { %6548 = vrot.lane.b32.xlu0 %v18418_v22, %s15908_s29  ;;  %14415 = vmatprep.mubr.msk.bf16.mxu0 %vm2064_vm2, %v15490_v9  ;;  %v5938_v30 = vmax.f32 %v5794_v3, 0.0 }
 0x38c   :  { %v6939_v7 = vpop.permute.xlu1 %6938  ;;  %v5939_v12 = vmax.f32 %v5795_v58, 0.0 }
 0x38d   :  { %v6933_v4 = vpop.permute.xlu0 %6932  ;;  %v18466_v15 = vpop.f32.mrb[88].mxu0 }
 0x38e   :  { %v7801_v47 = vsel %vm7719_vm7, %v7608_v0, %v6933_v4  ;;  %6958 = vrot.lane.b32.xlu1 %v6081_v57, %s15910_s14  ;;  %v18471_v49 = vpop.f32.mrb[89].mxu0  ;;  %v7419_v0 = vsel %vm7333_vm5, %v7173_v42, %v6529_v44  ;;  %v7421_v4 = vsel %vm7333_vm5, %v7176_v40, %v18398_v52  ;;  %v6083_v44 = vpack.c.bf16 %v5939_v12, %v5939_v12  ;;  %v15495_v42 = vld [vmem:[%s21123_s0 + $0x738] sm:$0xff]  }
 0x38f   :  { %v18476_v29 = vcombine.low %v7801_v47, %v7803_v48  ;;  %6756 = vrot.lane.b32.xlu0 %v6081_v57, %s15909_s11  ;;  %v18479_v10 = vpop.f32.mrb[90].mxu0 }
 0x390   :  { %v18486_v9 = vpop.permute.xlu1 %6534  ;;  %v18488_v36 = vpop.f32.mrb[91].mxu0 }
 0x391   :  { %21258 = vst [vmem:[#allocation45_spill] sm:$0xff] %v18476_v29  ;;  %14585 = vmatprep.mubr.msk.bf16.mxu1 %vm8138_vm8, %v18476_v29  ;;  %v18494_v57 = vpop.permute.xlu0 %6332 }
 0x392   :  { %14416 = vmatmul.mubr.msk.bf16.gmra.mrb[196].mxu0 %vm2064_vm2, %v15491_v26  ;;  %6350 = vrot.lane.b32.xlu1 %v6080_v51, %s15907_s24  ;;  %v6082_v26 = vpack.c.bf16 %v5938_v30, %v5938_v30 }
 0x393   :  { %6552 = vrot.lane.b32.xlu0 %v6080_v51, %s15908_s29  ;;  %14419 = vmatprep.mubr.msk.bf16.mxu0 %vm2064_vm2, %v15492_v39  ;;  %v7612_v39 = vsel %vm7526_vm6, %v7419_v0, %v18423_v8  ;;  %v15496_v0 = vld [vmem:[%s21123_s0 + $0x740] sm:$0xff]  }
 0x394   :  { %v6735_v18 = vpop.permute.xlu1 %6734 }
 0x395   :  { %v6737_v13 = vpop.permute.xlu0 %6736  ;;  %v18505_v19 = vpop.f32.mrb[92].mxu0  ;;  %v7614_v47 = vsel %vm7526_vm6, %v7421_v4, %v6735_v18 }
 0x396   :  { %6754 = vrot.lane.b32.xlu1 %v6080_v51, %s15909_s11  ;;  %v18511_v59 = vpop.f32.mrb[93].mxu0  ;;  %v7807_v40 = vsel %vm7719_vm7, %v7614_v47, %v6939_v7 }
 0x397   :  { %6956 = vrot.lane.b32.xlu0 %v6080_v51, %s15910_s14  ;;  %v18518_v20 = vpop.f32.mrb[94].mxu0 }
 0x398   :  { %v6331_v52 = vpop.permute.xlu1 %6330  ;;  %v18523_v48 = vpop.f32.mrb[95].mxu0 }
 0x399   :  { %v6937_v58 = vpop.permute.xlu0 %6936 }
 0x39a   :  { %v7805_v3 = vsel %vm7719_vm7, %v7612_v39, %v6937_v58  ;;  %14420 = vmatmul.mubr.msk.bf16.gmra.mrb[200].mxu0 %vm2064_vm2, %v15493_v46  ;;  %6962 = vrot.lane.b32.xlu1 %v6083_v44, %s15910_s14  ;;  %v7179_v44 = vsel %vm7044_vm4, %v18013_v5, %v18431_v63  ;;  %v15498_v5 = vld [vmem:[%s21123_s0 + $0x750] sm:$0xff]  }
 0x39b   :  { %v18531_v51 = vcombine.low %v7805_v3, %v7807_v40  ;;  %6960 = vrot.lane.b32.xlu0 %v6082_v26, %s15910_s14  ;;  %14423 = vmatprep.mubr.msk.bf16.mxu0 %vm2064_vm2, %v15494_v54 }
 0x39c   :  { %v6539_v12 = vpop.permute.xlu1 %6538 }
 0x39d   :  { %21259 = vst [vmem:[#allocation46_spill] sm:$0xff] %v18531_v51  ;;  %v6533_v18 = vpop.permute.xlu0 %6532  ;;  %14586 = vmatmul.mubr.msk.bf16.gmra.mrb[56].mxu1 %vm8138_vm8, %v18531_v51  ;;  %v18537_v8 = vpop.f32.mrb[96].mxu0 }
 0x39e   :  { %6758 = vrot.lane.b32.xlu1 %v6082_v26, %s15909_s11  ;;  %v18540_v7 = vpop.f32.mrb[97].mxu0  ;;  %v7182_v26 = vsel %vm7044_vm4, %v17990_v31, %v6331_v52  ;;  %v7423_v3 = vsel %vm7333_vm5, %v7179_v44, %v6533_v18 }
 0x39f   :  { %v18545_v30 = vpop.f32.mrb[98].mxu0  ;;  %v7425_v31 = vsel %vm7333_vm5, %v7182_v26, %v18486_v9  ;;  %v7616_v18 = vsel %vm7526_vm6, %v7423_v3, %v6737_v13  ;;  %v7185_v9 = vsel %vm7044_vm4, %v18077_v24, %v18494_v57 }
 0x3a0   :  { %v6943_v4 = vpop.permute.xlu1 %6942  ;;  %v18550_v46 = vpop.f32.mrb[99].mxu0 }
 0x3a1   :  { %v6741_v47 = vpop.permute.xlu0 %6740 }
 0x3a2   :  { %14424 = vmatmul.mubr.msk.bf16.gmra.mrb[204].mxu0 %vm2064_vm2, %v15495_v42  ;;  %v15497_v42 = vld [vmem:[%s21123_s0 + $0x748] sm:$0xff]  }
 0x3a3   :  { %14427 = vmatprep.mubr.msk.bf16.mxu0 %vm2064_vm2, %v15496_v0 }
 0x3a4   :  { %v6335_v54 = vpop.permute.xlu1 %6334 }
 0x3a5   :  { %v6537_v39 = vpop.permute.xlu0 %6536  ;;  %v18559_v58 = vpop.f32.mrb[100].mxu0  ;;  %v7188_v13 = vsel %vm7044_vm4, %v18042_v38, %v6335_v54  ;;  %v15500_v38 = vld [vmem:[%s21123_s0 + $0x760] sm:$0xff]  }
 0x3a6   :  { %v18562_v40 = vpop.f32.mrb[101].mxu0  ;;  %v7429_v54 = vsel %vm7333_vm5, %v7188_v13, %v6539_v12 }
 0x3a7   :  { %v18567_v0 = vpop.f32.mrb[102].mxu0 }
 0x3a8   :  { %v6739_v63 = vpop.permute.xlu1 %6738  ;;  %v18574_v52 = vpop.f32.mrb[103].mxu0 }
 0x3a9   :  { %v6941_v44 = vpop.permute.xlu0 %6940  ;;  %v7618_v51 = vsel %vm7526_vm6, %v7425_v31, %v6739_v63 }
 0x3aa   :  { %v7809_v29 = vsel %vm7719_vm7, %v7616_v18, %v6941_v44  ;;  %v7811_v6 = vsel %vm7719_vm7, %v7618_v51, %v6943_v4  ;;  %14428 = vmatmul.mubr.msk.bf16.gmra.mrb[208].mxu0 %vm2064_vm2, %v15497_v42  ;;  %v7427_v51 = vsel %vm7333_vm5, %v7185_v9, %v6537_v39 }
 0x3ab   :  { %v18581_v37 = vcombine.low %v7809_v29, %v7811_v6  ;;  %14431 = vmatprep.mubr.msk.bf16.mxu0 %vm2064_vm2, %v15498_v5  ;;  %v15499_v29 = vld [vmem:[%s21123_s0 + $0x758] sm:$0xff]  }
 0x3ac   :  { %v6947_v62 = vpop.permute.xlu1 %6946 }
 0x3ad   :  { %21260 = vst [vmem:[#allocation47_spill] sm:$0xff] %v18581_v37  ;;  %v14325_v26 = vpop.f32.mrb[104].mxu0  ;;  %14589 = vmatprep.mubr.msk.bf16.mxu1 %vm8138_vm8, %v18581_v37  ;;  %v6945_v3 = vpop.permute.xlu0 %6944 }
 0x3ae   :  { %v5443_v4 = vmax.f32 %v18400_v35, %v14325_v26  ;;  %v4410_v6 = vpop.f32.mrb[105].mxu0  ;;  %v7620_v35 = vsel %vm7526_vm6, %v7427_v51, %v6741_v47 }
 0x3af   :  { %v5441_v42 = vmax.f32 %v18404_v55, %v4410_v6  ;;  %v14326_v24 = vpop.f32.mrb[106].mxu0  ;;  %v7813_v18 = vsel %vm7719_vm7, %v7620_v35, %v6945_v3  ;;  %v15502_v6 = vld [vmem:[%s21123_s0 + $0x770] sm:$0xff]  }
 0x3b0   :  { %v5444_v57 = vmax.f32 %v18413_v11, %v14326_v24  ;;  %v6743_v39 = vpop.permute.xlu1 %6742  ;;  %v4413_v5 = vpop.f32.mrb[107].mxu0 }
 0x3b1   :  { %v7622_v31 = vsel %vm7526_vm6, %v7429_v54, %v6743_v39  ;;  %v5442_v63 = vmax.f32 %v18421_v56, %v4413_v5 }
 0x3b2   :  { %v5646_v55 = vmax.f32 %v5443_v4, %v5444_v57  ;;  %v7815_v44 = vsel %vm7719_vm7, %v7622_v31, %v6947_v62  ;;  %14432 = vmatmul.mubr.msk.bf16.gmra.mrb[212].mxu0 %vm2064_vm2, %v15499_v29  ;;  %v15501_v62 = vld [vmem:[%s21123_s0 + $0x768] sm:$0xff]  }
 0x3b3   :  { %v18608_v9 = vcombine.low %v7813_v18, %v7815_v44  ;;  %v18610_v11 = vmax.f32 %v5441_v42, %v5442_v63  ;;  %14435 = vmatprep.mubr.msk.bf16.mxu0 %vm2064_vm2, %v15500_v38  ;;  %v15504_v63 = vld [vmem:[%s21123_s0 + $0x780] sm:$0xff]  }
 0x3b4   :  { %v5797_v12 = vadd.f32 %v18275_v25, %v5646_v55 }
 0x3b5   :  { %21261 = vst [vmem:[#allocation48_spill] sm:$0xff] %v18608_v9  ;;  %v14329_v47 = vpop.f32.mrb[108].mxu0  ;;  %14590 = vmatmul.mubr.msk.bf16.gmra.mrb[60].mxu1 %vm8138_vm8, %v18608_v9 }
 0x3b6   :  { %v5941_v56 = vmax.f32 %v5797_v12, 0.0  ;;  %v5447_v13 = vmax.f32 %v18433_v33, %v14329_v47  ;;  %v4426_v26 = vpop.f32.mrb[109].mxu0 }
 0x3b7   :  { %v5445_v51 = vmax.f32 %v18437_v41, %v4426_v26  ;;  %v14330_v4 = vpop.f32.mrb[110].mxu0 }
 0x3b8   :  { %v18624_v29 = vpack.c.bf16 %v5941_v56, %v5941_v56  ;;  %v5448_v3 = vmax.f32 %v18446_v27, %v14330_v4  ;;  %v4429_v42 = vpop.f32.mrb[111].mxu0 }
 0x3b9   :  { %v5446_v24 = vmax.f32 %v18452_v43, %v4429_v42  ;;  %v15503_v43 = vld [vmem:[%s21123_s0 + $0x778] sm:$0xff]  }
 0x3ba   :  { %v5648_v33 = vmax.f32 %v5447_v13, %v5448_v3  ;;  %14436 = vmatmul.mubr.msk.bf16.gmra.mrb[216].mxu0 %vm2064_vm2, %v15501_v62  ;;  %6352 = vrot.lane.b32.xlu0 %v18624_v29, %s15907_s24  ;;  %v15506_v3 = vld [vmem:[%s21123_s0 + $0x790] sm:$0xff]  }
 0x3bb   :  { %v5647_v38 = vmax.f32 %v5445_v51, %v5446_v24  ;;  %14439 = vmatprep.mubr.msk.bf16.mxu0 %vm2064_vm2, %v15502_v6  ;;  %v15505_v51 = vld [vmem:[%s21123_s0 + $0x788] sm:$0xff]  }
 0x3bc   :  { %v5799_v41 = vadd.f32 %v18275_v25, %v5648_v33 }
 0x3bd   :  { %v5798_v57 = vadd.f32 %v18275_v25, %v5647_v38  ;;  %v14333_v54 = vpop.f32.mrb[112].mxu0 }
 0x3be   :  { %v5943_v39 = vmax.f32 %v5799_v41, 0.0  ;;  %v5451_v27 = vmax.f32 %v18466_v15, %v14333_v54  ;;  %v4442_v5 = vpop.f32.mrb[113].mxu0 }
 0x3bf   :  { %v5449_v35 = vmax.f32 %v18471_v49, %v4442_v5  ;;  %v14334_v31 = vpop.f32.mrb[114].mxu0  ;;  %v5942_v55 = vmax.f32 %v5798_v57, 0.0 }
 0x3c0   :  { %v18642_v18 = vpack.c.bf16 %v5943_v39, %v5943_v39  ;;  %v5452_v44 = vmax.f32 %v18479_v10, %v14334_v31  ;;  %v4445_v12 = vpop.f32.mrb[115].mxu0 }
 0x3c1   :  { %v5450_v15 = vmax.f32 %v18488_v36, %v4445_v12  ;;  %v18652_v56 = vpack.c.bf16 %v5942_v55, %v5942_v55 }
 0x3c2   :  { %v5650_v47 = vmax.f32 %v5451_v27, %v5452_v44  ;;  %14440 = vmatmul.mubr.msk.bf16.gmra.mrb[220].mxu0 %vm2064_vm2, %v15503_v43  ;;  %6558 = vrot.lane.b32.xlu1 %v18642_v18, %s15908_s29  ;;  %v15508_v43 = vld [vmem:[%s21123_s0 + $0x7a0] sm:$0xff]  }
 0x3c3   :  { %v5649_v49 = vmax.f32 %v5449_v35, %v5450_v15  ;;  %6356 = vrot.lane.b32.xlu0 %v18642_v18, %s15907_s24  ;;  %14443 = vmatprep.mubr.msk.bf16.mxu0 %vm2064_vm2, %v15504_v63 }
 0x3c4   :  { %v5801_v13 = vadd.f32 %v18275_v25, %v5650_v47 }
 0x3c5   :  { %v14337_v10 = vpop.f32.mrb[116].mxu0 }
 0x3c6   :  { %v5945_v26 = vmax.f32 %v5801_v13, 0.0  ;;  %v5455_v36 = vmax.f32 %v18505_v19, %v14337_v10  ;;  %6354 = vrot.lane.b32.xlu1 %v18652_v56, %s15907_s24  ;;  %v4458_v62 = vpop.f32.mrb[117].mxu0  ;;  %v5800_v19 = vadd.f32 %v18275_v25, %v5649_v49  ;;  %v15509_v10 = vld [vmem:[%s21123_s0 + $0x7a8] sm:$0xff]  }
 0x3c7   :  { %6760 = vrot.lane.b32.xlu0 %v18642_v18, %s15909_s11  ;;  %v5453_v4 = vmax.f32 %v18511_v59, %v4458_v62  ;;  %v14338_v6 = vpop.f32.mrb[118].mxu0  ;;  %v15510_v62 = vld [vmem:[%s21123_s0 + $0x7b0] sm:$0xff]  }
 0x3c8   :  { %v18667_v42 = vpack.c.bf16 %v5945_v26, %v5945_v26  ;;  %v5456_v24 = vmax.f32 %v18518_v20, %v14338_v6  ;;  %v4461_v33 = vpop.f32.mrb[119].mxu0  ;;  %v5944_v57 = vmax.f32 %v5800_v19, 0.0 }
 0x3c9   :  { %v5454_v38 = vmax.f32 %v18523_v48, %v4461_v33  ;;  %v15507_v48 = vld [vmem:[%s21123_s0 + $0x798] sm:$0xff]  }
 0x3ca   :  { %v5652_v41 = vmax.f32 %v5455_v36, %v5456_v24  ;;  %14444 = vmatmul.mubr.msk.bf16.gmra.mrb[224].mxu0 %vm2064_vm2, %v15505_v51  ;;  %6562 = vrot.lane.b32.xlu1 %v18667_v42, %s15908_s29  ;;  %v18690_v35 = vpack.c.bf16 %v5944_v57, %v5944_v57  ;;  %v15511_v57 = vld [vmem:[%s21123_s0 + $0x7b8] sm:$0xff]  }
 0x3cb   :  { %v5651_v59 = vmax.f32 %v5453_v4, %v5454_v38  ;;  %6556 = vrot.lane.b32.xlu0 %v18652_v56, %s15908_s29  ;;  %14447 = vmatprep.mubr.msk.bf16.mxu0 %vm2064_vm2, %v15506_v3 }
 0x3cc   :  { %v18694_v55 = vpop.permute.xlu0 %6336 }
 0x3cd   :  { %v14341_v54 = vpop.f32.mrb[120].mxu0 }
 0x3ce   :  { %v5459_v39 = vmax.f32 %v18537_v8, %v14341_v54  ;;  %6966 = vrot.lane.b32.xlu1 %v18667_v42, %s15910_s14  ;;  %v4474_v20 = vpop.f32.mrb[121].mxu0  ;;  %v5803_v8 = vadd.f32 %v18275_v25, %v5652_v41  ;;  %v15540_v54 = vld [vmem:[%s21125_s3] sm:$0xff]  }
 0x3cf   :  { %6764 = vrot.lane.b32.xlu0 %v18667_v42, %s15909_s11  ;;  %v5457_v27 = vmax.f32 %v18540_v7, %v4474_v20  ;;  %v14342_v5 = vpop.f32.mrb[122].mxu0  ;;  %14617 = vmatprep.subr.bf16.mxu1 %v15540_v54 }
 0x3d0   :  { %v5460_v31 = vmax.f32 %v18545_v30, %v14342_v5  ;;  %v4477_v63 = vpop.f32.mrb[123].mxu0  ;;  %v5947_v15 = vmax.f32 %v5803_v8, 0.0  ;;  %14618 = vmatpush3.bf16.msra.mxu1 %v15540_v54 }
 0x3d1   :  { %v5458_v44 = vmax.f32 %v18550_v46, %v4477_v63 }
 0x3d2   :  { %v5654_v12 = vmax.f32 %v5459_v39, %v5460_v31  ;;  %14448 = vmatmul.mubr.msk.bf16.gmra.mrb[228].mxu0 %vm2064_vm2, %v15507_v48  ;;  %6358 = vrot.lane.b32.xlu1 %v18690_v35, %s15907_s24  ;;  %v18721_v51 = vpack.c.bf16 %v5947_v15, %v5947_v15  ;;  %v5784_v39 = vadd.f32 %v18275_v25, %v18269_v21  ;;  %v15512_v48 = vld [vmem:[%s21123_s0 + $0x7c0] sm:$0xff]  }
 0x3d3   :  { %v18700_v7 = vmax.f32 %v5457_v27, %v5458_v44  ;;  %6360 = vrot.lane.b32.xlu0 %v18667_v42, %s15907_s24  ;;  %14451 = vmatprep.mubr.msk.bf16.mxu0 %vm2064_vm2, %v15508_v43 }
 0x3d4   :  { %v18705_v30 = vpop.permute.xlu1 %6542  ;;  %v5805_v5 = vadd.f32 %v18275_v25, %v5654_v12  ;;  %v5928_v21 = vmax.f32 %v5784_v39, 0.0 }
 0x3d5   :  { %v18707_v47 = vpop.permute.xlu0 %6340  ;;  %v14345_v49 = vpop.f32.mrb[124].mxu0 }
 0x3d6   :  { %v5463_v46 = vmax.f32 %v18559_v58, %v14345_v49  ;;  %6762 = vrot.lane.b32.xlu1 %v18690_v35, %s15909_s11  ;;  %v4490_v13 = vpop.f32.mrb[125].mxu0  ;;  %v5802_v58 = vadd.f32 %v18275_v25, %v5651_v59  ;;  %v5949_v63 = vmax.f32 %v5805_v5, 0.0 }
 0x3d7   :  { %6560 = vrot.lane.b32.xlu0 %v18690_v35, %s15908_s29  ;;  %v5461_v26 = vmax.f32 %v18562_v40, %v4490_v13  ;;  %v14346_v36 = vpop.f32.mrb[126].mxu0  ;;  %v6072_v13 = vpack.c.bf16 %v5928_v21, %v5928_v21  ;;  %v15515_v21 = vld [vmem:[%s21123_s0 + $0x7d8] sm:$0xff]  }
 0x3d8   :  { %v5464_v4 = vmax.f32 %v18567_v0, %v14346_v36  ;;  %v6339_v6 = vpop.permute.xlu1 %6338  ;;  %v4493_v3 = vpop.f32.mrb[127].mxu0  ;;  %v5946_v0 = vmax.f32 %v5802_v58, 0.0  ;;  %v15514_v36 = vld [vmem:[%s21123_s0 + $0x7d0] sm:$0xff]   ;;  %v5804_v58 = vadd.f32 %v18275_v25, %v18700_v7 }
 0x3d9   :  { %v6745_v19 = vpop.permute.xlu0 %6744  ;;  %v5462_v24 = vmax.f32 %v18574_v52, %v4493_v3 }
 0x3da   :  { %v18726_v33 = vmax.f32 %v5463_v46, %v5464_v4  ;;  %14452 = vmatmul.mubr.msk.bf16.gmra.mrb[232].mxu0 %vm2064_vm2, %v15509_v10  ;;  %6970 = vrot.lane.b32.xlu1 %v18721_v51, %s15910_s14  ;;  %v18759_v27 = vpack.c.bf16 %v5946_v0, %v5946_v0  ;;  %v15513_v46 = vld [vmem:[%s21123_s0 + $0x7c8] sm:$0xff]   ;;  %v7194_v10 = vsel %vm7044_vm4, %v18288_v23, %v6339_v6  ;;  %v5948_v7 = vmax.f32 %v5804_v58, 0.0 }
 0x3db   :  { %v18731_v40 = vmax.f32 %v5461_v26, %v5462_v24  ;;  %6964 = vrot.lane.b32.xlu0 %v18690_v35, %s15910_s14  ;;  %14455 = vmatprep.mubr.msk.bf16.mxu0 %vm2064_vm2, %v15510_v62  ;;  %v6093_v62 = vpack.c.bf16 %v5949_v63, %v5949_v63  ;;  %v7191_v24 = vsel %vm7044_vm4, %v6072_v13, %v18694_v55 }
 0x3dc   :  { %v18736_v38 = vpop.permute.xlu1 %6546  ;;  %v7433_v0 = vsel %vm7333_vm5, %v7194_v10, %v18705_v30  ;;  %v6092_v13 = vpack.c.bf16 %v5948_v7, %v5948_v7 }
 0x3dd   :  { %v6541_v41 = vpop.permute.xlu0 %6540  ;;  %v18738_v59 = vpop.f32.mrb[128].mxu0  ;;  %v5806_v58 = vadd.f32 %v18275_v25, %v18731_v40 }
 0x3de   :  { %6566 = vrot.lane.b32.xlu1 %v18721_v51, %s15908_s29  ;;  %v18742_v52 = vpop.f32.mrb[129].mxu0  ;;  %v7431_v6 = vsel %vm7333_vm5, %v7191_v24, %v6541_v41 }
 0x3df   :  { %6364 = vrot.lane.b32.xlu0 %v18721_v51, %s15907_s24  ;;  %v18754_v20 = vpop.f32.mrb[130].mxu0  ;;  %v7624_v55 = vsel %vm7526_vm6, %v7431_v6, %v6745_v19  ;;  %v5950_v40 = vmax.f32 %v5806_v58, 0.0 }
 0x3e0   :  { %v6951_v43 = vpop.permute.xlu1 %6950  ;;  %v18762_v8 = vpop.f32.mrb[131].mxu0 }
 0x3e1   :  { %v18764_v31 = vpop.permute.xlu0 %6748 }
 0x3e2   :  { %14456 = vmatmul.mubr.msk.bf16.gmra.mrb[236].mxu0 %vm2064_vm2, %v15511_v57  ;;  %6766 = vrot.lane.b32.xlu1 %v18759_v27, %s15909_s11 }
 0x3e3   :  { %6768 = vrot.lane.b32.xlu0 %v18721_v51, %s15909_s11  ;;  %14459 = vmatprep.mubr.msk.bf16.mxu0 %vm2064_vm2, %v15512_v48 }
 0x3e4   :  { %v6343_v44 = vpop.permute.xlu1 %6342 }
 0x3e5   :  { %v18772_v12 = vpop.permute.xlu0 %6344  ;;  %v18774_v15 = vpop.f32.mrb[132].mxu0 }
 0x3e6   :  { %6362 = vrot.lane.b32.xlu1 %v18759_v27, %s15907_s24  ;;  %v18778_v49 = vpop.f32.mrb[133].mxu0 }
 0x3e7   :  { %6968 = vrot.lane.b32.xlu0 %v18759_v27, %s15910_s14  ;;  %v18787_v26 = vpop.f32.mrb[134].mxu0 }
 0x3e8   :  { %v6747_v4 = vpop.permute.xlu1 %6746  ;;  %v18794_v3 = vpop.f32.mrb[135].mxu0 }
 0x3e9   :  { %v6545_v23 = vpop.permute.xlu0 %6544  ;;  %v7626_v57 = vsel %vm7526_vm6, %v7433_v0, %v6747_v4  ;;  %v7200_v4 = vsel %vm7044_vm4, %v18306_v32, %v6343_v44  ;;  %v15517_v44 = vld [vmem:[%s21123_s0 + $0x7e8] sm:$0xff]  }
 0x3ea   :  { %14460 = vmatmul.mubr.msk.bf16.gmra.mrb[240].mxu0 %vm2064_vm2, %v15513_v46  ;;  %6570 = vrot.lane.b32.xlu1 %v6093_v62, %s15908_s29  ;;  %v7819_v48 = vsel %vm7719_vm7, %v7626_v57, %v6951_v43  ;;  %v15516_v46 = vld [vmem:[%s21123_s0 + $0x7e0] sm:$0xff]   ;;  %v5807_v43 = vadd.f32 %v18275_v25, %v18726_v33  ;;  %v7197_v25 = vsel %vm7044_vm4, %v18316_v17, %v18707_v47  ;;  %v15518_v47 = vld [vmem:[%s21123_s0 + $0x7f0] sm:$0xff]  }
 0x3eb   :  { %6564 = vrot.lane.b32.xlu0 %v18759_v27, %s15908_s29  ;;  %14463 = vmatprep.mubr.msk.bf16.mxu0 %vm2064_vm2, %v15514_v36  ;;  %v7435_v57 = vsel %vm7333_vm5, %v7197_v25, %v6545_v23  ;;  %v7437_v7 = vsel %vm7333_vm5, %v7200_v4, %v18736_v38 }
 0x3ec   :  { %v6955_v54 = vpop.permute.xlu1 %6954  ;;  %v5951_v33 = vmax.f32 %v5807_v43, 0.0 }
 0x3ed   :  { %v6949_v39 = vpop.permute.xlu0 %6948  ;;  %v18808_v41 = vpop.f32.mrb[136].mxu0 }
 0x3ee   :  { %v7817_v30 = vsel %vm7719_vm7, %v7624_v55, %v6949_v39  ;;  %6974 = vrot.lane.b32.xlu1 %v6093_v62, %s15910_s14  ;;  %v18813_v5 = vpop.f32.mrb[137].mxu0  ;;  %v6095_v23 = vpack.c.bf16 %v5951_v33, %v5951_v33 }
 0x3ef   :  { %v18818_v63 = vcombine.low %v7817_v30, %v7819_v48  ;;  %6772 = vrot.lane.b32.xlu0 %v6093_v62, %s15909_s11  ;;  %v18821_v19 = vpop.f32.mrb[138].mxu0  ;;  %v15541_v30 = vld [vmem:[%s21125_s3 + $0x8] sm:$0xff]   ;;  %v6094_v48 = vpack.c.bf16 %v5950_v40, %v5950_v40  ;;  %v15520_v40 = vld [vmem:[%s21123_s0 + $0x800] sm:$0xff]  }
 0x3f0   :  { %v18828_v10 = vpop.permute.xlu1 %6550  ;;  %v18830_v36 = vpop.f32.mrb[139].mxu0  ;;  %14619 = vmatprep.subr.bf16.mxu1 %v15541_v30 }
 0x3f1   :  { %21262 = vst [vmem:[#allocation49_spill] sm:$0xff] %v18818_v63  ;;  %14593 = vmatprep.mubr.msk.bf16.mxu1 %vm8138_vm8, %v18818_v63  ;;  %v18836_v62 = vpop.permute.xlu0 %6348  ;;  %14620 = vmatpush3.bf16.msra.mxu1 %v15541_v30 }
 0x3f2   :  { %14464 = vmatmul.mubr.msk.bf16.gmra.mrb[244].mxu0 %vm2064_vm2, %v15515_v21  ;;  %6366 = vrot.lane.b32.xlu1 %v6092_v13, %s15907_s24  ;;  %v7628_v21 = vsel %vm7526_vm6, %v7435_v57, %v18764_v31 }
 0x3f3   :  { %6568 = vrot.lane.b32.xlu0 %v6092_v13, %s15908_s29  ;;  %14467 = vmatprep.mubr.msk.bf16.mxu0 %vm2064_vm2, %v15516_v46 }
 0x3f4   :  { %v6751_v24 = vpop.permute.xlu1 %6750 }
 0x3f5   :  { %v6753_v6 = vpop.permute.xlu0 %6752  ;;  %v18847_v0 = vpop.f32.mrb[140].mxu0  ;;  %v7630_v55 = vsel %vm7526_vm6, %v7437_v7, %v6751_v24  ;;  %v15519_v24 = vld [vmem:[%s21123_s0 + $0x7f8] sm:$0xff]  }
 0x3f6   :  { %6770 = vrot.lane.b32.xlu1 %v6092_v13, %s15909_s11  ;;  %v18853_v32 = vpop.f32.mrb[141].mxu0  ;;  %v7823_v43 = vsel %vm7719_vm7, %v7630_v55, %v6955_v54 }
 0x3f7   :  { %6972 = vrot.lane.b32.xlu0 %v6092_v13, %s15910_s14  ;;  %v18860_v17 = vpop.f32.mrb[142].mxu0 }
 0x3f8   :  { %v6347_v38 = vpop.permute.xlu1 %6346  ;;  %v18865_v39 = vpop.f32.mrb[143].mxu0 }
 0x3f9   :  { %v6953_v46 = vpop.permute.xlu0 %6952 }
 0x3fa   :  { %v7821_v13 = vsel %vm7719_vm7, %v7628_v21, %v6953_v46  ;;  %14468 = vmatmul.mubr.msk.bf16.gmra.mrb[248].mxu0 %vm2064_vm2, %v15517_v44  ;;  %6978 = vrot.lane.b32.xlu1 %v6095_v23, %s15910_s14  ;;  %v7206_v23 = vsel %vm7044_vm4, %v18331_v34, %v6347_v38 }
 0x3fb   :  { %v18876_v58 = vcombine.low %v7821_v13, %v7823_v43  ;;  %6976 = vrot.lane.b32.xlu0 %v6094_v48, %s15910_s14  ;;  %14471 = vmatprep.mubr.msk.bf16.mxu0 %vm2064_vm2, %v15518_v47  ;;  %v7203_v47 = vsel %vm7044_vm4, %v18354_v16, %v18772_v12  ;;  %v15521_v13 = vld [vmem:[%s21123_s0 + $0x808] sm:$0xff]   ;;  %v15522_v16 = vld [vmem:[%s21123_s0 + $0x810] sm:$0xff]   ;;  %v7441_v34 = vsel %vm7333_vm5, %v7206_v23, %v18828_v10 }
 0x3fc   :  { %v6555_v4 = vpop.permute.xlu1 %6554 }
 0x3fd   :  { %21263 = vst [vmem:[#allocation50_spill] sm:$0xff] %v18876_v58  ;;  %v6549_v33 = vpop.permute.xlu0 %6548  ;;  %14594 = vmatmul.mubr.msk.bf16.gmra.mrb[64].mxu1 %vm8138_vm8, %v18876_v58  ;;  %v18882_v31 = vpop.f32.mrb[144].mxu0 }
 0x3fe   :  { %6774 = vrot.lane.b32.xlu1 %v6094_v48, %s15909_s11  ;;  %v18885_v54 = vpop.f32.mrb[145].mxu0  ;;  %v7439_v21 = vsel %vm7333_vm5, %v7203_v47, %v6549_v33  ;;  %v15542_v33 = vld [vmem:[%s21125_s3 + $0x10] sm:$0xff]  }
 0x3ff   :  { %v18890_v25 = vpop.f32.mrb[146].mxu0  ;;  %14621 = vmatprep.subr.bf16.mxu1 %v15542_v33 }
 0x400   :  { %v6959_v57 = vpop.permute.xlu1 %6958  ;;  %v18895_v7 = vpop.f32.mrb[147].mxu0  ;;  %14622 = vmatpush3.bf16.msra.mxu1 %v15542_v33 }
 0x401   :  { %v6757_v44 = vpop.permute.xlu0 %6756 }
 0x402   :  { %14472 = vmatmul.mubr.msk.bf16.gmra.mrb[252].mxu0 %vm2064_vm2, %v15519_v24  ;;  %v7632_v24 = vsel %vm7526_vm6, %v7439_v21, %v6753_v6  ;;  %v7209_v6 = vsel %vm7044_vm4, %v18418_v22, %v18836_v62 }
 0x403   :  { %14475 = vmatprep.mubr.msk.bf16.mxu0 %vm2064_vm2, %v15520_v40 }
 0x404   :  { %v6351_v55 = vpop.permute.xlu1 %6350 }
 0x405   :  { %v6553_v30 = vpop.permute.xlu0 %6552  ;;  %v18904_v48 = vpop.f32.mrb[148].mxu0  ;;  %v7212_v21 = vsel %vm7044_vm4, %v18383_v2, %v6351_v55  ;;  %v15524_v2 = vld [vmem:[%s21123_s0 + $0x820] sm:$0xff]  }
 0x406   :  { %v18907_v46 = vpop.f32.mrb[149].mxu0  ;;  %v7445_v55 = vsel %vm7333_vm5, %v7212_v21, %v6555_v4  ;;  %v18964_v4 = vld [vmem:[%s21124_s2] ss:$0 sm:$0xff] }
 0x407   :  { %v18912_v43 = vpop.f32.mrb[150].mxu0 }
 0x408   :  { %v6755_v12 = vpop.permute.xlu1 %6754  ;;  %v18919_v38 = vpop.f32.mrb[151].mxu0 }
 0x409   :  { %v6957_v40 = vpop.permute.xlu0 %6956  ;;  %v7634_v47 = vsel %vm7526_vm6, %v7441_v34, %v6755_v12 }
 0x40a   :  { %v7825_v58 = vsel %vm7719_vm7, %v7632_v24, %v6957_v40  ;;  %v7827_v63 = vsel %vm7719_vm7, %v7634_v47, %v6959_v57  ;;  %14476 = vmatmul.mubr.msk.bf16.gmra.mrb[0].mxu0 %vm2064_vm2, %v15521_v13  ;;  %v7443_v57 = vsel %vm7333_vm5, %v7209_v6, %v6553_v30  ;;  %v15523_v13 = vld [vmem:[%s21123_s0 + $0x818] sm:$0xff]  }
 0x40b   :  { %v18929_v10 = vcombine.low %v7825_v58, %v7827_v63  ;;  %14479 = vmatprep.mubr.msk.bf16.mxu0 %vm2064_vm2, %v15522_v16 }
 0x40c   :  { %v6963_v23 = vpop.permute.xlu1 %6962 }
 0x40d   :  { %21264 = vst [vmem:[#allocation51_spill] sm:$0xff] %v18929_v10  ;;  %v14373_v34 = vpop.f32.mrb[152].mxu0  ;;  %14597 = vmatprep.mubr.msk.bf16.mxu1 %vm8138_vm8, %v18929_v10  ;;  %v6961_v16 = vpop.permute.xlu0 %6960 }
 0x40e   :  { %v5467_v63 = vmax.f32 %v18738_v59, %v14373_v34  ;;  %v4602_v58 = vpop.f32.mrb[153].mxu0  ;;  %v7636_v59 = vsel %vm7526_vm6, %v7443_v57, %v6757_v44 }
 0x40f   :  { %v5465_v12 = vmax.f32 %v18742_v52, %v4602_v58  ;;  %v14374_v22 = vpop.f32.mrb[154].mxu0  ;;  %v7829_v47 = vsel %vm7719_vm7, %v7636_v59, %v6961_v16  ;;  %v15543_v58 = vld [vmem:[%s21125_s3 + $0x18] sm:$0xff]  }
 0x410   :  { %v5468_v62 = vmax.f32 %v18754_v20, %v14374_v22  ;;  %v6759_v30 = vpop.permute.xlu1 %6758  ;;  %v4605_v33 = vpop.f32.mrb[155].mxu0  ;;  %14623 = vmatprep.subr.bf16.mxu1 %v15543_v58 }
 0x411   :  { %v7638_v24 = vsel %vm7526_vm6, %v7445_v55, %v6759_v30  ;;  %v5466_v40 = vmax.f32 %v18762_v8, %v4605_v33  ;;  %14624 = vmatpush3.bf16.msra.mxu1 %v15543_v58 }
 0x412   :  { %v5658_v52 = vmax.f32 %v5467_v63, %v5468_v62  ;;  %v7831_v6 = vsel %vm7719_vm7, %v7638_v24, %v6963_v23  ;;  %14480 = vmatmul.mubr.msk.bf16.gmra.mrb[4].mxu0 %vm2064_vm2, %v15523_v13  ;;  %v15525_v63 = vld [vmem:[%s21123_s0 + $0x828] sm:$0xff]  }
 0x413   :  { %v18956_v34 = vcombine.low %v7829_v47, %v7831_v6  ;;  %v18958_v20 = vmax.f32 %v5465_v12, %v5466_v40  ;;  %14483 = vmatprep.mubr.msk.bf16.mxu0 %vm2064_vm2, %v15524_v2  ;;  %v15526_v12 = vld [vmem:[%s21123_s0 + $0x830] sm:$0xff]  }
 0x414   :  { %v5809_v8 = vadd.f32 %v18964_v4, %v5658_v52  ;;  %v15527_v52 = vld [vmem:[%s21123_s0 + $0x838] sm:$0xff]  }
 0x415   :  { %21265 = vst [vmem:[#allocation52_spill] sm:$0xff] %v18956_v34  ;;  %v14377_v44 = vpop.f32.mrb[156].mxu0  ;;  %14598 = vmatmul.mubr.msk.bf16.gmra.mrb[68].mxu1 %vm8138_vm8, %v18956_v34 }
 0x416   :  { %v5953_v23 = vmax.f32 %v5809_v8, 0.0  ;;  %v5471_v21 = vmax.f32 %v18774_v15, %v14377_v44  ;;  %v4618_v57 = vpop.f32.mrb[157].mxu0 }
 0x417   :  { %v5469_v13 = vmax.f32 %v18778_v49, %v4618_v57  ;;  %v14378_v16 = vpop.f32.mrb[158].mxu0 }
 0x418   :  { %v18980_v22 = vpack.c.bf16 %v5953_v23, %v5953_v23  ;;  %v5472_v15 = vmax.f32 %v18787_v26, %v14378_v16  ;;  %v4621_v2 = vpop.f32.mrb[159].mxu0 }
 0x419   :  { %v5470_v62 = vmax.f32 %v18794_v3, %v4621_v2  ;;  %v15529_v2 = vld [vmem:[%s21123_s0 + $0x848] sm:$0xff]  }
 0x41a   :  { %v5660_v55 = vmax.f32 %v5471_v21, %v5472_v15  ;;  %6368 = vrot.lane.b32.xlu0 %v18980_v22, %s15907_s24  ;;  %14484 = vmatmul.mubr.msk.bf16.gmra.mrb[8].mxu0 %vm2064_vm2, %v15525_v63  ;;  %v15528_v21 = vld [vmem:[%s21123_s0 + $0x840] sm:$0xff]  }
 0x41b   :  { %v5659_v49 = vmax.f32 %v5469_v13, %v5470_v62  ;;  %14487 = vmatprep.mubr.msk.bf16.mxu0 %vm2064_vm2, %v15526_v12 }
 0x41c   :  { %v5811_v30 = vadd.f32 %v18964_v4, %v5660_v55 }
 0x41d   :  { %v5810_v33 = vadd.f32 %v18964_v4, %v5659_v49  ;;  %v14381_v59 = vpop.f32.mrb[160].mxu0 }
 0x41e   :  { %v5955_v26 = vmax.f32 %v5811_v30, 0.0  ;;  %v5475_v24 = vmax.f32 %v18808_v41, %v14381_v59  ;;  %v4634_v40 = vpop.f32.mrb[161].mxu0  ;;  %v15530_v30 = vld [vmem:[%s21123_s0 + $0x850] sm:$0xff]  }
 0x41f   :  { %v5473_v3 = vmax.f32 %v18813_v5, %v4634_v40  ;;  %v14382_v47 = vpop.f32.mrb[162].mxu0  ;;  %v5954_v8 = vmax.f32 %v5810_v33, 0.0 }
 0x420   :  { %v18995_v6 = vpack.c.bf16 %v5955_v26, %v5955_v26  ;;  %v5476_v44 = vmax.f32 %v18821_v19, %v14382_v47  ;;  %v4637_v23 = vpop.f32.mrb[163].mxu0 }
 0x421   :  { %v5474_v41 = vmax.f32 %v18830_v36, %v4637_v23  ;;  %v19007_v63 = vpack.c.bf16 %v5954_v8, %v5954_v8 }
 0x422   :  { %v5662_v57 = vmax.f32 %v5475_v24, %v5476_v44  ;;  %6574 = vrot.lane.b32.xlu1 %v18995_v6, %s15908_s29  ;;  %6372 = vrot.lane.b32.xlu0 %v18995_v6, %s15907_s24 }
 0x423   :  { %v5661_v5 = vmax.f32 %v5473_v3, %v5474_v41  ;;  %14488 = vmatmul.mubr.msk.bf16.gmra.mrb[12].mxu0 %vm2064_vm2, %v15527_v52  ;;  %v15531_v52 = vld [vmem:[%s21123_s0 + $0x858] sm:$0xff]  }
 0x424   :  { %v5813_v19 = vadd.f32 %v18964_v4, %v5662_v57  ;;  %14491 = vmatprep.mubr.msk.bf16.mxu0 %vm2064_vm2, %v15528_v21  ;;  %v15532_v21 = vld [vmem:[%s21123_s0 + $0x860] sm:$0xff]  }
 0x425   :  { %v14385_v58 = vpop.f32.mrb[164].mxu0  ;;  %v5812_v55 = vadd.f32 %v18964_v4, %v5661_v5 }
 0x426   :  { %v5957_v13 = vmax.f32 %v5813_v19, 0.0  ;;  %v5479_v36 = vmax.f32 %v18847_v0, %v14385_v58  ;;  %6776 = vrot.lane.b32.xlu0 %v18995_v6, %s15909_s11  ;;  %6370 = vrot.lane.b32.xlu1 %v19007_v63, %s15907_s24  ;;  %v4650_v16 = vpop.f32.mrb[165].mxu0 }
 0x427   :  { %v5477_v12 = vmax.f32 %v18853_v32, %v4650_v16  ;;  %v14386_v15 = vpop.f32.mrb[166].mxu0  ;;  %v15544_v32 = vld [vmem:[%s21125_s3 + $0x20] sm:$0xff]  }
 0x428   :  { %v19020_v62 = vpack.c.bf16 %v5957_v13, %v5957_v13  ;;  %v5480_v0 = vmax.f32 %v18860_v17, %v14386_v15  ;;  %v4653_v49 = vpop.f32.mrb[167].mxu0  ;;  %14625 = vmatprep.subr.bf16.mxu1 %v15544_v32  ;;  %v5956_v17 = vmax.f32 %v5812_v55, 0.0  ;;  %v15533_v15 = vld [vmem:[%s21123_s0 + $0x868] sm:$0xff]  }
 0x429   :  { %v5478_v33 = vmax.f32 %v18865_v39, %v4653_v49  ;;  %14626 = vmatpush3.bf16.msra.mxu1 %v15544_v32 }
 0x42a   :  { %v5664_v59 = vmax.f32 %v5479_v36, %v5480_v0  ;;  %6572 = vrot.lane.b32.xlu0 %v19007_v63, %s15908_s29  ;;  %6578 = vrot.lane.b32.xlu1 %v19020_v62, %s15908_s29  ;;  %v19046_v8 = vpack.c.bf16 %v5956_v17, %v5956_v17 }
 0x42b   :  { %v5663_v26 = vmax.f32 %v5477_v12, %v5478_v33  ;;  %14492 = vmatmul.mubr.msk.bf16.gmra.mrb[16].mxu0 %vm2064_vm2, %v15529_v2 }
 0x42c   :  { %14495 = vmatprep.mubr.msk.bf16.mxu0 %vm2064_vm2, %v15530_v30  ;;  %v5815_v44 = vadd.f32 %v18964_v4, %v5664_v59  ;;  %v19053_v41 = vpop.permute.xlu0 %6352  ;;  %v15534_v30 = vld [vmem:[%s21123_s0 + $0x870] sm:$0xff]  }
 0x42d   :  { %v14389_v39 = vpop.f32.mrb[168].mxu0  ;;  %v5814_v55 = vadd.f32 %v18964_v4, %v5663_v26 }
 0x42e   :  { %v5483_v24 = vmax.f32 %v18882_v31, %v14389_v39  ;;  %6780 = vrot.lane.b32.xlu0 %v19020_v62, %s15909_s11  ;;  %6982 = vrot.lane.b32.xlu1 %v19020_v62, %s15910_s14  ;;  %v4666_v40 = vpop.f32.mrb[169].mxu0 }
 0x42f   :  { %v5481_v3 = vmax.f32 %v18885_v54, %v4666_v40  ;;  %v14390_v47 = vpop.f32.mrb[170].mxu0  ;;  %v5958_v26 = vmax.f32 %v5814_v55, 0.0  ;;  %v5796_v40 = vadd.f32 %v18964_v4, %v18610_v11 }
 0x430   :  { %v5484_v31 = vmax.f32 %v18890_v25, %v14390_v47  ;;  %v4669_v23 = vpop.f32.mrb[171].mxu0  ;;  %v5959_v25 = vmax.f32 %v5815_v44, 0.0 }
 0x431   :  { %v5482_v54 = vmax.f32 %v18895_v7, %v4669_v23  ;;  %v15536_v23 = vld [vmem:[%s21123_s0 + $0x880] sm:$0xff]   ;;  %v5940_v11 = vmax.f32 %v5796_v40, 0.0 }
 0x432   :  { %v5666_v57 = vmax.f32 %v5483_v24, %v5484_v31  ;;  %6376 = vrot.lane.b32.xlu0 %v19020_v62, %s15907_s24  ;;  %6374 = vrot.lane.b32.xlu1 %v19046_v8, %s15907_s24  ;;  %v19077_v2 = vpack.c.bf16 %v5959_v25, %v5959_v25 }
 0x433   :  { %v19060_v5 = vmax.f32 %v5481_v3, %v5482_v54  ;;  %14496 = vmatmul.mubr.msk.bf16.gmra.mrb[20].mxu0 %vm2064_vm2, %v15531_v52  ;;  %v15535_v3 = vld [vmem:[%s21123_s0 + $0x878] sm:$0xff]   ;;  %v19115_v52 = vpack.c.bf16 %v5958_v26, %v5958_v26 }
 0x434   :  { %v19063_v19 = vpop.permute.xlu1 %6558  ;;  %14499 = vmatprep.mubr.msk.bf16.mxu0 %vm2064_vm2, %v15532_v21  ;;  %v5817_v44 = vadd.f32 %v18964_v4, %v5666_v57 }
 0x435   :  { %v19066_v58 = vpop.permute.xlu0 %6356  ;;  %v14393_v13 = vpop.f32.mrb[172].mxu0 }
 0x436   :  { %v5487_v7 = vmax.f32 %v18904_v48, %v14393_v13  ;;  %6576 = vrot.lane.b32.xlu0 %v19046_v8, %s15908_s29  ;;  %6778 = vrot.lane.b32.xlu1 %v19046_v8, %s15909_s11  ;;  %v4682_v36 = vpop.f32.mrb[173].mxu0  ;;  %v5961_v25 = vmax.f32 %v5817_v44, 0.0 }
 0x437   :  { %v5485_v16 = vmax.f32 %v18907_v46, %v4682_v36  ;;  %v14394_v12 = vpop.f32.mrb[174].mxu0 }
 0x438   :  { %v5488_v48 = vmax.f32 %v18912_v43, %v14394_v12  ;;  %v6355_v0 = vpop.permute.xlu1 %6354  ;;  %v4685_v49 = vpop.f32.mrb[175].mxu0  ;;  %v15545_v43 = vld [vmem:[%s21125_s3 + $0x28] sm:$0xff]  }
 0x439   :  { %v6761_v33 = vpop.permute.xlu0 %6760  ;;  %v5486_v46 = vmax.f32 %v18919_v38, %v4685_v49  ;;  %14627 = vmatprep.subr.bf16.mxu1 %v15545_v43  ;;  %v7218_v12 = vsel %vm7044_vm4, %v18624_v29, %v6355_v0  ;;  %v5816_v49 = vadd.f32 %v18964_v4, %v19060_v5 }
 0x43a   :  { %v19085_v32 = vmax.f32 %v5487_v7, %v5488_v48  ;;  %6980 = vrot.lane.b32.xlu0 %v19046_v8, %s15910_s14  ;;  %6986 = vrot.lane.b32.xlu1 %v19077_v2, %s15910_s14  ;;  %v6105_v48 = vpack.c.bf16 %v5961_v25, %v5961_v25  ;;  %v7449_v40 = vsel %vm7333_vm5, %v7218_v12, %v19063_v19  ;;  %v15546_v19 = vld [vmem:[%s21125_s3 + $0x30] ss:$0 sps:$4 sm:$0x33]  }
 0x43b   :  { %v19094_v59 = vmax.f32 %v5485_v16, %v5486_v46  ;;  %14500 = vmatmul.mubr.msk.bf16.gmra.mrb[24].mxu0 %vm2064_vm2, %v15533_v15  ;;  %14628 = vmatpush3.bf16.msra.mxu1 %v15545_v43  ;;  %v6084_v16 = vpack.c.bf16 %v5940_v11, %v5940_v11  ;;  %v15537_v15 = vld [vmem:[%s21123_s0 + $0x888] sm:$0xff]   ;;  %v15538_v46 = vld [vmem:[%s21123_s0 + $0x890] sm:$0xff]  }
 0x43c   :  { %v19097_v17 = vpop.permute.xlu1 %6562  ;;  %14503 = vmatprep.mubr.msk.bf16.mxu0 %vm2064_vm2, %v15534_v30  ;;  %15218 = vmatprep.subr.msk.bf16.mxu1 %vm8235_vm3, %v15546_v19 }
 0x43d   :  { %v6557_v38 = vpop.permute.xlu0 %6556  ;;  %v19100_v39 = vpop.f32.mrb[176].mxu0  ;;  %v7215_v29 = vsel %vm7044_vm4, %v6084_v16, %v19053_v41 }
 0x43e   :  { %6380 = vrot.lane.b32.xlu0 %v19077_v2, %s15907_s24  ;;  %6582 = vrot.lane.b32.xlu1 %v19077_v2, %s15908_s29  ;;  %v19106_v24 = vpop.f32.mrb[177].mxu0  ;;  %v7447_v26 = vsel %vm7333_vm5, %v7215_v29, %v6557_v38 }
 0x43f   :  { %v19113_v47 = vpop.f32.mrb[178].mxu0  ;;  %v7640_v41 = vsel %vm7526_vm6, %v7447_v26, %v6761_v33  ;;  %v15539_v33 = vld [vmem:[%s21123_s0 + $0x898] sm:$0xff]  }
 0x440   :  { %v6967_v31 = vpop.permute.xlu1 %6966  ;;  %v19121_v21 = vpop.f32.mrb[179].mxu0 }
 0x441   :  { %v19123_v54 = vpop.permute.xlu0 %6764 }
 0x442   :  { %6784 = vrot.lane.b32.xlu0 %v19077_v2, %s15909_s11  ;;  %6782 = vrot.lane.b32.xlu1 %v19115_v52, %s15909_s11 }
 0x443   :  { %14504 = vmatmul.mubr.msk.bf16.gmra.mrb[28].mxu0 %vm2064_vm2, %v15535_v3  ;;  %v5960_v3 = vmax.f32 %v5816_v49, 0.0  ;;  %v8600_v49 = vsel %vm8235_vm3, %v15546_v19, 0 }
 0x444   :  { %v6359_v57 = vpop.permute.xlu1 %6358  ;;  %14507 = vmatprep.mubr.msk.bf16.mxu0 %vm2064_vm2, %v15536_v23  ;;  %14630 = vmatpush3.bf16.msra.mxu1 %v8600_v49 }
 0x445   :  { %v19131_v13 = vpop.permute.xlu0 %6360  ;;  %v19133_v7 = vpop.f32.mrb[180].mxu0 }
 0x446   :  { %6984 = vrot.lane.b32.xlu0 %v19115_v52, %s15910_s14  ;;  %6378 = vrot.lane.b32.xlu1 %v19115_v52, %s15907_s24  ;;  %v19139_v36 = vpop.f32.mrb[181].mxu0 }
 0x447   :  { %v19146_v55 = vpop.f32.mrb[182].mxu0 }
 0x448   :  { %v6763_v30 = vpop.permute.xlu1 %6762  ;;  %v19153_v43 = vpop.f32.mrb[183].mxu0 }
 0x449   :  { %v6561_v0 = vpop.permute.xlu0 %6560  ;;  %v7642_v5 = vsel %vm7526_vm6, %v7449_v40, %v6763_v30  ;;  %v6104_v30 = vpack.c.bf16 %v5960_v3, %v5960_v3  ;;  %v7221_v3 = vsel %vm7044_vm4, %v18652_v56, %v19066_v58  ;;  %v5721_v56 = vadd.f32 %v18964_v4, %v16385_v53 }
 0x44a   :  { %6580 = vrot.lane.b32.xlu0 %v19115_v52, %s15908_s29  ;;  %6586 = vrot.lane.b32.xlu1 %v6105_v48, %s15908_s29  ;;  %v7835_v25 = vsel %vm7719_vm7, %v7642_v5, %v6967_v31  ;;  %v5819_v31 = vadd.f32 %v18964_v4, %v19085_v32  ;;  %v7224_v32 = vsel %vm7044_vm4, %v18642_v18, %v6359_v57 }
 0x44b   :  { %14508 = vmatmul.mubr.msk.bf16.gmra.mrb[32].mxu0 %vm2064_vm2, %v15537_v15  ;;  %v7451_v19 = vsel %vm7333_vm5, %v7221_v3, %v6561_v0  ;;  %v5722_v3 = vadd.f32 %v18964_v4, %v16415_v28 }
 0x44c   :  { %v6971_v44 = vpop.permute.xlu1 %6970  ;;  %14511 = vmatprep.mubr.msk.bf16.mxu0 %vm2064_vm2, %v15538_v46 }
 0x44d   :  { %v6965_v23 = vpop.permute.xlu0 %6964  ;;  %v19167_v38 = vpop.f32.mrb[184].mxu0 }
 0x44e   :  { %v7833_v11 = vsel %vm7719_vm7, %v7640_v41, %v6965_v23  ;;  %6788 = vrot.lane.b32.xlu0 %v6105_v48, %s15909_s11  ;;  %6990 = vrot.lane.b32.xlu1 %v6105_v48, %s15910_s14  ;;  %v19176_v16 = vpop.f32.mrb[185].mxu0  ;;  %v5818_v48 = vadd.f32 %v18964_v4, %v19094_v59  ;;  %v5963_v59 = vmax.f32 %v5819_v31, 0.0 }
 0x44f   :  { %v19178_v12 = vcombine.low %v7833_v11, %v7835_v25  ;;  %v19183_v15 = vpop.f32.mrb[186].mxu0  ;;  %v7453_v11 = vsel %vm7333_vm5, %v7224_v32, %v19097_v17  ;;  %v7644_v17 = vsel %vm7526_vm6, %v7451_v19, %v19123_v54 }
 0x450   :  { %v19191_v46 = vpop.permute.xlu1 %6566  ;;  %v19193_v29 = vpop.f32.mrb[187].mxu0  ;;  %v5962_v40 = vmax.f32 %v5818_v48, 0.0  ;;  %v6107_v58 = vpack.c.bf16 %v5963_v59, %v5963_v59  ;;  %v5865_v59 = vmax.f32 %v5721_v56, 0.0 }
 0x451   :  { %21266 = vst [vmem:[#allocation53_spill] sm:$0xff] %v19178_v12  ;;  %14601 = vmatprep.mubr.msk.bf16.mxu1 %vm8138_vm8, %v19178_v12  ;;  %v19197_v26 = vpop.permute.xlu0 %6364 }
 0x452   :  { %6584 = vrot.lane.b32.xlu0 %v6104_v30, %s15908_s29  ;;  %6382 = vrot.lane.b32.xlu1 %v6104_v30, %s15907_s24 }
 0x453   :  { %14512 = vmatmul.mubr.msk.bf16.gmra.mrb[36].mxu0 %vm2064_vm2, %v15539_v33  ;;  %v6106_v33 = vpack.c.bf16 %v5962_v40, %v5962_v40  ;;  %vm10399_vm2 = vcmask 719872  }
 0x454   :  { %v6767_v5 = vpop.permute.xlu1 %6766 }
 0x455   :  { %v6769_v41 = vpop.permute.xlu0 %6768  ;;  %v19207_v23 = vpop.f32.mrb[188].mxu0  ;;  %v7646_v57 = vsel %vm7526_vm6, %v7453_v11, %v6767_v5  ;;  %v6009_v11 = vpack.c.bf16 %v5865_v59, %v5865_v59 }
 0x456   :  { %6988 = vrot.lane.b32.xlu0 %v6104_v30, %s15910_s14  ;;  %6786 = vrot.lane.b32.xlu1 %v6104_v30, %s15909_s11  ;;  %v19214_v18 = vpop.f32.mrb[189].mxu0  ;;  %v7839_v48 = vsel %vm7719_vm7, %v7646_v57, %v6971_v44 }
 0x457   :  { %v19217_v25 = vpop.f32.mrb[190].mxu0 }
 0x458   :  { %v6363_v49 = vpop.permute.xlu1 %6362  ;;  %v19221_v0 = vpop.f32.mrb[191].mxu0 }
 0x459   :  { %v6969_v31 = vpop.permute.xlu0 %6968 }
 0x45a   :  { %v7837_v30 = vsel %vm7719_vm7, %v7644_v17, %v6969_v31  ;;  %6994 = vrot.lane.b32.xlu1 %v6107_v58, %s15910_s14  ;;  %6992 = vrot.lane.b32.xlu0 %v6106_v33, %s15910_s14  ;;  %v5866_v17 = vmax.f32 %v5722_v3, 0.0  ;;  %v7230_v31 = vsel %vm7044_vm4, %v18667_v42, %v6363_v49 }
 0x45b   :  { %v19229_v32 = vcombine.low %v7837_v30, %v7839_v48  ;;  %v7457_v42 = vsel %vm7333_vm5, %v7230_v31, %v19191_v46 }
 0x45c   :  { %v6571_v53 = vpop.permute.xlu1 %6570  ;;  %v6010_v49 = vpack.c.bf16 %v5866_v17, %v5866_v17 }
 0x45d   :  { %21267 = vst [vmem:[#allocation54_spill] sm:$0xff] %v19229_v32  ;;  %v6565_v40 = vpop.permute.xlu0 %6564  ;;  %14602 = vmatmul.mubr.msk.bf16.gmra.mrb[72].mxu1 %vm8138_vm8, %v19229_v32  ;;  %v19233_v5 = vpop.f32.mrb[192].mxu0 }
 0x45e   :  { %6656 = vrot.lane.b32.xlu0 %v16405_v61, %s15909_s11  ;;  %6790 = vrot.lane.b32.xlu1 %v6106_v33, %s15909_s11  ;;  %v19238_v54 = vpop.f32.mrb[193].mxu0  ;;  %v7227_v33 = vsel %vm7044_vm4, %v18690_v35, %v19131_v13  ;;  %v5723_v35 = vadd.f32 %v18964_v4, %v16410_v1 }
 0x45f   :  { %v19240_v44 = vpop.f32.mrb[194].mxu0  ;;  %v7455_v48 = vsel %vm7333_vm5, %v7227_v33, %v6565_v40  ;;  %v19273_v40 = vld [vmem:[%s21125_s3 + $0x68] sm:$0xff]  }
 0x460   :  { %v6975_v19 = vpop.permute.xlu1 %6974  ;;  %v19244_v57 = vpop.f32.mrb[195].mxu0  ;;  %14695 = vmatprep.subr.bf16.mxu1 %v19273_v40  ;;  %v5867_v31 = vmax.f32 %v5723_v35, 0.0 }
 0x461   :  { %v6773_v56 = vpop.permute.xlu0 %6772 }
 0x462   :  { %6660 = vrot.lane.b32.xlu0 %v6009_v11, %s15909_s11  ;;  %6458 = vrot.lane.b32.xlu1 %v6009_v11, %s15908_s29 }
 0x464   :  { %v6367_v58 = vpop.permute.xlu1 %6366 }
 0x465   :  { %v6569_v30 = vpop.permute.xlu0 %6568  ;;  %v19253_v28 = vpop.f32.mrb[196].mxu0 }
 0x466   :  { %6860 = vrot.lane.b32.xlu0 %v16465_v14, %s15910_s14  ;;  %6658 = vrot.lane.b32.xlu1 %v16465_v14, %s15909_s11  ;;  %v19260_v59 = vpop.f32.mrb[197].mxu0  ;;  %v7648_v14 = vsel %vm7526_vm6, %v7455_v48, %v6769_v41  ;;  %v7233_v41 = vsel %vm7044_vm4, %v18759_v27, %v19197_v26  ;;  %v7236_v48 = vsel %vm7044_vm4, %v18721_v51, %v6367_v58 }
 0x467   :  { %v19262_v3 = vpop.f32.mrb[198].mxu0  ;;  %v7461_v26 = vsel %vm7333_vm5, %v7236_v48, %v6571_v53  ;;  %v6011_v58 = vpack.c.bf16 %v5867_v31, %v5867_v31 }
 0x468   :  { %v6771_v13 = vpop.permute.xlu1 %6770  ;;  %v19268_v32 = vpop.f32.mrb[199].mxu0 }
 0x469   :  { %v6973_v33 = vpop.permute.xlu0 %6972  ;;  %v7650_v12 = vsel %vm7526_vm6, %v7457_v42, %v6771_v13 }
 0x46a   :  { %v7841_v34 = vsel %vm7719_vm7, %v7648_v14, %v6973_v33  ;;  %v7843_v1 = vsel %vm7719_vm7, %v7650_v12, %v6975_v19  ;;  %6864 = vrot.lane.b32.xlu0 %v6010_v49, %s15910_s14  ;;  %6662 = vrot.lane.b32.xlu1 %v6010_v49, %s15909_s11  ;;  %v7459_v12 = vsel %vm7333_vm5, %v7233_v41, %v6569_v30 }
 0x46b   :  { %v19281_v46 = vcombine.low %v7841_v34, %v7843_v1  ;;  %v7652_v33 = vsel %vm7526_vm6, %v7459_v12, %v6773_v56 }
 0x46c   :  { %v6979_v17 = vpop.permute.xlu1 %6978 }
 0x46d   :  { %21268 = vst [vmem:[#allocation55_spill] sm:$0xff] %v19281_v46  ;;  %v14421_v42 = vpop.f32.mrb[200].mxu0  ;;  %14605 = vmatprep.mubr.msk.bf16.mxu1 %vm8138_vm8, %v19281_v46  ;;  %v6977_v13 = vpop.permute.xlu0 %6976 }
 0x46e   :  { %v5491_v34 = vmax.f32 %v19100_v39, %v14421_v42  ;;  %6862 = vrot.lane.b32.xlu1 %v6009_v11, %s15910_s14  ;;  %v4794_v19 = vpop.f32.mrb[201].mxu0  ;;  %v7845_v11 = vsel %vm7719_vm7, %v7652_v33, %v6977_v13 }
 0x46f   :  { %v5489_v35 = vmax.f32 %v19106_v24, %v4794_v19  ;;  %v14422_v49 = vpop.f32.mrb[202].mxu0 }
 0x470   :  { %v5492_v27 = vmax.f32 %v19113_v47, %v14422_v49  ;;  %v6775_v51 = vpop.permute.xlu1 %6774  ;;  %v4797_v14 = vpop.f32.mrb[203].mxu0 }
 0x471   :  { %v7654_v30 = vsel %vm7526_vm6, %v7461_v26, %v6775_v51  ;;  %v5490_v39 = vmax.f32 %v19121_v21, %v4797_v14 }
 0x472   :  { %v5670_v1 = vmax.f32 %v5491_v34, %v5492_v27  ;;  %v7847_v41 = vsel %vm7719_vm7, %v7654_v30, %v6979_v17  ;;  %6866 = vrot.lane.b32.xlu1 %v6011_v58, %s15910_s14 }
 0x473   :  { %v19303_v24 = vcombine.low %v7845_v11, %v7847_v41  ;;  %v19305_v47 = vmax.f32 %v5489_v35, %v5490_v39 }
 0x474   :  { %v5821_v53 = vadd.f32 %v18964_v4, %v5670_v1  ;;  %v19326_v1 = vpop.f32.mrb[0].mxu1 }
 0x475   :  { %21269 = vst [vmem:[#allocation56_spill] sm:$0xff] %v19303_v24  ;;  %21270 = vst [vmem:[#allocation57_spill] sm:$0xff] %v19305_v47  ;;  %v14425_v31 = vpop.f32.mrb[204].mxu0  ;;  %14606 = vmatmul.mubr.msk.bf16.gmra.mrb[76].mxu1 %vm8138_vm8, %v19303_v24 }
 0x476   :  { %v5965_v56 = vmax.f32 %v5821_v53, 0.0  ;;  %v5495_v21 = vmax.f32 %v19133_v7, %v14425_v31  ;;  %v4810_v48 = vpop.f32.mrb[205].mxu0 }
 0x477   :  { %v5493_v42 = vmax.f32 %v19139_v36, %v4810_v48  ;;  %v14426_v12 = vpop.f32.mrb[206].mxu0 }
 0x478   :  { %v19312_v17 = vpack.c.bf16 %v5965_v56, %v5965_v56  ;;  %v5496_v34 = vmax.f32 %v19146_v55, %v14426_v12  ;;  %v4813_v19 = vpop.f32.mrb[207].mxu0 }
 0x479   :  { %v5494_v13 = vmax.f32 %v19153_v43, %v4813_v19 }
 0x47a   :  { %21271 = vst [vmem:[#allocation58_spill] sm:$0xff] %v19312_v17  ;;  %v5672_v35 = vmax.f32 %v5495_v21, %v5496_v34  ;;  %6384 = vrot.lane.b32.xlu0 %v19312_v17, %s15907_s24 }
 0x47b   :  { %v5671_v49 = vmax.f32 %v5493_v42, %v5494_v13 }
 0x47c   :  { %v5823_v27 = vadd.f32 %v18964_v4, %v5672_v35 }
 0x47d   :  { %v5822_v7 = vadd.f32 %v18964_v4, %v5671_v49  ;;  %v14429_v26 = vpop.f32.mrb[208].mxu0 }
 0x47e   :  { %v5967_v51 = vmax.f32 %v5823_v27, 0.0  ;;  %v5499_v36 = vmax.f32 %v19167_v38, %v14429_v26  ;;  %v4826_v58 = vpop.f32.mrb[209].mxu0  ;;  %v19334_v38 = vpop.f32.mrb[1].mxu1 }
 0x47f   :  { %v5966_v14 = vmax.f32 %v5822_v7, 0.0  ;;  %v5497_v55 = vmax.f32 %v19176_v16, %v4826_v58  ;;  %v14430_v33 = vpop.f32.mrb[210].mxu0  ;;  %v19336_v31 = vpop.f32.mrb[2].mxu1 }
 0x480   :  { %v19322_v30 = vpack.c.bf16 %v5967_v51, %v5967_v51  ;;  %v5500_v43 = vmax.f32 %v19183_v15, %v14430_v33  ;;  %v4829_v39 = vpop.f32.mrb[211].mxu0  ;;  %v19339_v56 = vpop.f32.mrb[3].mxu1 }
 0x481   :  { %v5498_v11 = vmax.f32 %v19193_v29, %v4829_v39  ;;  %v19328_v41 = vpack.c.bf16 %v5966_v14, %v5966_v14  ;;  %v19352_v7 = vpop.f32.mrb[4].mxu1 }
 0x482   :  { %21272 = vst [vmem:[#allocation59_spill] sm:$0xff] %v19322_v30  ;;  %v5674_v53 = vmax.f32 %v5499_v36, %v5500_v43  ;;  %6590 = vrot.lane.b32.xlu1 %v19322_v30, %s15908_s29  ;;  %6388 = vrot.lane.b32.xlu0 %v19322_v30, %s15907_s24  ;;  %v19358_v51 = vpop.f32.mrb[5].mxu1 }
 0x483   :  { %21273 = vst [vmem:[#allocation60_spill] sm:$0xff] %v19328_v41  ;;  %v5673_v16 = vmax.f32 %v5497_v55, %v5498_v11  ;;  %v19360_v36 = vpop.f32.mrb[6].mxu1 }
 0x484   :  { %v5825_v15 = vadd.f32 %v18964_v4, %v5674_v53  ;;  %v19362_v58 = vpop.f32.mrb[7].mxu1 }
 0x485   :  { %v14433_v29 = vpop.f32.mrb[212].mxu0  ;;  %v5824_v48 = vadd.f32 %v18964_v4, %v5673_v16 }
 0x486   :  { %v5969_v21 = vmax.f32 %v5825_v15, 0.0  ;;  %6792 = vrot.lane.b32.xlu0 %v19322_v30, %s15909_s11  ;;  %6386 = vrot.lane.b32.xlu1 %v19328_v41, %s15907_s24  ;;  %v5503_v42 = vmax.f32 %v19207_v23, %v14433_v29  ;;  %v4842_v12 = vpop.f32.mrb[213].mxu0  ;;  %v19377_v29 = vpop.f32.mrb[8].mxu1 }
 0x487   :  { %v5501_v34 = vmax.f32 %v19214_v18, %v4842_v12  ;;  %v14434_v19 = vpop.f32.mrb[214].mxu0  ;;  %v5968_v26 = vmax.f32 %v5824_v48, 0.0  ;;  %v19383_v48 = vpop.f32.mrb[9].mxu1 }
 0x488   :  { %v19348_v13 = vpack.c.bf16 %v5969_v21, %v5969_v21  ;;  %v5504_v35 = vmax.f32 %v19217_v25, %v14434_v19  ;;  %v4845_v49 = vpop.f32.mrb[215].mxu0 }
 0x489   :  { %v5502_v27 = vmax.f32 %v19221_v0, %v4845_v49  ;;  %v19364_v14 = vpack.c.bf16 %v5968_v26, %v5968_v26 }
 0x48a   :  { %21274 = vst [vmem:[#allocation61_spill] sm:$0xff] %v19348_v13  ;;  %6588 = vrot.lane.b32.xlu0 %v19328_v41, %s15908_s29  ;;  %6594 = vrot.lane.b32.xlu1 %v19348_v13, %s15908_s29  ;;  %v5676_v23 = vmax.f32 %v5503_v42, %v5504_v35  ;;  %v19385_v42 = vpop.f32.mrb[10].mxu1 }
 0x48b   :  { %v5675_v18 = vmax.f32 %v5501_v34, %v5502_v27  ;;  %21275 = vst [vmem:[#allocation62_spill] sm:$0xff] %v19364_v14  ;;  %v19391_v34 = vpop.f32.mrb[11].mxu1 }
 0x48c   :  { %v5827_v0 = vadd.f32 %v18964_v4, %v5676_v23  ;;  %v19373_v11 = vpop.permute.xlu0 %6368 }
 0x48d   :  { %v14437_v25 = vpop.f32.mrb[216].mxu0  ;;  %v5826_v35 = vadd.f32 %v18964_v4, %v5675_v18 }
 0x48e   :  { %6796 = vrot.lane.b32.xlu0 %v19348_v13, %s15909_s11  ;;  %6998 = vrot.lane.b32.xlu1 %v19348_v13, %s15910_s14  ;;  %v5507_v55 = vmax.f32 %v19233_v5, %v14437_v25  ;;  %v4858_v33 = vpop.f32.mrb[217].mxu0  ;;  %v5971_v21 = vmax.f32 %v5827_v0, 0.0 }
 0x48f   :  { %v5505_v43 = vmax.f32 %v19238_v54, %v4858_v33  ;;  %v14438_v39 = vpop.f32.mrb[218].mxu0 }
 0x490   :  { %v5508_v53 = vmax.f32 %v19240_v44, %v14438_v39  ;;  %v4861_v16 = vpop.f32.mrb[219].mxu0  ;;  %v19393_v19 = vpack.c.bf16 %v5971_v21, %v5971_v21  ;;  %v5970_v39 = vmax.f32 %v5826_v35, 0.0  ;;  %v5808_v21 = vadd.f32 %v18964_v4, %v18958_v20 }
 0x491   :  { %v5506_v15 = vmax.f32 %v19244_v57, %v4861_v16 }
 0x492   :  { %6392 = vrot.lane.b32.xlu0 %v19348_v13, %s15907_s24  ;;  %6390 = vrot.lane.b32.xlu1 %v19364_v14, %s15907_s24  ;;  %v5678_v5 = vmax.f32 %v5507_v55, %v5508_v53  ;;  %21276 = vst [vmem:[#allocation63_spill] sm:$0xff] %v19393_v19 }
 0x493   :  { %v5677_v54 = vmax.f32 %v5505_v43, %v5506_v15  ;;  %v19403_v43 = vpop.f32.mrb[12].mxu1 }
 0x494   :  { %v19387_v12 = vpop.permute.xlu1 %6574  ;;  %v19389_v44 = vpop.permute.xlu0 %6372 }
 0x495   :  { %v14441_v57 = vpop.f32.mrb[220].mxu0 }
 0x496   :  { %6592 = vrot.lane.b32.xlu0 %v19364_v14, %s15908_s29  ;;  %6794 = vrot.lane.b32.xlu1 %v19364_v14, %s15909_s11  ;;  %v5511_v49 = vmax.f32 %v19253_v28, %v14441_v57  ;;  %v4874_v27 = vpop.f32.mrb[221].mxu0 }
 0x497   :  { %v5509_v26 = vmax.f32 %v19260_v59, %v4874_v27  ;;  %v14442_v23 = vpop.f32.mrb[222].mxu0  ;;  %v19412_v59 = vpop.f32.mrb[13].mxu1  ;;  %v19424_v27 = vpack.c.bf16 %v5970_v39, %v5970_v39 }
 0x498   :  { %v6777_v25 = vpop.permute.xlu0 %6776  ;;  %v6371_v0 = vpop.permute.xlu1 %6370  ;;  %v5512_v55 = vmax.f32 %v19262_v3, %v14442_v23  ;;  %21277 = vst [vmem:[#allocation64_spill] sm:$0xff] %v19412_v59 }
 0x499   :  { %v4877_v33 = vpop.f32.mrb[223].mxu0  ;;  %v19414_v53 = vpop.f32.mrb[14].mxu1  ;;  %21280 = vst [vmem:[#allocation67_spill] sm:$0xff] %v19424_v27 }
 0x49a   :  { %6996 = vrot.lane.b32.xlu0 %v19364_v14, %s15910_s14  ;;  %7002 = vrot.lane.b32.xlu1 %v19393_v19, %s15910_s14  ;;  %v19409_v18 = vmax.f32 %v5511_v49, %v5512_v55  ;;  %v5510_v28 = vmax.f32 %v19268_v32, %v4877_v33  ;;  %21278 = vst [vmem:[#allocation65_spill] sm:$0xff] %v19414_v53  ;;  %v19422_v35 = vpop.f32.mrb[15].mxu1  ;;  %v5952_v55 = vmax.f32 %v5808_v21, 0.0 }
 0x49b   :  { %21279 = vst [vmem:[#allocation66_spill] sm:$0xff] %v19422_v35  ;;  %v5829_v32 = vadd.f32 %v18964_v4, %v5678_v5  ;;  %v19439_v39 = vpop.f32.mrb[16].mxu1 }
 0x49c   :  { %v6573_v16 = vpop.permute.xlu0 %6572  ;;  %v19416_v3 = vpop.permute.xlu1 %6578  ;;  %v5679_v15 = vmax.f32 %v5509_v26, %v5510_v28  ;;  %21281 = vst [vmem:[#allocation68_spill] sm:$0xff] %v19439_v39  ;;  %v6096_v13 = vpack.c.bf16 %v5952_v55, %v5952_v55 }
 0x49d   :  { %v19420_v57 = vpop.f32.mrb[224].mxu0  ;;  %v5973_v28 = vmax.f32 %v5829_v32, 0.0  ;;  %v19445_v5 = vpop.f32.mrb[17].mxu1  ;;  %v7242_v32 = vsel %vm7044_vm4, %v18980_v22, %v6371_v0 }
 0x49e   :  { %6396 = vrot.lane.b32.xlu0 %v19393_v19, %s15907_s24  ;;  %6598 = vrot.lane.b32.xlu1 %v19393_v19, %s15908_s29  ;;  %v19431_v49 = vpop.f32.mrb[225].mxu0  ;;  %21282 = vst [vmem:[#allocation69_spill] sm:$0xff] %v19445_v5  ;;  %v19447_v14 = vpop.f32.mrb[18].mxu1  ;;  %v7239_v55 = vsel %vm7044_vm4, %v6096_v13, %v19373_v11  ;;  %v7465_v0 = vsel %vm7333_vm5, %v7242_v32, %v19387_v12 }
 0x49f   :  { %v19433_v26 = vpop.f32.mrb[226].mxu0  ;;  %21283 = vst [vmem:[#allocation70_spill] sm:$0xff] %v19447_v14  ;;  %v19453_v17 = vpop.f32.mrb[19].mxu1  ;;  %v6117_v47 = vpack.c.bf16 %v5973_v28, %v5973_v28  ;;  %v7463_v22 = vsel %vm7333_vm5, %v7239_v55, %v6573_v16 }
 0x4a0   :  { %v19435_v23 = vpop.permute.xlu0 %6780  ;;  %v6983_v20 = vpop.permute.xlu1 %6982  ;;  %21284 = vst [vmem:[#allocation71_spill] sm:$0xff] %v19453_v17  ;;  %v7656_v16 = vsel %vm7526_vm6, %v7463_v22, %v6777_v25 }
 0x4a1   :  { %v19437_v33 = vpop.f32.mrb[227].mxu0  ;;  %v19473_v37 = vpop.f32.mrb[20].mxu1 }
 0x4a2   :  { %6800 = vrot.lane.b32.xlu0 %v19393_v19, %s15909_s11  ;;  %6798 = vrot.lane.b32.xlu1 %v19424_v27, %s15909_s11  ;;  %v5828_v19 = vadd.f32 %v18964_v4, %v5677_v54  ;;  %21285 = vst [vmem:[#allocation72_spill] sm:$0xff] %v19473_v37  ;;  %v19479_v13 = vpop.f32.mrb[21].mxu1 }
 0x4a3   :  { %21286 = vst [vmem:[#allocation73_spill] sm:$0xff] %v19479_v13  ;;  %v19481_v11 = vpop.f32.mrb[22].mxu1 }
 0x4a4   :  { %v19449_v30 = vpop.permute.xlu0 %6376  ;;  %v6375_v41 = vpop.permute.xlu1 %6374  ;;  %v5972_v17 = vmax.f32 %v5828_v19, 0.0  ;;  %21287 = vst [vmem:[#allocation74_spill] sm:$0xff] %v19481_v11  ;;  %v5830_v11 = vadd.f32 %v18964_v4, %v5679_v15  ;;  %v7245_v15 = vsel %vm7044_vm4, %v19007_v63, %v19389_v44 }
 0x4a5   :  { %v19451_v21 = vpop.f32.mrb[228].mxu0 }
 0x4a6   :  { %7000 = vrot.lane.b32.xlu0 %v19424_v27, %s15910_s14  ;;  %6394 = vrot.lane.b32.xlu1 %v19424_v27, %s15907_s24  ;;  %v19462_v24 = vpop.f32.mrb[229].mxu0 }
 0x4a7   :  { %v19464_v46 = vpop.f32.mrb[230].mxu0 }
 0x4a8   :  { %v6577_v10 = vpop.permute.xlu0 %6576  ;;  %v6779_v9 = vpop.permute.xlu1 %6778 }
 0x4a9   :  { %v19471_v28 = vpop.f32.mrb[231].mxu0  ;;  %v7658_v54 = vsel %vm7526_vm6, %v7465_v0, %v6779_v9  ;;  %v19488_v9 = vpop.f32.mrb[23].mxu1  ;;  %v6116_v0 = vpack.c.bf16 %v5972_v17, %v5972_v17  ;;  %v5974_v17 = vmax.f32 %v5830_v11, 0.0 }
 0x4aa   :  { %6596 = vrot.lane.b32.xlu0 %v19424_v27, %s15908_s29  ;;  %6602 = vrot.lane.b32.xlu1 %v6117_v47, %s15908_s29  ;;  %v7851_v37 = vsel %vm7719_vm7, %v7658_v54, %v6983_v20  ;;  %21288 = vst [vmem:[#allocation75_spill] sm:$0xff] %v19488_v9 }
 0x4ac   :  { %v6981_v55 = vpop.permute.xlu0 %6980  ;;  %v6987_v12 = vpop.permute.xlu1 %6986 }
 0x4ad   :  { %v7849_v32 = vsel %vm7719_vm7, %v7656_v16, %v6981_v55  ;;  %v19486_v19 = vpop.f32.mrb[232].mxu0 }
 0x4ae   :  { %v19490_v27 = vcombine.low %v7849_v32, %v7851_v37  ;;  %6804 = vrot.lane.b32.xlu0 %v6117_v47, %s15909_s11  ;;  %7006 = vrot.lane.b32.xlu1 %v6117_v47, %s15910_s14  ;;  %v19495_v25 = vpop.f32.mrb[233].mxu0  ;;  %v7248_v37 = vsel %vm7044_vm4, %v18995_v6, %v6375_v41  ;;  %v5831_v47 = vadd.f32 %v18964_v4, %v19409_v18 }
 0x4af   :  { %v19497_v22 = vpop.f32.mrb[234].mxu0  ;;  %v7469_v9 = vsel %vm7333_vm5, %v7248_v37, %v19416_v3  ;;  %v6118_v18 = vpack.c.bf16 %v5974_v17, %v5974_v17 }
 0x4b0   :  { %21289 = vst [vmem:[#allocation76_spill] sm:$0xff] %v19490_v27  ;;  %14609 = vmatprep.mubr.msk.bf16.mxu1 %vm8138_vm8, %v19490_v27  ;;  %v19501_v20 = vpop.permute.xlu0 %6380  ;;  %v6583_v54 = vpop.permute.xlu1 %6582  ;;  %v7467_v27 = vsel %vm7333_vm5, %v7245_v15, %v6577_v10  ;;  %v5975_v41 = vmax.f32 %v5831_v47, 0.0 }
 0x4b1   :  { %v19503_v16 = vpop.f32.mrb[235].mxu0  ;;  %v7660_v10 = vsel %vm7526_vm6, %v7467_v27, %v19435_v23 }
 0x4b2   :  { %6600 = vrot.lane.b32.xlu0 %v6116_v0, %s15908_s29  ;;  %6398 = vrot.lane.b32.xlu1 %v6116_v0, %s15907_s24 }
 0x4b4   :  { %v6785_v55 = vpop.permute.xlu0 %6784  ;;  %v6783_v32 = vpop.permute.xlu1 %6782 }
 0x4b5   :  { %v19517_v6 = vpop.f32.mrb[236].mxu0  ;;  %v7662_v11 = vsel %vm7526_vm6, %v7469_v9, %v6783_v32  ;;  %v6119_v9 = vpack.c.bf16 %v5975_v41, %v5975_v41 }
 0x4b6   :  { %7004 = vrot.lane.b32.xlu0 %v6116_v0, %s15910_s14  ;;  %6802 = vrot.lane.b32.xlu1 %v6116_v0, %s15909_s11  ;;  %v19522_v13 = vpop.f32.mrb[237].mxu0  ;;  %v7855_v37 = vsel %vm7719_vm7, %v7662_v11, %v6987_v12 }
 0x4b7   :  { %v19524_v63 = vpop.f32.mrb[238].mxu0 }
 0x4b8   :  { %v6985_v44 = vpop.permute.xlu0 %6984  ;;  %v6379_v15 = vpop.permute.xlu1 %6378 }
 0x4b9   :  { %v7853_v3 = vsel %vm7719_vm7, %v7660_v10, %v6985_v44  ;;  %v19530_v47 = vpop.f32.mrb[239].mxu0  ;;  %v5712_v10 = vadd.f32 %v18964_v4, %v16302_v45 }
 0x4ba   :  { %v19532_v17 = vcombine.low %v7853_v3, %v7855_v37  ;;  %7008 = vrot.lane.b32.xlu0 %v6118_v18, %s15910_s14  ;;  %6806 = vrot.lane.b32.xlu1 %v6118_v18, %s15909_s11  ;;  %v7251_v18 = vsel %vm7044_vm4, %v19046_v8, %v19449_v30 }
 0x4bc   :  { %21290 = vst [vmem:[#allocation77_spill] sm:$0xff] %v19532_v17  ;;  %v6581_v0 = vpop.permute.xlu0 %6580  ;;  %14610 = vmatmul.mubr.msk.bf16.gmra.mrb[80].mxu1 %vm8138_vm8, %v19532_v17  ;;  %v6587_v27 = vpop.permute.xlu1 %6586  ;;  %v5856_v17 = vmax.f32 %v5712_v10, 0.0 }
 0x4bd   :  { %v19538_v23 = vpop.f32.mrb[240].mxu0  ;;  %v7471_v14 = vsel %vm7333_vm5, %v7251_v18, %v6581_v0 }
 0x4be   :  { %7010 = vrot.lane.b32.xlu1 %v6119_v9, %s15910_s14  ;;  %v19541_v32 = vpop.f32.mrb[241].mxu0  ;;  %v7254_v9 = vsel %vm7044_vm4, %v19020_v62, %v6379_v15  ;;  %v7664_v45 = vsel %vm7526_vm6, %v7471_v14, %v6785_v55  ;;  %v6000_v30 = vpack.c.bf16 %v5856_v17, %v5856_v17  ;;  %v21291_v14 = vld [vmem:[#allocation2_spill] sm:$0xff] }
 0x4bf   :  { %v19543_v12 = vpop.f32.mrb[242].mxu0  ;;  %v7473_v53 = vsel %vm7333_vm5, %v7254_v9, %v6583_v54  ;;  %v7050_v55 = vsel %vm7044_vm4, %v21291_v14, %v16830_v50  ;;  %v21292_v54 = vld [vmem:[#allocation11_spill] sm:$0xff]  ;;  %v21297_v14 = vld [vmem:[#allocation18_spill] sm:$0xff] }
 0x4c0   :  { %v6789_v41 = vpop.permute.xlu0 %6788  ;;  %v6991_v11 = vpop.permute.xlu1 %6990  ;;  %v7047_v0 = vsel %vm7044_vm4, %v6000_v30, %v16782_v60 }
 0x4c1   :  { %v19547_v44 = vpop.f32.mrb[243].mxu0  ;;  %v7335_v17 = vsel %vm7333_vm5, %v7047_v0, %v21292_v54  ;;  %v21295_v0 = vld [vmem:[#allocation16_spill] sm:$0xff] }
 0x4c4   :  { %v6585_v3 = vpop.permute.xlu0 %6584  ;;  %v6383_v37 = vpop.permute.xlu1 %6382 }
 0x4c5   :  { %v19555_v5 = vpop.f32.mrb[244].mxu0 }
 0x4c6   :  { %v19557_v39 = vpop.f32.mrb[245].mxu0 }
 0x4c7   :  { %v19559_v35 = vpop.f32.mrb[246].mxu0 }
 0x4c8   :  { %v6989_v4 = vpop.permute.xlu0 %6988  ;;  %v6787_v8 = vpop.permute.xlu1 %6786 }
 0x4c9   :  { %v7857_v10 = vsel %vm7719_vm7, %v7664_v45, %v6989_v4  ;;  %v7666_v59 = vsel %vm7526_vm6, %v7473_v53, %v6787_v8  ;;  %v19565_v62 = vpop.f32.mrb[247].mxu0  ;;  %v7257_v53 = vsel %vm7044_vm4, %v19115_v52, %v19501_v20  ;;  %v21293_v8 = vld [vmem:[#allocation9_spill] sm:$0xff] }
 0x4ca   :  { %v7859_v15 = vsel %vm7719_vm7, %v7666_v59, %v6991_v11  ;;  %v7260_v59 = vsel %vm7044_vm4, %v19077_v2, %v6383_v37  ;;  %v7475_v11 = vsel %vm7333_vm5, %v7257_v53, %v6585_v3  ;;  %v7337_v30 = vsel %vm7333_vm5, %v7050_v55, %v21293_v8  ;;  %v21296_v2 = vld [vmem:[#allocation3_spill] sm:$0xff] }
 0x4cb   :  { %v19570_v18 = vcombine.low %v7857_v10, %v7859_v15  ;;  %v21294_v10 = vld [vmem:[#allocation10_spill] sm:$0xff]  ;;  %v7056_v37 = vsel %vm7044_vm4, %v21296_v2, %v21295_v0  ;;  %v7530_v54 = vsel %vm7526_vm6, %v7337_v30, %v21297_v14  ;;  %v21298_v55 = vld [vmem:[#allocation19_spill] sm:$0xff]  ;;  %v21299_v14 = vld [vmem:[#allocation8_spill] sm:$0xff] }
 0x4cc   :  { %v6995_v9 = vpop.permute.xlu1 %6994  ;;  %v6993_v45 = vpop.permute.xlu0 %6992  ;;  %v7528_v15 = vsel %vm7526_vm6, %v7335_v17, %v21294_v10  ;;  %v7668_v17 = vsel %vm7526_vm6, %v7475_v11, %v6789_v41 }
 0x4cd   :  { %14613 = vmatprep.mubr.msk.bf16.mxu1 %vm8138_vm8, %v19570_v18  ;;  %v14469_v60 = vpop.f32.mrb[248].mxu0  ;;  %v7721_v8 = vsel %vm7719_vm7, %v7528_v15, %v21298_v55  ;;  %v7861_v10 = vsel %vm7719_vm7, %v7668_v17, %v6993_v45  ;;  %v21302_v15 = vld [vmem:[#allocation12_spill] sm:$0xff] }
 0x4ce   :  { %v5515_v50 = vmax.f32 %v19420_v57, %v14469_v60  ;;  %v4986_v4 = vpop.f32.mrb[249].mxu0  ;;  %v7477_v57 = vsel %vm7333_vm5, %v7260_v59, %v6587_v27  ;;  %v21300_v27 = vld [vmem:[#allocation4_spill] sm:$0xff]  ;;  %v7341_v41 = vsel %vm7333_vm5, %v7056_v37, %v21302_v15 }
 0x4cf   :  { %v5513_v52 = vmax.f32 %v19431_v49, %v4986_v4  ;;  %v14470_v20 = vpop.f32.mrb[250].mxu0  ;;  %v7053_v59 = vsel %vm7044_vm4, %v21300_v27, %v21299_v14  ;;  %v21307_v27 = vld [vmem:[#allocation20_spill] sm:$0xff] }
 0x4d0   :  { %v6657_v3 = vpop.permute.xlu0 %6656  ;;  %v6791_v53 = vpop.permute.xlu1 %6790  ;;  %v5516_v60 = vmax.f32 %v19433_v26, %v14470_v20  ;;  %v21301_v26 = vld [vmem:[#allocation14_spill] sm:$0xff] }
 0x4d1   :  { %v7670_v49 = vsel %vm7526_vm6, %v7477_v57, %v6791_v53  ;;  %v4989_v4 = vpop.f32.mrb[251].mxu0  ;;  %v7723_v20 = vsel %vm7719_vm7, %v7530_v54, %v21301_v26  ;;  %v21303_v57 = vld [vmem:[#allocation17_spill] sm:$0xff]  ;;  %v21304_v54 = vld [vmem:[#allocation24_spill] sm:$0xff] }
 0x4d2   :  { %v7863_v0 = vsel %vm7719_vm7, %v7670_v49, %v6995_v9  ;;  %v5682_v2 = vmax.f32 %v5515_v50, %v5516_v60  ;;  %v5514_v30 = vmax.f32 %v19437_v33, %v4989_v4  ;;  %v7339_v45 = vsel %vm7333_vm5, %v7053_v59, %v21303_v57  ;;  %v19619_v33 = vld [vmem:[%s21124_s2] ss:$0 sm:$0xff] }
 0x4d3   :  { %v19612_v11 = vcombine.low %v7861_v10, %v7863_v0  ;;  %v12982_v53 = vcombine.low %v7721_v8, %v7723_v20  ;;  %v7534_v37 = vsel %vm7526_vm6, %v7341_v41, %v21304_v54  ;;  %v21305_v10 = vld [vmem:[#allocation13_spill] sm:$0xff] }
 0x4d4   :  { %v5833_v9 = vadd.f32 %v19619_v33, %v5682_v2  ;;  %v19622_v50 = vpop.permute.xlu1 %6458  ;;  %v19624_v60 = vmax.f32 %v5513_v52, %v5514_v30  ;;  %v6661_v8 = vpop.permute.xlu0 %6660  ;;  %v7532_v0 = vsel %vm7526_vm6, %v7339_v45, %v21305_v10  ;;  %v21306_v30 = vld [vmem:[#allocation23_spill] sm:$0xff]  ;;  %v7727_v59 = vsel %vm7719_vm7, %v7534_v37, %v21307_v27  ;;  %v15548_v45 = vld [vmem:[%s21125_s3 + $0x70] sm:$0xff]  }
 0x4d5   :  { %v14473_v55 = vpop.f32.mrb[252].mxu0  ;;  %14614 = vmatmul.mubr.msk.bf16.gmra.mrb[84].mxu1 %vm8138_vm8, %v19612_v11  ;;  %v7725_v14 = vsel %vm7719_vm7, %v7532_v0, %v21306_v30  ;;  %v21313_v0 = vld [vmem:[#allocation25_spill] sm:$0xff] }
 0x4d6   :  { %v5977_v17 = vmax.f32 %v5833_v9, 0.0  ;;  %v5519_v49 = vmax.f32 %v19451_v21, %v14473_v55  ;;  %v5002_v4 = vpop.f32.mrb[253].mxu0  ;;  %14631 = vmatprep.mubr.msk.bf16.mxu1 %vm8138_vm8, %v12982_v53  ;;  %v21309_v53 = vld [vmem:[#allocation26_spill] sm:$0xff]  ;;  %v21310_v9 = vld [vmem:[#allocation5_spill] sm:$0xff] }
 0x4d7   :  { %v5517_v52 = vmax.f32 %v19462_v24, %v5002_v4  ;;  %v14474_v2 = vpop.f32.mrb[254].mxu0  ;;  %v12983_v24 = vcombine.low %v7725_v14, %v7727_v59  ;;  %v7062_v54 = vsel %vm7044_vm4, %v21310_v9, %v21309_v53  ;;  %v21312_v4 = vld [vmem:[#allocation6_spill] sm:$0xff] }
 0x4d8   :  { %v19639_v26 = vpack.c.bf16 %v5977_v17, %v5977_v17  ;;  %v5520_v20 = vmax.f32 %v19464_v46, %v14474_v2  ;;  %v6659_v21 = vpop.permute.xlu1 %6658  ;;  %v5005_v15 = vpop.f32.mrb[255].mxu0 }
 0x4d9   :  { %v5518_v57 = vmax.f32 %v19471_v28, %v5005_v15  ;;  %v6861_v46 = vpop.permute.xlu0 %6860 }
 0x4da   :  { %21308 = vst [vmem:[#allocation2_spill] sm:$0xff] %v19639_v26  ;;  %v5684_v41 = vmax.f32 %v5519_v49, %v5520_v20  ;;  %6400 = vrot.lane.b32.xlu0 %v19639_v26, %s15907_s24  ;;  %v21311_v49 = vld [vmem:[#allocation15_spill] sm:$0xff] }
 0x4db   :  { %v5683_v55 = vmax.f32 %v5517_v52, %v5518_v57  ;;  %v7059_v28 = vsel %vm7044_vm4, %v21312_v4, %v21311_v49  ;;  %v21314_v52 = vld [vmem:[#allocation21_spill] sm:$0xff]  ;;  %v21315_v20 = vld [vmem:[#allocation7_spill] sm:$0xff]  ;;  %v21316_v57 = vld [vmem:[#allocation22_spill] sm:$0xff] }
 0x4dc   :  { %v5835_v37 = vadd.f32 %v19619_v33, %v5684_v41  ;;  %v6663_v17 = vpop.permute.xlu1 %6662  ;;  %v7343_v2 = vsel %vm7333_vm5, %v7059_v28, %v21313_v0  ;;  %v7065_v15 = vsel %vm7044_vm4, %v21315_v20, %v21314_v52  ;;  %v21318_v28 = vld [vmem:[#allocation28_spill] sm:$0xff] }
 0x4dd   :  { %v14477_v10 = vpop.f32.mrb[0].mxu0  ;;  %14632 = vmatmul.mubr.msk.bf16.vlgmr.msra.gmra.mrb[24].mxu1 %vm8138_vm8, %v12983_v24  ;;  %v5834_v14 = vadd.f32 %v19619_v33, %v5683_v55  ;;  %v7536_v41 = vsel %vm7526_vm6, %v7343_v2, %v6657_v3  ;;  %v7345_v24 = vsel %vm7333_vm5, %v7062_v54, %v21316_v57  ;;  %v15549_v3 = vld [vmem:[%s21125_s3 + $0x78] sm:$0xff]   ;;  %v7068_v54 = vsel %vm7044_vm4, %v16405_v61, %v21318_v28  ;;  %v6865_v2 = vpop.permute.xlu0 %6864 }
 0x4de   :  { %v5979_v30 = vmax.f32 %v5835_v37, 0.0  ;;  %v5523_v27 = vmax.f32 %v19486_v19, %v14477_v10  ;;  %v5018_v59 = vpop.f32.mrb[1].mxu0  ;;  %14696 = vmatpush3.bf16.msra.mxu1 %v19273_v40  ;;  %v7538_v19 = vsel %vm7526_vm6, %v7345_v24, %v6659_v21  ;;  %v21322_v28 = vld [vmem:[#allocation29_spill] sm:$0xff] }
 0x4df   :  { %v5521_v53 = vmax.f32 %v19495_v25, %v5018_v59  ;;  %v14478_v9 = vpop.f32.mrb[2].mxu0  ;;  %14697 = vmatprep.subr.bf16.mxu1 %v15548_v45  ;;  %v5978_v55 = vmax.f32 %v5834_v14, 0.0  ;;  %v7729_v25 = vsel %vm7719_vm7, %v7536_v41, %v6861_v46  ;;  %v21320_v14 = vld [vmem:[#allocation27_spill] sm:$0xff]  ;;  %v7349_v46 = vsel %vm7333_vm5, %v7068_v54, %v19622_v50  ;;  %v15550_v41 = vld [vmem:[%s21125_s3 + $0x80] sm:$0xff]   ;;  %v15552_v54 = vld [vmem:[%s21125_s3 + $0x90] sm:$0xff]  }
 0x4e0   :  { %v19668_v37 = vpack.c.bf16 %v5979_v30, %v5979_v30  ;;  %v5524_v40 = vmax.f32 %v19497_v22, %v14478_v9  ;;  %v6863_v49 = vpop.permute.xlu1 %6862  ;;  %v5021_v4 = vpop.f32.mrb[3].mxu0  ;;  %v7347_v61 = vsel %vm7333_vm5, %v7065_v15, %v21320_v14  ;;  %v7542_v52 = vsel %vm7526_vm6, %v7349_v46, %v6663_v17  ;;  %v21324_v14 = vld [vmem:[#allocation30_spill] sm:$0xff] }
 0x4e1   :  { %v7731_v10 = vsel %vm7719_vm7, %v7538_v19, %v6863_v49  ;;  %v5522_v0 = vmax.f32 %v19503_v16, %v5021_v4  ;;  %v19681_v21 = vpack.c.bf16 %v5978_v55, %v5978_v55  ;;  %v7540_v16 = vsel %vm7526_vm6, %v7347_v61, %v6661_v8  ;;  %v15551_v4 = vld [vmem:[%s21125_s3 + $0x88] sm:$0xff]  }
 0x4e2   :  { %21317 = vst [vmem:[#allocation11_spill] sm:$0xff] %v19668_v37  ;;  %v5686_v22 = vmax.f32 %v5523_v27, %v5524_v40  ;;  %v12984_v30 = vcombine.low %v7729_v25, %v7731_v10  ;;  %6606 = vrot.lane.b32.xlu1 %v19668_v37, %s15908_s29  ;;  %6404 = vrot.lane.b32.xlu0 %v19668_v37, %s15907_s24 }
 0x4e3   :  { %21319 = vst [vmem:[#allocation9_spill] sm:$0xff] %v19681_v21  ;;  %v5685_v59 = vmax.f32 %v5521_v53, %v5522_v0  ;;  %14698 = vmatpush3.bf16.msra.mxu1 %v15548_v45  ;;  %v7733_v15 = vsel %vm7719_vm7, %v7540_v16, %v6865_v2  ;;  %v21325_v16 = vld [vmem:[#allocation31_spill] sm:$0xff] }
 0x4e4   :  { %v5837_v27 = vadd.f32 %v19619_v33, %v5686_v22  ;;  %14635 = vmatprep.mubr.msk.bf16.mxu1 %vm8138_vm8, %v12984_v30  ;;  %v6867_v20 = vpop.permute.xlu1 %6866  ;;  %14699 = vmatprep.subr.bf16.mxu1 %v15549_v3 }
 0x4e5   :  { %v7735_v50 = vsel %vm7719_vm7, %v7542_v52, %v6867_v20  ;;  %v14481_v57 = vpop.f32.mrb[4].mxu0  ;;  %v5836_v8 = vadd.f32 %v19619_v33, %v5685_v59  ;;  %v15553_v59 = vld [vmem:[%s21125_s3 + $0x98] ss:$0 sps:$4 sm:$0x33]   ;;  %v19751_v20 = vld [vmem:[%s21125_s3 + $0x9c] sm:$0xff]  }
 0x4e6   :  { %v5981_v45 = vmax.f32 %v5837_v27, 0.0  ;;  %v12985_v24 = vcombine.low %v7733_v15, %v7735_v50  ;;  %6808 = vrot.lane.b32.xlu0 %v19668_v37, %s15909_s11  ;;  %6402 = vrot.lane.b32.xlu1 %v19681_v21, %s15907_s24  ;;  %v5527_v17 = vmax.f32 %v19517_v6, %v14481_v57  ;;  %v5034_v53 = vpop.f32.mrb[5].mxu0  ;;  %v8977_v27 = vsel %vm8235_vm3, %v15553_v59, 0  ;;  %v21376_v37 = vld [vmem:[#allocation61_spill] sm:$0xff] }
 0x4e7   :  { %v5525_v9 = vmax.f32 %v19522_v13, %v5034_v53  ;;  %v14482_v19 = vpop.f32.mrb[6].mxu0  ;;  %14700 = vmatpush3.bf16.msra.mxu1 %v15549_v3  ;;  %v5980_v13 = vmax.f32 %v5836_v8, 0.0  ;;  %v21328_v8 = vld [vmem:[#allocation33_spill] sm:$0xff] }
 0x4e8   :  { %v19707_v55 = vpack.c.bf16 %v5981_v45, %v5981_v45  ;;  %14636 = vmatmul.mubr.msk.bf16.gmra.mrb[28].mxu1 %vm8138_vm8, %v12985_v24  ;;  %v5528_v40 = vmax.f32 %v19524_v63, %v14482_v19  ;;  %v5037_v49 = vpop.f32.mrb[7].mxu0  ;;  %14701 = vmatprep.subr.bf16.mxu1 %v15550_v41  ;;  %v21327_v45 = vld [vmem:[#allocation32_spill] sm:$0xff] }
 0x4e9   :  { %14639 = vmatprep.mubr.msk.bf16.mxu1 %vm8138_vm8, %v21322_v28  ;;  %v5526_v6 = vmax.f32 %v19530_v47, %v5037_v49  ;;  %v19724_v10 = vpack.c.bf16 %v5980_v13, %v5980_v13 }
 0x4ea   :  { %21321 = vst [vmem:[#allocation10_spill] sm:$0xff] %v19707_v55  ;;  %6604 = vrot.lane.b32.xlu0 %v19681_v21, %s15908_s29  ;;  %6610 = vrot.lane.b32.xlu1 %v19707_v55, %s15908_s29  ;;  %v5688_v3 = vmax.f32 %v5527_v17, %v5528_v40 }
 0x4eb   :  { %v5687_v63 = vmax.f32 %v5525_v9, %v5526_v6  ;;  %14702 = vmatpush3.bf16.msra.mxu1 %v15550_v41  ;;  %21323 = vst [vmem:[#allocation16_spill] sm:$0xff] %v19724_v10 }
 0x4ec   :  { %14703 = vmatprep.subr.bf16.mxu1 %v15551_v4  ;;  %v5839_v47 = vadd.f32 %v19619_v33, %v5688_v3  ;;  %v21331_v3 = vld [vmem:[#allocation35_spill] sm:$0xff] }
 0x4ed   :  { %v14485_v25 = vpop.f32.mrb[8].mxu0  ;;  %v5838_v41 = vadd.f32 %v19619_v33, %v5687_v63 }
 0x4ee   :  { %6812 = vrot.lane.b32.xlu0 %v19707_v55, %s15909_s11  ;;  %7014 = vrot.lane.b32.xlu1 %v19707_v55, %s15910_s14  ;;  %v5531_v0 = vmax.f32 %v19538_v23, %v14485_v25  ;;  %v5050_v2 = vpop.f32.mrb[9].mxu0  ;;  %v5983_v52 = vmax.f32 %v5839_v47, 0.0 }
 0x4ef   :  { %v5529_v22 = vmax.f32 %v19541_v32, %v5050_v2  ;;  %v14486_v30 = vpop.f32.mrb[10].mxu0  ;;  %14704 = vmatpush3.bf16.msra.mxu1 %v15551_v4  ;;  %v5982_v53 = vmax.f32 %v5838_v41, 0.0 }
 0x4f0   :  { %14640 = vmatmul.mubr.msk.bf16.gmra.mrb[32].mxu1 %vm8138_vm8, %v21324_v14  ;;  %v5532_v61 = vmax.f32 %v19543_v12, %v14486_v30  ;;  %v5053_v46 = vpop.f32.mrb[11].mxu0  ;;  %14705 = vmatprep.subr.bf16.mxu1 %v15552_v54 }
 0x4f1   :  { %14643 = vmatprep.mubr.msk.bf16.mxu1 %vm8138_vm8, %v21325_v16  ;;  %v5530_v23 = vmax.f32 %v19547_v44, %v5053_v46  ;;  %v19753_v44 = vpack.c.bf16 %v5983_v52, %v5983_v52  ;;  %v19773_v49 = vpack.c.bf16 %v5982_v53, %v5982_v53  ;;  %v21334_v46 = vld [vmem:[#allocation37_spill] sm:$0xff] }
 0x4f2   :  { %6408 = vrot.lane.b32.xlu0 %v19707_v55, %s15907_s24  ;;  %6406 = vrot.lane.b32.xlu1 %v19724_v10, %s15907_s24  ;;  %v5690_v32 = vmax.f32 %v5531_v0, %v5532_v61 }
 0x4f3   :  { %v5689_v12 = vmax.f32 %v5529_v22, %v5530_v23  ;;  %14706 = vmatpush3.bf16.msra.mxu1 %v15552_v54  ;;  %21326 = vst [vmem:[#allocation3_spill] sm:$0xff] %v19753_v44  ;;  %21329 = vst [vmem:[#allocation18_spill] sm:$0xff] %v19773_v49 }
 0x4f4   :  { %15219 = vmatprep.subr.msk.bf16.mxu1 %vm8235_vm3, %v15553_v59  ;;  %v5841_v4 = vadd.f32 %v19619_v33, %v5690_v32 }
 0x4f5   :  { %v5840_v22 = vadd.f32 %v19619_v33, %v5689_v12 }
 0x4f6   :  { %6608 = vrot.lane.b32.xlu0 %v19724_v10, %s15908_s29  ;;  %6810 = vrot.lane.b32.xlu1 %v19724_v10, %s15909_s11  ;;  %v14489_v15 = vpop.f32.mrb[12].mxu0  ;;  %v5985_v54 = vmax.f32 %v5841_v4, 0.0 }
 0x4f7   :  { %v5535_v50 = vmax.f32 %v19555_v5, %v14489_v15  ;;  %v5066_v57 = vpop.f32.mrb[13].mxu0  ;;  %14708 = vmatpush3.bf16.msra.mxu1 %v8977_v27  ;;  %v5984_v16 = vmax.f32 %v5840_v22, 0.0 }
 0x4f8   :  { %14644 = vmatmul.mubr.msk.bf16.gmra.mrb[36].mxu1 %vm8138_vm8, %v21327_v45  ;;  %v5533_v24 = vmax.f32 %v19557_v39, %v5066_v57  ;;  %14773 = vmatprep.subr.bf16.mxu1 %v19751_v20  ;;  %v14490_v17 = vpop.f32.mrb[14].mxu0  ;;  %v21335_v57 = vld [vmem:[#allocation38_spill] sm:$0xff]  ;;  %v21336_v45 = vld [vmem:[#allocation39_spill] sm:$0xff] }
 0x4f9   :  { %14647 = vmatprep.mubr.msk.bf16.mxu1 %vm8138_vm8, %v21328_v8  ;;  %v5536_v5 = vmax.f32 %v19559_v35, %v14490_v17  ;;  %v5069_v9 = vpop.f32.mrb[15].mxu0  ;;  %v21330_v35 = vld [vmem:[#allocation34_spill] sm:$0xff]  ;;  %v6128_v27 = vpack.c.bf16 %v5984_v16, %v5984_v16 }
 0x4fa   :  { %7012 = vrot.lane.b32.xlu0 %v19724_v10, %s15910_s14  ;;  %7018 = vrot.lane.b32.xlu1 %v19753_v44, %s15910_s14  ;;  %v5534_v19 = vmax.f32 %v19565_v62, %v5069_v9 }
 0x4fb   :  { %v5692_v40 = vmax.f32 %v5535_v50, %v5536_v5 }
 0x4fc   :  { %v5691_v39 = vmax.f32 %v5533_v24, %v5534_v19 }
 0x4fd   :  { %v5843_v24 = vadd.f32 %v19619_v33, %v5692_v40 }
 0x4fe   :  { %6412 = vrot.lane.b32.xlu0 %v19753_v44, %s15907_s24  ;;  %6614 = vrot.lane.b32.xlu1 %v19753_v44, %s15908_s29  ;;  %v14493_v28 = vpop.f32.mrb[16].mxu0 }
 0x4ff   :  { %v5539_v6 = vmax.f32 %v14493_v28, %v19326_v1  ;;  %v5082_v13 = vpop.f32.mrb[17].mxu0 }
 0x500   :  { %14648 = vmatmul.mubr.msk.bf16.gmra.mrb[40].mxu1 %vm8138_vm8, %v21330_v35  ;;  %v5537_v62 = vmax.f32 %v5082_v13, %v19334_v38  ;;  %v14494_v63 = vpop.f32.mrb[18].mxu0  ;;  %v6129_v38 = vpack.c.bf16 %v5985_v54, %v5985_v54  ;;  %v21339_v54 = vld [vmem:[#allocation41_spill] sm:$0xff] }
 0x501   :  { %14651 = vmatprep.mubr.msk.bf16.mxu1 %vm8138_vm8, %v21331_v3  ;;  %v5540_v25 = vmax.f32 %v14494_v63, %v19336_v31  ;;  %v5085_v1 = vpop.f32.mrb[19].mxu0  ;;  %v21333_v31 = vld [vmem:[#allocation36_spill] sm:$0xff] }
 0x502   :  { %6816 = vrot.lane.b32.xlu0 %v19753_v44, %s15909_s11  ;;  %6814 = vrot.lane.b32.xlu1 %v19773_v49, %s15909_s11  ;;  %v5538_v47 = vmax.f32 %v5085_v1, %v19339_v56  ;;  %v21374_v44 = vld [vmem:[#allocation58_spill] sm:$0xff] }
 0x503   :  { %v5694_v0 = vmax.f32 %v5539_v6, %v5540_v25 }
 0x504   :  { %v19792_v2 = vmax.f32 %v5537_v62, %v5538_v47  ;;  %v21337_v62 = vld [vmem:[#allocation40_spill] sm:$0xff]  ;;  %v21340_v47 = vld [vmem:[#allocation65_spill] sm:$0xff] }
 0x505   :  { %v5845_v9 = vadd.f32 %v19619_v33, %v5694_v0 }
 0x506   :  { %21332 = vst [vmem:[#allocation19_spill] sm:$0xff] %v19792_v2  ;;  %7016 = vrot.lane.b32.xlu0 %v19773_v49, %s15910_s14  ;;  %6410 = vrot.lane.b32.xlu1 %v19773_v49, %s15907_s24  ;;  %v14497_v30 = vpop.f32.mrb[20].mxu0 }
 0x507   :  { %v5543_v14 = vmax.f32 %v14497_v30, %v19352_v7  ;;  %v5098_v61 = vpop.f32.mrb[21].mxu0  ;;  %v5989_v13 = vmax.f32 %v5845_v9, 0.0 }
 0x508   :  { %14652 = vmatmul.mubr.msk.bf16.gmra.mrb[44].mxu1 %vm8138_vm8, %v21333_v31  ;;  %v5541_v56 = vmax.f32 %v5098_v61, %v19358_v51  ;;  %v14498_v59 = vpop.f32.mrb[22].mxu0  ;;  %v5842_v51 = vadd.f32 %v19619_v33, %v5691_v39  ;;  %v5987_v39 = vmax.f32 %v5843_v24, 0.0 }
 0x509   :  { %14655 = vmatprep.mubr.msk.bf16.mxu1 %vm8138_vm8, %v21334_v46  ;;  %v5544_v23 = vmax.f32 %v14498_v59, %v19360_v36  ;;  %v5101_v52 = vpop.f32.mrb[23].mxu0  ;;  %v19838_v30 = vpack.c.bf16 %v5989_v13, %v5989_v13 }
 0x50a   :  { %6612 = vrot.lane.b32.xlu0 %v19773_v49, %s15908_s29  ;;  %6618 = vrot.lane.b32.xlu1 %v6129_v38, %s15908_s29  ;;  %v5542_v7 = vmax.f32 %v5101_v52, %v19362_v58  ;;  %v5986_v17 = vmax.f32 %v5842_v51, 0.0  ;;  %v6131_v1 = vpack.c.bf16 %v5987_v39, %v5987_v39 }
 0x50b   :  { %v5696_v32 = vmax.f32 %v5543_v14, %v5544_v23  ;;  %21342 = vst [vmem:[#allocation8_spill] sm:$0xff] %v19838_v30  ;;  %v21343_v23 = vld [vmem:[#allocation68_spill] sm:$0xff] }
 0x50c   :  { %v5695_v12 = vmax.f32 %v5541_v56, %v5542_v7  ;;  %v6130_v4 = vpack.c.bf16 %v5986_v17, %v5986_v17 }
 0x50e   :  { %6820 = vrot.lane.b32.xlu0 %v6129_v38, %s15909_s11  ;;  %7022 = vrot.lane.b32.xlu1 %v6129_v38, %s15910_s14  ;;  %v14501_v41 = vpop.f32.mrb[24].mxu0  ;;  %v21341_v38 = vld [vmem:[#allocation66_spill] sm:$0xff]  ;;  %v5846_v61 = vadd.f32 %v19619_v33, %v5695_v12  ;;  %v21346_v12 = vld [vmem:[#allocation69_spill] sm:$0xff] }
 0x50f   :  { %v5547_v15 = vmax.f32 %v14501_v41, %v19377_v29  ;;  %v5114_v50 = vpop.f32.mrb[25].mxu0  ;;  %v21345_v41 = vld [vmem:[#allocation42_spill] sm:$0xff] }
 0x510   :  { %14656 = vmatmul.mubr.msk.bf16.gmra.mrb[48].mxu1 %vm8138_vm8, %v21335_v57  ;;  %v5545_v36 = vmax.f32 %v5114_v50, %v19383_v48  ;;  %v14502_v58 = vpop.f32.mrb[26].mxu0  ;;  %v21347_v50 = vld [vmem:[#allocation43_spill] sm:$0xff] }
 0x511   :  { %14659 = vmatprep.mubr.msk.bf16.mxu1 %vm8138_vm8, %v21336_v45  ;;  %v5548_v53 = vmax.f32 %v14502_v58, %v19385_v42  ;;  %v5117_v29 = vpop.f32.mrb[27].mxu0  ;;  %v5847_v42 = vadd.f32 %v19619_v33, %v5696_v32  ;;  %v21348_v58 = vld [vmem:[#allocation70_spill] sm:$0xff] }
 0x512   :  { %6616 = vrot.lane.b32.xlu0 %v6128_v27, %s15908_s29  ;;  %6414 = vrot.lane.b32.xlu1 %v6128_v27, %s15907_s24  ;;  %v5546_v5 = vmax.f32 %v5117_v29, %v19391_v34  ;;  %v21338_v34 = vld [vmem:[#allocation64_spill] sm:$0xff] }
 0x513   :  { %v5698_v19 = vmax.f32 %v5547_v15, %v5548_v53  ;;  %v5991_v14 = vmax.f32 %v5847_v42, 0.0  ;;  %v21349_v53 = vld [vmem:[#allocation71_spill] sm:$0xff] }
 0x514   :  { %v5697_v48 = vmax.f32 %v5545_v36, %v5546_v5 }
 0x515   :  { %v19845_v32 = vpack.c.bf16 %v5991_v14, %v5991_v14  ;;  %v5849_v51 = vadd.f32 %v19619_v33, %v5698_v19 }
 0x516   :  { %7020 = vrot.lane.b32.xlu0 %v6128_v27, %s15910_s14  ;;  %6818 = vrot.lane.b32.xlu1 %v6128_v27, %s15909_s11  ;;  %v14505_v40 = vpop.f32.mrb[28].mxu0  ;;  %v5990_v27 = vmax.f32 %v5846_v61, 0.0  ;;  %v5848_v42 = vadd.f32 %v19619_v33, %v5697_v48 }
 0x517   :  { %v5551_v28 = vmax.f32 %v14505_v40, %v19403_v43  ;;  %v5130_v6 = vpop.f32.mrb[29].mxu0  ;;  %21344 = vst [vmem:[#allocation4_spill] sm:$0xff] %v19845_v32  ;;  %v5993_v9 = vmax.f32 %v5849_v51, 0.0  ;;  %v21351_v40 = vld [vmem:[#allocation72_spill] sm:$0xff] }
 0x518   :  { %14660 = vmatmul.mubr.msk.bf16.gmra.mrb[52].mxu1 %vm8138_vm8, %v21337_v62  ;;  %v5549_v63 = vmax.f32 %v5130_v6, %v21338_v34  ;;  %v14506_v25 = vpop.f32.mrb[30].mxu0  ;;  %v19859_v5 = vpack.c.bf16 %v5990_v27, %v5990_v27  ;;  %v21353_v34 = vld [vmem:[#allocation44_spill] sm:$0xff]  ;;  %v5992_v14 = vmax.f32 %v5848_v42, 0.0  ;;  %v21360_v27 = vld [vmem:[#allocation47_spill] sm:$0xff] }
 0x519   :  { %14663 = vmatprep.mubr.msk.bf16.mxu1 %vm8138_vm8, %v21339_v54  ;;  %v5552_v43 = vmax.f32 %v14506_v25, %v21340_v47  ;;  %v5133_v0 = vpop.f32.mrb[31].mxu0  ;;  %v19866_v13 = vpack.c.bf16 %v5993_v9, %v5993_v9 }
 0x51a   :  { %7024 = vrot.lane.b32.xlu0 %v6130_v4, %s15910_s14  ;;  %6822 = vrot.lane.b32.xlu1 %v6130_v4, %s15909_s11  ;;  %v5550_v22 = vmax.f32 %v5133_v0, %v21341_v38  ;;  %21350 = vst [vmem:[#allocation14_spill] sm:$0xff] %v19859_v5 }
 0x51b   :  { %v5700_v56 = vmax.f32 %v5551_v28, %v5552_v43  ;;  %21352 = vst [vmem:[#allocation12_spill] sm:$0xff] %v19866_v13  ;;  %v21356_v43 = vld [vmem:[#allocation74_spill] sm:$0xff] }
 0x51c   :  { %v5699_v59 = vmax.f32 %v5549_v63, %v5550_v22  ;;  %v21354_v63 = vld [vmem:[#allocation73_spill] sm:$0xff]  ;;  %v21357_v22 = vld [vmem:[#allocation75_spill] sm:$0xff] }
 0x51e   :  { %7026 = vrot.lane.b32.xlu1 %v6131_v1, %s15910_s14  ;;  %6416 = vrot.lane.b32.xlu0 %v19838_v30, %s15907_s24  ;;  %v14509_v16 = vpop.f32.mrb[32].mxu0  ;;  %v21355_v1 = vld [vmem:[#allocation45_spill] sm:$0xff] }
 0x51f   :  { %v5555_v52 = vmax.f32 %v14509_v16, %v21343_v23  ;;  %v5146_v7 = vpop.f32.mrb[33].mxu0  ;;  %v19884_v23 = vpack.c.bf16 %v5992_v14, %v5992_v14  ;;  %v15557_v14 = vld [vmem:[%s21125_s3 + $0xb4] sm:$0xff]  }
 0x520   :  { %14664 = vmatmul.mubr.msk.bf16.gmra.mrb[56].mxu1 %vm8138_vm8, %v21345_v41  ;;  %v5553_v15 = vmax.f32 %v5146_v7, %v21346_v12  ;;  %v14510_v36 = vpop.f32.mrb[34].mxu0  ;;  %v21359_v7 = vld [vmem:[#allocation46_spill] sm:$0xff]  ;;  %v5850_v12 = vadd.f32 %v19619_v33, %v5699_v59 }
 0x521   :  { %14667 = vmatprep.mubr.msk.bf16.mxu1 %vm8138_vm8, %v21347_v50  ;;  %v5556_v24 = vmax.f32 %v14510_v36, %v21348_v58  ;;  %v5149_v17 = vpop.f32.mrb[35].mxu0  ;;  %21358 = vst [vmem:[#allocation17_spill] sm:$0xff] %v19884_v23  ;;  %v21363_v36 = vld [vmem:[#allocation49_spill] sm:$0xff] }
 0x522   :  { %6622 = vrot.lane.b32.xlu1 %v19845_v32, %s15908_s29  ;;  %6420 = vrot.lane.b32.xlu0 %v19845_v32, %s15907_s24  ;;  %v5554_v29 = vmax.f32 %v5149_v17, %v21349_v53  ;;  %v5994_v58 = vmax.f32 %v5850_v12, 0.0  ;;  %v21365_v17 = vld [vmem:[#allocation50_spill] sm:$0xff]  ;;  %v21366_v53 = vld [vmem:[#allocation51_spill] sm:$0xff] }
 0x523   :  { %v5702_v19 = vmax.f32 %v5555_v52, %v5556_v24  ;;  %v5851_v52 = vadd.f32 %v19619_v33, %v5700_v56 }
 0x524   :  { %v5701_v39 = vmax.f32 %v5553_v15, %v5554_v29  ;;  %v21362_v15 = vld [vmem:[#allocation48_spill] sm:$0xff]  ;;  %v19914_v59 = vpack.c.bf16 %v5994_v58, %v5994_v58 }
 0x525   :  { %v5995_v51 = vmax.f32 %v5851_v52, 0.0  ;;  %v5853_v24 = vadd.f32 %v19619_v33, %v5702_v19  ;;  %v6385_v52 = vpop.permute.xlu0 %6384 }
 0x526   :  { %6824 = vrot.lane.b32.xlu0 %v19845_v32, %s15909_s11  ;;  %6418 = vrot.lane.b32.xlu1 %v19859_v5, %s15907_s24  ;;  %v14513_v4 = vpop.f32.mrb[36].mxu0  ;;  %21364 = vst [vmem:[#allocation13_spill] sm:$0xff] %v19914_v59  ;;  %v5852_v19 = vadd.f32 %v19619_v33, %v5701_v39  ;;  %v21369_v39 = vld [vmem:[#allocation54_spill] sm:$0xff]  ;;  %v21373_v32 = vld [vmem:[#allocation76_spill] sm:$0xff] }
 0x527   :  { %v5559_v28 = vmax.f32 %v14513_v4, %v21351_v40  ;;  %v5162_v6 = vpop.f32.mrb[37].mxu0  ;;  %v19899_v56 = vpack.c.bf16 %v5995_v51, %v5995_v51  ;;  %v5997_v29 = vmax.f32 %v5853_v24, 0.0  ;;  %v21367_v4 = vld [vmem:[#allocation52_spill] sm:$0xff]  ;;  %v21368_v40 = vld [vmem:[#allocation53_spill] sm:$0xff] }
 0x528   :  { %14668 = vmatmul.mubr.msk.bf16.gmra.mrb[60].mxu1 %vm8138_vm8, %v21353_v34  ;;  %v5557_v25 = vmax.f32 %v5162_v6, %v21354_v63  ;;  %v14514_v47 = vpop.f32.mrb[38].mxu0  ;;  %v21370_v63 = vld [vmem:[#allocation55_spill] sm:$0xff] }
 0x529   :  { %14671 = vmatprep.mubr.msk.bf16.mxu1 %vm8138_vm8, %v21355_v1  ;;  %v5560_v0 = vmax.f32 %v14514_v47, %v21356_v43  ;;  %v5165_v38 = vpop.f32.mrb[39].mxu0  ;;  %21361 = vst [vmem:[#allocation24_spill] sm:$0xff] %v19899_v56  ;;  %v6141_v9 = vpack.c.bf16 %v5997_v29, %v5997_v29  ;;  %v6389_v51 = vpop.permute.xlu0 %6388 }
 0x52a   :  { %6620 = vrot.lane.b32.xlu0 %v19859_v5, %s15908_s29  ;;  %6626 = vrot.lane.b32.xlu1 %v19866_v13, %s15908_s29  ;;  %v5558_v48 = vmax.f32 %v5165_v38, %v21357_v22  ;;  %v21371_v38 = vld [vmem:[#allocation56_spill] sm:$0xff] }
 0x52b   :  { %v5704_v61 = vmax.f32 %v5559_v28, %v5560_v0  ;;  %v5996_v28 = vmax.f32 %v5852_v19, 0.0 }
 0x52c   :  { %v5703_v16 = vmax.f32 %v5557_v25, %v5558_v48  ;;  %v15555_v48 = vld [vmem:[%s21125_s3 + $0xa4] sm:$0xff]  }
 0x52d   :  { %v6140_v6 = vpack.c.bf16 %v5996_v28, %v5996_v28  ;;  %v5855_v25 = vadd.f32 %v19619_v33, %v5704_v61  ;;  %v6793_v58 = vpop.permute.xlu0 %6792 }
 0x52e   :  { %6828 = vrot.lane.b32.xlu0 %v19866_v13, %s15909_s11  ;;  %7030 = vrot.lane.b32.xlu1 %v19866_v13, %s15910_s14  ;;  %v5854_v42 = vadd.f32 %v19619_v33, %v5703_v16  ;;  %v19992_v16 = vld [vmem:[%s21125_s3 + $0xd0] sm:$0xff]  }
 0x52f   :  { %v5999_v43 = vmax.f32 %v5855_v25, 0.0 }
 0x530   :  { %14672 = vmatmul.mubr.msk.bf16.gmra.mrb[64].mxu1 %vm8138_vm8, %v21359_v7  ;;  %v5998_v47 = vmax.f32 %v5854_v42, 0.0 }
 0x531   :  { %14675 = vmatprep.mubr.msk.bf16.mxu1 %vm8138_vm8, %v21360_v27  ;;  %v6143_v22 = vpack.c.bf16 %v5999_v43, %v5999_v43  ;;  %v6589_v29 = vpop.permute.xlu0 %6588 }
 0x532   :  { %6424 = vrot.lane.b32.xlu0 %v19866_v13, %s15907_s24  ;;  %6422 = vrot.lane.b32.xlu1 %v19884_v23, %s15907_s24  ;;  %v6142_v0 = vpack.c.bf16 %v5998_v47, %v5998_v47 }
 0x535   :  { %v6797_v19 = vpop.permute.xlu0 %6796 }
 0x536   :  { %6624 = vrot.lane.b32.xlu0 %v19884_v23, %s15908_s29  ;;  %6826 = vrot.lane.b32.xlu1 %v19884_v23, %s15909_s11 }
 0x538   :  { %14676 = vmatmul.mubr.msk.bf16.gmra.mrb[68].mxu1 %vm8138_vm8, %v21362_v15 }
 0x539   :  { %14679 = vmatprep.mubr.msk.bf16.mxu1 %vm8138_vm8, %v21363_v36 }
 0x53a   :  { %7028 = vrot.lane.b32.xlu0 %v19884_v23, %s15910_s14  ;;  %7034 = vrot.lane.b32.xlu1 %v19899_v56, %s15910_s14 }
 0x53e   :  { %6428 = vrot.lane.b32.xlu0 %v19899_v56, %s15907_s24  ;;  %6630 = vrot.lane.b32.xlu1 %v19899_v56, %s15908_s29 }
 0x540   :  { %14680 = vmatmul.mubr.msk.bf16.gmra.mrb[72].mxu1 %vm8138_vm8, %v21365_v17 }
 0x541   :  { %14683 = vmatprep.mubr.msk.bf16.mxu1 %vm8138_vm8, %v21366_v53 }
 0x542   :  { %6832 = vrot.lane.b32.xlu0 %v19899_v56, %s15909_s11  ;;  %6830 = vrot.lane.b32.xlu1 %v19914_v59, %s15909_s11 }
 0x546   :  { %7032 = vrot.lane.b32.xlu0 %v19914_v59, %s15910_s14  ;;  %6426 = vrot.lane.b32.xlu1 %v19914_v59, %s15907_s24 }
 0x548   :  { %14684 = vmatmul.mubr.msk.bf16.gmra.mrb[76].mxu1 %vm8138_vm8, %v21367_v4 }
 0x549   :  { %14687 = vmatprep.mubr.msk.bf16.mxu1 %vm8138_vm8, %v21368_v40 }
 0x54a   :  { %6628 = vrot.lane.b32.xlu0 %v19914_v59, %s15908_s29  ;;  %6634 = vrot.lane.b32.xlu1 %v6141_v9, %s15908_s29 }
 0x54e   :  { %6836 = vrot.lane.b32.xlu0 %v6141_v9, %s15909_s11  ;;  %7038 = vrot.lane.b32.xlu1 %v6141_v9, %s15910_s14 }
 0x550   :  { %14688 = vmatmul.mubr.msk.bf16.gmra.mrb[80].mxu1 %vm8138_vm8, %v21369_v39 }
 0x551   :  { %14691 = vmatprep.mubr.msk.bf16.mxu1 %vm8138_vm8, %v21370_v63 }
 0x552   :  { %6632 = vrot.lane.b32.xlu0 %v6140_v6, %s15908_s29  ;;  %6430 = vrot.lane.b32.xlu1 %v6140_v6, %s15907_s24  ;;  %s15912_s24 = smov 100   ;;  %s15913_s29 = smov 50  }
 0x556   :  { %7036 = vrot.lane.b32.xlu0 %v6140_v6, %s15910_s14  ;;  %6834 = vrot.lane.b32.xlu1 %v6140_v6, %s15909_s11  ;;  %v6393_v6 = vpop.permute.xlu0 %6392 }
 0x558   :  { %14692 = vmatmul.mubr.msk.bf16.gmra.mrb[84].mxu1 %vm8138_vm8, %v21371_v38 }
 0x559   :  { %14709 = vmatprep.mubr.msk.bf16.mxu1 %vm8138_vm8, %v21328_v8  ;;  %v15556_v8 = vld [vmem:[%s21125_s3 + $0xac] sm:$0xff]  }
 0x55a   :  { %7040 = vrot.lane.b32.xlu0 %v6142_v0, %s15910_s14  ;;  %6838 = vrot.lane.b32.xlu1 %v6142_v0, %s15909_s11  ;;  %v6593_v25 = vpop.permute.xlu0 %6592 }
 0x55e   :  { %7042 = vrot.lane.b32.xlu1 %v6143_v22, %s15910_s14  ;;  %v6997_v43 = vpop.permute.xlu0 %6996  ;;  %s15915_s14 = smov 122  }
 0x560   :  { %14710 = vmatmul.mubr.msk.bf16.vlgmr.msra.gmra.mrb[24].mxu1 %vm8138_vm8, %v21330_v35  ;;  %v15559_v35 = vld [vmem:[%s21125_s3 + $0xc4] sm:$0xff]  }
 0x561   :  { %14713 = vmatprep.mubr.msk.bf16.mxu1 %vm8138_vm8, %v21331_v3  ;;  %14774 = vmatpush3.bf16.msra.mxu1 %v19751_v20  ;;  %v15558_v20 = vld [vmem:[%s21125_s3 + $0xbc] sm:$0xff]   ;;  %v15560_v3 = vld [vmem:[%s21125_s3 + $0xcc] ss:$0 sps:$4 sm:$0x33]  }
 0x562   :  { %14775 = vmatprep.subr.bf16.mxu1 %v15555_v48  ;;  %v9418_v61 = vsel %vm8235_vm3, %v15560_v3, 0  ;;  %v6397_v22 = vpop.permute.xlu0 %6396 }
 0x565   :  { %14776 = vmatpush3.bf16.msra.mxu1 %v15555_v48 }
 0x566   :  { %14777 = vmatprep.subr.bf16.mxu1 %v15556_v8 }
 0x568   :  { %14714 = vmatmul.mubr.msk.bf16.gmra.mrb[28].mxu1 %vm8138_vm8, %v21333_v31  ;;  %v6591_v31 = vpop.permute.xlu1 %6590 }
 0x569   :  { %14717 = vmatprep.mubr.msk.bf16.mxu1 %vm8138_vm8, %v21334_v46  ;;  %14778 = vmatpush3.bf16.msra.mxu1 %v15556_v8  ;;  %v6801_v8 = vpop.permute.xlu0 %6800 }
 0x56a   :  { %14779 = vmatprep.subr.bf16.mxu1 %v15557_v14 }
 0x56c   :  { %v6387_v12 = vpop.permute.xlu1 %6386 }
 0x56d   :  { %14780 = vmatpush3.bf16.msra.mxu1 %v15557_v14  ;;  %v7266_v49 = vsel %vm7044_vm4, %v21374_v44, %v6387_v12 }
 0x56e   :  { %14781 = vmatprep.subr.bf16.mxu1 %v15558_v20 }
 0x570   :  { %14718 = vmatmul.mubr.msk.bf16.gmra.mrb[32].mxu1 %vm8138_vm8, %v21335_v57  ;;  %v6595_v24 = vpop.permute.xlu1 %6594 }
 0x571   :  { %14721 = vmatprep.mubr.msk.bf16.mxu1 %vm8138_vm8, %v21336_v45  ;;  %14782 = vmatpush3.bf16.msra.mxu1 %v15558_v20  ;;  %v7001_v20 = vpop.permute.xlu0 %7000 }
 0x572   :  { %14783 = vmatprep.subr.bf16.mxu1 %v15559_v35 }
 0x574   :  { %v6999_v9 = vpop.permute.xlu1 %6998 }
 0x575   :  { %14784 = vmatpush3.bf16.msra.mxu1 %v15559_v35  ;;  %v6597_v56 = vpop.permute.xlu0 %6596 }
 0x576   :  { %15220 = vmatprep.subr.msk.bf16.mxu1 %vm8235_vm3, %v15560_v3  ;;  %v21372_v3 = vld [vmem:[#allocation57_spill] sm:$0xff] }
 0x578   :  { %14722 = vmatmul.mubr.msk.bf16.gmra.mrb[36].mxu1 %vm8138_vm8, %v21337_v62  ;;  %v6391_v28 = vpop.permute.xlu1 %6390 }
 0x579   :  { %14725 = vmatprep.mubr.msk.bf16.mxu1 %vm8138_vm8, %v21339_v54  ;;  %14786 = vmatpush3.bf16.msra.mxu1 %v9418_v61  ;;  %v5820_v61 = vadd.f32 %v19619_v33, %v21372_v3  ;;  %v6805_v13 = vpop.permute.xlu0 %6804  ;;  %v21375_v33 = vld [vmem:[#allocation77_spill] sm:$0xff]  ;;  %v7481_v3 = vsel %vm7333_vm5, %v7266_v49, %v6591_v31  ;;  %v21379_v49 = vld [vmem:[#allocation62_spill] sm:$0xff] }
 0x57a   :  { %14851 = vmatprep.subr.bf16.mxu1 %v19992_v16  ;;  %v7275_v31 = vsel %vm7044_vm4, %v21379_v49, %v6393_v6 }
 0x57b   :  { %v5964_v59 = vmax.f32 %v5820_v61, 0.0 }
 0x57c   :  { %v6795_v42 = vpop.permute.xlu1 %6794 }
 0x57d   :  { %v6108_v5 = vpack.c.bf16 %v5964_v59, %v5964_v59  ;;  %v7674_v61 = vsel %vm7526_vm6, %v7481_v3, %v6795_v42  ;;  %v6601_v10 = vpop.permute.xlu0 %6600  ;;  %v7487_v42 = vsel %vm7333_vm5, %v7275_v31, %v6597_v56  ;;  %v21380_v3 = vld [vmem:[#allocation63_spill] sm:$0xff] }
 0x57e   :  { %v7867_v26 = vsel %vm7719_vm7, %v7674_v61, %v6999_v9 }
 0x57f   :  { %v7263_v2 = vsel %vm7044_vm4, %v6108_v5, %v6385_v52 }
 0x580   :  { %14726 = vmatmul.mubr.msk.bf16.gmra.mrb[40].mxu1 %vm8138_vm8, %v21345_v41  ;;  %v7003_v47 = vpop.permute.xlu1 %7002  ;;  %v7479_v55 = vsel %vm7333_vm5, %v7263_v2, %v6589_v29  ;;  %v21377_v2 = vld [vmem:[#allocation60_spill] sm:$0xff]  ;;  %v21378_v29 = vld [vmem:[#allocation59_spill] sm:$0xff] }
 0x581   :  { %14729 = vmatprep.mubr.msk.bf16.mxu1 %vm8138_vm8, %v21347_v50  ;;  %v7672_v59 = vsel %vm7526_vm6, %v7479_v55, %v6793_v58  ;;  %v7269_v12 = vsel %vm7044_vm4, %v21377_v2, %v6389_v51  ;;  %v7272_v21 = vsel %vm7044_vm4, %v21378_v29, %v6391_v28  ;;  %v7005_v51 = vpop.permute.xlu0 %7004 }
 0x582   :  { %v7865_v5 = vsel %vm7719_vm7, %v7672_v59, %v6997_v43  ;;  %v7483_v55 = vsel %vm7333_vm5, %v7269_v12, %v6593_v25  ;;  %v7680_v25 = vsel %vm7526_vm6, %v7487_v42, %v6801_v8 }
 0x583   :  { %v20055_v58 = vcombine.low %v7865_v5, %v7867_v26  ;;  %v7676_v26 = vsel %vm7526_vm6, %v7483_v55, %v6797_v19 }
 0x584   :  { %v6599_v0 = vpop.permute.xlu1 %6598  ;;  %v7869_v56 = vsel %vm7719_vm7, %v7676_v26, %v7001_v20 }
 0x588   :  { %14730 = vmatmul.mubr.msk.bf16.gmra.mrb[44].mxu1 %vm8138_vm8, %v21353_v34  ;;  %v6799_v48 = vpop.permute.xlu1 %6798 }
 0x589   :  { %14733 = vmatprep.mubr.msk.bf16.mxu1 %vm8138_vm8, %v21355_v1 }
 0x58c   :  { %v6395_v14 = vpop.permute.xlu1 %6394 }
 0x58d   :  { %v7278_v44 = vsel %vm7044_vm4, %v21376_v37, %v6395_v14  ;;  %v7485_v37 = vsel %vm7333_vm5, %v7272_v21, %v6595_v24 }
 0x58e   :  { %v7489_v43 = vsel %vm7333_vm5, %v7278_v44, %v6599_v0  ;;  %v7678_v9 = vsel %vm7526_vm6, %v7485_v37, %v6799_v48  ;;  %v7873_v0 = vsel %vm7719_vm7, %v7680_v25, %v7005_v51  ;;  %v21381_v48 = vld [vmem:[#allocation67_spill] sm:$0xff] }
 0x58f   :  { %v7871_v21 = vsel %vm7719_vm7, %v7678_v9, %v7003_v47  ;;  %v7281_v19 = vsel %vm7044_vm4, %v21381_v48, %v6397_v22  ;;  %v7009_v47 = vpop.permute.xlu0 %7008 }
 0x590   :  { %14734 = vmatmul.mubr.msk.bf16.gmra.mrb[48].mxu1 %vm8138_vm8, %v21359_v7  ;;  %v6603_v35 = vpop.permute.xlu1 %6602  ;;  %v20072_v24 = vcombine.low %v7869_v56, %v7871_v21  ;;  %v7491_v8 = vsel %vm7333_vm5, %v7281_v19, %v6601_v10  ;;  %v15562_v10 = vld [vmem:[%s21125_s3 + $0xd8] sm:$0xff]  }
 0x591   :  { %14737 = vmatprep.mubr.msk.bf16.mxu1 %vm8138_vm8, %v21360_v27 }
 0x594   :  { %v7007_v23 = vpop.permute.xlu1 %7006 }
 0x598   :  { %14738 = vmatmul.mubr.msk.bf16.gmra.mrb[52].mxu1 %vm8138_vm8, %v21362_v15  ;;  %v6399_v30 = vpop.permute.xlu1 %6398 }
 0x599   :  { %14741 = vmatprep.mubr.msk.bf16.mxu1 %vm8138_vm8, %v21363_v36  ;;  %v7284_v61 = vsel %vm7044_vm4, %v21380_v3, %v6399_v30  ;;  %v20160_v3 = vld [vmem:[%s21124_s2] ss:$0 sm:$0xff]  ;;  %s15916_s2 = smov 94  }
 0x59c   :  { %v6803_v52 = vpop.permute.xlu1 %6802 }
 0x59d   :  { %v7682_v28 = vsel %vm7526_vm6, %v7489_v43, %v6803_v52  ;;  %v7684_v52 = vsel %vm7526_vm6, %v7491_v8, %v6805_v13  ;;  %v15563_v13 = vld [vmem:[%s21125_s3 + $0xe0] sm:$0xff]  }
 0x59e   :  { %v7875_v14 = vsel %vm7719_vm7, %v7682_v28, %v7007_v23  ;;  %v7493_v23 = vsel %vm7333_vm5, %v7284_v61, %v6603_v35  ;;  %v7877_v22 = vsel %vm7719_vm7, %v7684_v52, %v7009_v47  ;;  %v5832_v61 = vadd.f32 %v20160_v3, %v19624_v60 }
 0x59f   :  { %v20076_v59 = vcombine.low %v7873_v0, %v7875_v14 }
 0x5a0   :  { %14742 = vmatmul.mubr.msk.bf16.gmra.mrb[56].mxu1 %vm8138_vm8, %v21365_v17  ;;  %v6807_v6 = vpop.permute.xlu1 %6806 }
 0x5a1   :  { %14745 = vmatprep.mubr.msk.bf16.mxu1 %vm8138_vm8, %v21366_v53  ;;  %v7686_v20 = vsel %vm7526_vm6, %v7493_v23, %v6807_v6 }
 0x5a4   :  { %v7011_v5 = vpop.permute.xlu1 %7010 }
 0x5a5   :  { %v7879_v30 = vsel %vm7719_vm7, %v7686_v20, %v7011_v5  ;;  %v5976_v5 = vmax.f32 %v5832_v61, 0.0  ;;  %v21382_v20 = vld [vmem:[#allocation2_spill] sm:$0xff] }
 0x5a6   :  { %v20090_v44 = vcombine.low %v7877_v22, %v7879_v30 }
 0x5a7   :  { %v6120_v8 = vpack.c.bf16 %v5976_v5, %v5976_v5  ;;  %v21385_v5 = vld [vmem:[#allocation16_spill] sm:$0xff] }
 0x5a8   :  { %14746 = vmatmul.mubr.msk.bf16.gmra.mrb[60].mxu1 %vm8138_vm8, %v21367_v4  ;;  %v6607_v35 = vpop.permute.xlu1 %6606 }
 0x5a9   :  { %14749 = vmatprep.mubr.msk.bf16.mxu1 %vm8138_vm8, %v21368_v40 }
 0x5ac   :  { %v6403_v29 = vpop.permute.xlu1 %6402 }
 0x5ad   :  { %v7290_v30 = vsel %vm7044_vm4, %v21382_v20, %v6403_v29 }
 0x5b0   :  { %14750 = vmatmul.mubr.msk.bf16.gmra.mrb[64].mxu1 %vm8138_vm8, %v21369_v39  ;;  %v6611_v31 = vpop.permute.xlu1 %6610 }
 0x5b1   :  { %14753 = vmatprep.mubr.msk.bf16.mxu1 %vm8138_vm8, %v21370_v63 }
 0x5b4   :  { %v7015_v42 = vpop.permute.xlu1 %7014 }
 0x5b8   :  { %14754 = vmatmul.mubr.msk.bf16.gmra.mrb[68].mxu1 %vm8138_vm8, %v21371_v38  ;;  %v6407_v37 = vpop.permute.xlu1 %6406 }
 0x5b9   :  { %14757 = vmatprep.mubr.msk.bf16.mxu1 %vm8138_vm8, %v21373_v32 }
 0x5bc   :  { %v6811_v28 = vpop.permute.xlu1 %6810 }
 0x5c0   :  { %14758 = vmatmul.mubr.msk.bf16.gmra.mrb[72].mxu1 %vm8138_vm8, %v21375_v33  ;;  %v7019_v26 = vpop.permute.xlu1 %7018 }
 0x5c1   :  { %14761 = vmatprep.mubr.msk.bf16.mxu1 %vm8138_vm8, %v19570_v18 }
 0x5c4   :  { %v6615_v56 = vpop.permute.xlu1 %6614 }
 0x5c8   :  { %14762 = vmatmul.mubr.msk.bf16.gmra.mrb[76].mxu1 %vm8138_vm8, %v19612_v11  ;;  %v6815_v0 = vpop.permute.xlu1 %6814 }
 0x5c9   :  { %14765 = vmatprep.mubr.msk.bf16.mxu1 %vm8138_vm8, %v20055_v58 }
 0x5cc   :  { %v6411_v21 = vpop.permute.xlu1 %6410 }
 0x5d0   :  { %14766 = vmatmul.mubr.msk.bf16.gmra.mrb[80].mxu1 %vm8138_vm8, %v20072_v24  ;;  %v6619_v19 = vpop.permute.xlu1 %6618 }
 0x5d1   :  { %14769 = vmatprep.mubr.msk.bf16.mxu1 %vm8138_vm8, %v20076_v59 }
 0x5d4   :  { %v7023_v47 = vpop.permute.xlu1 %7022 }
 0x5d8   :  { %14770 = vmatmul.mubr.msk.bf16.gmra.mrb[84].mxu1 %vm8138_vm8, %v20090_v44 }
 0x5d9   :  { %14787 = vmatprep.mubr.msk.bf16.mxu1 %vm8138_vm8, %v21334_v46  ;;  %v15564_v46 = vld [vmem:[%s21125_s3 + $0xe8] sm:$0xff]  }
 0x5e0   :  { %14788 = vmatmul.mubr.msk.bf16.vlgmr.msra.gmra.mrb[24].mxu1 %vm8138_vm8, %v21335_v57  ;;  %v15565_v57 = vld [vmem:[%s21125_s3 + $0xf0] sm:$0xff]  }
 0x5e1   :  { %14791 = vmatprep.mubr.msk.bf16.mxu1 %vm8138_vm8, %v21336_v45  ;;  %14852 = vmatpush3.bf16.msra.mxu1 %v19992_v16  ;;  %v15566_v45 = vld [vmem:[%s21125_s3 + $0xf8] sm:$0xff]   ;;  %v6401_v16 = vpop.permute.xlu0 %6400 }
 0x5e2   :  { %14853 = vmatprep.subr.bf16.mxu1 %v15562_v10  ;;  %v7287_v60 = vsel %vm7044_vm4, %v6120_v8, %v6401_v16  ;;  %v21386_v8 = vld [vmem:[#allocation10_spill] sm:$0xff] }
 0x5e5   :  { %14854 = vmatpush3.bf16.msra.mxu1 %v15562_v10  ;;  %v6405_v12 = vpop.permute.xlu0 %6404  ;;  %v7497_v10 = vsel %vm7333_vm5, %v7290_v30, %v6607_v35 }
 0x5e6   :  { %14855 = vmatprep.subr.bf16.mxu1 %v15563_v13 }
 0x5e8   :  { %14792 = vmatmul.mubr.msk.bf16.gmra.mrb[28].mxu1 %vm8138_vm8, %v21337_v62  ;;  %v15567_v62 = vld [vmem:[%s21125_s3 + $0x100] ss:$0 sps:$4 sm:$0x33]   ;;  %s15914_s3 = smov 72  }
 0x5e9   :  { %14795 = vmatprep.mubr.msk.bf16.mxu1 %vm8138_vm8, %v21339_v54  ;;  %14856 = vmatpush3.bf16.msra.mxu1 %v15563_v13  ;;  %v9859_v2 = vsel %vm8235_vm3, %v15567_v62, 0  ;;  %v6809_v49 = vpop.permute.xlu0 %6808  ;;  %v6415_v13 = vpop.permute.xlu1 %6414 }
 0x5ea   :  { %14857 = vmatprep.subr.bf16.mxu1 %v15564_v46 }
 0x5ed   :  { %14858 = vmatpush3.bf16.msra.mxu1 %v15564_v46  ;;  %v6605_v55 = vpop.permute.xlu0 %6604  ;;  %v7690_v46 = vsel %vm7526_vm6, %v7497_v10, %v6811_v28  ;;  %v6819_v61 = vpop.permute.xlu1 %6818 }
 0x5ee   :  { %14859 = vmatprep.subr.bf16.mxu1 %v15565_v57  ;;  %v7495_v22 = vsel %vm7333_vm5, %v7287_v60, %v6605_v55  ;;  %v7883_v55 = vsel %vm7719_vm7, %v7690_v46, %v7015_v42  ;;  %v21387_v46 = vld [vmem:[#allocation18_spill] sm:$0xff] }
 0x5f0   :  { %14796 = vmatmul.mubr.msk.bf16.gmra.mrb[32].mxu1 %vm8138_vm8, %v21345_v41 }
 0x5f1   :  { %14799 = vmatprep.mubr.msk.bf16.mxu1 %vm8138_vm8, %v21347_v50  ;;  %14860 = vmatpush3.bf16.msra.mxu1 %v15565_v57  ;;  %v6813_v43 = vpop.permute.xlu0 %6812  ;;  %v7688_v57 = vsel %vm7526_vm6, %v7495_v22, %v6809_v49  ;;  %v7302_v49 = vsel %vm7044_vm4, %v21386_v8, %v6411_v21  ;;  %v6823_v21 = vpop.permute.xlu1 %6822 }
 0x5f2   :  { %14861 = vmatprep.subr.bf16.mxu1 %v15566_v45 }
 0x5f5   :  { %14862 = vmatpush3.bf16.msra.mxu1 %v15566_v45  ;;  %v6409_v51 = vpop.permute.xlu0 %6408 }
 0x5f6   :  { %15221 = vmatprep.subr.msk.bf16.mxu1 %vm8235_vm3, %v15567_v62  ;;  %v21383_v62 = vld [vmem:[#allocation9_spill] sm:$0xff]  ;;  %v7299_v28 = vsel %vm7044_vm4, %v21385_v5, %v6409_v51 }
 0x5f7   :  { %v7293_v16 = vsel %vm7044_vm4, %v21383_v62, %v6405_v12 }
 0x5f8   :  { %14800 = vmatmul.mubr.msk.bf16.gmra.mrb[36].mxu1 %vm8138_vm8, %v21353_v34 }
 0x5f9   :  { %14803 = vmatprep.mubr.msk.bf16.mxu1 %vm8138_vm8, %v21355_v1  ;;  %14864 = vmatpush3.bf16.msra.mxu1 %v9859_v2  ;;  %v6609_v9 = vpop.permute.xlu0 %6608  ;;  %v21384_v2 = vld [vmem:[#allocation11_spill] sm:$0xff] }
 0x5fa   :  { %v7296_v29 = vsel %vm7044_vm4, %v21384_v2, %v6407_v37  ;;  %v7499_v60 = vsel %vm7333_vm5, %v7293_v16, %v6609_v9  ;;  %v7505_v37 = vsel %vm7333_vm5, %v7302_v49, %v6615_v56  ;;  %v21388_v16 = vld [vmem:[#allocation3_spill] sm:$0xff]  ;;  %v7027_v2 = vpop.permute.xlu1 %7026 }
 0x5fb   :  { %v7501_v12 = vsel %vm7333_vm5, %v7296_v29, %v6611_v31  ;;  %v7692_v9 = vsel %vm7526_vm6, %v7499_v60, %v6813_v43  ;;  %v21390_v60 = vld [vmem:[#allocation8_spill] sm:$0xff] }
 0x5fc   :  { %v7694_v51 = vsel %vm7526_vm6, %v7501_v12, %v6815_v0  ;;  %v7308_v0 = vsel %vm7044_vm4, %v21388_v16, %v6415_v13 }
 0x5fd   :  { %v7013_v6 = vpop.permute.xlu0 %7012  ;;  %v7887_v10 = vsel %vm7719_vm7, %v7694_v51, %v7019_v26 }
 0x5fe   :  { %v7881_v35 = vsel %vm7719_vm7, %v7688_v57, %v7013_v6  ;;  %v7698_v6 = vsel %vm7526_vm6, %v7505_v37, %v6819_v61  ;;  %v21389_v61 = vld [vmem:[#allocation19_spill] sm:$0xff] }
 0x5ff   :  { %v20194_v20 = vcombine.low %v7881_v35, %v7883_v55  ;;  %v7891_v22 = vsel %vm7719_vm7, %v7698_v6, %v7023_v47  ;;  %v21391_v6 = vld [vmem:[#allocation12_spill] sm:$0xff] }
 0x600   :  { %14804 = vmatmul.mubr.msk.bf16.gmra.mrb[40].mxu1 %vm8138_vm8, %v21359_v7 }
 0x601   :  { %14807 = vmatprep.mubr.msk.bf16.mxu1 %vm8138_vm8, %v21360_v27  ;;  %v6413_v25 = vpop.permute.xlu0 %6412 }
 0x602   :  { %v7305_v57 = vsel %vm7044_vm4, %v21387_v46, %v6413_v25 }
 0x605   :  { %v6817_v14 = vpop.permute.xlu0 %6816 }
 0x608   :  { %14808 = vmatmul.mubr.msk.bf16.gmra.mrb[44].mxu1 %vm8138_vm8, %v21362_v15 }
 0x609   :  { %14811 = vmatprep.mubr.msk.bf16.mxu1 %vm8138_vm8, %v21363_v36  ;;  %v7017_v48 = vpop.permute.xlu0 %7016 }
 0x60a   :  { %v7885_v31 = vsel %vm7719_vm7, %v7692_v9, %v7017_v48  ;;  %v7509_v48 = vsel %vm7333_vm5, %v7308_v0, %v6619_v19  ;;  %v21392_v9 = vld [vmem:[#allocation14_spill] sm:$0xff] }
 0x60b   :  { %v20213_v62 = vcombine.low %v7885_v31, %v7887_v10  ;;  %v7702_v25 = vsel %vm7526_vm6, %v7509_v48, %v6823_v21  ;;  %v21393_v31 = vld [vmem:[#allocation4_spill] sm:$0xff] }
 0x60c   :  { %v7895_v47 = vsel %vm7719_vm7, %v7702_v25, %v7027_v2 }
 0x60d   :  { %v6613_v23 = vpop.permute.xlu0 %6612 }
 0x60e   :  { %v7503_v30 = vsel %vm7333_vm5, %v7299_v28, %v6613_v23 }
 0x60f   :  { %v7696_v23 = vsel %vm7526_vm6, %v7503_v30, %v6817_v14 }
 0x610   :  { %14812 = vmatmul.mubr.msk.bf16.gmra.mrb[48].mxu1 %vm8138_vm8, %v21365_v17 }
 0x611   :  { %14815 = vmatprep.mubr.msk.bf16.mxu1 %vm8138_vm8, %v21366_v53  ;;  %v6821_v52 = vpop.permute.xlu0 %6820 }
 0x615   :  { %v6617_v45 = vpop.permute.xlu0 %6616 }
 0x616   :  { %v7507_v14 = vsel %vm7333_vm5, %v7305_v57, %v6617_v45 }
 0x617   :  { %v7700_v13 = vsel %vm7526_vm6, %v7507_v14, %v6821_v52 }
 0x618   :  { %14816 = vmatmul.mubr.msk.bf16.gmra.mrb[52].mxu1 %vm8138_vm8, %v21367_v4 }
 0x619   :  { %14819 = vmatprep.mubr.msk.bf16.mxu1 %vm8138_vm8, %v21368_v40  ;;  %v7021_v42 = vpop.permute.xlu0 %7020 }
 0x61a   :  { %v7889_v56 = vsel %vm7719_vm7, %v7696_v23, %v7021_v42 }
 0x61b   :  { %v20217_v43 = vcombine.low %v7889_v56, %v7891_v22  ;;  %v21394_v22 = vld [vmem:[#allocation17_spill] sm:$0xff] }
 0x61d   :  { %v7025_v26 = vpop.permute.xlu0 %7024 }
 0x61e   :  { %v7893_v29 = vsel %vm7719_vm7, %v7700_v13, %v7025_v26 }
 0x61f   :  { %v20229_v35 = vcombine.low %v7893_v29, %v7895_v47 }
 0x620   :  { %14820 = vmatmul.mubr.msk.bf16.gmra.mrb[56].mxu1 %vm8138_vm8, %v21369_v39 }
 0x621   :  { %14823 = vmatprep.mubr.msk.bf16.mxu1 %vm8138_vm8, %v21370_v63  ;;  %v6417_v19 = vpop.permute.xlu0 %6416 }
 0x628   :  { %14824 = vmatmul.mubr.msk.bf16.gmra.mrb[60].mxu1 %vm8138_vm8, %v21371_v38 }
 0x629   :  { %14827 = vmatprep.mubr.msk.bf16.mxu1 %vm8138_vm8, %v21373_v32 }
 0x630   :  { %14828 = vmatmul.mubr.msk.bf16.gmra.mrb[64].mxu1 %vm8138_vm8, %v21375_v33 }
 0x631   :  { %14831 = vmatprep.mubr.msk.bf16.mxu1 %vm8138_vm8, %v19570_v18 }
 0x638   :  { %14832 = vmatmul.mubr.msk.bf16.gmra.mrb[68].mxu1 %vm8138_vm8, %v19612_v11 }
 0x639   :  { %14835 = vmatprep.mubr.msk.bf16.mxu1 %vm8138_vm8, %v20055_v58 }
 0x640   :  { %14836 = vmatmul.mubr.msk.bf16.gmra.mrb[72].mxu1 %vm8138_vm8, %v20072_v24 }
 0x641   :  { %14839 = vmatprep.mubr.msk.bf16.mxu1 %vm8138_vm8, %v20076_v59 }
 0x648   :  { %14840 = vmatmul.mubr.msk.bf16.gmra.mrb[76].mxu1 %vm8138_vm8, %v20090_v44 }
 0x649   :  { %14843 = vmatprep.mubr.msk.bf16.mxu1 %vm8138_vm8, %v20194_v20 }
 0x650   :  { %14844 = vmatmul.mubr.msk.bf16.gmra.mrb[80].mxu1 %vm8138_vm8, %v20213_v62 }
 0x651   :  { %14847 = vmatprep.mubr.msk.bf16.mxu1 %vm8138_vm8, %v20217_v43 }
 0x658   :  { %14848 = vmatmul.mubr.msk.bf16.gmra.mrb[84].mxu1 %vm8138_vm8, %v20229_v35 }
 0x659   :  { %14865 = vmatprep.mubr.msk.bf16.mxu1 %vm8138_vm8, %v21339_v54  ;;  %v6623_v54 = vpop.permute.xlu1 %6622 }
 0x660   :  { %14866 = vmatmul.mubr.msk.bf16.vlgmr.msra.gmra.mrb[24].mxu1 %vm8138_vm8, %v21345_v41  ;;  %v6421_v41 = vpop.permute.xlu0 %6420 }
 0x661   :  { %14869 = vmatprep.mubr.msk.bf16.mxu1 %vm8138_vm8, %v21347_v50  ;;  %v6419_v50 = vpop.permute.xlu1 %6418  ;;  %v7317_v21 = vsel %vm7044_vm4, %v21392_v9, %v6421_v41 }
 0x668   :  { %14870 = vmatmul.mubr.msk.bf16.gmra.mrb[28].mxu1 %vm8138_vm8, %v21353_v34  ;;  %v6825_v34 = vpop.permute.xlu0 %6824 }
 0x669   :  { %14873 = vmatprep.mubr.msk.bf16.mxu1 %vm8138_vm8, %v21355_v1  ;;  %v6627_v1 = vpop.permute.xlu1 %6626 }
 0x670   :  { %14874 = vmatmul.mubr.msk.bf16.gmra.mrb[32].mxu1 %vm8138_vm8, %v21359_v7  ;;  %v6621_v7 = vpop.permute.xlu0 %6620 }
 0x671   :  { %14877 = vmatprep.mubr.msk.bf16.mxu1 %vm8138_vm8, %v21360_v27  ;;  %v7031_v27 = vpop.permute.xlu1 %7030 }
 0x678   :  { %14878 = vmatmul.mubr.msk.bf16.gmra.mrb[36].mxu1 %vm8138_vm8, %v21362_v15  ;;  %v6829_v15 = vpop.permute.xlu0 %6828 }
 0x679   :  { %14881 = vmatprep.mubr.msk.bf16.mxu1 %vm8138_vm8, %v21363_v36  ;;  %v6423_v36 = vpop.permute.xlu1 %6422 }
 0x67a   :  { %v7320_v23 = vsel %vm7044_vm4, %v21393_v31, %v6423_v36  ;;  %v15603_v31 = vld [vmem:[%s21126_s5 + $0x164] ss:$16 sps:$4 sm:$0xff]  }
 0x67b   :  { %v7517_v0 = vsel %vm7333_vm5, %v7320_v23, %v6627_v1 }
 0x67d   :  { %v6827_v52 = vpop.permute.xlu1 %6826 }
 0x680   :  { %14882 = vmatmul.mubr.msk.bf16.gmra.mrb[40].mxu1 %vm8138_vm8, %v21365_v17  ;;  %v6425_v17 = vpop.permute.xlu0 %6424 }
 0x681   :  { %14885 = vmatprep.mubr.msk.bf16.mxu1 %vm8138_vm8, %v21366_v53  ;;  %v7323_v10 = vsel %vm7044_vm4, %v21394_v22, %v6425_v17  ;;  %v15606_v22 = vld [vmem:[%s21126_s5 + $0x184] ss:$16 sps:$4 sm:$0xff]  }
 0x684   :  { %v6625_v53 = vpop.permute.xlu0 %6624 }
 0x685   :  { %v7515_v46 = vsel %vm7333_vm5, %v7317_v21, %v6625_v53 }
 0x686   :  { %v7708_v48 = vsel %vm7526_vm6, %v7515_v46, %v6829_v15 }
 0x688   :  { %14886 = vmatmul.mubr.msk.bf16.gmra.mrb[44].mxu1 %vm8138_vm8, %v21367_v4  ;;  %v7035_v4 = vpop.permute.xlu1 %7034  ;;  %v7029_v45 = vpop.permute.xlu0 %7028 }
 0x689   :  { %14889 = vmatprep.mubr.msk.bf16.mxu1 %vm8138_vm8, %v21368_v40 }
 0x68c   :  { %v6631_v40 = vpop.permute.xlu1 %6630 }
 0x690   :  { %14890 = vmatmul.mubr.msk.bf16.gmra.mrb[48].mxu1 %vm8138_vm8, %v21369_v39  ;;  %v6429_v39 = vpop.permute.xlu0 %6428 }
 0x691   :  { %14893 = vmatprep.mubr.msk.bf16.mxu1 %vm8138_vm8, %v21370_v63  ;;  %v6831_v63 = vpop.permute.xlu1 %6830 }
 0x692   :  { %v7710_v14 = vsel %vm7526_vm6, %v7517_v0, %v6831_v63  ;;  %v15571_v63 = vld [vmem:[%s21126_s5 + $0x20] ss:$16 sps:$4 sm:$0xff]  }
 0x695   :  { %v6427_v55 = vpop.permute.xlu1 %6426 }
 0x696   :  { %v7326_v51 = vsel %vm7044_vm4, %v21391_v6, %v6427_v55  ;;  %v15574_v55 = vld [vmem:[%s21126_s5 + $0x40] ss:$16 sps:$4 sm:$0xff]  }
 0x697   :  { %v7521_v16 = vsel %vm7333_vm5, %v7326_v51, %v6631_v40  ;;  %v15568_v40 = vld [vmem:[%s21126_s5] ss:$16 sps:$4 sm:$0xff]  }
 0x698   :  { %14894 = vmatmul.mubr.msk.bf16.gmra.mrb[52].mxu1 %vm8138_vm8, %v21371_v38  ;;  %v6833_v38 = vpop.permute.xlu0 %6832  ;;  %v15598_v6 = vld [vmem:[%s21126_s5 + $0x140] ss:$16 sps:$4 sm:$0xff]  }
 0x699   :  { %14897 = vmatprep.mubr.msk.bf16.mxu1 %vm8138_vm8, %v21373_v32 }
 0x69c   :  { %v7033_v32 = vpop.permute.xlu0 %7032 }
 0x69d   :  { %v7901_v25 = vsel %vm7719_vm7, %v7708_v48, %v7033_v32  ;;  %v15576_v32 = vld [vmem:[%s21126_s5 + $0x44] ss:$16 sps:$4 sm:$0xff]  }
 0x6a0   :  { %14898 = vmatmul.mubr.msk.bf16.gmra.mrb[56].mxu1 %vm8138_vm8, %v21375_v33  ;;  %v6635_v33 = vpop.permute.xlu1 %6634  ;;  %v6629_v5 = vpop.permute.xlu0 %6628 }
 0x6a1   :  { %14901 = vmatprep.mubr.msk.bf16.mxu1 %vm8138_vm8, %v19570_v18  ;;  %v5844_v18 = vadd.f32 %v20160_v3, %v21389_v61  ;;  %v15579_v61 = vld [vmem:[%s21126_s5 + $0x64] ss:$16 sps:$4 sm:$0xff]  }
 0x6a4   :  { %v7039_v28 = vpop.permute.xlu1 %7038  ;;  %v6837_v8 = vpop.permute.xlu0 %6836 }
 0x6a8   :  { %14902 = vmatmul.mubr.msk.bf16.gmra.mrb[60].mxu1 %vm8138_vm8, %v19612_v11  ;;  %v5988_v11 = vmax.f32 %v5844_v18, 0.0  ;;  %v6633_v30 = vpop.permute.xlu0 %6632  ;;  %v15580_v18 = vld [vmem:[%s21126_s5 + $0x80] ss:$16 sps:$4 sm:$0xff]  }
 0x6a9   :  { %14905 = vmatprep.mubr.msk.bf16.mxu1 %vm8138_vm8, %v20055_v58 }
 0x6aa   :  { %v6132_v58 = vpack.c.bf16 %v5988_v11, %v5988_v11  ;;  %v15585_v11 = vld [vmem:[%s21126_s5 + $0xa4] ss:$16 sps:$4 sm:$0xff]  }
 0x6ac   :  { %v7311_v49 = vsel %vm7044_vm4, %v6132_v58, %v6417_v19  ;;  %v15586_v58 = vld [vmem:[%s21126_s5 + $0xc0] ss:$16 sps:$4 sm:$0xff]  }
 0x6ad   :  { %v7511_v12 = vsel %vm7333_vm5, %v7311_v49, %v6621_v7  ;;  %v15591_v49 = vld [vmem:[%s21126_s5 + $0xe4] ss:$16 sps:$4 sm:$0xff]  }
 0x6b0   :  { %14906 = vmatmul.mubr.msk.bf16.gmra.mrb[64].mxu1 %vm8138_vm8, %v20072_v24  ;;  %v6431_v24 = vpop.permute.xlu1 %6430 }
 0x6b1   :  { %14909 = vmatprep.mubr.msk.bf16.mxu1 %vm8138_vm8, %v20076_v59  ;;  %v7314_v59 = vsel %vm7044_vm4, %v21390_v60, %v6419_v50  ;;  %v15592_v60 = vld [vmem:[%s21126_s5 + $0x100] ss:$16 sps:$4 sm:$0xff]  }
 0x6b4   :  { %v6835_v42 = vpop.permute.xlu1 %6834 }
 0x6b5   :  { %v7714_v2 = vsel %vm7526_vm6, %v7521_v16, %v6835_v42  ;;  %v15600_v42 = vld [vmem:[%s21126_s5 + $0x144] ss:$16 sps:$4 sm:$0xff]  }
 0x6b6   :  { %v7907_v29 = vsel %vm7719_vm7, %v7714_v2, %v7039_v28  ;;  %v15583_v28 = vld [vmem:[%s21126_s5 + $0xa0] ss:$16 sps:$4 sm:$0xff]  }
 0x6b8   :  { %14910 = vmatmul.mubr.msk.bf16.gmra.mrb[68].mxu1 %vm8138_vm8, %v20090_v44  ;;  %v7513_v44 = vsel %vm7333_vm5, %v7314_v59, %v6623_v54  ;;  %v6839_v26 = vpop.permute.xlu1 %6838  ;;  %v21395_v54 = vld [vmem:[#allocation24_spill] sm:$0xff] }
 0x6b9   :  { %14913 = vmatprep.mubr.msk.bf16.mxu1 %vm8138_vm8, %v20194_v20  ;;  %v7706_v3 = vsel %vm7526_vm6, %v7513_v44, %v6827_v52  ;;  %v7704_v20 = vsel %vm7526_vm6, %v7511_v12, %v6825_v34  ;;  %v7332_v41 = vsel %vm7044_vm4, %v21395_v54, %v6431_v24  ;;  %v21396_v34 = vld [vmem:[#allocation13_spill] sm:$0xff]  ;;  %v15589_v24 = vld [vmem:[%s21126_s5 + $0xe0] ss:$16 sps:$4 sm:$0xff]   ;;  %v15594_v59 = vld [vmem:[%s21126_s5 + $0x104] ss:$16 sps:$4 sm:$0xff]  }
 0x6ba   :  { %v7897_v37 = vsel %vm7719_vm7, %v7704_v20, %v7029_v45  ;;  %v7899_v56 = vsel %vm7719_vm7, %v7706_v3, %v7031_v27  ;;  %v7329_v1 = vsel %vm7044_vm4, %v21396_v34, %v6429_v39  ;;  %v7525_v15 = vsel %vm7333_vm5, %v7332_v41, %v6635_v33  ;;  %v15570_v39 = vld [vmem:[%s21126_s5 + $0x4] ss:$16 sps:$4 sm:$0xff]   ;;  %v15577_v33 = vld [vmem:[%s21126_s5 + $0x60] ss:$16 sps:$4 sm:$0xff]  }
 0x6bb   :  { %v13150_v57 = vcombine.low %v7897_v37, %v7899_v56  ;;  %v7523_v27 = vsel %vm7333_vm5, %v7329_v1, %v6633_v30  ;;  %v7718_v17 = vsel %vm7526_vm6, %v7525_v15, %v6839_v26  ;;  %11637 = vmatprep.subr.bf16.mxu1 %v15570_v39  ;;  %v15595_v30 = vld [vmem:[%s21126_s5 + $0x120] ss:$16 sps:$4 sm:$0xff]   ;;  %v15597_v37 = vld [vmem:[%s21126_s5 + $0x124] ss:$16 sps:$4 sm:$0xff]   ;;  %vm10382_vm4 = vcmask 769024  }
 0x6bc   :  { %v7043_v7 = vpop.permute.xlu1 %7042  ;;  %v7716_v53 = vsel %vm7526_vm6, %v7523_v27, %v6837_v8  ;;  %11638 = vmatpush1.bf16.msra.mxu1 %v15568_v40  ;;  %v15588_v8 = vld [vmem:[%s21126_s5 + $0xc4] ss:$16 sps:$4 sm:$0xff]   ;;  %v15601_v56 = vld [vmem:[%s21126_s5 + $0x160] ss:$16 sps:$4 sm:$0xff]  }
 0x6bd   :  { %v7911_v52 = vsel %vm7719_vm7, %v7718_v17, %v7043_v7  ;;  %v20417_v41 = vld [vmem:[%s21127_s4] ss:$0 sm:$0xff]  ;;  %v15609_v7 = vld [vmem:[%s21126_s5 + $0x1a4] ss:$16 sps:$4 sm:$0xff]  }
 0x6be   :  { %v15607_v1 = vld [vmem:[%s21126_s5 + $0x1a0] ss:$16 sps:$4 sm:$0xff]   ;;  %v15612_v15 = vld [vmem:[%s21126_s5 + $0x1c4] ss:$16 sps:$4 sm:$0xff]  }
 0x6bf   :  { %v15615_v39 = vld [vmem:[%s21126_s5 + $0x1e4] ss:$16 sps:$4 sm:$0xff]  }
 0x6c0   :  { %14914 = vmatmul.mubr.msk.bf16.gmra.mrb[72].mxu1 %vm8138_vm8, %v20213_v62  ;;  %v7519_v62 = vsel %vm7333_vm5, %v7323_v10, %v6629_v5  ;;  %v15582_v5 = vld [vmem:[%s21126_s5 + $0x84] ss:$16 sps:$4 sm:$0xff]   ;;  %v15604_v10 = vld [vmem:[%s21126_s5 + $0x180] ss:$16 sps:$4 sm:$0xff]   ;;  %vm10403_vm5 = vcmask 80896  }
 0x6c1   :  { %14917 = vmatprep.mubr.msk.bf16.mxu1 %vm8138_vm8, %v20217_v43  ;;  %v7037_v43 = vpop.permute.xlu0 %7036  ;;  %v7712_v47 = vsel %vm7526_vm6, %v7519_v62, %v6833_v38  ;;  %v15573_v38 = vld [vmem:[%s21126_s5 + $0x24] ss:$16 sps:$4 sm:$0xff]  }
 0x6c2   :  { %v7905_v13 = vsel %vm7719_vm7, %v7712_v47, %v7037_v43  ;;  %11639 = vmatprep.subr.bf16.mxu1 %v15573_v38 }
 0x6c3   :  { %v13152_v50 = vcombine.low %v7905_v13, %v7907_v29  ;;  %11640 = vmatpush1.bf16.msra.mxu1 %v15571_v63 }
 0x6c4   :  { %11641 = vmatprep.subr.bf16.mxu1 %v15576_v32 }
 0x6c5   :  { %v7041_v36 = vpop.permute.xlu0 %7040 }
 0x6c7   :  { %11642 = vmatpush1.bf16.msra.mxu1 %v15574_v55 }
 0x6c8   :  { %14918 = vmatmul.mubr.msk.bf16.gmra.mrb[76].mxu1 %vm8138_vm8, %v20229_v35  ;;  %v7903_v35 = vsel %vm7719_vm7, %v7710_v14, %v7035_v4  ;;  %v7909_v4 = vsel %vm7719_vm7, %v7716_v53, %v7041_v36  ;;  %11643 = vmatprep.subr.bf16.mxu1 %v15579_v61  ;;  %vm10408_vm7 = vcmask 900096  }
 0x6c9   :  { %14921 = vmatprep.mubr.msk.bf16.mxu1 %vm8138_vm8, %v13150_v57  ;;  %v13151_v19 = vcombine.low %v7901_v25, %v7903_v35  ;;  %v13153_v45 = vcombine.low %v7909_v4, %v7911_v52  ;;  %v15610_v4 = vld [vmem:[%s21126_s5 + $0x1c0] ss:$16 sps:$4 sm:$0xff]  }
 0x6cb   :  { %11644 = vmatpush1.bf16.msra.mxu1 %v15577_v33 }
 0x6cc   :  { %11645 = vmatprep.subr.bf16.mxu1 %v15582_v5 }
 0x6cf   :  { %11646 = vmatpush1.bf16.msra.mxu1 %v15580_v18  ;;  %v15613_v18 = vld [vmem:[%s21126_s5 + $0x1e0] ss:$16 sps:$4 sm:$0xff]  }
 0x6d0   :  { %14922 = vmatmul.mubr.msk.bf16.gmra.mrb[80].mxu1 %vm8138_vm8, %v13151_v19  ;;  %11647 = vmatprep.subr.bf16.mxu1 %v15585_v11 }
 0x6d1   :  { %14925 = vmatprep.mubr.msk.bf16.mxu1 %vm8138_vm8, %v13152_v50 }
 0x6d3   :  { %11648 = vmatpush1.bf16.msra.mxu1 %v15583_v28 }
 0x6d4   :  { %11649 = vmatprep.subr.bf16.mxu1 %v15588_v8 }
 0x6d7   :  { %11650 = vmatpush1.bf16.msra.mxu1 %v15586_v58 }
 0x6d8   :  { %14926 = vmatmul.mubr.msk.bf16.gmra.mrb[84].mxu1 %vm8138_vm8, %v13153_v45  ;;  %11651 = vmatprep.subr.bf16.mxu1 %v15591_v49 }
 0x6db   :  { %11652 = vmatpush1.bf16.msra.mxu1 %v15589_v24 }
 0x6dc   :  { %11653 = vmatprep.subr.bf16.mxu1 %v15594_v59 }
 0x6df   :  { %11654 = vmatpush1.bf16.msra.mxu1 %v15592_v60 }
 0x6e0   :  { %11655 = vmatprep.subr.bf16.mxu1 %v15597_v37  ;;  %v15618_v37 = vld [vmem:[%s21126_s5 + $0x204] ss:$16 sps:$4 sm:$0xff]  }
 0x6e3   :  { %11656 = vmatpush1.bf16.msra.mxu1 %v15595_v30 }
 0x6e4   :  { %11657 = vmatprep.subr.bf16.mxu1 %v15600_v42 }
 0x6e7   :  { %11658 = vmatpush1.bf16.msra.mxu1 %v15598_v6 }
 0x6e8   :  { %11659 = vmatprep.subr.bf16.mxu1 %v15603_v31 }
 0x6eb   :  { %11660 = vmatpush1.bf16.msra.mxu1 %v15601_v56 }
 0x6ec   :  { %11661 = vmatprep.subr.bf16.mxu1 %v15606_v22 }
 0x6ef   :  { %11662 = vmatpush1.bf16.msra.mxu1 %v15604_v10 }
 0x6f0   :  { %11663 = vmatprep.subr.bf16.mxu1 %v15609_v7 }
 0x6f3   :  { %11664 = vmatpush1.bf16.msra.mxu1 %v15607_v1 }
 0x6f4   :  { %11665 = vmatprep.subr.bf16.mxu1 %v15612_v15 }
 0x6f7   :  { %11666 = vmatpush1.bf16.msra.mxu1 %v15610_v4 }
 0x6f8   :  { %11667 = vmatprep.subr.bf16.mxu1 %v15615_v39 }
 0x6fb   :  { %11668 = vmatpush1.bf16.msra.mxu1 %v15613_v18 }
 0x6fc   :  { %11678 = vmatprep.subr.bf16.mxu1 %v15618_v37 }
 0x733   :  { %v14867_v12 = vpop.f32.mrb[24].mxu1 }
 0x734   :  { %v9895_v44 = vpop.f32.mrb[25].mxu1 }
 0x735   :  { %v14868_v3 = vpop.f32.mrb[26].mxu1 }
 0x736   :  { %v9898_v20 = vpop.f32.mrb[27].mxu1 }
 0x73b   :  { %v14871_v51 = vpop.f32.mrb[28].mxu1 }
 0x73c   :  { %v9911_v9 = vpop.f32.mrb[29].mxu1 }
 0x73d   :  { %v14872_v21 = vpop.f32.mrb[30].mxu1 }
 0x73e   :  { %v9914_v23 = vpop.f32.mrb[31].mxu1 }
 0x743   :  { %v14875_v46 = vpop.f32.mrb[32].mxu1 }
 0x744   :  { %v10216_v57 = vmax.f32 %v14867_v12, %v14875_v46  ;;  %v9927_v62 = vpop.f32.mrb[33].mxu1 }
 0x745   :  { %v10214_v16 = vmax.f32 %v9895_v44, %v9927_v62  ;;  %v14876_v0 = vpop.f32.mrb[34].mxu1 }
 0x746   :  { %v10217_v43 = vmax.f32 %v14868_v3, %v14876_v0  ;;  %v9930_v2 = vpop.f32.mrb[35].mxu1 }
 0x747   :  { %v10215_v14 = vmax.f32 %v9898_v20, %v9930_v2 }
 0x748   :  { %v10247_v48 = vmax.f32 %v10216_v57, %v10217_v43 }
 0x749   :  { %v20412_v26 = vmax.f32 %v10214_v16, %v10215_v14 }
 0x74a   :  { %v10270_v36 = vadd.f32 %v20417_v41, %v10247_v48 }
 0x74b   :  { %v14879_v25 = vpop.f32.mrb[36].mxu1 }
 0x74c   :  { %v10220_v47 = vmax.f32 %v14871_v51, %v14879_v25  ;;  %v9943_v13 = vpop.f32.mrb[37].mxu1  ;;  %v10286_v55 = vmax.f32 %v10270_v36, 0.0 }
 0x74d   :  { %v10218_v29 = vmax.f32 %v9911_v9, %v9943_v13  ;;  %v14880_v35 = vpop.f32.mrb[38].mxu1 }
 0x74e   :  { %v10221_v19 = vmax.f32 %v14872_v21, %v14880_v35  ;;  %v9946_v54 = vpop.f32.mrb[39].mxu1  ;;  %v10302_v5 = vpack.c.bf16 %v10286_v55, %v10286_v55 }
 0x74f   :  { %v10219_v50 = vmax.f32 %v9914_v23, %v9946_v54 }
 0x750   :  { %v10249_v34 = vmax.f32 %v10220_v47, %v10221_v19 }
 0x751   :  { %v10248_v27 = vmax.f32 %v10218_v29, %v10219_v50 }
 0x752   :  { %v10272_v17 = vadd.f32 %v20417_v41, %v10249_v34 }
 0x753   :  { %v10271_v52 = vadd.f32 %v20417_v41, %v10248_v27  ;;  %v14883_v53 = vpop.f32.mrb[40].mxu1 }
 0x754   :  { %v10288_v45 = vmax.f32 %v10272_v17, 0.0  ;;  %v9959_v40 = vpop.f32.mrb[41].mxu1 }
 0x755   :  { %v10287_v63 = vmax.f32 %v10271_v52, 0.0  ;;  %v14884_v38 = vpop.f32.mrb[42].mxu1 }
 0x756   :  { %v10304_v32 = vpack.c.bf16 %v10288_v45, %v10288_v45  ;;  %v9962_v33 = vpop.f32.mrb[43].mxu1 }
 0x757   :  { %v10303_v61 = vpack.c.bf16 %v10287_v63, %v10287_v63 }
 0x758   :  { %10324 = vrot.lane.b32.xlu1 %v10304_v32, %s15911_s25 }
 0x759   :  { %10321 = vrot.lane.b32.xlu0 %v10303_v61, %s15912_s24 }
 0x75b   :  { %v14887_v28 = vpop.f32.mrb[44].mxu1 }
 0x75c   :  { %v9975_v11 = vpop.f32.mrb[45].mxu1  ;;  %10318 = vrot.lane.b32.xlu1 %v10302_v5, %s15913_s29 }
 0x75d   :  { %v14888_v58 = vpop.f32.mrb[46].mxu1 }
 0x75e   :  { %v9978_v8 = vpop.f32.mrb[47].mxu1 }
 0x763   :  { %v14891_v24 = vpop.f32.mrb[48].mxu1 }
 0x764   :  { %v10224_v49 = vmax.f32 %v14883_v53, %v14891_v24  ;;  %v9991_v60 = vpop.f32.mrb[49].mxu1 }
 0x765   :  { %v10222_v59 = vmax.f32 %v9959_v40, %v9991_v60  ;;  %v14892_v12 = vpop.f32.mrb[50].mxu1 }
 0x766   :  { %v10225_v44 = vmax.f32 %v14884_v38, %v14892_v12  ;;  %v9994_v3 = vpop.f32.mrb[51].mxu1 }
 0x767   :  { %v10223_v20 = vmax.f32 %v9962_v33, %v9994_v3 }
 0x768   :  { %v10251_v30 = vmax.f32 %v10224_v49, %v10225_v44 }
 0x769   :  { %v10250_v42 = vmax.f32 %v10222_v59, %v10223_v20 }
 0x76a   :  { %v10274_v6 = vadd.f32 %v20417_v41, %v10251_v30 }
 0x76b   :  { %v10273_v51 = vadd.f32 %v20417_v41, %v10250_v42  ;;  %v14895_v9 = vpop.f32.mrb[52].mxu1 }
 0x76c   :  { %v10228_v21 = vmax.f32 %v14887_v28, %v14895_v9  ;;  %v10007_v31 = vpop.f32.mrb[53].mxu1  ;;  %v10290_v57 = vmax.f32 %v10274_v6, 0.0 }
 0x76d   :  { %v10289_v23 = vmax.f32 %v10273_v51, 0.0  ;;  %v10226_v56 = vmax.f32 %v9975_v11, %v10007_v31  ;;  %v14896_v22 = vpop.f32.mrb[54].mxu1 }
 0x76e   :  { %v10229_v10 = vmax.f32 %v14888_v58, %v14896_v22  ;;  %v10010_v46 = vpop.f32.mrb[55].mxu1  ;;  %v10306_v14 = vpack.c.bf16 %v10290_v57, %v10290_v57 }
 0x76f   :  { %v10305_v62 = vpack.c.bf16 %v10289_v23, %v10289_v23  ;;  %v10227_v16 = vmax.f32 %v9978_v8, %v10010_v46 }
 0x770   :  { %v10253_v0 = vmax.f32 %v10228_v21, %v10229_v10 }
 0x771   :  { %v10252_v43 = vmax.f32 %v10226_v56, %v10227_v16  ;;  %10327 = vrot.lane.b32.xlu0 %v10305_v62, %s15914_s3 }
 0x772   :  { %v10276_v2 = vadd.f32 %v20417_v41, %v10253_v0 }
 0x773   :  { %v14899_v48 = vpop.f32.mrb[56].mxu1  ;;  %v10275_v39 = vadd.f32 %v20417_v41, %v10252_v43 }
 0x774   :  { %v10292_v25 = vmax.f32 %v10276_v2, 0.0  ;;  %v10023_v47 = vpop.f32.mrb[57].mxu1 }
 0x775   :  { %v14900_v13 = vpop.f32.mrb[58].mxu1  ;;  %10330 = vrot.lane.b32.xlu0 %v10306_v14, %s15915_s14  ;;  %v10291_v8 = vmax.f32 %v10275_v39, 0.0 }
 0x776   :  { %v10308_v29 = vpack.c.bf16 %v10292_v25, %v10292_v25  ;;  %v10026_v35 = vpop.f32.mrb[59].mxu1 }
 0x777   :  { %v10307_v12 = vpack.c.bf16 %v10291_v8, %v10291_v8 }
 0x778   :  { %10336 = vrot.lane.b32.xlu1 %v10308_v29, %s15916_s2 }
 0x77b   :  { %v14903_v19 = vpop.f32.mrb[60].mxu1 }
 0x77c   :  { %v10039_v54 = vpop.f32.mrb[61].mxu1 }
 0x77d   :  { %v14904_v50 = vpop.f32.mrb[62].mxu1 }
 0x77e   :  { %v10042_v34 = vpop.f32.mrb[63].mxu1 }
 0x783   :  { %v14907_v1 = vpop.f32.mrb[64].mxu1 }
 0x784   :  { %v10232_v7 = vmax.f32 %v14899_v48, %v14907_v1  ;;  %v10055_v27 = vpop.f32.mrb[65].mxu1 }
 0x785   :  { %v10230_v15 = vmax.f32 %v10023_v47, %v10055_v27  ;;  %v14908_v36 = vpop.f32.mrb[66].mxu1 }
 0x786   :  { %v10233_v17 = vmax.f32 %v14900_v13, %v14908_v36  ;;  %v10058_v52 = vpop.f32.mrb[67].mxu1 }
 0x787   :  { %v10231_v53 = vmax.f32 %v10026_v35, %v10058_v52 }
 0x788   :  { %v10255_v4 = vmax.f32 %v10232_v7, %v10233_v17 }
 0x789   :  { %v10254_v45 = vmax.f32 %v10230_v15, %v10231_v53 }
 0x78a   :  { %v10278_v40 = vadd.f32 %v20417_v41, %v10255_v4 }
 0x78b   :  { %v10277_v63 = vadd.f32 %v20417_v41, %v10254_v45  ;;  %v14911_v38 = vpop.f32.mrb[68].mxu1 }
 0x78c   :  { %v10294_v55 = vmax.f32 %v10278_v40, 0.0  ;;  %v10236_v32 = vmax.f32 %v14903_v19, %v14911_v38  ;;  %v10071_v33 = vpop.f32.mrb[69].mxu1  ;;  %v10269_v38 = vadd.f32 %v20417_v41, %v20412_v26 }
 0x78d   :  { %v10293_v61 = vmax.f32 %v10277_v63, 0.0  ;;  %v10234_v18 = vmax.f32 %v10039_v54, %v10071_v33  ;;  %v14912_v5 = vpop.f32.mrb[70].mxu1 }
 0x78e   :  { %v10310_v28 = vpack.c.bf16 %v10294_v55, %v10294_v55  ;;  %v10237_v11 = vmax.f32 %v14904_v50, %v14912_v5  ;;  %v10074_v58 = vpop.f32.mrb[71].mxu1  ;;  %v10285_v33 = vmax.f32 %v10269_v38, 0.0  ;;  %v15672_v38 = vld [vmem:[%s21126_s5 + $0x444] ss:$16 sps:$4 sm:$0xff]  }
 0x78f   :  { %v10309_v24 = vpack.c.bf16 %v10293_v61, %v10293_v61  ;;  %v10235_v49 = vmax.f32 %v10042_v34, %v10074_v58 }
 0x790   :  { %v10257_v60 = vmax.f32 %v10236_v32, %v10237_v11  ;;  %10342 = vrot.lane.b32.xlu1 %v10310_v28, %s15917_s27  ;;  %v10301_v5 = vpack.c.bf16 %v10285_v33, %v10285_v33 }
 0x791   :  { %v10256_v59 = vmax.f32 %v10234_v18, %v10235_v49  ;;  %10339 = vrot.lane.b32.xlu0 %v10309_v24, %s15918_s28  ;;  %v15616_v24 = vld [vmem:[%s21126_s5 + $0x200] ss:$16 sps:$4 sm:$0xff]  }
 0x792   :  { %v10280_v2 = vadd.f32 %v20417_v41, %v10257_v60  ;;  %v15619_v60 = vld [vmem:[%s21126_s5 + $0x220] ss:$16 sps:$4 sm:$0xff]  }
 0x793   :  { %v10279_v44 = vadd.f32 %v20417_v41, %v10256_v59  ;;  %v14915_v3 = vpop.f32.mrb[72].mxu1  ;;  %v15624_v59 = vld [vmem:[%s21126_s5 + $0x244] ss:$16 sps:$4 sm:$0xff]  }
 0x794   :  { %v10087_v20 = vpop.f32.mrb[73].mxu1  ;;  %v10296_v50 = vmax.f32 %v10280_v2, 0.0  ;;  %v15648_v2 = vld [vmem:[%s21126_s5 + $0x344] ss:$16 sps:$4 sm:$0xff]  }
 0x795   :  { %v10295_v30 = vmax.f32 %v10279_v44, 0.0  ;;  %v14916_v37 = vpop.f32.mrb[74].mxu1  ;;  %10333 = vrot.lane.b32.xlu0 %v10307_v12, %s15919_s30  ;;  %v15622_v12 = vld [vmem:[%s21126_s5 + $0x240] ss:$16 sps:$4 sm:$0xff]   ;;  %v15627_v44 = vld [vmem:[%s21126_s5 + $0x264] ss:$16 sps:$4 sm:$0xff]  }
 0x796   :  { %v10090_v42 = vpop.f32.mrb[75].mxu1  ;;  %v10312_v52 = vpack.c.bf16 %v10296_v50, %v10296_v50  ;;  %v15663_v50 = vld [vmem:[%s21126_s5 + $0x3e4] ss:$16 sps:$4 sm:$0xff]  }
 0x797   :  { %v10311_v6 = vpack.c.bf16 %v10295_v30, %v10295_v30  ;;  %v15628_v30 = vld [vmem:[%s21126_s5 + $0x280] ss:$16 sps:$4 sm:$0xff]  }
 0x799   :  { %10345 = vrot.lane.b32.xlu1 %v10311_v6, %s15920_s10  ;;  %v15636_v6 = vld [vmem:[%s21126_s5 + $0x2c4] ss:$16 sps:$4 sm:$0xff]  }
 0x79b   :  { %v14919_v51 = vpop.f32.mrb[76].mxu1 }
 0x79c   :  { %v10103_v9 = vpop.f32.mrb[77].mxu1 }
 0x79d   :  { %v14920_v21 = vpop.f32.mrb[78].mxu1 }
 0x79e   :  { %v10106_v31 = vpop.f32.mrb[79].mxu1 }
 0x7a3   :  { %v14923_v23 = vpop.f32.mrb[80].mxu1 }
 0x7a4   :  { %v10240_v56 = vmax.f32 %v14915_v3, %v14923_v23  ;;  %v10119_v22 = vpop.f32.mrb[81].mxu1  ;;  %v15625_v3 = vld [vmem:[%s21126_s5 + $0x260] ss:$16 sps:$4 sm:$0xff]   ;;  %v15642_v23 = vld [vmem:[%s21126_s5 + $0x304] ss:$16 sps:$4 sm:$0xff]  }
 0x7a5   :  { %v10238_v10 = vmax.f32 %v10087_v20, %v10119_v22  ;;  %v14924_v46 = vpop.f32.mrb[82].mxu1  ;;  %v15630_v20 = vld [vmem:[%s21126_s5 + $0x284] ss:$16 sps:$4 sm:$0xff]  }
 0x7a6   :  { %v10241_v57 = vmax.f32 %v14916_v37, %v14924_v46  ;;  %v10122_v62 = vpop.f32.mrb[83].mxu1  ;;  %v15633_v37 = vld [vmem:[%s21126_s5 + $0x2a4] ss:$16 sps:$4 sm:$0xff]  }
 0x7a7   :  { %v10239_v16 = vmax.f32 %v10090_v42, %v10122_v62  ;;  %v15631_v42 = vld [vmem:[%s21126_s5 + $0x2a0] ss:$16 sps:$4 sm:$0xff]  }
 0x7a8   :  { %v10259_v0 = vmax.f32 %v10240_v56, %v10241_v57  ;;  %v15645_v57 = vld [vmem:[%s21126_s5 + $0x324] ss:$16 sps:$4 sm:$0xff]  }
 0x7a9   :  { %v10258_v43 = vmax.f32 %v10238_v10, %v10239_v16  ;;  %v15640_v10 = vld [vmem:[%s21126_s5 + $0x300] ss:$16 sps:$4 sm:$0xff]  }
 0x7aa   :  { %v10282_v14 = vadd.f32 %v20417_v41, %v10259_v0  ;;  %v15643_v16 = vld [vmem:[%s21126_s5 + $0x320] ss:$16 sps:$4 sm:$0xff]  }
 0x7ab   :  { %v10281_v48 = vadd.f32 %v20417_v41, %v10258_v43  ;;  %v14927_v25 = vpop.f32.mrb[84].mxu1 }
 0x7ac   :  { %v10298_v47 = vmax.f32 %v10282_v14, 0.0  ;;  %v10244_v13 = vmax.f32 %v14919_v51, %v14927_v25  ;;  %v10135_v29 = vpop.f32.mrb[85].mxu1  ;;  %v15634_v51 = vld [vmem:[%s21126_s5 + $0x2c0] ss:$16 sps:$4 sm:$0xff]  }
 0x7ad   :  { %v10297_v35 = vmax.f32 %v10281_v48, 0.0  ;;  %v10242_v19 = vmax.f32 %v10103_v9, %v10135_v29  ;;  %v14928_v54 = vpop.f32.mrb[86].mxu1  ;;  %v15639_v9 = vld [vmem:[%s21126_s5 + $0x2e4] ss:$16 sps:$4 sm:$0xff]   ;;  %v15646_v14 = vld [vmem:[%s21126_s5 + $0x340] ss:$16 sps:$4 sm:$0xff]  }
 0x7ae   :  { %v10314_v34 = vpack.c.bf16 %v10298_v47, %v10298_v47  ;;  %v10245_v1 = vmax.f32 %v14920_v21, %v14928_v54  ;;  %v10138_v7 = vpop.f32.mrb[87].mxu1  ;;  %v15651_v48 = vld [vmem:[%s21126_s5 + $0x364] ss:$16 sps:$4 sm:$0xff]   ;;  %v15649_v25 = vld [vmem:[%s21126_s5 + $0x360] ss:$16 sps:$4 sm:$0xff]  }
 0x7af   :  { %v10313_v27 = vpack.c.bf16 %v10297_v35, %v10297_v35  ;;  %v10243_v15 = vmax.f32 %v10106_v31, %v10138_v7  ;;  %v15637_v31 = vld [vmem:[%s21126_s5 + $0x2e0] ss:$16 sps:$4 sm:$0xff]   ;;  %v15654_v47 = vld [vmem:[%s21126_s5 + $0x384] ss:$16 sps:$4 sm:$0xff]  }
 0x7b0   :  { %v10261_v36 = vmax.f32 %v10244_v13, %v10245_v1  ;;  %10354 = vrot.lane.b32.xlu1 %v10314_v34, %s15921_s12  ;;  %v15652_v13 = vld [vmem:[%s21126_s5 + $0x380] ss:$16 sps:$4 sm:$0xff]   ;;  %v15657_v29 = vld [vmem:[%s21126_s5 + $0x3a4] ss:$16 sps:$4 sm:$0xff]  }
 0x7b1   :  { %v10260_v17 = vmax.f32 %v10242_v19, %v10243_v15  ;;  %10351 = vrot.lane.b32.xlu0 %v10313_v27, %s15922_s13  ;;  %v15655_v35 = vld [vmem:[%s21126_s5 + $0x3a0] ss:$16 sps:$4 sm:$0xff]   ;;  %v15660_v19 = vld [vmem:[%s21126_s5 + $0x3c4] ss:$16 sps:$4 sm:$0xff]  }
 0x7b2   :  { %v10284_v53 = vadd.f32 %v20417_v41, %v10261_v36  ;;  %v15658_v54 = vld [vmem:[%s21126_s5 + $0x3c0] ss:$16 sps:$4 sm:$0xff]   ;;  %v15666_v27 = vld [vmem:[%s21126_s5 + $0x404] ss:$16 sps:$4 sm:$0xff]  }
 0x7b3   :  { %v10283_v4 = vadd.f32 %v20417_v41, %v10260_v17  ;;  %v15621_v41 = vld [vmem:[%s21126_s5 + $0x224] ss:$16 sps:$4 sm:$0xff]   ;;  %v15661_v7 = vld [vmem:[%s21126_s5 + $0x3e0] ss:$16 sps:$4 sm:$0xff]  }
 0x7b4   :  { %10348 = vrot.lane.b32.xlu1 %v10312_v52, %s15923_s15  ;;  %v10300_v40 = vmax.f32 %v10284_v53, 0.0  ;;  %v15664_v53 = vld [vmem:[%s21126_s5 + $0x400] ss:$16 sps:$4 sm:$0xff]  }
 0x7b5   :  { %v10299_v45 = vmax.f32 %v10283_v4, 0.0  ;;  %v15669_v4 = vld [vmem:[%s21126_s5 + $0x424] ss:$16 sps:$4 sm:$0xff]  }
 0x7b6   :  { %v10316_v63 = vpack.c.bf16 %v10300_v40, %v10300_v40 }
 0x7b7   :  { %v10315_v39 = vpack.c.bf16 %v10299_v45, %v10299_v45 }
 0x7b9   :  { %10357 = vrot.lane.b32.xlu0 %v10315_v39, %s15909_s11 }
 0x7bd   :  { %10360 = vrot.lane.b32.xlu0 %v10316_v63, %s15924_s16  ;;  %v15667_v63 = vld [vmem:[%s21126_s5 + $0x420] ss:$16 sps:$4 sm:$0xff]  }
 0x7ca   :  { %v10325_v55 = vpop.permute.xlu1 %10324 }
 0x7cb   :  { %v10322_v32 = vpop.permute.xlu0 %10321 }
 0x7cc   :  { %v10371_v28 = vsel %vm10369_vm9, %v10322_v32, %v10325_v55 }
 0x7ce   :  { %v10319_v61 = vpop.permute.xlu1 %10318 }
 0x7cf   :  { %v10365_v11 = vsel %vm10362_vm10, %v10301_v5, %v10319_v61  ;;  %v15670_v61 = vld [vmem:[%s21126_s5 + $0x440] ss:$16 sps:$4 sm:$0xff]   ;;  %v15675_v5 = vld [vmem:[%s21126_s5 + $0x464] ss:$16 sps:$4 sm:$0xff]  }
 0x7d0   :  { %v20470_v49 = vsel %vm8138_vm8, %v10365_v11, %v10322_v32  ;;  %v15678_v11 = vld [vmem:[%s21126_s5 + $0x484] ss:$16 sps:$4 sm:$0xff]  }
 0x7e3   :  { %v10328_v18 = vpop.permute.xlu0 %10327 }
 0x7e4   :  { %v10374_v58 = vsel %vm10372_vm11, %v10371_v28, %v10328_v18  ;;  %v15673_v28 = vld [vmem:[%s21126_s5 + $0x460] ss:$16 sps:$4 sm:$0xff]  }
 0x7e7   :  { %v20458_v8 = vpop.permute.xlu0 %10330 }
 0x7e8   :  { %v20464_v26 = vsel %vm10375_vm12, %v10374_v58, %v20458_v8  ;;  %v15676_v58 = vld [vmem:[%s21126_s5 + $0x480] ss:$16 sps:$4 sm:$0xff]  }
 0x7e9   :  { %11669 = vmatprep.mubr.bf16.mxu1 %v20464_v26 }
 0x7ea   :  { %11670 = vmatmul.mubr.bf16.vlgmr.msra.gmra.mrb[88].mxu1 %v20470_v49  ;;  %v20510_v21 = vpop.permute.xlu1 %10336 }
 0x7eb   :  { %11679 = vmatpush1.bf16.msra.mxu1 %v15616_v24  ;;  %v15679_v24 = vld [vmem:[%s21126_s5 + $0x4a0] ss:$16 sps:$4 sm:$0xff]  }
 0x7ec   :  { %11680 = vmatprep.subr.bf16.mxu1 %v15621_v41  ;;  %v15684_v41 = vld [vmem:[%s21126_s5 + $0x4c4] ss:$16 sps:$4 sm:$0xff]  }
 0x7ef   :  { %11681 = vmatpush1.bf16.msra.mxu1 %v15619_v60  ;;  %v15682_v60 = vld [vmem:[%s21126_s5 + $0x4c0] ss:$16 sps:$4 sm:$0xff]  }
 0x7f0   :  { %11682 = vmatprep.subr.bf16.mxu1 %v15624_v59  ;;  %v15687_v59 = vld [vmem:[%s21126_s5 + $0x4e4] ss:$16 sps:$4 sm:$0xff]  }
 0x7f3   :  { %11683 = vmatpush1.bf16.msra.mxu1 %v15622_v12  ;;  %v15685_v12 = vld [vmem:[%s21126_s5 + $0x4e0] ss:$16 sps:$4 sm:$0xff]  }
 0x7f4   :  { %11684 = vmatprep.subr.bf16.mxu1 %v15627_v44  ;;  %v15690_v44 = vld [vmem:[%s21126_s5 + $0x504] ss:$16 sps:$4 sm:$0xff]  }
 0x7f7   :  { %11685 = vmatpush1.bf16.msra.mxu1 %v15625_v3  ;;  %v15688_v3 = vld [vmem:[%s21126_s5 + $0x500] ss:$16 sps:$4 sm:$0xff]  }
 0x7f8   :  { %11686 = vmatprep.subr.bf16.mxu1 %v15630_v20  ;;  %v15693_v20 = vld [vmem:[%s21126_s5 + $0x524] ss:$16 sps:$4 sm:$0xff]  }
 0x7fb   :  { %11687 = vmatpush1.bf16.msra.mxu1 %v15628_v30  ;;  %v15691_v30 = vld [vmem:[%s21126_s5 + $0x520] ss:$16 sps:$4 sm:$0xff]  }
 0x7fc   :  { %11688 = vmatprep.subr.bf16.mxu1 %v15633_v37  ;;  %v15696_v37 = vld [vmem:[%s21126_s5 + $0x544] ss:$16 sps:$4 sm:$0xff]  }
 0x7ff   :  { %11689 = vmatpush1.bf16.msra.mxu1 %v15631_v42  ;;  %v15694_v42 = vld [vmem:[%s21126_s5 + $0x540] ss:$16 sps:$4 sm:$0xff]  }
 0x800   :  { %11690 = vmatprep.subr.bf16.mxu1 %v15636_v6  ;;  %v15699_v6 = vld [vmem:[%s21126_s5 + $0x564] ss:$16 sps:$4 sm:$0xff]  }
 0x802   :  { %v10343_v22 = vpop.permute.xlu1 %10342 }
 0x803   :  { %11691 = vmatpush1.bf16.msra.mxu1 %v15634_v51  ;;  %v10340_v56 = vpop.permute.xlu0 %10339  ;;  %v15697_v51 = vld [vmem:[%s21126_s5 + $0x560] ss:$16 sps:$4 sm:$0xff]  }
 0x804   :  { %11692 = vmatprep.subr.bf16.mxu1 %v15639_v9  ;;  %v10388_v46 = vsel %vm10386_vm13, %v20510_v21, %v10340_v56  ;;  %v15702_v9 = vld [vmem:[%s21126_s5 + $0x584] ss:$16 sps:$4 sm:$0xff]  }
 0x805   :  { %v10391_v0 = vsel %vm10389_vm14, %v10388_v46, %v10343_v22  ;;  %v15708_v56 = vld [vmem:[%s21126_s5 + $0x5c4] ss:$16 sps:$4 sm:$0xff]   ;;  %v15706_v22 = vld [vmem:[%s21126_s5 + $0x5c0] ss:$16 sps:$4 sm:$0xff]  }
 0x806   :  { %v15709_v46 = vld [vmem:[%s21126_s5 + $0x5e0] ss:$16 sps:$4 sm:$0xff]  }
 0x807   :  { %11693 = vmatpush1.bf16.msra.mxu1 %v15637_v31  ;;  %v10334_v1 = vpop.permute.xlu0 %10333  ;;  %v15705_v31 = vld [vmem:[%s21126_s5 + $0x5a4] ss:$16 sps:$4 sm:$0xff]  }
 0x808   :  { %11694 = vmatprep.subr.bf16.mxu1 %v15642_v23  ;;  %v10381_v15 = vsel %vm10379_vm0, %v20458_v8, %v10334_v1  ;;  %v15681_v8 = vld [vmem:[%s21126_s5 + $0x4a4] ss:$16 sps:$4 sm:$0xff]   ;;  %v15703_v23 = vld [vmem:[%s21126_s5 + $0x5a0] ss:$16 sps:$4 sm:$0xff]   ;;  %v15738_v1 = vld [vmem:[%s21126_s5 + $0xcc] ss:$16 sps:$4 sm:$0xff]  }
 0x809   :  { %v20581_v40 = vsel %vm10382_vm4, %v10381_v15, %v20510_v21  ;;  %v15700_v21 = vld [vmem:[%s21126_s5 + $0x580] ss:$16 sps:$4 sm:$0xff]   ;;  %v15739_v15 = vld [vmem:[%s21126_s5 + $0xe8] ss:$16 sps:$4 sm:$0xff]  }
 0x80b   :  { %11695 = vmatpush1.bf16.msra.mxu1 %v15640_v10  ;;  %v10346_v62 = vpop.permute.xlu1 %10345  ;;  %v15711_v10 = vld [vmem:[%s21126_s5 + $0x5e4] ss:$16 sps:$4 sm:$0xff]  }
 0x80c   :  { %11696 = vmatprep.subr.bf16.mxu1 %v15645_v57  ;;  %v20529_v43 = vsel %vm10392_vm15, %v10391_v0, %v10346_v62  ;;  %v15714_v57 = vld [vmem:[%s21126_s5 + $0x604] ss:$16 sps:$4 sm:$0xff]   ;;  %v15715_v0 = vld [vmem:[%s21126_s5 + $0x620] ss:$16 sps:$4 sm:$0xff]  }
 0x80d   :  { %11710 = vmatprep.mubr.bf16.mxu1 %v20529_v43 }
 0x80f   :  { %11697 = vmatpush1.bf16.msra.mxu1 %v15643_v16  ;;  %v15717_v16 = vld [vmem:[%s21126_s5 + $0x624] ss:$16 sps:$4 sm:$0xff]  }
 0x810   :  { %11698 = vmatprep.subr.bf16.mxu1 %v15648_v2  ;;  %v15925_v2 = vmov 0  }
 0x813   :  { %11699 = vmatpush1.bf16.msra.mxu1 %v15646_v14  ;;  %v15720_v14 = vld [vmem:[%s21126_s5 + $0xc] ss:$16 sps:$4 sm:$0xff]  }
 0x814   :  { %11700 = vmatprep.subr.bf16.mxu1 %v15651_v48  ;;  %v15718_v48 = vld [vmem:[%s21126_s5 + $0x8] ss:$16 sps:$4 sm:$0xff]  }
 0x817   :  { %11701 = vmatpush1.bf16.msra.mxu1 %v15649_v25  ;;  %v15723_v25 = vld [vmem:[%s21126_s5 + $0x2c] ss:$16 sps:$4 sm:$0xff]  }
 0x818   :  { %11702 = vmatprep.subr.bf16.mxu1 %v15654_v47  ;;  %v15721_v47 = vld [vmem:[%s21126_s5 + $0x28] ss:$16 sps:$4 sm:$0xff]  }
 0x81b   :  { %11703 = vmatpush1.bf16.msra.mxu1 %v15652_v13  ;;  %v15726_v13 = vld [vmem:[%s21126_s5 + $0x4c] ss:$16 sps:$4 sm:$0xff]  }
 0x81c   :  { %11704 = vmatprep.subr.bf16.mxu1 %v15657_v29  ;;  %v15724_v29 = vld [vmem:[%s21126_s5 + $0x48] ss:$16 sps:$4 sm:$0xff]  }
 0x81f   :  { %11705 = vmatpush1.bf16.msra.mxu1 %v15655_v35  ;;  %v15729_v35 = vld [vmem:[%s21126_s5 + $0x6c] ss:$16 sps:$4 sm:$0xff]  }
 0x820   :  { %11706 = vmatprep.subr.bf16.mxu1 %v15660_v19  ;;  %v15732_v19 = vld [vmem:[%s21126_s5 + $0x8c] ss:$16 sps:$4 sm:$0xff]  }
 0x822   :  { %v10355_v34 = vpop.permute.xlu1 %10354 }
 0x823   :  { %11707 = vmatpush1.bf16.msra.mxu1 %v15658_v54  ;;  %v10352_v17 = vpop.permute.xlu0 %10351  ;;  %v15730_v54 = vld [vmem:[%s21126_s5 + $0x88] ss:$16 sps:$4 sm:$0xff]  }
 0x824   :  { %11708 = vmatprep.subr.bf16.mxu1 %v15663_v50  ;;  %v10405_v55 = vsel %vm10403_vm5, %v10352_v17, %v10355_v34  ;;  %v15735_v50 = vld [vmem:[%s21126_s5 + $0xac] ss:$16 sps:$4 sm:$0xff]   ;;  %v15733_v34 = vld [vmem:[%s21126_s5 + $0xa8] ss:$16 sps:$4 sm:$0xff]  }
 0x826   :  { %v10349_v36 = vpop.permute.xlu1 %10348 }
 0x827   :  { %11709 = vmatpush1.bf16.msra.mxu1 %v15661_v7  ;;  %v10398_v52 = vsel %vm10396_vm1, %v10346_v62, %v10349_v36  ;;  %v15712_v62 = vld [vmem:[%s21126_s5 + $0x600] ss:$16 sps:$4 sm:$0xff]   ;;  %v15736_v7 = vld [vmem:[%s21126_s5 + $0xc8] ss:$16 sps:$4 sm:$0xff]   ;;  %v15744_v36 = vld [vmem:[%s21126_s5 + $0x10c] ss:$16 sps:$4 sm:$0xff]  }
 0x828   :  { %11719 = vmatprep.subr.bf16.mxu1 %v15666_v27  ;;  %v20578_v45 = vsel %vm10399_vm2, %v10398_v52, %v10352_v17  ;;  %v15741_v27 = vld [vmem:[%s21126_s5 + $0xec] ss:$16 sps:$4 sm:$0xff]   ;;  %v15742_v17 = vld [vmem:[%s21126_s5 + $0x108] ss:$16 sps:$4 sm:$0xff]  }
 0x829   :  { %v15747_v52 = vld [vmem:[%s21126_s5 + $0x12c] ss:$16 sps:$4 sm:$0xff]  }
 0x82a   :  { %11711 = vmatmul.mubr.bf16.vlgmr.msra.gmra.mrb[88].mxu1 %v20581_v40 }
 0x82b   :  { %11720 = vmatpush1.bf16.msra.mxu1 %v15664_v53  ;;  %v10358_v39 = vpop.permute.xlu0 %10357  ;;  %v15745_v53 = vld [vmem:[%s21126_s5 + $0x128] ss:$16 sps:$4 sm:$0xff]  }
 0x82c   :  { %11721 = vmatprep.subr.bf16.mxu1 %v15669_v4  ;;  %v10407_v32 = vsel %vm7526_vm6, %v10405_v55, %v10358_v39  ;;  %vm11634_vm6 = vcmask 261120   ;;  %v15750_v4 = vld [vmem:[%s21126_s5 + $0x14c] ss:$16 sps:$4 sm:$0xff]   ;;  %v15748_v39 = vld [vmem:[%s21126_s5 + $0x148] ss:$16 sps:$4 sm:$0xff]  }
 0x82d   :  { %v15756_v55 = vld [vmem:[%s21126_s5 + $0x18c] ss:$16 sps:$4 sm:$0xff]  }
 0x82f   :  { %11722 = vmatpush1.bf16.msra.mxu1 %v15667_v63  ;;  %v20591_v33 = vpop.permute.xlu0 %10360  ;;  %v15753_v63 = vld [vmem:[%s21126_s5 + $0x16c] ss:$16 sps:$4 sm:$0xff]  }
 0x830   :  { %11723 = vmatprep.subr.bf16.mxu1 %v15672_v38  ;;  %v20597_v18 = vsel %vm10408_vm7, %v10407_v32, %v20591_v33  ;;  %v15751_v38 = vld [vmem:[%s21126_s5 + $0x168] ss:$16 sps:$4 sm:$0xff]  }
 0x831   :  { %11751 = vmatprep.mubr.bf16.mxu1 %v20597_v18  ;;  %v15754_v32 = vld [vmem:[%s21126_s5 + $0x188] ss:$16 sps:$4 sm:$0xff]  }
 0x833   :  { %11724 = vmatpush1.bf16.msra.mxu1 %v15670_v61  ;;  %v15759_v61 = vld [vmem:[%s21126_s5 + $0x1ac] ss:$16 sps:$4 sm:$0xff]  }
 0x834   :  { %11725 = vmatprep.subr.bf16.mxu1 %v15675_v5  ;;  %v15757_v5 = vld [vmem:[%s21126_s5 + $0x1a8] ss:$16 sps:$4 sm:$0xff]  }
 0x837   :  { %11726 = vmatpush1.bf16.msra.mxu1 %v15673_v28  ;;  %v15762_v28 = vld [vmem:[%s21126_s5 + $0x1cc] ss:$16 sps:$4 sm:$0xff]  }
 0x838   :  { %11727 = vmatprep.subr.bf16.mxu1 %v15678_v11  ;;  %v15760_v11 = vld [vmem:[%s21126_s5 + $0x1c8] ss:$16 sps:$4 sm:$0xff]  }
 0x83b   :  { %11728 = vmatpush1.bf16.msra.mxu1 %v15676_v58  ;;  %v15765_v58 = vld [vmem:[%s21126_s5 + $0x1ec] ss:$16 sps:$4 sm:$0xff]  }
 0x83c   :  { %11729 = vmatprep.subr.bf16.mxu1 %v15681_v8  ;;  %v15763_v8 = vld [vmem:[%s21126_s5 + $0x1e8] ss:$16 sps:$4 sm:$0xff]  }
 0x83f   :  { %11730 = vmatpush1.bf16.msra.mxu1 %v15679_v24  ;;  %v15768_v24 = vld [vmem:[%s21126_s5 + $0x20c] ss:$16 sps:$4 sm:$0xff]  }
 0x840   :  { %11731 = vmatprep.subr.bf16.mxu1 %v15684_v41  ;;  %v15766_v41 = vld [vmem:[%s21126_s5 + $0x208] ss:$16 sps:$4 sm:$0xff]  }
 0x843   :  { %11732 = vmatpush1.bf16.msra.mxu1 %v15682_v60  ;;  %v15771_v60 = vld [vmem:[%s21126_s5 + $0x22c] ss:$16 sps:$4 sm:$0xff]  }
 0x844   :  { %11733 = vmatprep.subr.bf16.mxu1 %v15687_v59  ;;  %v15769_v59 = vld [vmem:[%s21126_s5 + $0x228] ss:$16 sps:$4 sm:$0xff]  }
 0x847   :  { %11734 = vmatpush1.bf16.msra.mxu1 %v15685_v12  ;;  %v15774_v12 = vld [vmem:[%s21126_s5 + $0x24c] ss:$16 sps:$4 sm:$0xff]  }
 0x848   :  { %11735 = vmatprep.subr.bf16.mxu1 %v15690_v44  ;;  %v15772_v44 = vld [vmem:[%s21126_s5 + $0x248] ss:$16 sps:$4 sm:$0xff]  }
 0x84b   :  { %11736 = vmatpush1.bf16.msra.mxu1 %v15688_v3  ;;  %v15780_v3 = vld [vmem:[%s21126_s5 + $0x28c] ss:$16 sps:$4 sm:$0xff]  }
 0x84c   :  { %11737 = vmatprep.subr.bf16.mxu1 %v15693_v20  ;;  %v15778_v20 = vld [vmem:[%s21126_s5 + $0x288] ss:$16 sps:$4 sm:$0xff]  }
 0x84f   :  { %11738 = vmatpush1.bf16.msra.mxu1 %v15691_v30  ;;  %v15783_v30 = vld [vmem:[%s21126_s5 + $0x2ac] ss:$16 sps:$4 sm:$0xff]  }
 0x850   :  { %11739 = vmatprep.subr.bf16.mxu1 %v15696_v37  ;;  %v15781_v37 = vld [vmem:[%s21126_s5 + $0x2a8] ss:$16 sps:$4 sm:$0xff]  }
 0x853   :  { %11740 = vmatpush1.bf16.msra.mxu1 %v15694_v42  ;;  %v15786_v42 = vld [vmem:[%s21126_s5 + $0x2cc] ss:$16 sps:$4 sm:$0xff]  }
 0x854   :  { %11741 = vmatprep.subr.bf16.mxu1 %v15699_v6  ;;  %v15784_v6 = vld [vmem:[%s21126_s5 + $0x2c8] ss:$16 sps:$4 sm:$0xff]  }
 0x857   :  { %11742 = vmatpush1.bf16.msra.mxu1 %v15697_v51  ;;  %v15789_v51 = vld [vmem:[%s21126_s5 + $0x2ec] ss:$16 sps:$4 sm:$0xff]  }
 0x858   :  { %11743 = vmatprep.subr.bf16.mxu1 %v15702_v9  ;;  %v15787_v9 = vld [vmem:[%s21126_s5 + $0x2e8] ss:$16 sps:$4 sm:$0xff]  }
 0x85b   :  { %11744 = vmatpush1.bf16.msra.mxu1 %v15700_v21  ;;  %v15792_v21 = vld [vmem:[%s21126_s5 + $0x30c] ss:$16 sps:$4 sm:$0xff]  }
 0x85c   :  { %11745 = vmatprep.subr.bf16.mxu1 %v15705_v31  ;;  %v15790_v31 = vld [vmem:[%s21126_s5 + $0x308] ss:$16 sps:$4 sm:$0xff]  }
 0x85f   :  { %11746 = vmatpush1.bf16.msra.mxu1 %v15703_v23  ;;  %v15795_v23 = vld [vmem:[%s21126_s5 + $0x32c] ss:$16 sps:$4 sm:$0xff]  }
 0x860   :  { %11747 = vmatprep.subr.bf16.mxu1 %v15708_v56  ;;  %v15793_v56 = vld [vmem:[%s21126_s5 + $0x328] ss:$16 sps:$4 sm:$0xff]  }
 0x863   :  { %11748 = vmatpush1.bf16.msra.mxu1 %v15706_v22  ;;  %v15798_v22 = vld [vmem:[%s21126_s5 + $0x34c] ss:$16 sps:$4 sm:$0xff]  }
 0x864   :  { %11749 = vmatprep.subr.bf16.mxu1 %v15711_v10  ;;  %v15796_v10 = vld [vmem:[%s21126_s5 + $0x348] ss:$16 sps:$4 sm:$0xff]  }
 0x867   :  { %11750 = vmatpush1.bf16.msra.mxu1 %v15709_v46  ;;  %v15801_v46 = vld [vmem:[%s21126_s5 + $0x36c] ss:$16 sps:$4 sm:$0xff]  }
 0x868   :  { %11760 = vmatprep.subr.bf16.mxu1 %v15714_v57  ;;  %v15799_v57 = vld [vmem:[%s21126_s5 + $0x368] ss:$16 sps:$4 sm:$0xff]  }
 0x86a   :  { %11752 = vmatmul.mubr.bf16.vlgmr.msra.gmra.mrb[88].mxu1 %v20578_v45 }
 0x86b   :  { %11761 = vmatpush1.bf16.msra.mxu1 %v15712_v62  ;;  %11792 = vmatprep.mubr.bf16.mxu1 %v15925_v2  ;;  %v15804_v62 = vld [vmem:[%s21126_s5 + $0x38c] ss:$16 sps:$4 sm:$0xff]  }
 0x86c   :  { %11762 = vmatprep.subr.bf16.mxu1 %v15717_v16  ;;  %v15802_v16 = vld [vmem:[%s21126_s5 + $0x388] ss:$16 sps:$4 sm:$0xff]  }
 0x86f   :  { %11763 = vmatpush1.bf16.msra.mxu1 %v15715_v0  ;;  %v15807_v0 = vld [vmem:[%s21126_s5 + $0x3ac] ss:$16 sps:$4 sm:$0xff]  }
 0x870   :  { %11801 = vmatprep.subr.bf16.mxu1 %v15720_v14  ;;  %v15805_v14 = vld [vmem:[%s21126_s5 + $0x3a8] ss:$16 sps:$4 sm:$0xff]  }
 0x876   :  { %13394 = vmatmul.mubr.msk.bf16.vlgmr.msra.gmra.mrb[88].mxu1 %vm11634_vm6, %v20591_v33 }
 0x877   :  { %11802 = vmatpush1.bf16.msra.mxu1 %v15718_v48  ;;  %11833 = vmatprep.mubr.bf16.mxu1 %v20464_v26  ;;  %v15727_v26 = vld [vmem:[%s21126_s5 + $0x68] ss:$16 sps:$4 sm:$0xff]   ;;  %v15810_v48 = vld [vmem:[%s21126_s5 + $0x3cc] ss:$16 sps:$4 sm:$0xff]  }
 0x878   :  { %11803 = vmatprep.subr.bf16.mxu1 %v15723_v25  ;;  %v15808_v25 = vld [vmem:[%s21126_s5 + $0x3c8] ss:$16 sps:$4 sm:$0xff]  }
 0x87b   :  { %11804 = vmatpush1.bf16.msra.mxu1 %v15721_v47  ;;  %v15813_v47 = vld [vmem:[%s21126_s5 + $0x3ec] ss:$16 sps:$4 sm:$0xff]  }
 0x87c   :  { %11805 = vmatprep.subr.bf16.mxu1 %v15726_v13  ;;  %v15811_v13 = vld [vmem:[%s21126_s5 + $0x3e8] ss:$16 sps:$4 sm:$0xff]  }
 0x87f   :  { %11806 = vmatpush1.bf16.msra.mxu1 %v15724_v29  ;;  %v15816_v29 = vld [vmem:[%s21126_s5 + $0x40c] ss:$16 sps:$4 sm:$0xff]  }
 0x880   :  { %11807 = vmatprep.subr.bf16.mxu1 %v15729_v35  ;;  %v15814_v35 = vld [vmem:[%s21126_s5 + $0x408] ss:$16 sps:$4 sm:$0xff]  }
 0x883   :  { %11808 = vmatpush1.bf16.msra.mxu1 %v15727_v26  ;;  %v15819_v26 = vld [vmem:[%s21126_s5 + $0x42c] ss:$16 sps:$4 sm:$0xff]  }
 0x884   :  { %11809 = vmatprep.subr.bf16.mxu1 %v15732_v19  ;;  %v15817_v19 = vld [vmem:[%s21126_s5 + $0x428] ss:$16 sps:$4 sm:$0xff]  }
 0x887   :  { %11810 = vmatpush1.bf16.msra.mxu1 %v15730_v54  ;;  %v15822_v54 = vld [vmem:[%s21126_s5 + $0x44c] ss:$16 sps:$4 sm:$0xff]  }
 0x888   :  { %11811 = vmatprep.subr.bf16.mxu1 %v15735_v50  ;;  %v15820_v50 = vld [vmem:[%s21126_s5 + $0x448] ss:$16 sps:$4 sm:$0xff]  }
 0x88b   :  { %11812 = vmatpush1.bf16.msra.mxu1 %v15733_v34  ;;  %v15828_v34 = vld [vmem:[%s21126_s5 + $0x48c] ss:$16 sps:$4 sm:$0xff]  }
 0x88c   :  { %11813 = vmatprep.subr.bf16.mxu1 %v15738_v1  ;;  %v15826_v1 = vld [vmem:[%s21126_s5 + $0x488] ss:$16 sps:$4 sm:$0xff]  }
 0x88f   :  { %11814 = vmatpush1.bf16.msra.mxu1 %v15736_v7  ;;  %v15831_v7 = vld [vmem:[%s21126_s5 + $0x4ac] ss:$16 sps:$4 sm:$0xff]  }
 0x890   :  { %11815 = vmatprep.subr.bf16.mxu1 %v15741_v27  ;;  %v15829_v27 = vld [vmem:[%s21126_s5 + $0x4a8] ss:$16 sps:$4 sm:$0xff]  }
 0x893   :  { %11816 = vmatpush1.bf16.msra.mxu1 %v15739_v15  ;;  %v15834_v15 = vld [vmem:[%s21126_s5 + $0x4cc] ss:$16 sps:$4 sm:$0xff]  }
 0x894   :  { %11817 = vmatprep.subr.bf16.mxu1 %v15744_v36  ;;  %v15832_v36 = vld [vmem:[%s21126_s5 + $0x4c8] ss:$16 sps:$4 sm:$0xff]  }
 0x897   :  { %11818 = vmatpush1.bf16.msra.mxu1 %v15742_v17  ;;  %v15837_v17 = vld [vmem:[%s21126_s5 + $0x4ec] ss:$16 sps:$4 sm:$0xff]  }
 0x898   :  { %11819 = vmatprep.subr.bf16.mxu1 %v15747_v52  ;;  %v15835_v52 = vld [vmem:[%s21126_s5 + $0x4e8] ss:$16 sps:$4 sm:$0xff]  }
 0x89b   :  { %11820 = vmatpush1.bf16.msra.mxu1 %v15745_v53  ;;  %v15840_v53 = vld [vmem:[%s21126_s5 + $0x50c] ss:$16 sps:$4 sm:$0xff]  }
 0x89c   :  { %11821 = vmatprep.subr.bf16.mxu1 %v15750_v4  ;;  %v15838_v4 = vld [vmem:[%s21126_s5 + $0x508] ss:$16 sps:$4 sm:$0xff]  }
 0x89f   :  { %11822 = vmatpush1.bf16.msra.mxu1 %v15748_v39  ;;  %v15843_v39 = vld [vmem:[%s21126_s5 + $0x52c] ss:$16 sps:$4 sm:$0xff]  }
 0x8a0   :  { %11823 = vmatprep.subr.bf16.mxu1 %v15753_v63  ;;  %v15841_v63 = vld [vmem:[%s21126_s5 + $0x528] ss:$16 sps:$4 sm:$0xff]  }
 0x8a3   :  { %11824 = vmatpush1.bf16.msra.mxu1 %v15751_v38  ;;  %v15846_v38 = vld [vmem:[%s21126_s5 + $0x54c] ss:$16 sps:$4 sm:$0xff]  }
 0x8a4   :  { %11825 = vmatprep.subr.bf16.mxu1 %v15756_v55  ;;  %v15844_v55 = vld [vmem:[%s21126_s5 + $0x548] ss:$16 sps:$4 sm:$0xff]  }
 0x8a7   :  { %11826 = vmatpush1.bf16.msra.mxu1 %v15754_v32  ;;  %v15849_v32 = vld [vmem:[%s21126_s5 + $0x56c] ss:$16 sps:$4 sm:$0xff]  }
 0x8a8   :  { %11827 = vmatprep.subr.bf16.mxu1 %v15759_v61  ;;  %v15847_v61 = vld [vmem:[%s21126_s5 + $0x568] ss:$16 sps:$4 sm:$0xff]  }
 0x8ab   :  { %11828 = vmatpush1.bf16.msra.mxu1 %v15757_v5  ;;  %v15852_v5 = vld [vmem:[%s21126_s5 + $0x58c] ss:$16 sps:$4 sm:$0xff]  }
 0x8ac   :  { %11829 = vmatprep.subr.bf16.mxu1 %v15762_v28  ;;  %v15850_v28 = vld [vmem:[%s21126_s5 + $0x588] ss:$16 sps:$4 sm:$0xff]  }
 0x8af   :  { %11830 = vmatpush1.bf16.msra.mxu1 %v15760_v11  ;;  %v15855_v11 = vld [vmem:[%s21126_s5 + $0x5ac] ss:$16 sps:$4 sm:$0xff]  }
 0x8b0   :  { %11831 = vmatprep.subr.bf16.mxu1 %v15765_v58  ;;  %v15853_v58 = vld [vmem:[%s21126_s5 + $0x5a8] ss:$16 sps:$4 sm:$0xff]  }
 0x8b3   :  { %11832 = vmatpush1.bf16.msra.mxu1 %v15763_v8  ;;  %v15858_v8 = vld [vmem:[%s21126_s5 + $0x5cc] ss:$16 sps:$4 sm:$0xff]  }
 0x8b4   :  { %11842 = vmatprep.subr.bf16.mxu1 %v15768_v24  ;;  %v15856_v24 = vld [vmem:[%s21126_s5 + $0x5c8] ss:$16 sps:$4 sm:$0xff]  }
 0x8b6   :  { %11834 = vmatmul.mubr.bf16.vlgmr.msra.gmra.mrb[92].mxu1 %v20470_v49  ;;  %v15777_v49 = vld [vmem:[%s21126_s5 + $0x26c] ss:$16 sps:$4 sm:$0xff]  }
 0x8b7   :  { %11843 = vmatpush1.bf16.msra.mxu1 %v15766_v41  ;;  %11874 = vmatprep.mubr.bf16.mxu1 %v20529_v43  ;;  %v15775_v43 = vld [vmem:[%s21126_s5 + $0x268] ss:$16 sps:$4 sm:$0xff]   ;;  %v15861_v41 = vld [vmem:[%s21126_s5 + $0x5ec] ss:$16 sps:$4 sm:$0xff]  }
 0x8b8   :  { %11844 = vmatprep.subr.bf16.mxu1 %v15771_v60  ;;  %v15859_v60 = vld [vmem:[%s21126_s5 + $0x5e8] ss:$16 sps:$4 sm:$0xff]  }
 0x8bb   :  { %11845 = vmatpush1.bf16.msra.mxu1 %v15769_v59  ;;  %v15864_v59 = vld [vmem:[%s21126_s5 + $0x60c] ss:$16 sps:$4 sm:$0xff]  }
 0x8bc   :  { %11846 = vmatprep.subr.bf16.mxu1 %v15774_v12  ;;  %v15862_v12 = vld [vmem:[%s21126_s5 + $0x608] ss:$16 sps:$4 sm:$0xff]  }
 0x8bf   :  { %11847 = vmatpush1.bf16.msra.mxu1 %v15772_v44  ;;  %v15867_v44 = vld [vmem:[%s21126_s5 + $0x62c] ss:$16 sps:$4 sm:$0xff]  }
 0x8c0   :  { %11848 = vmatprep.subr.bf16.mxu1 %v15777_v49  ;;  %v15865_v49 = vld [vmem:[%s21126_s5 + $0x628] ss:$16 sps:$4 sm:$0xff]  }
 0x8c3   :  { %11849 = vmatpush1.bf16.msra.mxu1 %v15775_v43  ;;  %v15868_v43 = vld [vmem:[%s21128_s7 + $0x40] sm:$0xff]  }
 0x8c4   :  { %11850 = vmatprep.subr.bf16.mxu1 %v15780_v3  ;;  %v10614_v3 = vlaneseq }
 0x8c7   :  { %11851 = vmatpush1.bf16.msra.mxu1 %v15778_v20  ;;  %v15869_v20 = vld [vmem:[%s21128_s7] sm:$0xff]  }
 0x8c8   :  { %11852 = vmatprep.subr.bf16.mxu1 %v15783_v30  ;;  %v15870_v30 = vld [vmem:[%s21128_s7 + $0x48] sm:$0xff]  }
 0x8cb   :  { %11853 = vmatpush1.bf16.msra.mxu1 %v15781_v37 }
 0x8cc   :  { %11854 = vmatprep.subr.bf16.mxu1 %v15786_v42  ;;  %v15872_v42 = vld [vmem:[%s21128_s7 + $0x50] sm:$0xff]  }
 0x8cf   :  { %11855 = vmatpush1.bf16.msra.mxu1 %v15784_v6  ;;  %v21024_v6 = vld [vmem:[%s21129_s6] sm:$0xf] }
 0x8d0   :  { %11856 = vmatprep.subr.bf16.mxu1 %v15789_v51 }
 0x8d3   :  { %11857 = vmatpush1.bf16.msra.mxu1 %v15787_v9  ;;  %v15874_v9 = vld [vmem:[%s21128_s7 + $0x58] sm:$0xff]  }
 0x8d4   :  { %11858 = vmatprep.subr.bf16.mxu1 %v15792_v21 }
 0x8d7   :  { %11859 = vmatpush1.bf16.msra.mxu1 %v15790_v31 }
 0x8d8   :  { %11860 = vmatprep.subr.bf16.mxu1 %v15795_v23 }
 0x8db   :  { %11861 = vmatpush1.bf16.msra.mxu1 %v15793_v56 }
 0x8dc   :  { %11862 = vmatprep.subr.bf16.mxu1 %v15798_v22  ;;  %v15875_v22 = vld [vmem:[%s21128_s7 + $0x18] sm:$0xff]  }
 0x8df   :  { %11863 = vmatpush1.bf16.msra.mxu1 %v15796_v10 }
 0x8e0   :  { %11864 = vmatprep.subr.bf16.mxu1 %v15801_v46  ;;  %v15876_v46 = vld [vmem:[%s21128_s7 + $0x60] sm:$0xff]  }
 0x8e3   :  { %11865 = vmatpush1.bf16.msra.mxu1 %v15799_v57 }
 0x8e4   :  { %11866 = vmatprep.subr.bf16.mxu1 %v15804_v62  ;;  %v15877_v62 = vld [vmem:[%s21128_s7 + $0x20] sm:$0xff]  }
 0x8e7   :  { %11867 = vmatpush1.bf16.msra.mxu1 %v15802_v16  ;;  %v15878_v16 = vld [vmem:[%s21128_s7 + $0x68] sm:$0xff]  }
 0x8e8   :  { %11868 = vmatprep.subr.bf16.mxu1 %v15807_v0  ;;  %v15879_v0 = vld [vmem:[%s21128_s7 + $0x28] sm:$0xff]  }
 0x8eb   :  { %11869 = vmatpush1.bf16.msra.mxu1 %v15805_v14 }
 0x8ec   :  { %11870 = vmatprep.subr.bf16.mxu1 %v15810_v48  ;;  %v15880_v48 = vld [vmem:[%s21128_s7 + $0x70] sm:$0xff]  }
 0x8ef   :  { %11871 = vmatpush1.bf16.msra.mxu1 %v15808_v25  ;;  %v15881_v25 = vld [vmem:[%s21128_s7 + $0x30] sm:$0xff]  }
 0x8f0   :  { %11872 = vmatprep.subr.bf16.mxu1 %v15813_v47 }
 0x8f3   :  { %11873 = vmatpush1.bf16.msra.mxu1 %v15811_v13  ;;  %v15882_v13 = vld [vmem:[%s21128_s7 + $0x78] sm:$0xff]  }
 0x8f4   :  { %11883 = vmatprep.subr.bf16.mxu1 %v15816_v29  ;;  %v15883_v29 = vld [vmem:[%s21128_s7 + $0x38] sm:$0xff]  }
 0x8f6   :  { %11875 = vmatmul.mubr.bf16.vlgmr.msra.gmra.mrb[92].mxu1 %v20581_v40  ;;  %v15825_v40 = vld [vmem:[%s21126_s5 + $0x46c] ss:$16 sps:$4 sm:$0xff]  }
 0x8f7   :  { %11884 = vmatpush1.bf16.msra.mxu1 %v15814_v35  ;;  %11915 = vmatprep.mubr.bf16.mxu1 %v20597_v18  ;;  %v15823_v18 = vld [vmem:[%s21126_s5 + $0x468] ss:$16 sps:$4 sm:$0xff]  }
 0x8f8   :  { %11885 = vmatprep.subr.bf16.mxu1 %v15819_v26  ;;  %v15884_v26 = vld [vmem:[%s21128_s7 + $0xc0] sm:$0xff]  }
 0x8fb   :  { %11886 = vmatpush1.bf16.msra.mxu1 %v15817_v19  ;;  %v15885_v19 = vld [vmem:[%s21128_s7 + $0x80] sm:$0xff]  }
 0x8fc   :  { %11887 = vmatprep.subr.bf16.mxu1 %v15822_v54 }
 0x8ff   :  { %11888 = vmatpush1.bf16.msra.mxu1 %v15820_v50  ;;  %v15886_v50 = vld [vmem:[%s21128_s7 + $0xc8] sm:$0xff]  }
 0x900   :  { %11889 = vmatprep.subr.bf16.mxu1 %v15825_v40  ;;  %v15887_v40 = vld [vmem:[%s21128_s7 + $0x88] sm:$0xff]  }
 0x903   :  { %11890 = vmatpush1.bf16.msra.mxu1 %v15823_v18  ;;  %v15888_v18 = vld [vmem:[%s21128_s7 + $0xd0] sm:$0xff]  }
 0x904   :  { %11891 = vmatprep.subr.bf16.mxu1 %v15828_v34  ;;  %v15889_v34 = vld [vmem:[%s21128_s7 + $0x90] sm:$0xff]  }
 0x907   :  { %11892 = vmatpush1.bf16.msra.mxu1 %v15826_v1  ;;  %v15890_v1 = vld [vmem:[%s21128_s7 + $0xd8] sm:$0xff]  }
 0x908   :  { %11893 = vmatprep.subr.bf16.mxu1 %v15831_v7  ;;  %v15891_v7 = vld [vmem:[%s21128_s7 + $0x98] sm:$0xff]  }
 0x90b   :  { %11894 = vmatpush1.bf16.msra.mxu1 %v15829_v27  ;;  %v15892_v27 = vld [vmem:[%s21128_s7 + $0xe0] sm:$0xff]  }
 0x90c   :  { %11895 = vmatprep.subr.bf16.mxu1 %v15834_v15  ;;  %v15893_v15 = vld [vmem:[%s21128_s7 + $0xa0] sm:$0xff]  }
 0x90f   :  { %11896 = vmatpush1.bf16.msra.mxu1 %v15832_v36  ;;  %v15894_v36 = vld [vmem:[%s21128_s7 + $0xe8] sm:$0xff]  }
 0x910   :  { %11897 = vmatprep.subr.bf16.mxu1 %v15837_v17  ;;  %v15895_v17 = vld [vmem:[%s21128_s7 + $0xa8] sm:$0xff]  }
 0x913   :  { %11898 = vmatpush1.bf16.msra.mxu1 %v15835_v52  ;;  %v15896_v52 = vld [vmem:[%s21128_s7 + $0xf0] sm:$0xff]  }
 0x914   :  { %11899 = vmatprep.subr.bf16.mxu1 %v15840_v53  ;;  %v15897_v53 = vld [vmem:[%s21128_s7 + $0xb0] sm:$0xff]  }
 0x917   :  { %11900 = vmatpush1.bf16.msra.mxu1 %v15838_v4  ;;  %v15898_v4 = vld [vmem:[%s21128_s7 + $0xf8] ss:$0 sps:$4 sm:$0x33]  }
 0x918   :  { %11901 = vmatprep.subr.bf16.mxu1 %v15843_v39  ;;  %v15899_v39 = vld [vmem:[%s21128_s7 + $0xb8] sm:$0xff]  }
 0x91b   :  { %11902 = vmatpush1.bf16.msra.mxu1 %v15841_v63 }
 0x91c   :  { %11903 = vmatprep.subr.bf16.mxu1 %v15846_v38 }
 0x91f   :  { %11904 = vmatpush1.bf16.msra.mxu1 %v15844_v55 }
 0x920   :  { %11905 = vmatprep.subr.bf16.mxu1 %v15849_v32 }
 0x923   :  { %11906 = vmatpush1.bf16.msra.mxu1 %v15847_v61 }
 0x924   :  { %11907 = vmatprep.subr.bf16.mxu1 %v15852_v5 }
 0x927   :  { %11908 = vmatpush1.bf16.msra.mxu1 %v15850_v28 }
 0x928   :  { %11909 = vmatprep.subr.bf16.mxu1 %v15855_v11 }
 0x92b   :  { %11910 = vmatpush1.bf16.msra.mxu1 %v15853_v58 }
 0x92c   :  { %11911 = vmatprep.subr.bf16.mxu1 %v15858_v8 }
 0x92f   :  { %11912 = vmatpush1.bf16.msra.mxu1 %v15856_v24 }
 0x930   :  { %11913 = vmatprep.subr.bf16.mxu1 %v15861_v41 }
 0x933   :  { %11914 = vmatpush1.bf16.msra.mxu1 %v15859_v60 }
 0x934   :  { %11924 = vmatprep.subr.bf16.mxu1 %v15864_v59 }
 0x936   :  { %11916 = vmatmul.mubr.bf16.vlgmr.msra.gmra.mrb[92].mxu1 %v20578_v45  ;;  %v21007_v45 = vshrl.u32 %v10614_v3, 7 }
 0x937   :  { %11925 = vmatpush1.bf16.msra.mxu1 %v15862_v12  ;;  %11956 = vmatprep.mubr.bf16.mxu1 %v15925_v2  ;;  %v15871_v2 = vld [vmem:[%s21128_s7 + $0x8] sm:$0xff]  }
 0x938   :  { %11926 = vmatprep.subr.bf16.mxu1 %v15867_v44  ;;  %v10620_v37 = vsub.s32 1, %v21007_v45  ;;  %v10616_v14 = vsub.s32 0, %v21007_v45  ;;  %v10624_v63 = vsub.s32 2, %v21007_v45  ;;  %v10628_v38 = vsub.s32 3, %v21007_v45 }
 0x93a   :  { %v10621_v51 = vrot.slane %v21024_v6, %v10620_v37  ;;  %v10617_v47 = vrot.slane %v21024_v6, %v10616_v14  ;;  %v10625_v55 = vrot.slane %v21024_v6, %v10624_v63  ;;  %v10629_v32 = vrot.slane %v21024_v6, %v10628_v38 }
 0x93b   :  { %11927 = vmatpush1.bf16.msra.mxu1 %v15865_v49 }
 0x93c   :  { %13915 = vmatprep.subr.bf16.mxu1 %v15868_v43  ;;  %v13396_v43 = vld [vmem:[%s21130_s8] ss:$0 sm:$0xff] }
 0x942   :  { %13395 = vmatmul.mubr.msk.bf16.vlgmr.msra.gmra.mrb[92].mxu1 %vm11634_vm6, %v20591_v33  ;;  %v15873_v33 = vld [vmem:[%s21128_s7 + $0x10] sm:$0xff]  }
 0x943   :  { %13916 = vmatpush3.bf16.msra.mxu1 %v15869_v20 }
 0x944   :  { %13917 = vmatprep.subr.bf16.mxu1 %v15870_v30 }
 0x947   :  { %13918 = vmatpush3.bf16.msra.mxu1 %v15871_v2 }
 0x948   :  { %13919 = vmatprep.subr.bf16.mxu1 %v15872_v42 }
 0x949   :  { %v11794_v21 = vpop.f32.mrb[88].mxu1 }
 0x94a   :  { %v11796_v31 = vpop.f32.mrb[89].mxu1  ;;  %v14933_v35 = vadd.f32 %v11794_v21, %v10617_v47 }
 0x94b   :  { %13920 = vmatpush3.bf16.msra.mxu1 %v15873_v33  ;;  %v14934_v23 = vadd.f32 %v11796_v31, %v10621_v51  ;;  %v11798_v56 = vpop.f32.mrb[90].mxu1 }
 0x94c   :  { %v11799_v10 = vpop.f32.mrb[91].mxu1  ;;  %13921 = vmatprep.subr.bf16.mxu1 %v15874_v9  ;;  %v11965_v54 = vpack.c.bf16 %v14933_v35, %v14933_v35 }
 0x94d   :  { %v11966_v57 = vpack.c.bf16 %v14934_v23, %v14934_v23 }
 0x94f   :  { %13922 = vmatpush3.bf16.msra.mxu1 %v15875_v22  ;;  %12266 = vmatprep.mubr.bf16.mxu1 %v11966_v57 }
 0x950   :  { %13923 = vmatprep.subr.bf16.mxu1 %v15876_v46 }
 0x953   :  { %13924 = vmatpush3.bf16.msra.mxu1 %v15877_v62 }
 0x954   :  { %13925 = vmatprep.subr.bf16.mxu1 %v15878_v16 }
 0x957   :  { %13926 = vmatpush3.bf16.msra.mxu1 %v15879_v0 }
 0x958   :  { %13927 = vmatprep.subr.bf16.mxu1 %v15880_v48 }
 0x95b   :  { %13928 = vmatpush3.bf16.msra.mxu1 %v15881_v25 }
 0x95c   :  { %13929 = vmatprep.subr.bf16.mxu1 %v15882_v13 }
 0x95f   :  { %13930 = vmatpush3.bf16.msra.mxu1 %v15883_v29 }
 0x960   :  { %13937 = vmatprep.subr.bf16.mxu1 %v15884_v26 }
 0x962   :  { %12267 = vmatmul.mubr.bf16.vlgmr.msra.gmra.mrb[96].mxu1 %v11965_v54 }
 0x963   :  { %13938 = vmatpush3.bf16.msra.mxu1 %v15885_v19 }
 0x964   :  { %13939 = vmatprep.subr.bf16.mxu1 %v15886_v50 }
 0x967   :  { %13940 = vmatpush3.bf16.msra.mxu1 %v15887_v40 }
 0x968   :  { %13941 = vmatprep.subr.bf16.mxu1 %v15888_v18 }
 0x96b   :  { %13942 = vmatpush3.bf16.msra.mxu1 %v15889_v34 }
 0x96c   :  { %13943 = vmatprep.subr.bf16.mxu1 %v15890_v1 }
 0x96f   :  { %13944 = vmatpush3.bf16.msra.mxu1 %v15891_v7 }
 0x970   :  { %13945 = vmatprep.subr.bf16.mxu1 %v15892_v27 }
 0x973   :  { %13946 = vmatpush3.bf16.msra.mxu1 %v15893_v15 }
 0x974   :  { %13947 = vmatprep.subr.bf16.mxu1 %v15894_v36 }
 0x977   :  { %13948 = vmatpush3.bf16.msra.mxu1 %v15895_v17 }
 0x978   :  { %13949 = vmatprep.subr.bf16.mxu1 %v15896_v52 }
 0x97b   :  { %13950 = vmatpush3.bf16.msra.mxu1 %v15897_v53 }
 0x97c   :  { %15222 = vmatprep.subr.msk.bf16.mxu1 %vm8235_vm3, %v15898_v4 }
 0x97f   :  { %13952 = vmatpush3.bf16.msra.mxu1 %v15899_v39 }
 0xa15   :  { %v11958_v61 = vpop.f32.mrb[92].mxu1 }
 0xa16   :  { %v14935_v5 = vadd.f32 %v11958_v61, %v10625_v55  ;;  %v11960_v28 = vpop.f32.mrb[93].mxu1 }
 0xa17   :  { %v14936_v11 = vadd.f32 %v11960_v28, %v10629_v32  ;;  %v11962_v58 = vpop.f32.mrb[94].mxu1 }
 0xa18   :  { %v11963_v8 = vpop.f32.mrb[95].mxu1  ;;  %v11967_v41 = vpack.c.bf16 %v14935_v5, %v14935_v5 }
 0xa19   :  { %v11968_v24 = vpack.c.bf16 %v14936_v11, %v14936_v11 }
 0xa1b   :  { %13429 = vmatprep.mubr.msk.bf16.mxu1 %vm10392_vm15, %v11968_v24 }
 0xa1c   :  { %12307 = vmatmul.mubr.bf16.vlgmr.msra.gmra.mrb[100].mxu1 %v11967_v41 }
 0xa35   :  { %v13931_v60 = vpop.f32.mrb[96].mxu1 }
 0xa36   :  { %v13932_v59 = vpop.f32.mrb[97].mxu1 }
 0xa37   :  { %v13933_v12 = vadd.f32 %v13932_v59, %v13931_v60  ;;  %v13934_v44 = vpop.f32.mrb[98].mxu1 }
 0xa38   :  { %v13935_v49 = vpop.f32.mrb[99].mxu1 }
 0xa39   :  { %v12269_v45 = vadd.f32 %v13933_v12, %v13396_v43 }
 0xaef   :  { %v13953_v3 = vpop.f32.mrb[100].mxu1 }
 0xaf0   :  { %v13954_v20 = vpop.f32.mrb[101].mxu1 }
 0xaf1   :  { %v13955_v30 = vadd.f32 %v13954_v20, %v13953_v3  ;;  %v13956_v2 = vpop.f32.mrb[102].mxu1 }
 0xaf2   :  { %v13957_v37 = vpop.f32.mrb[103].mxu1 }
 0xaf3   :  { %v12309_v42 = vadd.f32 %v13955_v30, %v12269_v45 }
 0xaf5   :  { %12314 = vst [vmem:[%s21131_s9] sm:$0xff] %v12309_v42 }

</bundles_post_ra>
